<compile_context>
chip_gen: v7x
topology: tpu7x:2x2x1
jax: 0.10.0
libtpu: 0.0.40
codegen_flags: <defaults>
</compile_context>

<pallas_src>
import jax
import jax.numpy as jnp
import numpy as np
from jax.experimental import pallas as pl
from jax.experimental.pallas import tpu as pltpu

L_IN = 13200              # Conv1d input length (hard-coded by the module's Linear)
KSIZE = 4                 # Conv1d kernel size
L_CONV = L_IN - KSIZE + 1 # 13197 conv output length == Linear in_features
HID = 1000
OUT = 4
EPS = 1e-5

# padded / tiled sizes (zero padding; padded W1 rows / cols are zero so results are exact)
KP = 13312                # 104 * 128  >= L_CONV   (K of the big matmul)
LXP = 13440               # 105 * 128  >= KP + KSIZE - 1
N1P = 1024                # padded hidden width
TK = 6656                 # K-tile of the big matmul (KP / 2)
KT = KP // TK             # 2 reduction steps
NJ = 2                    # N split (parallel axis; maps to the 2 TCs on v7x)
NB = N1P // NJ            # 512 per N block
OUT_P = 128               # lane-dense padded output width


# ----------------------------- Kernel 1: conv + BN1 + ReLU -----------------------------
def _conv_bn_relu_kernel(w_ref, x_ref, h_ref):
    # w_ref: SMEM (5,) = [eff_w0, eff_w1, eff_w2, eff_w3, eff_bias]  (conv folded with BN1)
    # x_ref: VMEM (B, LXP)   zero-padded input
    # h_ref: VMEM (B, KP)    conv+bn+relu output (positions >= L_CONV are don't-care)
    xv = x_ref[...]
    acc = w_ref[0] * xv[:, 0:KP]
    for k in range(1, KSIZE):
        acc = acc + w_ref[k] * xv[:, k:k + KP]
    h_ref[...] = jnp.maximum(acc + w_ref[KSIZE], 0.0)


# ------------------- Kernel 2: Linear1 + BN2 + ReLU + Linear2 (fused) ------------------
def _mlp_kernel(h_ref, w1_ref, b1_ref, s2_ref, t2_ref, w2_ref, o_ref, acc_ref):
    # grid = (NJ parallel, KT arbitrary/reduction)
    k = pl.program_id(1)

    @pl.when(k == 0)
    def _():
        acc_ref[...] = jnp.zeros_like(acc_ref)

    # bf16 x bf16 MXU matmul, f32 accumulation
    acc_ref[...] += jnp.dot(h_ref[...].astype(jnp.bfloat16), w1_ref[...],
                            preferred_element_type=jnp.float32)

    @pl.when(k == pl.num_programs(1) - 1)
    def _():
        z = acc_ref[...] + b1_ref[...]
        a = jnp.maximum(z * s2_ref[...] + t2_ref[...], 0.0)     # BN2 (folded) + ReLU
        o_ref[...] = jnp.dot(a, w2_ref[...],
                             preferred_element_type=jnp.float32).astype(o_ref.dtype)


# ------------------------- one-time parameter prep (NOT in the hot path) ---------------
def prepare_params(params):
    # fold Conv1d bias + BatchNorm1d(1) (eval mode) into effective conv weights
    s1 = params['bn1_g'] / jnp.sqrt(params['bn1_rv'] + EPS)
    eff_w = params['conv_w'] * s1                                    # (4,)
    eff_b = (params['conv_b'] - params['bn1_rm']) * s1 + params['bn1_beta']
    conv_packed = jnp.concatenate([eff_w, eff_b.reshape(1)]).astype(jnp.float32)

    # zero-pad in f32 first, then cast -> padded rows/cols stay exactly zero in bf16
    w1p = (jnp.zeros((KP, N1P), jnp.float32)
           .at[:L_CONV, :HID].set(params['w1'])).astype(jnp.bfloat16)
    b1p = jnp.zeros((1, N1P), jnp.float32).at[0, :HID].set(params['b1'])
    s2 = params['bn2_g'] / jnp.sqrt(params['bn2_rv'] + EPS)
    t2 = params['bn2_beta'] - params['bn2_rm'] * s2
    s2p = jnp.zeros((1, N1P), jnp.float32).at[0, :HID].set(s2)
    t2p = jnp.zeros((1, N1P), jnp.float32).at[0, :HID].set(t2)
    w2p = jnp.zeros((N1P, OUT_P), jnp.float32).at[:HID, :OUT].set(params['w2'])
    b2 = params['b2'].astype(jnp.float32)
    return dict(conv_packed=conv_packed, w1p=w1p, b1p=b1p,
                s2p=s2p, t2p=t2p, w2p=w2p, b2=b2)


# ------------------------------------- forward -----------------------------------------
def net_forward(x, kparams):
    # x: (B, 1, L_IN) float32   (PyTorch NCL layout)
    B = x.shape[0]
    xb = x[:, 0, :].astype(jnp.float32)
    x_pad = jnp.zeros((B, LXP), jnp.float32).at[:, :L_IN].set(xb)

    h = pl.pallas_call(
        _conv_bn_relu_kernel,
        out_shape=jax.ShapeDtypeStruct((B, KP), jnp.float32),
        in_specs=[pl.BlockSpec(memory_space=pltpu.MemorySpace.SMEM),
                  pl.BlockSpec(memory_space=pltpu.MemorySpace.VMEM)],
        out_specs=pl.BlockSpec(memory_space=pltpu.MemorySpace.VMEM),
    )(kparams['conv_packed'], x_pad)

    out_full = pl.pallas_call(
        _mlp_kernel,
        out_shape=jax.ShapeDtypeStruct((B, NJ * OUT_P), jnp.float32),
        grid_spec=pltpu.PrefetchScalarGridSpec(
            num_scalar_prefetch=0,
            grid=(NJ, KT),
            in_specs=[
                pl.BlockSpec((B, TK), lambda j, k: (0, k)),        # h       (K-tiled)
                pl.BlockSpec((TK, NB), lambda j, k: (k, j)),       # W1 bf16 (K,N-tiled)
                pl.BlockSpec((1, NB), lambda j, k: (0, j)),        # b1
                pl.BlockSpec((1, NB), lambda j, k: (0, j)),        # BN2 scale
                pl.BlockSpec((1, NB), lambda j, k: (0, j)),        # BN2 shift
                pl.BlockSpec((NB, OUT_P), lambda j, k: (j, 0)),    # W2 (N-tiled)
            ],
            out_specs=pl.BlockSpec((B, OUT_P), lambda j, k: (0, j)),
            scratch_shapes=[pltpu.VMEM((B, NB), jnp.float32)],
        ),
        compiler_params=pltpu.CompilerParams(
            dimension_semantics=("parallel", "arbitrary"),
            vmem_limit_bytes=32 * 1024 * 1024),
    )(h, kparams['w1p'], kparams['b1p'], kparams['s2p'], kparams['t2p'], kparams['w2p'])

    # sum the NJ partial N-blocks of the second matmul, slice padded output, add bias
    out = out_full.reshape(B, NJ, OUT_P).sum(axis=1)[:, :OUT]
    return out + kparams['b2'][None, :]


# ------------------------------ reference (plain JAX) -----------------------------------
def ref_forward(x, params):
    xb = x[:, 0, :]
    windows = jnp.stack([xb[:, k:k + L_CONV] for k in range(KSIZE)], axis=-1)
    conv = windows @ params['conv_w'] + params['conv_b']
    s1 = params['bn1_g'] / jnp.sqrt(params['bn1_rv'] + EPS)
    h = jnp.maximum((conv - params['bn1_rm']) * s1 + params['bn1_beta'], 0.0)
    z = h @ params['w1'] + params['b1']
    s2 = params['bn2_g'] / jnp.sqrt(params['bn2_rv'] + EPS)
    a = jnp.maximum((z - params['bn2_rm']) * s2 + params['bn2_beta'], 0.0)
    return a @ params['w2'] + params['b2']


def init_params(key):
    ks = jax.random.split(key, 6)
    bc = 1.0 / np.sqrt(1 * KSIZE)
    b1 = 1.0 / np.sqrt(L_CONV)
    b2 = 1.0 / np.sqrt(HID)
    return dict(
        conv_w=jax.random.uniform(ks[0], (KSIZE,), jnp.float32, -bc, bc),
        conv_b=jax.random.uniform(ks[1], (), jnp.float32, -bc, bc),
        bn1_g=jnp.ones(()), bn1_beta=jnp.zeros(()),
        bn1_rm=jnp.zeros(()), bn1_rv=jnp.ones(()),
        w1=jax.random.uniform(ks[2], (L_CONV, HID), jnp.float32, -b1, b1),
        b1=jax.random.uniform(ks[3], (HID,), jnp.float32, -b1, b1),
        bn2_g=jnp.ones((HID,)), bn2_beta=jnp.zeros((HID,)),
        bn2_rm=jnp.zeros((HID,)), bn2_rv=jnp.ones((HID,)),
        w2=jax.random.uniform(ks[4], (HID, OUT), jnp.float32, -b2, b2),
        b2=jax.random.uniform(ks[5], (OUT,), jnp.float32, -b2, b2),
    )


if __name__ == "__main__":
    key = jax.random.PRNGKey(0)
    kx, kprm = jax.random.split(key)
    params = init_params(kprm)
    x = jax.random.normal(kx, (2, 1, L_IN), jnp.float32)   # batch=2, C=1, L=13200

    kparams = prepare_params(params)          # one-time, outside the jitted forward
    fwd = jax.jit(net_forward)
    out = fwd(x, kparams)
    out = jax.block_until_ready(out)

    ref = ref_forward(x, params)
    assert out.shape == (2, OUT), out.shape
    err = float(jnp.max(jnp.abs(out - ref)))
    assert np.isfinite(err) and err < 1e-2, f"max abs err {err}"
    print("KERNEL_OK")
</pallas_src>

<mosaic_0001>
module attributes {stable_mosaic.version = 11 : i64} {
  func.func @_conv_bn_relu_kernel(%arg0: memref<5xf32, #tpu.memory_space<smem>>, %arg1: memref<2x13440xf32, #tpu.memory_space<vmem>>, %arg2: memref<2x13312xf32, #tpu.memory_space<vmem>>) attributes {dimension_semantics = [], scalar_prefetch = 0 : i64, scratch_operands = 0 : i64, tpu.core_type = #tpu.core_type<tc>} {
    %c0 = arith.constant 0 : index
    %c0_0 = arith.constant 0 : index
    %0 = vector.load %arg1[%c0, %c0_0] : memref<2x13440xf32, #tpu.memory_space<vmem>>, vector<2x13440xf32>
    %c0_1 = arith.constant 0 : index
    %1 = memref.load %arg0[%c0_1] : memref<5xf32, #tpu.memory_space<smem>>
    %2 = vector.extract_strided_slice %0 {offsets = [0, 0], sizes = [2, 13312], strides = [1, 1]} : vector<2x13440xf32> to vector<2x13312xf32>
    %3 = vector.broadcast %1 : f32 to vector<2x13312xf32>
    %4 = arith.mulf %3, %2 : vector<2x13312xf32>
    %c1 = arith.constant 1 : index
    %5 = memref.load %arg0[%c1] : memref<5xf32, #tpu.memory_space<smem>>
    %6 = vector.extract_strided_slice %0 {offsets = [0, 1], sizes = [2, 13312], strides = [1, 1]} : vector<2x13440xf32> to vector<2x13312xf32>
    %7 = vector.broadcast %5 : f32 to vector<2x13312xf32>
    %8 = arith.mulf %7, %6 : vector<2x13312xf32>
    %9 = arith.addf %4, %8 : vector<2x13312xf32>
    %c2 = arith.constant 2 : index
    %10 = memref.load %arg0[%c2] : memref<5xf32, #tpu.memory_space<smem>>
    %11 = vector.extract_strided_slice %0 {offsets = [0, 2], sizes = [2, 13312], strides = [1, 1]} : vector<2x13440xf32> to vector<2x13312xf32>
    %12 = vector.broadcast %10 : f32 to vector<2x13312xf32>
    %13 = arith.mulf %12, %11 : vector<2x13312xf32>
    %14 = arith.addf %9, %13 : vector<2x13312xf32>
    %c3 = arith.constant 3 : index
    %15 = memref.load %arg0[%c3] : memref<5xf32, #tpu.memory_space<smem>>
    %16 = vector.extract_strided_slice %0 {offsets = [0, 3], sizes = [2, 13312], strides = [1, 1]} : vector<2x13440xf32> to vector<2x13312xf32>
    %17 = vector.broadcast %15 : f32 to vector<2x13312xf32>
    %18 = arith.mulf %17, %16 : vector<2x13312xf32>
    %19 = arith.addf %14, %18 : vector<2x13312xf32>
    %c4 = arith.constant 4 : index
    %20 = memref.load %arg0[%c4] : memref<5xf32, #tpu.memory_space<smem>>
    %21 = vector.broadcast %20 : f32 to vector<2x13312xf32>
    %22 = arith.addf %19, %21 : vector<2x13312xf32>
    %cst = arith.constant 0.000000e+00 : f32
    %23 = vector.broadcast %cst : f32 to vector<2x13312xf32>
    %24 = arith.maximumf %22, %23 : vector<2x13312xf32>
    %c0_2 = arith.constant 0 : index
    %c0_3 = arith.constant 0 : index
    %25 = vector.load %arg2[%c0_2, %c0_3] : memref<2x13312xf32, #tpu.memory_space<vmem>>, vector<2x13312xf32>
    tpu.vector_store %arg2[%c0_2, %c0_3], %24 {strides = array<i32>} : memref<2x13312xf32, #tpu.memory_space<vmem>>, vector<2x13312xf32>,
    return
  }
}

module attributes {stable_mosaic.version = 11 : i64} {
  func.func @_mlp_kernel(%arg0: i32, %arg1: i32, %arg2: memref<2x6656xf32, #tpu.memory_space<vmem>>, %arg3: memref<6656x512xbf16, #tpu.memory_space<vmem>>, %arg4: memref<1x512xf32, #tpu.memory_space<vmem>>, %arg5: memref<1x512xf32, #tpu.memory_space<vmem>>, %arg6: memref<1x512xf32, #tpu.memory_space<vmem>>, %arg7: memref<512x128xf32, #tpu.memory_space<vmem>>, %arg8: memref<2x128xf32, #tpu.memory_space<vmem>>, %arg9: memref<2x512xf32, #tpu.memory_space<vmem>>) attributes {dimension_semantics = [#tpu.dimension_semantics<parallel>, #tpu.dimension_semantics<arbitrary>], iteration_bounds = array<i64: 2, 2>, scalar_prefetch = 0 : i64, scratch_operands = 1 : i64, tpu.core_type = #tpu.core_type<tc>, window_params = [{transform_indices = @transform_0, window_bounds = array<i64: 2, 6656>}, {transform_indices = @transform_1, window_bounds = array<i64: 6656, 512>}, {transform_indices = @transform_2, window_bounds = array<i64: 1, 512>}, {transform_indices = @transform_3, window_bounds = array<i64: 1, 512>}, {transform_indices = @transform_4, window_bounds = array<i64: 1, 512>}, {transform_indices = @transform_5, window_bounds = array<i64: 512, 128>}, {transform_indices = @transform_6, window_bounds = array<i64: 2, 128>}]} {
    %c0_i32 = arith.constant 0 : i32
    %0 = arith.cmpi eq, %arg1, %c0_i32 : i32
    %1 = arith.extui %0 : i1 to i32
    %c0_i32_0 = arith.constant 0 : i32
    %2 = arith.cmpi ne, %1, %c0_i32_0 : i32
    scf.if %2 {
      %cst_9 = arith.constant 0.000000e+00 : f32
      %13 = vector.broadcast %cst_9 : f32 to vector<2x512xf32>
      %c0_10 = arith.constant 0 : index
      %c0_11 = arith.constant 0 : index
      %14 = vector.load %arg9[%c0_10, %c0_11] : memref<2x512xf32, #tpu.memory_space<vmem>>, vector<2x512xf32>
      tpu.vector_store %arg9[%c0_10, %c0_11], %13 {strides = array<i32>} : memref<2x512xf32, #tpu.memory_space<vmem>>, vector<2x512xf32>,
    } else {
    }
    %c0 = arith.constant 0 : index
    %c0_1 = arith.constant 0 : index
    %3 = vector.load %arg9[%c0, %c0_1] : memref<2x512xf32, #tpu.memory_space<vmem>>, vector<2x512xf32>
    %c0_2 = arith.constant 0 : index
    %c0_3 = arith.constant 0 : index
    %4 = vector.load %arg2[%c0_2, %c0_3] : memref<2x6656xf32, #tpu.memory_space<vmem>>, vector<2x6656xf32>
    %5 = arith.truncf %4 : vector<2x6656xf32> to vector<2x6656xbf16>
    %c0_4 = arith.constant 0 : index
    %c0_5 = arith.constant 0 : index
    %6 = vector.load %arg3[%c0_4, %c0_5] : memref<6656x512xbf16, #tpu.memory_space<vmem>>, vector<6656x512xbf16>
    %cst = arith.constant dense<0.000000e+00> : vector<2x512xf32>
    %7 = tpu.matmul %5, %6, %cst {dimension_numbers = #tpu.dot_dimension_numbers<[1], [0], [0], [1], [0, 0, 1, 1], [], []>} : vector<2x6656xbf16>, vector<6656x512xbf16>, vector<2x512xf32> -> vector<2x512xf32>
    %8 = arith.addf %3, %7 : vector<2x512xf32>
    %c0_6 = arith.constant 0 : index
    %c0_7 = arith.constant 0 : index
    %9 = vector.load %arg9[%c0_6, %c0_7] : memref<2x512xf32, #tpu.memory_space<vmem>>, vector<2x512xf32>
    tpu.vector_store %arg9[%c0_6, %c0_7], %8 {strides = array<i32>} : memref<2x512xf32, #tpu.memory_space<vmem>>, vector<2x512xf32>,
    %c1_i32 = arith.constant 1 : i32
    %10 = arith.cmpi eq, %arg1, %c1_i32 : i32
    %11 = arith.extui %10 : i1 to i32
    %c0_i32_8 = arith.constant 0 : i32
    %12 = arith.cmpi ne, %11, %c0_i32_8 : i32
    scf.if %12 {
      %c0_9 = arith.constant 0 : index
      %c0_10 = arith.constant 0 : index
      %13 = vector.load %arg9[%c0_9, %c0_10] : memref<2x512xf32, #tpu.memory_space<vmem>>, vector<2x512xf32>
      %c0_11 = arith.constant 0 : index
      %c0_12 = arith.constant 0 : index
      %14 = vector.load %arg4[%c0_11, %c0_12] : memref<1x512xf32, #tpu.memory_space<vmem>>, vector<1x512xf32>
      %15 = vector.broadcast %14 : vector<1x512xf32> to vector<2x512xf32>
      %16 = arith.addf %13, %15 : vector<2x512xf32>
      %c0_13 = arith.constant 0 : index
      %c0_14 = arith.constant 0 : index
      %17 = vector.load %arg5[%c0_13, %c0_14] : memref<1x512xf32, #tpu.memory_space<vmem>>, vector<1x512xf32>
      %18 = vector.broadcast %17 : vector<1x512xf32> to vector<2x512xf32>
      %19 = arith.mulf %16, %18 : vector<2x512xf32>
      %c0_15 = arith.constant 0 : index
      %c0_16 = arith.constant 0 : index
      %20 = vector.load %arg6[%c0_15, %c0_16] : memref<1x512xf32, #tpu.memory_space<vmem>>, vector<1x512xf32>
      %21 = vector.broadcast %20 : vector<1x512xf32> to vector<2x512xf32>
      %22 = arith.addf %19, %21 : vector<2x512xf32>
      %cst_17 = arith.constant 0.000000e+00 : f32
      %23 = vector.broadcast %cst_17 : f32 to vector<2x512xf32>
      %24 = arith.maximumf %22, %23 : vector<2x512xf32>
      %c0_18 = arith.constant 0 : index
      %c0_19 = arith.constant 0 : index
      %25 = vector.load %arg7[%c0_18, %c0_19] : memref<512x128xf32, #tpu.memory_space<vmem>>, vector<512x128xf32>
      %cst_20 = arith.constant dense<0.000000e+00> : vector<2x128xf32>
      %26 = tpu.matmul %24, %25, %cst_20 {dimension_numbers = #tpu.dot_dimension_numbers<[1], [0], [0], [1], [0, 0, 1, 1], [], []>} : vector<2x512xf32>, vector<512x128xf32>, vector<2x128xf32> -> vector<2x128xf32>
      %c0_21 = arith.constant 0 : index
      %c0_22 = arith.constant 0 : index
      %27 = vector.load %arg8[%c0_21, %c0_22] : memref<2x128xf32, #tpu.memory_space<vmem>>, vector<2x128xf32>
      tpu.vector_store %arg8[%c0_21, %c0_22], %26 {strides = array<i32>} : memref<2x128xf32, #tpu.memory_space<vmem>>, vector<2x128xf32>,
    } else {
    }
    return
  }
  func.func @transform_0(%arg0: i32, %arg1: i32) -> (i32, i32) {
    %c0_i32 = arith.constant 0 : i32
    %c0_i32_0 = arith.constant 0 : i32
    return %c0_i32, %arg1 : i32, i32
  }
  func.func @transform_1(%arg0: i32, %arg1: i32) -> (i32, i32) {
    %c0_i32 = arith.constant 0 : i32
    return %arg1, %arg0 : i32, i32
  }
  func.func @transform_2(%arg0: i32, %arg1: i32) -> (i32, i32) {
    %c0_i32 = arith.constant 0 : i32
    %c0_i32_0 = arith.constant 0 : i32
    return %c0_i32, %arg0 : i32, i32
  }
  func.func @transform_3(%arg0: i32, %arg1: i32) -> (i32, i32) {
    %c0_i32 = arith.constant 0 : i32
    %c0_i32_0 = arith.constant 0 : i32
    return %c0_i32, %arg0 : i32, i32
  }
  func.func @transform_4(%arg0: i32, %arg1: i32) -> (i32, i32) {
    %c0_i32 = arith.constant 0 : i32
    %c0_i32_0 = arith.constant 0 : i32
    return %c0_i32, %arg0 : i32, i32
  }
  func.func @transform_5(%arg0: i32, %arg1: i32) -> (i32, i32) {
    %c0_i32 = arith.constant 0 : i32
    %c0_i32_0 = arith.constant 0 : i32
    return %arg0, %c0_i32 : i32, i32
  }
  func.func @transform_6(%arg0: i32, %arg1: i32) -> (i32, i32) {
    %c0_i32 = arith.constant 0 : i32
    %c0_i32_0 = arith.constant 0 : i32
    return %c0_i32, %arg0 : i32, i32
  }
}

</mosaic_0001>

<bundles_post_ra>
// kernel: net_forward.2
= control target key start
LH: loop header
LB: loop body
LE: loop exit
PB: predicated region body
PF: predicated region fallthrough
CT: control target
= control target key end

     0   :  { %7 = vsyncpa [#allocation3], 0  ;;  %s1814_s0 = inlined_call_operand.hbm [shape: f32[5], index: 0, kind: input, shape index: {}]   ;;  %s1815_s1 = inlined_call_operand.vmem [shape: f32[2,13440], index: 1, kind: input, shape index: {}]   ;;  %s1816_s2 = inlined_call_operand.vmem [shape: f32[2,13312], index: 2, kind: output, shape index: {}]  }
   0x1   :  { %s897_s11 = scalar_lea.hbm %s1814_s0, 16 }
   0x2   :  { %p898_p0 = scmp.ne.s32.totalorder %s1814_s0, %s897_s11  ;;  %p901_p1 = scmp.lt.u32.totalorder %s897_s11, %s1814_s0 }
   0x4   :  { %p903_p2 = pnand %p901_p1, %p898_p0 }
   0x6   :  { %906 = shalt.err (!%p903_p2)
}
   0x7   :  { %s909_s16 = smov [#allocation2]  }
   0x8   :  { %15 = dma.hbm_to_smem %s1814_s0, 16, %s909_s16, [#allocation3]  }
   0x9   :  { %907 = dma.done.wait [#allocation3], 16  }
   0xa   :  { %908 = vsyncadd [#allocation3], 4294967280 }
   0xb   :  { %21 = sfence }
   0xc   :  { %s889_s19 = sld [smem:[#allocation2 + $0x1]]  ;;  %v943_v0 = vld [vmem:[%s1815_s1 + $0x10] sm:$0xff]  ;;  %v948_v1 = vld [vmem:[%s1815_s1] sm:$0xff]  ;;  %v955_v3 = vld [vmem:[%s1815_s1 + $0x18] sm:$0xff]  ;;  %s910_s27 = smov 127   ;;  %vm214_vm0 = vcmask 1045504  }
   0xd   :  { %v960_v4 = vld [vmem:[%s1815_s1 + $0x8] sm:$0xff]  ;;  %v980_v10 = vld [vmem:[%s1815_s1 + $0x20] sm:$0xff]  ;;  %v991_v13 = vld [vmem:[%s1815_s1 + $0x38] sm:$0xff]  ;;  %s890_s12 = sld [smem:[#allocation2 + $0x2]]  ;;  %s912_s20 = smov 125   ;;  %vm216_vm1 = vcmask 1039360  }
   0xe   :  { %v975_v9 = vld [vmem:[%s1815_s1 + $0x28] sm:$0xff]  ;;  %v996_v14 = vld [vmem:[%s1815_s1 + $0x30] sm:$0xff]  ;;  %v1012_v18 = vld [vmem:[%s1815_s1 + $0x40] sm:$0xff]  ;;  %s892_s21 = sld [smem:[#allocation2 + $0x4]]  ;;  %vm458_vm2 = vcmask 1031168   ;;  %vm700_vm3 = vcmask 1022976  }
   0xf   :  { %v1007_v17 = vld [vmem:[%s1815_s1 + $0x48] sm:$0xff]  ;;  %v1023_v21 = vld [vmem:[%s1815_s1 + $0x58] sm:$0xff]  ;;  %v1028_v22 = vld [vmem:[%s1815_s1 + $0x50] sm:$0xff] }
  0x10   :  { %v1039_v25 = vld [vmem:[%s1815_s1 + $0x68] sm:$0xff]  ;;  %v1044_v26 = vld [vmem:[%s1815_s1 + $0x60] sm:$0xff]  ;;  %v1055_v29 = vld [vmem:[%s1815_s1 + $0x78] sm:$0xff] }
  0x11   :  { %v1060_v30 = vld [vmem:[%s1815_s1 + $0x70] sm:$0xff]  ;;  %v1071_v33 = vld [vmem:[%s1815_s1 + $0x88] sm:$0xff]  ;;  %v1076_v34 = vld [vmem:[%s1815_s1 + $0x80] sm:$0xff] }
  0x12   :  { %v950_v2 = vstv %s889_s19  ;;  %v1087_v37 = vld [vmem:[%s1815_s1 + $0x98] sm:$0xff]  ;;  %v1092_v38 = vld [vmem:[%s1815_s1 + $0x90] sm:$0xff]  ;;  %v1103_v41 = vld [vmem:[%s1815_s1 + $0xa8] sm:$0xff]  ;;  %s911_s19 = smov 126  }
  0x13   :  { %v81_v5 = vmul.f32 %v950_v2, %v943_v0  ;;  %v79_v6 = vmul.f32 %v950_v2, %v948_v1  ;;  %v82_v7 = vmul.f32 %v950_v2, %v955_v3  ;;  %v80_v8 = vmul.f32 %v950_v2, %v960_v4  ;;  %v1108_v42 = vld [vmem:[%s1815_s1 + $0xa0] sm:$0xff]  ;;  %v1119_v45 = vld [vmem:[%s1815_s1 + $0xb8] sm:$0xff]  ;;  %v1124_v46 = vld [vmem:[%s1815_s1 + $0xb0] sm:$0xff] }
  0x14   :  { %v84_v11 = vmul.f32 %v950_v2, %v975_v9  ;;  %v83_v12 = vmul.f32 %v950_v2, %v980_v10  ;;  %v86_v15 = vmul.f32 %v950_v2, %v991_v13  ;;  %v85_v16 = vmul.f32 %v950_v2, %v996_v14  ;;  %v1135_v49 = vld [vmem:[%s1815_s1 + $0xc8] sm:$0xff]  ;;  %v1140_v50 = vld [vmem:[%s1815_s1 + $0xc0] sm:$0xff]  ;;  %v1151_v54 = vld [vmem:[%s1815_s1 + $0xd0] sm:$0x3]  ;;  %s891_s1 = sld [smem:[#allocation2 + $0x3]] }
  0x15   :  { %137 = vrot.lane.b32.xlu1 %v81_v5, %s910_s27  ;;  %133 = vrot.lane.b32.xlu0 %v79_v6, %s910_s27  ;;  %v88_v19 = vmul.f32 %v950_v2, %v1007_v17  ;;  %v87_v20 = vmul.f32 %v950_v2, %v1012_v18  ;;  %v90_v23 = vmul.f32 %v950_v2, %v1023_v21  ;;  %v321_v53 = vstv %s890_s12 }
  0x16   :  { %v89_v24 = vmul.f32 %v950_v2, %v1028_v22  ;;  %v92_v27 = vmul.f32 %v950_v2, %v1039_v25  ;;  %v91_v28 = vmul.f32 %v950_v2, %v1044_v26  ;;  %v94_v31 = vmul.f32 %v950_v2, %v1055_v29 }
  0x17   :  { %v93_v32 = vmul.f32 %v950_v2, %v1060_v30  ;;  %v96_v35 = vmul.f32 %v950_v2, %v1071_v33  ;;  %v95_v36 = vmul.f32 %v950_v2, %v1076_v34  ;;  %v98_v39 = vmul.f32 %v950_v2, %v1087_v37 }
  0x18   :  { %v97_v40 = vmul.f32 %v950_v2, %v1092_v38  ;;  %v100_v43 = vmul.f32 %v950_v2, %v1103_v41  ;;  %v99_v44 = vmul.f32 %v950_v2, %v1108_v42  ;;  %v102_v47 = vmul.f32 %v950_v2, %v1119_v45 }
  0x19   :  { %139 = vrot.lane.b32.xlu1 %v82_v7, %s910_s27  ;;  %135 = vrot.lane.b32.xlu0 %v80_v8, %s910_s27  ;;  %v101_v48 = vmul.f32 %v950_v2, %v1124_v46  ;;  %v104_v51 = vmul.f32 %v950_v2, %v1135_v49  ;;  %v103_v52 = vmul.f32 %v950_v2, %v1140_v50 }
  0x1a   :  { %v322_v55 = vmul.f32 %v321_v53, %v948_v1  ;;  %v105_v56 = vmul.f32 %v950_v2, %v1151_v54  ;;  %v324_v57 = vmul.f32 %v321_v53, %v943_v0  ;;  %v323_v58 = vmul.f32 %v321_v53, %v960_v4 }
  0x1b   :  { %v326_v59 = vmul.f32 %v321_v53, %v980_v10  ;;  %v325_v60 = vmul.f32 %v321_v53, %v955_v3  ;;  %v328_v61 = vmul.f32 %v321_v53, %v996_v14  ;;  %v327_v62 = vmul.f32 %v321_v53, %v975_v9 }
  0x1c   :  { %v330_v63 = vmul.f32 %v321_v53, %v1012_v18  ;;  %v329_v2 = vmul.f32 %v321_v53, %v991_v13  ;;  %v332_v5 = vmul.f32 %v321_v53, %v1028_v22  ;;  %v331_v6 = vmul.f32 %v321_v53, %v1007_v17 }
  0x1d   :  { %143 = vrot.lane.b32.xlu1 %v84_v11, %s910_s27  ;;  %141 = vrot.lane.b32.xlu0 %v83_v12, %s910_s27  ;;  %v334_v7 = vmul.f32 %v321_v53, %v1044_v26  ;;  %v333_v8 = vmul.f32 %v321_v53, %v1023_v21  ;;  %v336_v11 = vmul.f32 %v321_v53, %v1060_v30 }
  0x1e   :  { %v335_v12 = vmul.f32 %v321_v53, %v1039_v25 }
  0x21   :  { %147 = vrot.lane.b32.xlu1 %v86_v15, %s910_s27  ;;  %145 = vrot.lane.b32.xlu0 %v85_v16, %s910_s27  ;;  %v338_v15 = vmul.f32 %v321_v53, %v1076_v34  ;;  %v337_v16 = vmul.f32 %v321_v53, %v1055_v29 }
  0x25   :  { %151 = vrot.lane.b32.xlu1 %v88_v19, %s910_s27  ;;  %149 = vrot.lane.b32.xlu0 %v87_v20, %s910_s27  ;;  %v340_v19 = vmul.f32 %v321_v53, %v1092_v38  ;;  %v339_v20 = vmul.f32 %v321_v53, %v1071_v33 }
  0x29   :  { %155 = vrot.lane.b32.xlu1 %v90_v23, %s910_s27  ;;  %153 = vrot.lane.b32.xlu0 %v89_v24, %s910_s27  ;;  %v342_v23 = vmul.f32 %v321_v53, %v1108_v42  ;;  %v341_v24 = vmul.f32 %v321_v53, %v1087_v37 }
  0x2d   :  { %159 = vrot.lane.b32.xlu1 %v92_v27, %s910_s27  ;;  %157 = vrot.lane.b32.xlu0 %v91_v28, %s910_s27  ;;  %v344_v27 = vmul.f32 %v321_v53, %v1124_v46  ;;  %v343_v28 = vmul.f32 %v321_v53, %v1103_v41 }
  0x31   :  { %163 = vrot.lane.b32.xlu1 %v94_v31, %s910_s27  ;;  %161 = vrot.lane.b32.xlu0 %v93_v32, %s910_s27  ;;  %v346_v31 = vmul.f32 %v321_v53, %v1140_v50  ;;  %v345_v32 = vmul.f32 %v321_v53, %v1119_v45 }
  0x35   :  { %167 = vrot.lane.b32.xlu1 %v96_v35, %s910_s27  ;;  %165 = vrot.lane.b32.xlu0 %v95_v36, %s910_s27  ;;  %v348_v35 = vmul.f32 %v321_v53, %v1151_v54  ;;  %v347_v36 = vmul.f32 %v321_v53, %v1135_v49 }
  0x39   :  { %171 = vrot.lane.b32.xlu1 %v98_v39, %s910_s27  ;;  %169 = vrot.lane.b32.xlu0 %v97_v40, %s910_s27  ;;  %v1210_v39 = vstv %s891_s1 }
  0x3a   :  { %v565_v40 = vmul.f32 %v1210_v39, %v960_v4 }
  0x3d   :  { %175 = vrot.lane.b32.xlu1 %v100_v43, %s910_s27  ;;  %173 = vrot.lane.b32.xlu0 %v99_v44, %s910_s27  ;;  %v564_v43 = vmul.f32 %v1210_v39, %v948_v1  ;;  %v567_v44 = vmul.f32 %v1210_v39, %v955_v3 }
  0x41   :  { %179 = vrot.lane.b32.xlu1 %v102_v47, %s910_s27  ;;  %177 = vrot.lane.b32.xlu0 %v101_v48, %s910_s27  ;;  %v566_v47 = vmul.f32 %v1210_v39, %v943_v0  ;;  %v569_v48 = vmul.f32 %v1210_v39, %v975_v9 }
  0x45   :  { %183 = vrot.lane.b32.xlu1 %v104_v51, %s910_s27  ;;  %181 = vrot.lane.b32.xlu0 %v103_v52, %s910_s27  ;;  %v568_v51 = vmul.f32 %v1210_v39, %v980_v10 }
  0x49   :  { %376 = vrot.lane.b32.xlu1 %v322_v55, %s911_s19  ;;  %185 = vrot.lane.b32.xlu0 %v105_v56, %s910_s27  ;;  %s49_s27 = sld [smem:[#allocation2]]  ;;  %v571_v56 = vmul.f32 %v1210_v39, %v991_v13 }
  0x4d   :  { %380 = vrot.lane.b32.xlu1 %v324_v57, %s911_s19  ;;  %378 = vrot.lane.b32.xlu0 %v323_v58, %s911_s19  ;;  %v570_v57 = vmul.f32 %v1210_v39, %v996_v14 }
  0x4f   :  { %v1230_v55 = vstv %s49_s27 }
  0x51   :  { %384 = vrot.lane.b32.xlu1 %v326_v59, %s911_s19  ;;  %382 = vrot.lane.b32.xlu0 %v325_v60, %s911_s19  ;;  %v52_v60 = vmul.f32 %v1230_v55, %v960_v4  ;;  %v53_v4 = vmul.f32 %v1230_v55, %v943_v0 }
  0x55   :  { %388 = vrot.lane.b32.xlu1 %v328_v61, %s911_s19  ;;  %386 = vrot.lane.b32.xlu0 %v327_v62, %s911_s19 }
  0x59   :  { %392 = vrot.lane.b32.xlu1 %v330_v63, %s911_s19  ;;  %390 = vrot.lane.b32.xlu0 %v329_v2, %s911_s19 }
  0x5d   :  { %396 = vrot.lane.b32.xlu1 %v332_v5, %s911_s19  ;;  %394 = vrot.lane.b32.xlu0 %v331_v6, %s911_s19  ;;  %v51_v5 = vmul.f32 %v1230_v55, %v948_v1  ;;  %v573_v6 = vmul.f32 %v1210_v39, %v1007_v17  ;;  %v55_v1 = vmul.f32 %v1230_v55, %v980_v10 }
  0x5e   :  { %v575_v10 = vmul.f32 %v1210_v39, %v1023_v21 }
  0x61   :  { %400 = vrot.lane.b32.xlu1 %v334_v7, %s911_s19  ;;  %398 = vrot.lane.b32.xlu0 %v333_v8, %s911_s19  ;;  %v572_v7 = vmul.f32 %v1210_v39, %v1012_v18 }
  0x65   :  { %404 = vrot.lane.b32.xlu1 %v336_v11, %s911_s19  ;;  %402 = vrot.lane.b32.xlu0 %v335_v12, %s911_s19 }
  0x69   :  { %408 = vrot.lane.b32.xlu1 %v338_v15, %s911_s19  ;;  %406 = vrot.lane.b32.xlu0 %v337_v16, %s911_s19 }
  0x6d   :  { %412 = vrot.lane.b32.xlu1 %v340_v19, %s911_s19  ;;  %410 = vrot.lane.b32.xlu0 %v339_v20, %s911_s19  ;;  %v54_v20 = vmul.f32 %v1230_v55, %v955_v3  ;;  %v574_v3 = vmul.f32 %v1210_v39, %v1028_v22 }
  0x71   :  { %416 = vrot.lane.b32.xlu1 %v342_v23, %s911_s19  ;;  %414 = vrot.lane.b32.xlu0 %v341_v24, %s911_s19 }
  0x75   :  { %420 = vrot.lane.b32.xlu1 %v344_v27, %s911_s19  ;;  %418 = vrot.lane.b32.xlu0 %v343_v28, %s911_s19 }
  0x79   :  { %424 = vrot.lane.b32.xlu1 %v346_v31, %s911_s19  ;;  %422 = vrot.lane.b32.xlu0 %v345_v32, %s911_s19 }
  0x7d   :  { %428 = vrot.lane.b32.xlu1 %v348_v35, %s911_s19  ;;  %426 = vrot.lane.b32.xlu0 %v347_v36, %s911_s19 }
  0x81   :  { %620 = vrot.lane.b32.xlu1 %v565_v40, %s912_s20  ;;  %618 = vrot.lane.b32.xlu0 %v564_v43, %s912_s20 }
  0x85   :  { %624 = vrot.lane.b32.xlu1 %v567_v44, %s912_s20  ;;  %622 = vrot.lane.b32.xlu0 %v566_v47, %s912_s20  ;;  %v57_v44 = vmul.f32 %v1230_v55, %v996_v14  ;;  %v576_v14 = vmul.f32 %v1210_v39, %v1044_v26 }
  0x87   :  { %v138_v52 = vpop.permute.xlu1 %137  ;;  %v134_v53 = vpop.permute.xlu0 %133 }
  0x88   :  { %v189_v58 = vrot.slane %v138_v52, 2  ;;  %v187_v62 = vrot.slane %v134_v53, 2 }
  0x89   :  { %628 = vrot.lane.b32.xlu1 %v569_v48, %s912_s20  ;;  %626 = vrot.lane.b32.xlu0 %v568_v51, %s912_s20  ;;  %v56_v51 = vmul.f32 %v1230_v55, %v975_v9 }
  0x8b   :  { %v140_v59 = vpop.permute.xlu1 %139  ;;  %v136_v61 = vpop.permute.xlu0 %135 }
  0x8c   :  { %v190_v63 = vrot.slane %v140_v59, 2  ;;  %v188_v2 = vrot.slane %v136_v61, 2 }
  0x8d   :  { %632 = vrot.lane.b32.xlu1 %v571_v56, %s912_s20  ;;  %630 = vrot.lane.b32.xlu0 %v570_v57, %s912_s20 }
  0x8e   :  { %v220_v8 = vsel %vm214_vm0, %v189_v58, %v190_v63  ;;  %v215_v11 = vsel %vm214_vm0, %v187_v62, %v188_v2  ;;  %v218_v12 = vsel %vm214_vm0, %v188_v2, %v189_v58  ;;  %v577_v58 = vmul.f32 %v1210_v39, %v1039_v25 }
  0x8f   :  { %v219_v15 = vsel %vm216_vm1, %v136_v61, %v218_v12  ;;  %v144_v16 = vpop.permute.xlu1 %143  ;;  %v142_v19 = vpop.permute.xlu0 %141  ;;  %v217_v23 = vsel %vm216_vm1, %v134_v53, %v215_v11  ;;  %v221_v0 = vsel %vm216_vm1, %v138_v52, %v220_v8  ;;  %v59_v62 = vmul.f32 %v1230_v55, %v1012_v18 }
  0x90   :  { %v1260_v24 = vadd.f32 %v219_v15, %v52_v60  ;;  %v192_v27 = vrot.slane %v144_v16, 2  ;;  %v191_v28 = vrot.slane %v142_v19, 2  ;;  %v1262_v31 = vadd.f32 %v217_v23, %v51_v5 }
  0x91   :  { %636 = vrot.lane.b32.xlu1 %v573_v6, %s912_s20  ;;  %634 = vrot.lane.b32.xlu0 %v572_v7, %s912_s20  ;;  %v1270_v32 = vadd.f32 %v221_v0, %v53_v4  ;;  %v58_v5 = vmul.f32 %v1230_v55, %v991_v13  ;;  %v579_v11 = vmul.f32 %v1210_v39, %v1055_v29 }
  0x92   :  { %v222_v35 = vsel %vm214_vm0, %v190_v63, %v191_v28  ;;  %v224_v36 = vsel %vm214_vm0, %v191_v28, %v192_v27  ;;  %v578_v18 = vmul.f32 %v1210_v39, %v1060_v30  ;;  %v60_v23 = vmul.f32 %v1230_v55, %v1007_v17 }
  0x93   :  { %v225_v40 = vsel %vm216_vm1, %v142_v19, %v224_v36  ;;  %v148_v43 = vpop.permute.xlu1 %147  ;;  %v146_v47 = vpop.permute.xlu0 %145  ;;  %v223_v48 = vsel %vm216_vm1, %v140_v59, %v222_v35 }
  0x94   :  { %v1280_v52 = vadd.f32 %v225_v40, %v55_v1  ;;  %v194_v53 = vrot.slane %v148_v43, 2  ;;  %v193_v56 = vrot.slane %v146_v47, 2  ;;  %v1282_v57 = vadd.f32 %v223_v48, %v54_v20 }
  0x95   :  { %640 = vrot.lane.b32.xlu1 %v575_v10, %s912_s20  ;;  %638 = vrot.lane.b32.xlu0 %v574_v3, %s912_s20  ;;  %v581_v3 = vmul.f32 %v1210_v39, %v1071_v33  ;;  %v62_v48 = vmul.f32 %v1230_v55, %v1023_v21 }
  0x96   :  { %v226_v59 = vsel %vm214_vm0, %v192_v27, %v193_v56  ;;  %v228_v9 = vsel %vm214_vm0, %v193_v56, %v194_v53 }
  0x97   :  { %v229_v60 = vsel %vm216_vm1, %v146_v47, %v228_v9  ;;  %v152_v61 = vpop.permute.xlu1 %151  ;;  %v150_v63 = vpop.permute.xlu0 %149  ;;  %v227_v2 = vsel %vm216_vm1, %v144_v16, %v226_v59  ;;  %v61_v16 = vmul.f32 %v1230_v55, %v1028_v22  ;;  %v580_v22 = vmul.f32 %v1210_v39, %v1076_v34 }
  0x98   :  { %v1298_v6 = vadd.f32 %v229_v60, %v57_v44  ;;  %v196_v7 = vrot.slane %v152_v61, 2  ;;  %v195_v4 = vrot.slane %v150_v63, 2  ;;  %v1300_v8 = vadd.f32 %v227_v2, %v56_v51 }
  0x99   :  { %644 = vrot.lane.b32.xlu1 %v577_v58, %s912_s20  ;;  %642 = vrot.lane.b32.xlu0 %v576_v14, %s912_s20  ;;  %v583_v14 = vmul.f32 %v1210_v39, %v1087_v37  ;;  %v64_v2 = vmul.f32 %v1230_v55, %v1039_v25 }
  0x9a   :  { %v230_v12 = vsel %vm214_vm0, %v194_v53, %v195_v4  ;;  %v232_v13 = vsel %vm214_vm0, %v195_v4, %v196_v7 }
  0x9b   :  { %v233_v1 = vsel %vm216_vm1, %v150_v63, %v232_v13  ;;  %v156_v15 = vpop.permute.xlu1 %155  ;;  %v154_v19 = vpop.permute.xlu0 %153  ;;  %v231_v20 = vsel %vm216_vm1, %v148_v43, %v230_v12  ;;  %v63_v43 = vmul.f32 %v1230_v55, %v1044_v26  ;;  %v582_v26 = vmul.f32 %v1210_v39, %v1092_v38 }
  0x9c   :  { %v1316_v0 = vadd.f32 %v233_v1, %v59_v62  ;;  %v198_v27 = vrot.slane %v156_v15, 2  ;;  %v197_v28 = vrot.slane %v154_v19, 2  ;;  %v1318_v10 = vadd.f32 %v231_v20, %v58_v5 }
  0x9d   :  { %648 = vrot.lane.b32.xlu1 %v579_v11, %s912_s20  ;;  %646 = vrot.lane.b32.xlu0 %v578_v18, %s912_s20  ;;  %v585_v18 = vmul.f32 %v1210_v39, %v1103_v41  ;;  %v66_v20 = vmul.f32 %v1230_v55, %v1055_v29 }
  0x9e   :  { %v234_v35 = vsel %vm214_vm0, %v196_v7, %v197_v28  ;;  %v236_v17 = vsel %vm214_vm0, %v197_v28, %v198_v27 }
  0x9f   :  { %v237_v36 = vsel %vm216_vm1, %v154_v19, %v236_v17  ;;  %v160_v40 = vpop.permute.xlu1 %159  ;;  %v158_v44 = vpop.permute.xlu0 %157  ;;  %v235_v47 = vsel %vm216_vm1, %v152_v61, %v234_v35  ;;  %v65_v61 = vmul.f32 %v1230_v55, %v1060_v30  ;;  %v584_v30 = vmul.f32 %v1210_v39, %v1108_v42 }
  0xa0   :  { %v1334_v51 = vadd.f32 %v237_v36, %v61_v16  ;;  %v200_v53 = vrot.slane %v160_v40, 2  ;;  %v199_v56 = vrot.slane %v158_v44, 2  ;;  %v1336_v58 = vadd.f32 %v235_v47, %v60_v23 }
  0xa1   :  { %652 = vrot.lane.b32.xlu1 %v581_v3, %s912_s20  ;;  %650 = vrot.lane.b32.xlu0 %v580_v22, %s912_s20  ;;  %v587_v22 = vmul.f32 %v1210_v39, %v1119_v45  ;;  %v68_v47 = vmul.f32 %v1230_v55, %v1071_v33 }
  0xa2   :  { %v238_v59 = vsel %vm214_vm0, %v198_v27, %v199_v56  ;;  %v240_v21 = vsel %vm214_vm0, %v199_v56, %v200_v53 }
  0xa3   :  { %v241_v9 = vsel %vm216_vm1, %v158_v44, %v240_v21  ;;  %v164_v60 = vpop.permute.xlu1 %163  ;;  %v162_v62 = vpop.permute.xlu0 %161  ;;  %v239_v63 = vsel %vm216_vm1, %v156_v15, %v238_v59  ;;  %v67_v15 = vmul.f32 %v1230_v55, %v1076_v34  ;;  %v586_v34 = vmul.f32 %v1210_v39, %v1124_v46 }
  0xa4   :  { %v1352_v5 = vadd.f32 %v241_v9, %v63_v43  ;;  %v202_v7 = vrot.slane %v164_v60, 2  ;;  %v201_v4 = vrot.slane %v162_v62, 2  ;;  %v1354_v11 = vadd.f32 %v239_v63, %v62_v48 }
  0xa5   :  { %656 = vrot.lane.b32.xlu1 %v583_v14, %s912_s20  ;;  %654 = vrot.lane.b32.xlu0 %v582_v26, %s912_s20  ;;  %v589_v26 = vmul.f32 %v1210_v39, %v1135_v49  ;;  %v70_v63 = vmul.f32 %v1230_v55, %v1087_v37 }
  0xa6   :  { %v242_v12 = vsel %vm214_vm0, %v200_v53, %v201_v4  ;;  %v244_v25 = vsel %vm214_vm0, %v201_v4, %v202_v7 }
  0xa7   :  { %v245_v13 = vsel %vm216_vm1, %v162_v62, %v244_v25  ;;  %v168_v1 = vpop.permute.xlu1 %167  ;;  %v166_v16 = vpop.permute.xlu0 %165  ;;  %v243_v19 = vsel %vm216_vm1, %v160_v40, %v242_v12  ;;  %v69_v40 = vmul.f32 %v1230_v55, %v1092_v38  ;;  %v588_v38 = vmul.f32 %v1210_v39, %v1140_v50 }
  0xa8   :  { %v1370_v23 = vadd.f32 %v245_v13, %v65_v61  ;;  %v204_v27 = vrot.slane %v168_v1, 2  ;;  %v203_v28 = vrot.slane %v166_v16, 2  ;;  %v1372_v3 = vadd.f32 %v243_v19, %v64_v2 }
  0xa9   :  { %660 = vrot.lane.b32.xlu1 %v585_v18, %s912_s20  ;;  %658 = vrot.lane.b32.xlu0 %v584_v30, %s912_s20  ;;  %v590_v30 = vmul.f32 %v1210_v39, %v1151_v54  ;;  %v73_v13 = vmul.f32 %v1230_v55, %v1124_v46 }
  0xaa   :  { %v246_v35 = vsel %vm214_vm0, %v202_v7, %v203_v28  ;;  %v248_v29 = vsel %vm214_vm0, %v203_v28, %v204_v27 }
  0xab   :  { %v249_v17 = vsel %vm216_vm1, %v166_v16, %v248_v29  ;;  %v172_v36 = vpop.permute.xlu1 %171  ;;  %v170_v43 = vpop.permute.xlu0 %169  ;;  %v247_v44 = vsel %vm216_vm1, %v164_v60, %v246_v35  ;;  %v71_v60 = vmul.f32 %v1230_v55, %v1108_v42  ;;  %v72_v16 = vmul.f32 %v1230_v55, %v1103_v41 }
  0xac   :  { %v1388_v48 = vadd.f32 %v249_v17, %v67_v15  ;;  %v206_v53 = vrot.slane %v172_v36, 2  ;;  %v205_v56 = vrot.slane %v170_v43, 2  ;;  %v1390_v14 = vadd.f32 %v247_v44, %v66_v20 }
  0xad   :  { %664 = vrot.lane.b32.xlu1 %v587_v22, %s912_s20  ;;  %662 = vrot.lane.b32.xlu0 %v586_v34, %s912_s20  ;;  %v75_v34 = vmul.f32 %v1230_v55, %v1140_v50  ;;  %v74_v29 = vmul.f32 %v1230_v55, %v1119_v45 }
  0xae   :  { %v250_v59 = vsel %vm214_vm0, %v204_v27, %v205_v56  ;;  %v252_v33 = vsel %vm214_vm0, %v205_v56, %v206_v53 }
  0xaf   :  { %v253_v21 = vsel %vm216_vm1, %v170_v43, %v252_v33  ;;  %v176_v9 = vpop.permute.xlu1 %175  ;;  %v174_v61 = vpop.permute.xlu0 %173  ;;  %v251_v62 = vsel %vm216_vm1, %v168_v1, %v250_v59  ;;  %v76_v33 = vmul.f32 %v1230_v55, %v1135_v49 }
  0xb0   :  { %v1406_v2 = vadd.f32 %v253_v21, %v69_v40  ;;  %v208_v7 = vrot.slane %v176_v9, 2  ;;  %v207_v4 = vrot.slane %v174_v61, 2  ;;  %v1408_v18 = vadd.f32 %v251_v62, %v68_v47 }
  0xb1   :  { %668 = vrot.lane.b32.xlu1 %v589_v26, %s912_s20  ;;  %666 = vrot.lane.b32.xlu0 %v588_v38, %s912_s20 }
  0xb2   :  { %1820 = vst [vmem:[#allocation5_spill] sm:$0xff] %v1406_v2  ;;  %v254_v42 = vsel %vm214_vm0, %v206_v53, %v207_v4  ;;  %v256_v12 = vsel %vm214_vm0, %v207_v4, %v208_v7 }
  0xb3   :  { %v257_v25 = vsel %vm216_vm1, %v174_v61, %v256_v12  ;;  %v180_v37 = vpop.permute.xlu1 %179  ;;  %v178_v1 = vpop.permute.xlu0 %177  ;;  %v255_v15 = vsel %vm216_vm1, %v172_v36, %v254_v42 }
  0xb4   :  { %v1422_v19 = vadd.f32 %v257_v25, %v71_v60  ;;  %v210_v20 = vrot.slane %v180_v37, 2  ;;  %v209_v54 = vrot.slane %v178_v1, 2  ;;  %v1424_v39 = vadd.f32 %v255_v15, %v70_v63 }
  0xb5   :  { %670 = vrot.lane.b32.xlu0 %v590_v30, %s912_s20 }
  0xb6   :  { %1821 = vst [vmem:[#allocation6_spill] sm:$0xff] %v1422_v19  ;;  %v258_v27 = vsel %vm214_vm0, %v208_v7, %v209_v54  ;;  %v260_v28 = vsel %vm214_vm0, %v209_v54, %v210_v20 }
  0xb7   :  { %v261_v46 = vsel %vm216_vm1, %v178_v1, %v260_v28  ;;  %v184_v22 = vpop.permute.xlu1 %183  ;;  %v182_v35 = vpop.permute.xlu0 %181  ;;  %v259_v41 = vsel %vm216_vm1, %v176_v9, %v258_v27 }
  0xb8   :  { %v1435_v17 = vadd.f32 %v261_v46, %v73_v13  ;;  %v212_v36 = vrot.slane %v184_v22, 2  ;;  %v211_v40 = vrot.slane %v182_v35, 2  ;;  %v1437_v43 = vadd.f32 %v259_v41, %v72_v16 }
  0xba   :  { %1822 = vst [vmem:[#allocation7_spill] sm:$0xff] %v1435_v17  ;;  %1823 = vst [vmem:[#allocation8_spill] sm:$0xff] %v1437_v43  ;;  %v262_v44 = vsel %vm214_vm0, %v210_v20, %v211_v40  ;;  %v264_v47 = vsel %vm214_vm0, %v211_v40, %v212_v36 }
  0xbb   :  { %v265_v53 = vsel %vm216_vm1, %v182_v35, %v264_v47  ;;  %v377_v56 = vpop.permute.xlu1 %376  ;;  %v186_v50 = vpop.permute.xlu0 %185  ;;  %v263_v26 = vsel %vm216_vm1, %v180_v37, %v262_v44 }
  0xbc   :  { %v1443_v38 = vadd.f32 %v265_v53, %v75_v34  ;;  %v213_v59 = vrot.slane %v186_v50, 2  ;;  %v1445_v45 = vadd.f32 %v263_v26, %v74_v29  ;;  %v430_v34 = vrot.slane %v377_v56, 2 }
  0xbe   :  { %1824 = vst [vmem:[#allocation9_spill] sm:$0xff] %v1443_v38  ;;  %1825 = vst [vmem:[#allocation10_spill] sm:$0xff] %v1445_v45  ;;  %v266_v21 = vsel %vm214_vm0, %v212_v36, %v213_v59 }
  0xbf   :  { %v381_v9 = vpop.permute.xlu1 %380  ;;  %v379_v60 = vpop.permute.xlu0 %378  ;;  %v267_v61 = vsel %vm216_vm1, %v184_v22, %v266_v21 }
  0xc0   :  { %v1451_v62 = vadd.f32 %v267_v61, %v76_v33  ;;  %v432_v46 = vrot.slane %v381_v9, 2  ;;  %v431_v22 = vrot.slane %v379_v60, 2 }
  0xc2   :  { %1826 = vst [vmem:[#allocation11_spill] sm:$0xff] %v1451_v62  ;;  %v460_v40 = vsel %vm214_vm0, %v431_v22, %v432_v46  ;;  %v457_v53 = vsel %vm214_vm0, %v430_v34, %v431_v22 }
  0xc3   :  { %v385_v63 = vpop.permute.xlu1 %384  ;;  %v383_v7 = vpop.permute.xlu0 %382  ;;  %v461_v38 = vsel %vm458_vm2, %v379_v60, %v460_v40  ;;  %v459_v19 = vsel %vm458_vm2, %v377_v56, %v457_v53 }
  0xc4   :  { %v434_v35 = vrot.slane %v385_v63, 2  ;;  %v433_v41 = vrot.slane %v383_v7, 2  ;;  %v536_v53 = vadd.f32 %v459_v19, %v1262_v31 }
  0xc6   :  { %v464_v50 = vsel %vm214_vm0, %v433_v41, %v434_v35  ;;  %v462_v17 = vsel %vm214_vm0, %v432_v46, %v433_v41  ;;  %v1506_v46 = vstv %s892_s21 }
  0xc7   :  { %v1453_v4 = vpop.permute.xlu1 %388  ;;  %v387_v30 = vpop.permute.xlu0 %386  ;;  %v465_v45 = vsel %vm458_vm2, %v383_v7, %v464_v50  ;;  %v537_v7 = vadd.f32 %v461_v38, %v1260_v24  ;;  %v463_v56 = vsel %vm458_vm2, %v381_v9, %v462_v17 }
  0xc8   :  { %v436_v44 = vrot.slane %v1453_v4, 2  ;;  %v435_v47 = vrot.slane %v387_v30, 2  ;;  %v1513_v40 = vadd.f32 %v465_v45, %v1282_v57  ;;  %v538_v9 = vadd.f32 %v463_v56, %v1270_v32 }
  0xca   :  { %v466_v22 = vsel %vm214_vm0, %v434_v35, %v435_v47  ;;  %v468_v34 = vsel %vm214_vm0, %v435_v47, %v436_v44 }
  0xcb   :  { %v1455_v42 = vpop.permute.xlu1 %392  ;;  %v391_v12 = vpop.permute.xlu0 %390  ;;  %v469_v47 = vsel %vm458_vm2, %v387_v30, %v468_v34  ;;  %v467_v50 = vsel %vm458_vm2, %v385_v63, %v466_v22 }
  0xcc   :  { %v438_v26 = vrot.slane %v1455_v42, 2  ;;  %v437_v59 = vrot.slane %v391_v12, 2  ;;  %v1530_v30 = vadd.f32 %v469_v47, %v1300_v8 }
  0xce   :  { %v472_v43 = vsel %vm214_vm0, %v437_v59, %v438_v26  ;;  %v470_v35 = vsel %vm214_vm0, %v436_v44, %v437_v59 }
  0xcf   :  { %v1457_v25 = vpop.permute.xlu1 %396  ;;  %v395_v37 = vpop.permute.xlu0 %394  ;;  %v471_v31 = vsel %vm458_vm2, %v1453_v4, %v470_v35 }
  0xd0   :  { %v440_v61 = vrot.slane %v1457_v25, 2  ;;  %v439_v62 = vrot.slane %v395_v37, 2 }
  0xd2   :  { %v476_v41 = vsel %vm214_vm0, %v439_v62, %v440_v61 }
  0xd3   :  { %v1459_v49 = vpop.permute.xlu1 %400  ;;  %v1461_v55 = vpop.permute.xlu0 %398  ;;  %v477_v44 = vsel %vm458_vm2, %v395_v37, %v476_v41  ;;  %v540_v37 = vadd.f32 %v467_v50, %v1280_v52 }
  0xd4   :  { %v441_v2 = vrot.slane %v1461_v55, 2  ;;  %v1544_v8 = vadd.f32 %v477_v44, %v1336_v58 }
  0xd7   :  { %v1463_v13 = vpop.permute.xlu1 %404  ;;  %v1465_v1 = vpop.permute.xlu0 %402 }
  0xd8   :  { %v444_v24 = vrot.slane %v1463_v13, 2  ;;  %v443_v38 = vrot.slane %v1465_v1, 2 }
  0xda   :  { %v484_v59 = vsel %vm214_vm0, %v443_v38, %v444_v24 }
  0xdb   :  { %v1467_v15 = vpop.permute.xlu1 %408  ;;  %v1469_v16 = vpop.permute.xlu0 %406  ;;  %v485_v58 = vsel %vm458_vm2, %v1465_v1, %v484_v59 }
  0xdc   :  { %v446_v19 = vrot.slane %v1467_v15, 2 }
  0xdf   :  { %v1471_v20 = vpop.permute.xlu1 %412  ;;  %v1473_v54 = vpop.permute.xlu0 %410 }
  0xe3   :  { %v1475_v27 = vpop.permute.xlu1 %416  ;;  %v1477_v28 = vpop.permute.xlu0 %414 }
  0xe7   :  { %v1479_v29 = vpop.permute.xlu1 %420  ;;  %v1481_v36 = vpop.permute.xlu0 %418 }
  0xeb   :  { %v1488_v33 = vpop.permute.xlu1 %424  ;;  %v1490_v21 = vpop.permute.xlu0 %422 }
  0xec   :  { %1827 = vst [vmem:[#allocation12_spill] sm:$0xff] %v1488_v33  ;;  %1828 = vst [vmem:[#allocation13_spill] sm:$0xff] %v1490_v21  ;;  %v442_v33 = vrot.slane %v1459_v49, 2 }
  0xee   :  { %v480_v17 = vsel %vm214_vm0, %v441_v2, %v442_v33 }
  0xef   :  { %v1502_v21 = vpop.permute.xlu1 %428  ;;  %v1504_v60 = vpop.permute.xlu0 %426  ;;  %v481_v4 = vsel %vm458_vm2, %v1461_v55, %v480_v17 }
  0xf0   :  { %1829 = vst [vmem:[#allocation14_spill] sm:$0xff] %v1502_v21  ;;  %1830 = vst [vmem:[#allocation15_spill] sm:$0xff] %v1504_v60  ;;  %v473_v21 = vsel %vm458_vm2, %v391_v12, %v472_v43  ;;  %v474_v60 = vsel %vm214_vm0, %v438_v26, %v439_v62  ;;  %v445_v43 = vrot.slane %v1469_v16, 2  ;;  %v478_v26 = vsel %vm214_vm0, %v440_v61, %v441_v2 }
  0xf1   :  { %v1533_v12 = vadd.f32 %v473_v21, %v1318_v10  ;;  %v475_v32 = vsel %vm458_vm2, %v1455_v42, %v474_v60  ;;  %v482_v10 = vsel %vm214_vm0, %v442_v33, %v443_v38  ;;  %v1549_v42 = vadd.f32 %v471_v31, %v1298_v6 }
  0xf2   :  { %v488_v2 = vsel %vm214_vm0, %v445_v43, %v446_v19  ;;  %v1555_v35 = vadd.f32 %v481_v4, %v1354_v11  ;;  %v1560_v33 = vadd.f32 %v475_v32, %v1316_v0  ;;  %v479_v6 = vsel %vm458_vm2, %v1457_v25, %v478_v26 }
  0xf3   :  { %v621_v57 = vpop.permute.xlu1 %620  ;;  %v619_v45 = vpop.permute.xlu0 %618  ;;  %v486_v11 = vsel %vm214_vm0, %v444_v24, %v445_v43  ;;  %v489_v1 = vsel %vm458_vm2, %v1469_v16, %v488_v2  ;;  %v447_v16 = vrot.slane %v1473_v54, 2 }
  0xf4   :  { %v673_v62 = vrot.slane %v621_v57, 2  ;;  %v672_v63 = vrot.slane %v619_v45, 2 }
  0xf5   :  { %v490_v2 = vsel %vm214_vm0, %v446_v19, %v447_v16 }
  0xf6   :  { %v699_v22 = vsel %vm214_vm0, %v672_v63, %v673_v62 }
  0xf7   :  { %v701_v21 = vsel %vm700_vm3, %v619_v45, %v699_v22  ;;  %v625_v52 = vpop.permute.xlu1 %624  ;;  %v623_v34 = vpop.permute.xlu0 %622 }
  0xf8   :  { %v778_v55 = vadd.f32 %v701_v21, %v536_v53  ;;  %v675_v61 = vrot.slane %v625_v52, 2  ;;  %v674_v60 = vrot.slane %v623_v34, 2  ;;  %v483_v53 = vsel %vm458_vm2, %v1459_v49, %v482_v10 }
  0xf9   :  { %v1578_v49 = vadd.f32 %v479_v6, %v1334_v51  ;;  %v1581_v24 = vadd.f32 %v483_v53, %v1352_v5  ;;  %v448_v51 = vrot.slane %v1471_v20, 2 }
  0xfa   :  { %v806_v41 = vadd.f32 %v1506_v46, %v778_v55  ;;  %v702_v56 = vsel %vm214_vm0, %v673_v62, %v674_v60  ;;  %v704_v47 = vsel %vm214_vm0, %v674_v60, %v675_v61  ;;  %v1575_v62 = vadd.f32 %v485_v58, %v1372_v3 }
  0xfb   :  { %v703_v0 = vsel %vm700_vm3, %v621_v57, %v702_v56  ;;  %v705_v50 = vsel %vm700_vm3, %v623_v34, %v704_v47  ;;  %v629_v38 = vpop.permute.xlu1 %628  ;;  %v627_v25 = vpop.permute.xlu0 %626  ;;  %v487_v3 = vsel %vm458_vm2, %v1463_v13, %v486_v11  ;;  %v450_v55 = vrot.slane %v1475_v27, 2 }
  0xfc   :  { %v832_v44 = vmax.f32 %v806_v41, 0.0  ;;  %v779_v17 = vadd.f32 %v703_v0, %v537_v7  ;;  %v780_v45 = vadd.f32 %v705_v50, %v538_v9  ;;  %v677_v31 = vrot.slane %v629_v38, 2 }
  0xfd   :  { %v676_v63 = vrot.slane %v627_v25, 2  ;;  %v1592_v9 = vadd.f32 %v489_v1, %v1390_v14  ;;  %v492_v50 = vsel %vm214_vm0, %v447_v16, %v448_v51 }
  0xfe   :  { %858 = vst [vmem:[%s1816_s2] sm:$0xff] %v832_v44  ;;  %v807_v7 = vadd.f32 %v1506_v46, %v779_v17  ;;  %v808_v57 = vadd.f32 %v1506_v46, %v780_v45 }
  0xff   :  { %v706_v5 = vsel %vm214_vm0, %v675_v61, %v676_v63  ;;  %v708_v43 = vsel %vm214_vm0, %v676_v63, %v677_v31  ;;  %v633_v32 = vpop.permute.xlu1 %632  ;;  %v631_v26 = vpop.permute.xlu0 %630  ;;  %v449_v61 = vrot.slane %v1477_v28, 2 }
 0x100   :  { %v833_v4 = vmax.f32 %v807_v7, 0.0  ;;  %v834_v59 = vmax.f32 %v808_v57, 0.0  ;;  %v707_v22 = vsel %vm700_vm3, %v625_v52, %v706_v5  ;;  %v709_v10 = vsel %vm700_vm3, %v627_v25, %v708_v43 }
 0x101   :  { %v781_v21 = vadd.f32 %v707_v22, %v1513_v40  ;;  %v782_v13 = vadd.f32 %v709_v10, %v540_v37  ;;  %v679_v34 = vrot.slane %v633_v32, 2  ;;  %v678_v14 = vrot.slane %v631_v26, 2 }
 0x102   :  { %859 = vst [vmem:[%s1816_s2 + $0x8] sm:$0xff] %v833_v4  ;;  %860 = vst [vmem:[%s1816_s2 + $0x10] sm:$0xff] %v834_v59  ;;  %v1612_v40 = vadd.f32 %v487_v3, %v1370_v23  ;;  %v496_v25 = vsel %vm214_vm0, %v449_v61, %v450_v55  ;;  %v493_v5 = vsel %vm458_vm2, %v1473_v54, %v492_v50 }
 0x103   :  { %v809_v37 = vadd.f32 %v1506_v46, %v781_v21  ;;  %v810_v52 = vadd.f32 %v1506_v46, %v782_v13  ;;  %v710_v19 = vsel %vm214_vm0, %v677_v31, %v678_v14  ;;  %v712_v60 = vsel %vm214_vm0, %v678_v14, %v679_v34  ;;  %v637_v58 = vpop.permute.xlu1 %636  ;;  %v635_v6 = vpop.permute.xlu0 %634 }
 0x104   :  { %v711_v41 = vsel %vm700_vm3, %v629_v38, %v710_v19  ;;  %v713_v56 = vsel %vm700_vm3, %v631_v26, %v712_v60  ;;  %v681_v47 = vrot.slane %v637_v58, 2  ;;  %v680_v53 = vrot.slane %v635_v6, 2 }
 0x105   :  { %v835_v11 = vmax.f32 %v809_v37, 0.0  ;;  %v836_v1 = vmax.f32 %v810_v52, 0.0  ;;  %v783_v23 = vadd.f32 %v711_v41, %v1530_v30  ;;  %v784_v0 = vadd.f32 %v713_v56, %v1549_v42 }
 0x106   :  { %v714_v44 = vsel %vm214_vm0, %v679_v34, %v680_v53  ;;  %v716_v38 = vsel %vm214_vm0, %v680_v53, %v681_v47  ;;  %v491_v4 = vsel %vm458_vm2, %v1467_v15, %v490_v2  ;;  %v497_v10 = vsel %vm458_vm2, %v1477_v28, %v496_v25 }
 0x107   :  { %861 = vst [vmem:[%s1816_s2 + $0x18] sm:$0xff] %v835_v11  ;;  %862 = vst [vmem:[%s1816_s2 + $0x20] sm:$0xff] %v836_v1  ;;  %v811_v30 = vadd.f32 %v1506_v46, %v783_v23  ;;  %v812_v42 = vadd.f32 %v1506_v46, %v784_v0  ;;  %v715_v17 = vsel %vm700_vm3, %v633_v32, %v714_v44  ;;  %v641_v31 = vpop.permute.xlu1 %640  ;;  %v639_v63 = vpop.permute.xlu0 %638  ;;  %v452_v19 = vrot.slane %v1479_v29, 2 }
 0x108   :  { %v717_v45 = vsel %vm700_vm3, %v635_v6, %v716_v38  ;;  %v785_v16 = vadd.f32 %v715_v17, %v1533_v12  ;;  %v683_v57 = vrot.slane %v641_v31, 2  ;;  %v682_v3 = vrot.slane %v639_v63, 2  ;;  %v1831_v38 = vld [vmem:[#allocation13_spill] sm:$0xff] }
 0x109   :  { %v786_v7 = vadd.f32 %v717_v45, %v1560_v33  ;;  %v837_v43 = vmax.f32 %v811_v30, 0.0  ;;  %v838_v26 = vmax.f32 %v812_v42, 0.0  ;;  %v494_v33 = vsel %vm214_vm0, %v448_v51, %v449_v61 }
 0x10a   :  { %v813_v32 = vadd.f32 %v1506_v46, %v785_v16  ;;  %v718_v22 = vsel %vm214_vm0, %v681_v47, %v682_v3  ;;  %v720_v12 = vsel %vm214_vm0, %v682_v3, %v683_v57  ;;  %v1662_v2 = vadd.f32 %v493_v5, %v1408_v18 }
 0x10b   :  { %v814_v59 = vadd.f32 %v1506_v46, %v786_v7  ;;  %863 = vst [vmem:[%s1816_s2 + $0x28] sm:$0xff] %v837_v43  ;;  %864 = vst [vmem:[%s1816_s2 + $0x30] sm:$0xff] %v838_v26  ;;  %v719_v15 = vsel %vm700_vm3, %v637_v58, %v718_v22  ;;  %v721_v54 = vsel %vm700_vm3, %v639_v63, %v720_v12  ;;  %v645_v21 = vpop.permute.xlu1 %644  ;;  %v643_v13 = vpop.permute.xlu0 %642  ;;  %v451_v60 = vrot.slane %v1481_v36, 2 }
 0x10c   :  { %v839_v34 = vmax.f32 %v813_v32, 0.0  ;;  %v787_v51 = vadd.f32 %v719_v15, %v1544_v8  ;;  %v788_v28 = vadd.f32 %v721_v54, %v1578_v49  ;;  %v685_v61 = vrot.slane %v645_v21, 2  ;;  %v1833_v32 = vld [vmem:[#allocation12_spill] sm:$0xff] }
 0x10d   :  { %v840_v14 = vmax.f32 %v814_v59, 0.0  ;;  %v684_v37 = vrot.slane %v643_v13, 2  ;;  %v552_v52 = vadd.f32 %v491_v4, %v1388_v48  ;;  %v1676_v49 = vadd.f32 %v497_v10, %v1424_v39 }
 0x10e   :  { %865 = vst [vmem:[%s1816_s2 + $0x38] sm:$0xff] %v839_v34  ;;  %v815_v8 = vadd.f32 %v1506_v46, %v787_v51  ;;  %v816_v18 = vadd.f32 %v1506_v46, %v788_v28  ;;  %v495_v56 = vsel %vm458_vm2, %v1471_v20, %v494_v33  ;;  %v498_v25 = vsel %vm214_vm0, %v450_v55, %v451_v60 }
 0x10f   :  { %866 = vst [vmem:[%s1816_s2 + $0x40] sm:$0xff] %v840_v14  ;;  %v722_v48 = vsel %vm214_vm0, %v683_v57, %v684_v37  ;;  %v724_v58 = vsel %vm214_vm0, %v684_v37, %v685_v61  ;;  %v649_v6 = vpop.permute.xlu1 %648  ;;  %v647_v41 = vpop.permute.xlu0 %646  ;;  %v500_v44 = vsel %vm214_vm0, %v451_v60, %v452_v19  ;;  %v453_v20 = vrot.slane %v1831_v38, 2 }
 0x110   :  { %v841_v47 = vmax.f32 %v815_v8, 0.0  ;;  %v842_v53 = vmax.f32 %v816_v18, 0.0  ;;  %v723_v11 = vsel %vm700_vm3, %v641_v31, %v722_v48  ;;  %v725_v1 = vsel %vm700_vm3, %v643_v13, %v724_v58 }
 0x111   :  { %v789_v23 = vadd.f32 %v723_v11, %v1555_v35  ;;  %v790_v39 = vadd.f32 %v725_v1, %v1581_v24  ;;  %v687_v0 = vrot.slane %v649_v6, 2  ;;  %v686_v50 = vrot.slane %v647_v41, 2  ;;  %v1832_v35 = vld [vmem:[#allocation5_spill] sm:$0xff]  ;;  %v1835_v11 = vld [vmem:[#allocation8_spill] sm:$0xff] }
 0x112   :  { %867 = vst [vmem:[%s1816_s2 + $0x48] sm:$0xff] %v841_v47  ;;  %868 = vst [vmem:[%s1816_s2 + $0x50] sm:$0xff] %v842_v53  ;;  %v554_v24 = vadd.f32 %v495_v56, %v1832_v35  ;;  %v501_v4 = vsel %vm458_vm2, %v1481_v36, %v500_v44  ;;  %v454_v59 = vrot.slane %v1833_v32, 2  ;;  %v502_v14 = vsel %vm214_vm0, %v452_v19, %v453_v20  ;;  %v1837_v44 = vld [vmem:[#allocation14_spill] sm:$0xff] }
 0x113   :  { %v817_v30 = vadd.f32 %v1506_v46, %v789_v23  ;;  %v818_v42 = vadd.f32 %v1506_v46, %v790_v39  ;;  %v726_v55 = vsel %vm214_vm0, %v685_v61, %v686_v50  ;;  %v728_v17 = vsel %vm214_vm0, %v686_v50, %v687_v0  ;;  %v653_v45 = vpop.permute.xlu1 %652  ;;  %v651_v31 = vpop.permute.xlu0 %650  ;;  %v1836_v39 = vld [vmem:[#allocation6_spill] sm:$0xff] }
 0x114   :  { %v727_v63 = vsel %vm700_vm3, %v645_v21, %v726_v55  ;;  %v729_v16 = vsel %vm700_vm3, %v647_v41, %v728_v17  ;;  %v689_v7 = vrot.slane %v653_v45, 2  ;;  %v688_v57 = vrot.slane %v651_v31, 2 }
 0x115   :  { %v843_v3 = vmax.f32 %v817_v30, 0.0  ;;  %v844_v5 = vmax.f32 %v818_v42, 0.0  ;;  %v791_v43 = vadd.f32 %v727_v63, %v1575_v62  ;;  %v792_v26 = vadd.f32 %v729_v16, %v1612_v40 }
 0x116   :  { %v730_v22 = vsel %vm214_vm0, %v687_v0, %v688_v57  ;;  %v732_v12 = vsel %vm214_vm0, %v688_v57, %v689_v7  ;;  %v499_v61 = vsel %vm458_vm2, %v1475_v27, %v498_v25  ;;  %v557_v1 = vadd.f32 %v501_v4, %v1835_v11 }
 0x117   :  { %869 = vst [vmem:[%s1816_s2 + $0x58] sm:$0xff] %v843_v3  ;;  %870 = vst [vmem:[%s1816_s2 + $0x60] sm:$0xff] %v844_v5  ;;  %v819_v62 = vadd.f32 %v1506_v46, %v791_v43  ;;  %v820_v40 = vadd.f32 %v1506_v46, %v792_v26  ;;  %v731_v36 = vsel %vm700_vm3, %v649_v6, %v730_v22  ;;  %v657_v10 = vpop.permute.xlu1 %656  ;;  %v655_v15 = vpop.permute.xlu0 %654  ;;  %v1838_v43 = vld [vmem:[#allocation10_spill] sm:$0xff] }
 0x118   :  { %v733_v33 = vsel %vm700_vm3, %v651_v31, %v732_v12  ;;  %v793_v54 = vadd.f32 %v731_v36, %v1592_v9  ;;  %v691_v13 = vrot.slane %v657_v10, 2  ;;  %v690_v34 = vrot.slane %v655_v15, 2 }
 0x119   :  { %v794_v21 = vadd.f32 %v733_v33, %v552_v52  ;;  %v845_v51 = vmax.f32 %v819_v62, 0.0  ;;  %v846_v28 = vmax.f32 %v820_v40, 0.0  ;;  %v504_v9 = vsel %vm214_vm0, %v453_v20, %v454_v59  ;;  %v1834_v52 = vld [vmem:[#allocation15_spill] sm:$0xff] }
 0x11a   :  { %v821_v37 = vadd.f32 %v1506_v46, %v793_v54  ;;  %v734_v8 = vsel %vm214_vm0, %v689_v7, %v690_v34  ;;  %v736_v18 = vsel %vm214_vm0, %v690_v34, %v691_v13  ;;  %v455_v48 = vrot.slane %v1834_v52, 2 }
 0x11b   :  { %v822_v60 = vadd.f32 %v1506_v46, %v794_v21  ;;  %871 = vst [vmem:[%s1816_s2 + $0x68] sm:$0xff] %v845_v51  ;;  %872 = vst [vmem:[%s1816_s2 + $0x70] sm:$0xff] %v846_v28  ;;  %v735_v27 = vsel %vm700_vm3, %v653_v45, %v734_v8  ;;  %v737_v19 = vsel %vm700_vm3, %v655_v15, %v736_v18  ;;  %v661_v58 = vpop.permute.xlu1 %660  ;;  %v659_v6 = vpop.permute.xlu0 %658  ;;  %v456_v20 = vrot.slane %v1837_v44, 2  ;;  %v1840_v28 = vld [vmem:[#allocation9_spill] sm:$0xff] }
 0x11c   :  { %v847_v41 = vmax.f32 %v821_v37, 0.0  ;;  %v795_v47 = vadd.f32 %v735_v27, %v1662_v2  ;;  %v796_v53 = vadd.f32 %v737_v19, %v554_v24  ;;  %v693_v23 = vrot.slane %v661_v58, 2 }
 0x11d   :  { %v848_v56 = vmax.f32 %v822_v60, 0.0  ;;  %v556_v0 = vadd.f32 %v499_v61, %v1836_v39  ;;  %v692_v50 = vrot.slane %v659_v6, 2  ;;  %v505_v25 = vsel %vm458_vm2, %v1831_v38, %v504_v9 }
 0x11e   :  { %873 = vst [vmem:[%s1816_s2 + $0x78] sm:$0xff] %v847_v41  ;;  %v823_v2 = vadd.f32 %v1506_v46, %v795_v47  ;;  %v824_v35 = vadd.f32 %v1506_v46, %v796_v53  ;;  %v506_v24 = vsel %vm214_vm0, %v454_v59, %v455_v48  ;;  %v503_v55 = vsel %vm458_vm2, %v1479_v29, %v502_v14  ;;  %v1839_v29 = vld [vmem:[#allocation7_spill] sm:$0xff] }
 0x11f   :  { %874 = vst [vmem:[%s1816_s2 + $0x80] sm:$0xff] %v848_v56  ;;  %v738_v30 = vsel %vm214_vm0, %v691_v13, %v692_v50  ;;  %v740_v38 = vsel %vm214_vm0, %v692_v50, %v693_v23  ;;  %v665_v42 = vpop.permute.xlu1 %664  ;;  %v663_v17 = vpop.permute.xlu0 %662  ;;  %v559_v26 = vadd.f32 %v505_v25, %v1838_v43  ;;  %v508_v4 = vsel %vm214_vm0, %v455_v48, %v456_v20  ;;  %v1841_v56 = vld [vmem:[#allocation11_spill] sm:$0xff] }
 0x120   :  { %v849_v45 = vmax.f32 %v823_v2, 0.0  ;;  %v850_v31 = vmax.f32 %v824_v35, 0.0  ;;  %v739_v63 = vsel %vm700_vm3, %v657_v10, %v738_v30  ;;  %v741_v16 = vsel %vm700_vm3, %v659_v6, %v740_v38 }
 0x121   :  { %v797_v7 = vadd.f32 %v739_v63, %v1676_v49  ;;  %v798_v57 = vadd.f32 %v741_v16, %v556_v0  ;;  %v695_v3 = vrot.slane %v665_v42, 2  ;;  %v694_v5 = vrot.slane %v663_v17, 2 }
 0x122   :  { %875 = vst [vmem:[%s1816_s2 + $0x88] sm:$0xff] %v849_v45  ;;  %876 = vst [vmem:[%s1816_s2 + $0x90] sm:$0xff] %v850_v31  ;;  %v558_v59 = vadd.f32 %v503_v55, %v1839_v29  ;;  %v507_v49 = vsel %vm458_vm2, %v1833_v32, %v506_v24  ;;  %v509_v51 = vsel %vm458_vm2, %v1834_v52, %v508_v4 }
 0x123   :  { %v825_v22 = vadd.f32 %v1506_v46, %v797_v7  ;;  %v826_v12 = vadd.f32 %v1506_v46, %v798_v57  ;;  %v742_v62 = vsel %vm214_vm0, %v693_v23, %v694_v5  ;;  %v744_v40 = vsel %vm214_vm0, %v694_v5, %v695_v3  ;;  %v669_v36 = vpop.permute.xlu1 %668  ;;  %v667_v33 = vpop.permute.xlu0 %666 }
 0x124   :  { %v743_v10 = vsel %vm700_vm3, %v661_v58, %v742_v62  ;;  %v745_v15 = vsel %vm700_vm3, %v663_v17, %v744_v40  ;;  %v697_v54 = vrot.slane %v669_v36, 2  ;;  %v696_v21 = vrot.slane %v667_v33, 2 }
 0x125   :  { %v851_v13 = vmax.f32 %v825_v22, 0.0  ;;  %v852_v34 = vmax.f32 %v826_v12, 0.0  ;;  %v799_v14 = vadd.f32 %v743_v10, %v557_v1  ;;  %v800_v32 = vadd.f32 %v745_v15, %v558_v59 }
 0x126   :  { %v560_v61 = vadd.f32 %v507_v49, %v1840_v28  ;;  %v746_v37 = vsel %vm214_vm0, %v695_v3, %v696_v21  ;;  %v748_v60 = vsel %vm214_vm0, %v696_v21, %v697_v54  ;;  %v561_v47 = vadd.f32 %v509_v51, %v1841_v56 }
 0x127   :  { %877 = vst [vmem:[%s1816_s2 + $0x98] sm:$0xff] %v851_v13  ;;  %878 = vst [vmem:[%s1816_s2 + $0xa0] sm:$0xff] %v852_v34  ;;  %v827_v8 = vadd.f32 %v1506_v46, %v799_v14  ;;  %v828_v18 = vadd.f32 %v1506_v46, %v800_v32  ;;  %v747_v9 = vsel %vm700_vm3, %v665_v42, %v746_v37  ;;  %v671_v48 = vpop.permute.xlu0 %670 }
 0x128   :  { %v749_v52 = vsel %vm700_vm3, %v667_v33, %v748_v60  ;;  %v801_v27 = vadd.f32 %v747_v9, %v559_v26  ;;  %v698_v58 = vrot.slane %v671_v48, 2 }
 0x129   :  { %v802_v19 = vadd.f32 %v749_v52, %v560_v61  ;;  %v853_v6 = vmax.f32 %v827_v8, 0.0  ;;  %v854_v41 = vmax.f32 %v828_v18, 0.0 }
 0x12a   :  { %v829_v53 = vadd.f32 %v1506_v46, %v801_v27  ;;  %v750_v1 = vsel %vm214_vm0, %v697_v54, %v698_v58 }
 0x12b   :  { %v830_v11 = vadd.f32 %v1506_v46, %v802_v19  ;;  %879 = vst [vmem:[%s1816_s2 + $0xa8] sm:$0xff] %v853_v6  ;;  %880 = vst [vmem:[%s1816_s2 + $0xb0] sm:$0xff] %v854_v41  ;;  %v751_v23 = vsel %vm700_vm3, %v669_v36, %v750_v1 }
 0x12c   :  { %v855_v39 = vmax.f32 %v829_v53, 0.0  ;;  %v803_v50 = vadd.f32 %v751_v23, %v561_v47 }
 0x12d   :  { %v856_v0 = vmax.f32 %v830_v11, 0.0 }
 0x12e   :  { %881 = vst [vmem:[%s1816_s2 + $0xb8] sm:$0xff] %v855_v39  ;;  %v831_v25 = vadd.f32 %v1506_v46, %v803_v50 }
 0x12f   :  { %882 = vst [vmem:[%s1816_s2 + $0xc0] sm:$0xff] %v856_v0 }
 0x130   :  { %v857_v44 = vmax.f32 %v831_v25, 0.0 }
 0x132   :  { %883 = vst [vmem:[%s1816_s2 + $0xc8] sm:$0xff] %v857_v44 }
 0x133   :  { %888 = vsyncpa [#allocation3], 1 }

// kernel: net_forward.3
= control target key start
LH: loop header
LB: loop body
LE: loop exit
PB: predicated region body
PF: predicated region fallthrough
CT: control target
= control target key end

     0   :  { %s20827_s0 = inlined_call_operand.vmem [shape: f32[2,13312], index: 0, kind: input, shape index: {}]   ;;  %s20828_s1 = inlined_call_operand.hbm [shape: bf16[13312,1024], index: 1, kind: input, shape index: {}]   ;;  %s20829_s2 = inlined_call_operand.hbm [shape: f32[1,1024], index: 2, kind: input, shape index: {}]   ;;  %s20830_s3 = inlined_call_operand.hbm [shape: f32[1,1024], index: 3, kind: input, shape index: {}]   ;;  %s20831_s4 = inlined_call_operand.hbm [shape: f32[1,1024], index: 4, kind: input, shape index: {}]   ;;  %s20832_s5 = inlined_call_operand.hbm [shape: f32[1024,128], index: 5, kind: input, shape index: {}]   ;;  %s20833_s6 = inlined_call_operand.vmem [shape: f32[2,256], index: 6, kind: output, shape index: {}]  }
   0x1   :  { %20848 = sst [smem:[#allocation23_spill]] %s20827_s0 }
   0x2   :  { %20849 = sst [smem:[#allocation24_spill]] %s20829_s2 }
   0x3   :  { %20850 = sst [smem:[#allocation25_spill]] %s20831_s4 }
   0x4   :  { %20851 = sst [smem:[#allocation26_spill]] %s20833_s6 }
   0x5   :  { %11 = vsyncpa [#allocation4], 0 }
   0x6   :  { %13 = vsyncpa [#allocation4 + $0x1], 0 }
   0x7   :  { %14 = vsyncpa [#allocation6], 0 }
   0x8   :  { %16 = vsyncpa [#allocation6 + $0x1], 0 }
   0x9   :  { %17 = vsyncpa [#allocation9], 0 }
   0xa   :  { %19 = vsyncpa [#allocation9 + $0x1], 0  ;;  %s18444_s21 = smov 0   ;;  %s18446_s22 = smov 0  }
   0xb   :  { %s18448_s23 = smov 0   ;;  %s18450_s24 = smov 0  }
   0xc   :  { %s18452_s25 = smov 0   ;;  %s18454_s26 = smov 0  }
   0xd   :  { %s18456_s27 = smov 0   ;;  %s18458_s28 = smov 0  }
   0xe   :  { %s18460_s29 = smov 0   ;;  %s18462_s30 = smov 0  }
   0xf   :  { %s18464_s7 = smov 0  }
  0x10 LB: > { %20852 = sst [smem:[#allocation14_spill]] %s18359_s22  ;;  %s20834_s8 = sadd.s32 4294967295, %s18395_s7   ;;  %s18395_s7 = sphi %s18464_s7, %s25_s7   ;;  %s18391_s30 = sphi %s18462_s30, %s20901_s30   ;;  %s18387_s29 = sphi %s18460_s29, %s20900_s29   ;;  %s18383_s28 = sphi %s18458_s28, %s20899_s28   ;;  %s18379_s27 = sphi %s18456_s27, %s20898_s27   ;;  %s18375_s26 = sphi %s18454_s26, %s20897_s26   ;;  %s18371_s25 = sphi %s18452_s25, %s20896_s25   ;;  %s18367_s24 = sphi %s18450_s24, %s20895_s24   ;;  %s18363_s23 = sphi %s18448_s23, %s20891_s23   ;;  %s18359_s22 = sphi %s18446_s22, %s20890_s22   ;;  %s18355_s21 = sphi %s18444_s21, %s20889_s21  }
  0x11   : > { %20853 = sst [smem:[#allocation15_spill]] %s18363_s23  ;;  %s34_s9 = sadd.s32 1, %s18387_s29 }
  0x12   : > { %20854 = sst [smem:[#allocation16_spill]] %s18379_s27  ;;  %p35_p0 = scmp.ge.s32.totalorder %s34_s9, 2 }
  0x13   : > { %20855 = sst [smem:[#allocation17_spill]] %s18383_s28  ;;  %s37_s10 = sadd.s32 1, %s18391_s30 }
  0x14   : > { %s72_s11 = sadd.s32 1, %s18375_s26  ;;  %p79_p1 = scmp.ne.s32.totalorder %s18375_s26, %s18371_s25 }
  0x15   : > { %s20903_s9 = smov (%p35_p0, %s34_s9), 0  ;;  %s20905_s10 = smov (!%p35_p0, %s37_s10), %s18391_s30 }
  0x16   : > { %20856 = sst [smem:[#allocation18_spill]] %s20903_s9  ;;  %s67_s12 = ssub.s32 %s18387_s29, %s20903_s9 }
  0x17   : > { %p80_p2 = scmp.eq.s32.totalorder %s18395_s7, 0  ;;  %p39_p3 = scmp.ge.s32.totalorder %s20905_s10, 2 }
  0x18   : > { %p85_p4 = scmp.ne.s32.totalorder %s18371_s25, %s18367_s24  ;;  %p18518_p6 = scmp.eq.s32.totalorder %s20834_s8, 0 }
  0x19   : > { %p18512_p5 = por %p80_p2, %p79_p1  ;;  %s20907_s10 = smov (%p39_p3, %s20905_s10), 0 }
  0x1a   : > { %20859 = sst [smem:[#allocation19_spill]] %s20907_s10  ;;  %p18526_p7 = por %p18518_p6, %p85_p4 }
  0x1b   : > { %s98_s16 = sadd.s32 1, %s18363_s23  ;;  %s68_s17 = ssub.s32 %s18391_s30, %s20907_s10 }
  0x1c   : > { %s20860_s15 = scalar_select %p18526_p7, 1, 0 }
  0x1d   : > { %p105_p8 = scmp.ne.s32.totalorder %s18363_s23, %s18359_s22  ;;  %s69_s18 = sor.u32 %s68_s17, %s67_s12 }
  0x1e   : > { %p96_p9 = scmp.eq.s32.totalorder %s68_s17, 0  ;;  %p70_p10 = scmp.eq.s32.totalorder %s69_s18, 0 }
  0x1f   : > { %p18537_p11 = por %p105_p8, %p80_p2  ;;  %p111_p12 = scmp.ne.s32.totalorder %s18359_s22, %s18355_s21 }
  0x20   : > { %s18542_s20 = scalar_select %p96_p9, %s18363_s23, %s98_s16  }
  0x21   : > { %s18545_s24 = scalar_select %p70_p10, %s18375_s26, %s72_s11  }
  0x22   : > { %20862 = sst [smem:[#allocation20_spill]] %s18542_s20  ;;  %p15542_p13 = scmp.lt.s32.totalorder %s18395_s7, 4 }
  0x23   : > { %20863 = sst [smem:[#allocation21_spill]] %s18545_s24  ;;  %p18553_p0 = por %p111_p12, %p18518_p6 }
  0x24   : > { %p18559_p1 = pnand %p15542_p13, %p18512_p5  ;;  %s274_s18 = sand.u32 1, %s18363_s23  }
  0x25   : > { %s20864_s12 = scalar_select %p18553_p0, 1, 0 }
  0x26   : > { %s20866_s17 = scalar_select %p18559_p1, 1, 0 }
  0x27   : > { %20865 = sst [smem:[#allocation22_spill]] %s20864_s12  ;;  %s18564_s16 = sshll.u32 %s274_s18, 2 }
  0x28   : > { %s18567_s11 = sshll.u32 %s18391_s30, 6  ;;  %s20867_s2 = sld [smem:[#allocation24_spill]] }
  0x29   : > { %s276_s13 = scalar_lea.vmem [#allocation5], %s18564_s16  ;;  %p18580_p2 = pnand %p15542_p13, %p18537_p11 }
  0x2a   : > { %s284_s8 = sshll.u32 %s276_s13, 4  ;;  %s18584_s24 = sshll.u32 %s274_s18, 9  ;;  %s18576_s8 = int_to_ptr.vmem [resolvable:$true] %s284_s8 }
  0x2b   : > { %s20868_s9 = scalar_select %p18580_p2, 1, 0 }
  0x2c   : > { %s20869_s10 = sand.u32 1, %s18395_s7   ;;  %p18595_p5 = pneg %p18580_p2 }
  0x2d   : > { %s18589_s21 = scalar_lea.sflag [#allocation6], %s20869_s10 }
  0x2e   : > { %s18573_s14 = scalar_lea.hbm %s20867_s2, %s18567_s11  ;;  %s18152_s18 = scalar_lea.hbm %s20867_s2, 128 }
  0x2f   : > { %s18147_s20 = scalar_lea.hbm %s18573_s14, 64  ;;  %p18153_p9 = scmp.lt.u32.totalorder %s18573_s14, %s20867_s2 }
  0x30   : > { %p18148_p4 = scmp.ne.s32.totalorder %s18573_s14, %s18147_s20  ;;  %p18154_p10 = scmp.lt.u32.totalorder %s18152_s18, %s18147_s20 }
  0x31   : > { %p18156_p12 = scmp.lt.u32.totalorder %s18147_s20, %s18573_s14 }
  0x32   : > { %p18150_p6 = pnand %p18595_p5, %p18148_p4  ;;  %p18155_p11 = por %p18154_p10, %p18153_p9 }
  0x34   : > { %p18151_p8 = pneg %p18150_p6  ;;  %p18157_p13 = por %p18156_p12, %p18155_p11 }
  0x36   : > { %p18158_p3 = pnand %p18157_p13, %p18151_p8 }
  0x38   : > { %18161 = shalt.err (!%p18158_p3)
}
  0x39   : > { %s18162_s10 = scalar_lea.vmem %s18576_s8, 64  ;;  %s18397_s19 = smov [#allocation5]  }
  0x3a   : > { %p18163_p4 = scmp.ne.s32.totalorder %s18576_s8, %s18162_s10  ;;  %s18167_s13 = sshll.u32 %s18397_s19, 4  ;;  %s18168_s13 = int_to_ptr.vmem [resolvable:$false] %s18167_s13 }
  0x3b   : > { %s18169_s0 = scalar_lea.vmem %s18168_s13, 128  ;;  %p18170_p7 = scmp.lt.s32.totalorder %s18576_s8, %s18168_s13 }
  0x3c   : > { %p18165_p6 = pnand %p18163_p4, %p18595_p5  ;;  %p18171_p1 = scmp.lt.s32.totalorder %s18169_s0, %s18162_s10 }
  0x3e   : > { %p18166_p0 = pneg %p18165_p6  ;;  %p18172_p9 = por %p18171_p1, %p18170_p7 }
  0x40   : > { %p18173_p10 = pnand %p18172_p9, %p18166_p0 }
  0x42   : > { %18176 = shalt.err (!%p18173_p10)
}
  0x43   : > { %15532 = dma.hbm_to_vmem [thread:$0]  (!%p18580_p2), %s18573_s14, 64, %s18576_s8, %s18589_s21  }
  0x44   : > { %s333_s6 = scalar_lea.vmem [#allocation10], %s18584_s24  ;;  %p348_p3 = scmp.lt.s32.totalorder %s18395_s7, 5 }
  0x45   : > { %s340_s20 = sshll.u32 %s333_s6, 4  ;;  %p20871_p7 = scmp.ge.s32.totalorder %s18395_s7, 1  ;;  %s18621_s20 = int_to_ptr.vmem [resolvable:$true] %s340_s20 }
  0x46   : > { %s20873_s4 = sld [smem:[#allocation25_spill]]  ;;  %s314_s8 = scalar_lea.vmem [#allocation8], %s18564_s16 }
  0x47   : > { %p18625_p0 = pnand %p20871_p7, %p348_p3  ;;  %s322_s24 = sshll.u32 %s314_s8, 4  ;;  %s323_s24 = int_to_ptr.vmem [resolvable:$true] %s322_s24 }
  0x48   : > { %s20874_s14 = sand.u32 1, %s18395_s7  }
  0x49   : > { %s20872_s18 = scalar_select %p18625_p0, 1, 0 }
  0x4a   : > { %s18638_s0 = scalar_lea.sflag [#allocation9], %s20874_s14 }
  0x4c   : > { %s18633_s13 = scalar_lea.hbm %s20873_s4, %s18567_s11  ;;  %s18182_s10 = scalar_lea.hbm %s20873_s4, 128 }
  0x4d   : > { %s18177_s6 = scalar_lea.hbm %s18633_s13, 64  ;;  %p18183_p12 = scmp.lt.u32.totalorder %s18633_s13, %s20873_s4 }
  0x4e   : > { %p18178_p1 = scmp.ne.s32.totalorder %s18633_s13, %s18177_s6  ;;  %p18184_p13 = scmp.lt.u32.totalorder %s18182_s10, %s18177_s6 }
  0x4f   : > { %p18186_p6 = scmp.lt.u32.totalorder %s18177_s6, %s18633_s13 }
  0x50   : > { %p18180_p8 = pnand %p18178_p1, %p18595_p5  ;;  %p18185_p4 = por %p18184_p13, %p18183_p12 }
  0x52   : > { %p18181_p11 = pneg %p18180_p8  ;;  %p18187_p9 = por %p18186_p6, %p18185_p4 }
  0x54   : > { %p18188_p10 = pnand %p18187_p9, %p18181_p11 }
  0x56   : > { %18191 = shalt.err (!%p18188_p10)
}
  0x57   : > { %s18192_s8 = scalar_lea.vmem %s323_s24, 64  ;;  %s18398_s14 = smov [#allocation8]  }
  0x58   : > { %p18193_p3 = scmp.ne.s32.totalorder %s323_s24, %s18192_s8  ;;  %s18197_s12 = sshll.u32 %s18398_s14, 4  ;;  %s18198_s12 = int_to_ptr.vmem [resolvable:$false] %s18197_s12 }
  0x59   : > { %s18199_s2 = scalar_lea.vmem %s18198_s12, 128  ;;  %p18200_p8 = scmp.lt.s32.totalorder %s323_s24, %s18198_s12 }
  0x5a   : > { %p18195_p7 = pnand %p18193_p3, %p18595_p5  ;;  %p18201_p0 = scmp.lt.s32.totalorder %s18199_s2, %s18192_s8 }
  0x5c   : > { %p18196_p1 = pneg %p18195_p7  ;;  %p18202_p2 = por %p18201_p0, %p18200_p8 }
  0x5e   : > { %p18203_p12 = pnand %p18202_p2, %p18196_p1 }
  0x60   : > { %18206 = shalt.err (!%p18203_p12)
}
  0x61   : > { %p20875_p13 = scmp.ne.s32.totalorder %s20868_s9, 0  ;;  %s248_s27 = sand.u32 1, %s18375_s26  }
  0x62   : > { %s15514_s28 = smul.u32 13312, %s248_s27  ;;  %s13485_s6 = sshll.u32 %s18391_s30, 2 }
  0x63   : > { %15538 = dma.hbm_to_vmem [thread:$0]  (!%p20875_p13), %s18633_s13, 64, %s323_s24, %s18638_s0  }
  0x64   : > { %s15175_s10 = smul.u32 6656, %s18387_s29  ;;  %s252_s12 = scalar_lea.vmem [#allocation3], %s15514_s28 }
  0x65   : > { %s262_s8 = sshll.u32 %s252_s12, 4  ;;  %s18668_s13 = scalar_lea.sflag [#allocation4], %s248_s27  ;;  %s18661_s8 = int_to_ptr.vmem [resolvable:$true] %s262_s8 }
  0x66   : > { %s259_s19 = sadd.s32 %s15175_s10, %s13485_s6  ;;  %p20876_p0 = scmp.ne.s32.totalorder %s20866_s17, 0 }
  0x67   : > { %s13487_s14 = sshll.u32 %s259_s19, 6  ;;  %s18212_s4 = scalar_lea.hbm %s20828_s1, 851968 }
  0x68   : > { %s18666_s22 = scalar_lea.hbm %s20828_s1, %s13487_s14  ;;  %p18209_p11 = pneg %p20876_p0 }
  0x69   : > { %s18207_s24 = scalar_lea.hbm %s18666_s22, 212992  ;;  %p18213_p9 = scmp.lt.u32.totalorder %s18666_s22, %s20828_s1 }
  0x6a   : > { %p18208_p2 = scmp.ne.s32.totalorder %s18666_s22, %s18207_s24  ;;  %p18214_p10 = scmp.lt.u32.totalorder %s18212_s4, %s18207_s24 }
  0x6b   : > { %p18216_p7 = scmp.lt.u32.totalorder %s18207_s24, %s18666_s22 }
  0x6c   : > { %p18210_p4 = pnand %p18209_p11, %p18208_p2  ;;  %p18215_p3 = por %p18214_p10, %p18213_p9 }
  0x6e   : > { %p18211_p6 = pneg %p18210_p4  ;;  %p18217_p1 = por %p18216_p7, %p18215_p3 }
  0x70   : > { %p18218_p8 = pnand %p18217_p1, %p18211_p6 }
  0x72   : > { %18221 = shalt.err (!%p18218_p8)
}
  0x73   : > { %s18222_s27 = scalar_lea.vmem %s18661_s8, 212992  ;;  %s18399_s12 = smov [#allocation3]  }
  0x74   : > { %p18223_p12 = scmp.ne.s32.totalorder %s18661_s8, %s18222_s27  ;;  %s18227_s14 = sshll.u32 %s18399_s12, 4  ;;  %s18228_s14 = int_to_ptr.vmem [resolvable:$false] %s18227_s14 }
  0x75   : > { %s18229_s2 = scalar_lea.vmem %s18228_s14, 425984  ;;  %p18230_p13 = scmp.lt.s32.totalorder %s18661_s8, %s18228_s14 }
  0x76   : > { %p18225_p2 = pnand %p18223_p12, %p18209_p11  ;;  %p18231_p9 = scmp.lt.s32.totalorder %s18229_s2, %s18222_s27 }
  0x78   : > { %p18226_p4 = pneg %p18225_p2  ;;  %p18232_p10 = por %p18231_p9, %p18230_p13 }
  0x7a   : > { %p18233_p3 = pnand %p18232_p10, %p18226_p4 }
  0x7c   : > { %18236 = shalt.err (!%p18233_p3)
}
  0x7d   : > { %s18400_s24 = smov 512   ;;  %s18401_s28 = smov 256  }
  0x7e   : > { %s18402_s6 = smov 16   ;;  %s18700_s19 = scalar_lea.hbm %s20830_s3, %s18567_s11 }
  0x7f   : > { %15529 = dma.hbm_to_vmem [thread:$0]  (!%p20876_p0), %s18666_s22, 212992, %s18661_s8, %s18668_s13, %s18400_s24, %s18401_s28, %s18402_s6  }
  0x80   : > { %s295_s27 = scalar_lea.vmem [#allocation7], %s18564_s16  ;;  %s15179_s14 = sshll.u32 %s18391_s30, 13 }
  0x81   : > { %s303_s12 = sshll.u32 %s295_s27, 4  ;;  %s18237_s2 = scalar_lea.hbm %s18700_s19, 64  ;;  %s304_s12 = int_to_ptr.vmem [resolvable:$true] %s303_s12 }
  0x82   : > { %p18238_p13 = scmp.ne.s32.totalorder %s18700_s19, %s18237_s2  ;;  %s18242_s8 = scalar_lea.hbm %s20830_s3, 128 }
  0x83   : > { %p18243_p0 = scmp.lt.u32.totalorder %s18700_s19, %s20830_s3  ;;  %p18244_p7 = scmp.lt.u32.totalorder %s18242_s8, %s18237_s2 }
  0x84   : > { %p18240_p11 = pnand %p18238_p13, %p18595_p5  ;;  %p18246_p8 = scmp.lt.u32.totalorder %s18237_s2, %s18700_s19 }
  0x85   : > { %p18245_p1 = por %p18244_p7, %p18243_p0 }
  0x86   : > { %p18241_p6 = pneg %p18240_p11 }
  0x87   : > { %p18247_p12 = por %p18246_p8, %p18245_p1 }
  0x89   : > { %p18248_p2 = pnand %p18247_p12, %p18241_p6 }
  0x8b   : > { %18251 = shalt.err (!%p18248_p2)
}
  0x8c   : > { %s18252_s16 = scalar_lea.vmem %s304_s12, 64  ;;  %s18403_s24 = smov [#allocation7]  }
  0x8d   : > { %p18253_p4 = scmp.ne.s32.totalorder %s304_s12, %s18252_s16  ;;  %s18257_s28 = sshll.u32 %s18403_s24, 4  ;;  %s18258_s28 = int_to_ptr.vmem [resolvable:$false] %s18257_s28 }
  0x8e   : > { %s18259_s6 = scalar_lea.vmem %s18258_s28, 128  ;;  %p18260_p3 = scmp.lt.s32.totalorder %s304_s12, %s18258_s28 }
  0x8f   : > { %p18255_p9 = pnand %p18253_p4, %p18595_p5  ;;  %p18261_p13 = scmp.lt.s32.totalorder %s18259_s6, %s18252_s16 }
  0x91   : > { %p18256_p10 = pneg %p18255_p9  ;;  %p18262_p11 = por %p18261_p13, %p18260_p3 }
  0x93   : > { %p18263_p0 = pnand %p18262_p11, %p18256_p10 }
  0x95   : > { %18266 = shalt.err (!%p18263_p0)
}
  0x96   : > { %p20877_p7 = scmp.ne.s32.totalorder %s20868_s9, 0  ;;  %s18725_s27 = scalar_lea.hbm %s20832_s5, %s15179_s14 }
  0x97   : > { %s18267_s2 = scalar_lea.hbm %s18725_s27, 8192  ;;  %s18272_s8 = scalar_lea.hbm %s20832_s5, 16384 }
  0x98   : > { %15535 = dma.hbm_to_vmem [thread:$0]  (!%p20877_p7), %s18700_s19, 64, %s304_s12, %s18589_s21  }
  0x99   : > { %p18268_p6 = scmp.ne.s32.totalorder %s18725_s27, %s18267_s2  ;;  %p18273_p12 = scmp.lt.u32.totalorder %s18725_s27, %s20832_s5 }
  0x9a   : > { %p18274_p2 = scmp.lt.u32.totalorder %s18272_s8, %s18267_s2  ;;  %p18276_p9 = scmp.lt.u32.totalorder %s18267_s2, %s18725_s27 }
  0x9b   : > { %p18270_p1 = pnand %p18268_p6, %p18595_p5 }
  0x9c   : > { %p18275_p4 = por %p18274_p2, %p18273_p12 }
  0x9d   : > { %p18271_p8 = pneg %p18270_p1 }
  0x9e   : > { %p18277_p10 = por %p18276_p9, %p18275_p4 }
  0xa0   : > { %p18278_p3 = pnand %p18277_p10, %p18271_p8 }
  0xa2   : > { %18281 = shalt.err (!%p18278_p3)
}
  0xa3   : > { %s18282_s19 = scalar_lea.vmem %s18621_s20, 8192  ;;  %s18404_s12 = smov [#allocation10]  }
  0xa4   : > { %p18283_p13 = scmp.ne.s32.totalorder %s18621_s20, %s18282_s19  ;;  %s18287_s14 = sshll.u32 %s18404_s12, 4  ;;  %s18288_s14 = int_to_ptr.vmem [resolvable:$false] %s18287_s14 }
  0xa5   : > { %s18289_s11 = scalar_lea.vmem %s18288_s14, 16384  ;;  %p18290_p6 = scmp.lt.s32.totalorder %s18621_s20, %s18288_s14 }
  0xa6   : > { %p18285_p11 = pnand %p18283_p13, %p18595_p5  ;;  %p18291_p1 = scmp.lt.s32.totalorder %s18289_s11, %s18282_s19 }
  0xa8   : > { %p18286_p0 = pneg %p18285_p11  ;;  %p18292_p12 = por %p18291_p1, %p18290_p6 }
  0xaa   : > { %p18293_p2 = pnand %p18292_p12, %p18286_p0 }
  0xac   : > { %18296 = shalt.err (!%p18293_p2)
}
  0xad   : > { %s18405_s16 = smov 128   ;;  %s18406_s24 = smov 8  }
  0xae   : > { %15541 = dma.hbm_to_vmem [thread:$0]  (!%p20877_p7), %s18725_s27, 8192, %s18621_s20, %s18638_s0, %s18405_s16, %s18405_s16, %s18406_s24  }
  0xaf   : > { %p20878_p5 = scmp.ne.s32.totalorder %s20872_s18, 0 }
  0xb0   : > { %s354_s23 = sand.u32 (!%p20878_p5), 1, %s18371_s25   ;;  %p20879_p8 = scmp.ne.s32.totalorder (!%p20878_p5), %s20860_s15, 0 }
  0xb1   : > { %352 = sbr.rel (%p20878_p5) target bundleno = 2341 (0x925), region = 44  ;;  %s355_s6 = scalar_lea.sflag (!%p20878_p5), [#allocation4], %s354_s23 }
  0xb2   : > { %s15515_s28 = smul.u32 (!%p20878_p5), 13312, %s354_s23 }
  0xb4   : > { %s18752_s4 = scalar_lea.vmem (!%p20878_p5), [#allocation3], %s15515_s28 }
  0xb8   : > { %18342 = dma.done.wait (%p20879_p8), %s355_s6, 212992  }
  0xb9   : > { %18344 = vsyncadd (%p20879_p8), %s355_s6, 4294754304  ;;  %s20880_s10 = sadd.s32 4294967295, %s18395_s7   ;;  %s20881_s2 = sld [smem:[#allocation14_spill]] }
  0xba   : > { %s20882_s9 = sld [smem:[#allocation22_spill]]  ;;  %s363_s20 = sand.u32 1, %s20880_s10  }
  0xbb   : > { %s364_s27 = scalar_lea.sflag [#allocation6], %s363_s20 }
  0xbf   : > { %s365_s0 = sand.u32 1, %s20881_s2  }
  0xc0   : > { %s18761_s18 = sshll.u32 %s365_s0, 2  ;;  %p20883_p7 = scmp.ne.s32.totalorder %s20882_s9, 0 }
  0xc1   : > { %s367_s17 = scalar_lea.vmem [#allocation5], %s18761_s18 }
  0xc2   : > { %18346 = dma.done.wait (%p20883_p7), %s364_s27, 128  }
  0xc3   : > { %18348 = vsyncadd (%p20883_p7), %s364_s27, 4294967168  ;;  %s376_s15 = scalar_lea.vmem [#allocation7], %s18761_s18  ;;  %s382_s22 = scalar_lea.sflag [#allocation9], %s363_s20 }
  0xc4   : > { %s385_s8 = scalar_lea.vmem [#allocation8], %s18761_s18 }
  0xc5   : > { %18350 = dma.done.wait (%p20883_p7), %s382_s22, 8256  }
  0xc6   : > { %18352 = vsyncadd (%p20883_p7), %s382_s22, 4294959040  ;;  %s20884_s13 = sld [smem:[#allocation16_spill]]  ;;  %s20885_s21 = sld [smem:[#allocation17_spill]] }
  0xc7   : > { %s13504_s19 = sshll.u32 %s365_s0, 9  ;;  %s20886_s23 = sld [smem:[#allocation26_spill]] }
  0xc8   : > { %s20887_s2 = sld [smem:[#allocation23_spill]]  ;;  %s18787_s20 = scalar_lea.vmem [#allocation10], %s13504_s19 }
  0xcc   : > { %s447_s12 = smul.u32 52, %s20884_s13  ;;  %p459_p4 = scmp.lt.s32.totalorder %s20885_s21, 1 }
  0xcd   : > { %p13507_p10 = scmp.ne.s32.totalorder %s20884_s13, 0 }
  0xce   : > { %p448_p9 = scmp.lt.s32.totalorder %s447_s12, 103  ;;  %s20909_s21 = smov (!%p459_p4, %s20885_s21), 1  ;;  %v18407_v0 = vmov (!%p13507_p10), 0.0  }
  0xcf   : > { %s13506_s14 = sshll.u32 %s20909_s21, 1  ;;  %466 = sbr.rel (%p13507_p10) target bundleno = 214 (0xd6), region = 68  ;;  %467 = vst [vmem:[#allocation2] sm:$0xff] (!%p13507_p10), %v18407_v0 }
  0xd0   : > { %s20911_s12 = smov (!%p448_p9, %s447_s12), 103  ;;  %s18780_s28 = scalar_lea.vmem %s20886_s23, %s13506_s14 }
  0xd1   : > { %s13505_s11 = sshll.u32 %s20911_s12, 1 }
  0xd2   : > { %s18785_s9 = scalar_lea.vmem %s20887_s2, %s13505_s11 }
  0xd6 PF: > { %v15638_v1 = vld [vmem:[%s18752_s4 + $0x4] ss:$16 sps:$4 sm:$0xff]   ;;  %v15640_v2 = vld [vmem:[%s18752_s4 + $0xc] ss:$16 sps:$4 sm:$0xff]   ;;  %v15642_v3 = vld [vmem:[%s18752_s4] ss:$16 sps:$4 sm:$0xff]   ;;  %v499_v39 = vlaneseq }
  0xd7   : > { %10804 = vmatprep.subr.bf16.mxu0 %v15638_v1  ;;  %v15643_v4 = vld [vmem:[%s18752_s4 + $0x8] ss:$16 sps:$4 sm:$0xff]   ;;  %11870 = vmatprep.subr.bf16.mxu1 %v15640_v2  ;;  %v15644_v5 = vld [vmem:[%s18752_s4 + $0x24] ss:$16 sps:$4 sm:$0xff]   ;;  %v15646_v6 = vld [vmem:[%s18752_s4 + $0x2c] ss:$16 sps:$4 sm:$0xff]  }
  0xd8   : > { %10805 = vmatpush1.bf16.msra.mxu0 %v15642_v3  ;;  %11871 = vmatpush1.bf16.msra.mxu1 %v15643_v4  ;;  %v15648_v7 = vld [vmem:[%s18752_s4 + $0x20] ss:$16 sps:$4 sm:$0xff]   ;;  %v15649_v8 = vld [vmem:[%s18752_s4 + $0x28] ss:$16 sps:$4 sm:$0xff]   ;;  %v15650_v9 = vld [vmem:[%s18752_s4 + $0x44] ss:$16 sps:$4 sm:$0xff]  }
  0xd9   : > { %10806 = vmatprep.subr.bf16.mxu0 %v15644_v5  ;;  %11872 = vmatprep.subr.bf16.mxu1 %v15646_v6  ;;  %v15652_v10 = vld [vmem:[%s18752_s4 + $0x4c] ss:$16 sps:$4 sm:$0xff]   ;;  %v15654_v11 = vld [vmem:[%s18752_s4 + $0x40] ss:$16 sps:$4 sm:$0xff]   ;;  %v15655_v12 = vld [vmem:[%s18752_s4 + $0x48] ss:$16 sps:$4 sm:$0xff]  }
  0xda   : > { %v15656_v13 = vld [vmem:[%s18752_s4 + $0x64] ss:$16 sps:$4 sm:$0xff]   ;;  %v15658_v14 = vld [vmem:[%s18752_s4 + $0x6c] ss:$16 sps:$4 sm:$0xff]   ;;  %v15660_v15 = vld [vmem:[%s18752_s4 + $0x60] ss:$16 sps:$4 sm:$0xff]  }
  0xdb   : > { %v15661_v16 = vld [vmem:[%s18752_s4 + $0x68] ss:$16 sps:$4 sm:$0xff]   ;;  %v15662_v17 = vld [vmem:[%s18752_s4 + $0x84] ss:$16 sps:$4 sm:$0xff]   ;;  %v15664_v18 = vld [vmem:[%s18752_s4 + $0x8c] ss:$16 sps:$4 sm:$0xff]  }
  0xdc   : > { %10807 = vmatpush1.bf16.msra.mxu0 %v15648_v7  ;;  %11873 = vmatpush1.bf16.msra.mxu1 %v15649_v8  ;;  %v15666_v19 = vld [vmem:[%s18752_s4 + $0x80] ss:$16 sps:$4 sm:$0xff]   ;;  %v15667_v20 = vld [vmem:[%s18752_s4 + $0x88] ss:$16 sps:$4 sm:$0xff]   ;;  %v15668_v21 = vld [vmem:[%s18752_s4 + $0xa4] ss:$16 sps:$4 sm:$0xff]  }
  0xdd   : > { %10808 = vmatprep.subr.bf16.mxu0 %v15650_v9  ;;  %11874 = vmatprep.subr.bf16.mxu1 %v15652_v10  ;;  %v15670_v22 = vld [vmem:[%s18752_s4 + $0xac] ss:$16 sps:$4 sm:$0xff]   ;;  %v15672_v23 = vld [vmem:[%s18752_s4 + $0xa0] ss:$16 sps:$4 sm:$0xff]   ;;  %v15673_v24 = vld [vmem:[%s18752_s4 + $0xa8] ss:$16 sps:$4 sm:$0xff]  }
  0xde   : > { %v15674_v25 = vld [vmem:[%s18752_s4 + $0xc4] ss:$16 sps:$4 sm:$0xff]   ;;  %v15676_v26 = vld [vmem:[%s18752_s4 + $0xcc] ss:$16 sps:$4 sm:$0xff]   ;;  %v15678_v27 = vld [vmem:[%s18752_s4 + $0xc0] ss:$16 sps:$4 sm:$0xff]  }
  0xdf   : > { %v15679_v28 = vld [vmem:[%s18752_s4 + $0xc8] ss:$16 sps:$4 sm:$0xff]   ;;  %v15680_v29 = vld [vmem:[%s18752_s4 + $0xe4] ss:$16 sps:$4 sm:$0xff]   ;;  %v15682_v30 = vld [vmem:[%s18752_s4 + $0xec] ss:$16 sps:$4 sm:$0xff]  }
  0xe0   : > { %10809 = vmatpush1.bf16.msra.mxu0 %v15654_v11  ;;  %11875 = vmatpush1.bf16.msra.mxu1 %v15655_v12  ;;  %v15684_v31 = vld [vmem:[%s18752_s4 + $0xe0] ss:$16 sps:$4 sm:$0xff]   ;;  %v15685_v32 = vld [vmem:[%s18752_s4 + $0xe8] ss:$16 sps:$4 sm:$0xff]   ;;  %v15686_v33 = vld [vmem:[%s18752_s4 + $0x104] ss:$16 sps:$4 sm:$0xff]  }
  0xe1   : > { %10810 = vmatprep.subr.bf16.mxu0 %v15656_v13  ;;  %11876 = vmatprep.subr.bf16.mxu1 %v15658_v14  ;;  %v15688_v34 = vld [vmem:[%s18752_s4 + $0x10c] ss:$16 sps:$4 sm:$0xff]   ;;  %v15690_v35 = vld [vmem:[%s18752_s4 + $0x100] ss:$16 sps:$4 sm:$0xff]   ;;  %v15691_v36 = vld [vmem:[%s18752_s4 + $0x108] ss:$16 sps:$4 sm:$0xff]  }
  0xe2   : > { %v18408_v37 = vmov 1983009808   ;;  %v15692_v40 = vld [vmem:[%s18752_s4 + $0x124] ss:$16 sps:$4 sm:$0xff]   ;;  %v15694_v41 = vld [vmem:[%s18752_s4 + $0x12c] ss:$16 sps:$4 sm:$0xff]  }
  0xe3   : > { %v497_v38 = vunpack.c.l.s4 %v18408_v37  ;;  %v15696_v42 = vld [vmem:[%s18752_s4 + $0x120] ss:$16 sps:$4 sm:$0xff]   ;;  %v18829_v44 = vshrl.u32 %v499_v39, 7  ;;  %v15697_v45 = vld [vmem:[%s18752_s4 + $0x128] ss:$16 sps:$4 sm:$0xff]  }
  0xe4   : > { %10811 = vmatpush1.bf16.msra.mxu0 %v15660_v15  ;;  %11877 = vmatpush1.bf16.msra.mxu1 %v15661_v16  ;;  %v15698_v46 = vld [vmem:[%s18752_s4 + $0x144] ss:$16 sps:$4 sm:$0xff]   ;;  %v15700_v47 = vld [vmem:[%s18752_s4 + $0x14c] ss:$16 sps:$4 sm:$0xff]   ;;  %v15702_v48 = vld [vmem:[%s18752_s4 + $0x140] ss:$16 sps:$4 sm:$0xff]  }
  0xe5   : > { %10812 = vmatprep.subr.bf16.mxu0 %v15662_v17  ;;  %11878 = vmatprep.subr.bf16.mxu1 %v15664_v18  ;;  %v498_v43 = vunpack.c.0.s8 %v497_v38  ;;  %v15703_v49 = vld [vmem:[%s18752_s4 + $0x148] ss:$16 sps:$4 sm:$0xff]   ;;  %v15704_v51 = vld [vmem:[%s18752_s4 + $0x164] ss:$16 sps:$4 sm:$0xff]   ;;  %v15706_v52 = vld [vmem:[%s18752_s4 + $0x16c] ss:$16 sps:$4 sm:$0xff]  }
  0xe6   : > { %v469_v53 = vld [vmem:[%s18785_s9] sm:$0xff]  ;;  %v15708_v54 = vld [vmem:[%s18752_s4 + $0x160] ss:$16 sps:$4 sm:$0xff]   ;;  %v15710_v57 = vld [vmem:[%s18752_s4 + $0x184] ss:$16 sps:$4 sm:$0xff]  }
  0xe7   : > { %v18837_v50 = vsub.s32 %v498_v43, %v18829_v44  ;;  %v15709_v56 = vld [vmem:[%s18752_s4 + $0x168] ss:$16 sps:$4 sm:$0xff]   ;;  %v15712_v58 = vld [vmem:[%s18752_s4 + $0x18c] ss:$16 sps:$4 sm:$0xff]   ;;  %v15714_v60 = vld [vmem:[%s18752_s4 + $0x180] ss:$16 sps:$4 sm:$0xff]   ;;  %v495_v5 = vcombine.high %v469_v53, %v469_v53 }
  0xe8   : > { %10813 = vmatpush1.bf16.msra.mxu0 %v15666_v19  ;;  %11879 = vmatpush1.bf16.msra.mxu1 %v15667_v20  ;;  %v15715_v62 = vld [vmem:[%s18752_s4 + $0x188] ss:$16 sps:$4 sm:$0xff]   ;;  %v15716_v63 = vld [vmem:[%s18752_s4 + $0x1a4] ss:$16 sps:$4 sm:$0xff]   ;;  %v15718_v0 = vld [vmem:[%s18752_s4 + $0x1ac] ss:$16 sps:$4 sm:$0xff]  }
  0xe9   : > { %10814 = vmatprep.subr.bf16.mxu0 %v15668_v21  ;;  %11880 = vmatprep.subr.bf16.mxu1 %v15670_v22  ;;  %v502_v55 = vrot.slane %v469_v53, %v18837_v50  ;;  %v15720_v1 = vld [vmem:[%s18752_s4 + $0x1a0] ss:$16 sps:$4 sm:$0xff]   ;;  %v15721_v2 = vld [vmem:[%s18752_s4 + $0x1a8] ss:$16 sps:$4 sm:$0xff]   ;;  %v15722_v3 = vld [vmem:[%s18752_s4 + $0x1c4] ss:$16 sps:$4 sm:$0xff]   ;;  %v18860_v10 = vrot.slane %v495_v5, %v18837_v50 }
  0xea   : > { %v15724_v4 = vld [vmem:[%s18752_s4 + $0x1cc] ss:$16 sps:$4 sm:$0xff]   ;;  %v15726_v6 = vld [vmem:[%s18752_s4 + $0x1c0] ss:$16 sps:$4 sm:$0xff]   ;;  %v15727_v7 = vld [vmem:[%s18752_s4 + $0x1c8] ss:$16 sps:$4 sm:$0xff]  }
  0xeb   : > { %v510_v59 = vcombine.high %v502_v55, %v502_v55  ;;  %v15728_v8 = vld [vmem:[%s18752_s4 + $0x1e4] ss:$16 sps:$4 sm:$0xff]   ;;  %v15730_v9 = vld [vmem:[%s18752_s4 + $0x1ec] ss:$16 sps:$4 sm:$0xff]   ;;  %v15732_v11 = vld [vmem:[%s18752_s4 + $0x1e0] ss:$16 sps:$4 sm:$0xff]   ;;  %v511_v15 = vcombine.high %v18860_v10, %v18860_v10  ;;  %v768_v17 = vpack.c.bf16 %v502_v55, %v502_v55 }
  0xec   : > { %10815 = vmatpush1.bf16.msra.mxu0 %v15672_v23  ;;  %11881 = vmatpush1.bf16.msra.mxu1 %v15673_v24  ;;  %v15733_v12 = vld [vmem:[%s18752_s4 + $0x1e8] ss:$16 sps:$4 sm:$0xff]   ;;  %v15737_v13 = vld [vmem:[%s18752_s4 + $0x204] ss:$16 sps:$4 sm:$0xff]   ;;  %v15740_v14 = vld [vmem:[%s18752_s4 + $0x20c] ss:$16 sps:$4 sm:$0xff]  }
  0xed   : > { %10816 = vmatprep.subr.bf16.mxu0 %v15674_v25  ;;  %11882 = vmatprep.subr.bf16.mxu1 %v15676_v26  ;;  %v769_v61 = vpack.c.bf16 %v510_v59, %v510_v59  ;;  %v15735_v16 = vld [vmem:[%s18752_s4 + $0x200] ss:$16 sps:$4 sm:$0xff]   ;;  %v15738_v18 = vld [vmem:[%s18752_s4 + $0x208] ss:$16 sps:$4 sm:$0xff]   ;;  %v15743_v19 = vld [vmem:[%s18752_s4 + $0x224] ss:$16 sps:$4 sm:$0xff]   ;;  %v771_v21 = vpack.c.bf16 %v511_v15, %v511_v15 }
  0xee   : > { %v15746_v20 = vld [vmem:[%s18752_s4 + $0x22c] ss:$16 sps:$4 sm:$0xff]   ;;  %v15741_v22 = vld [vmem:[%s18752_s4 + $0x220] ss:$16 sps:$4 sm:$0xff]   ;;  %v15744_v23 = vld [vmem:[%s18752_s4 + $0x228] ss:$16 sps:$4 sm:$0xff]  }
  0xef   : > { %10836 = vmatprep.mubr.bf16.mxu0 %v769_v61  ;;  %11902 = vmatprep.mubr.bf16.mxu1 %v769_v61  ;;  %v15749_v24 = vld [vmem:[%s18752_s4 + $0x244] ss:$16 sps:$4 sm:$0xff]   ;;  %v15752_v25 = vld [vmem:[%s18752_s4 + $0x24c] ss:$16 sps:$4 sm:$0xff]   ;;  %v15747_v26 = vld [vmem:[%s18752_s4 + $0x240] ss:$16 sps:$4 sm:$0xff]  }
  0xf0   : > { %10817 = vmatpush1.bf16.msra.mxu0 %v15678_v27  ;;  %11883 = vmatpush1.bf16.msra.mxu1 %v15679_v28  ;;  %v15750_v27 = vld [vmem:[%s18752_s4 + $0x248] ss:$16 sps:$4 sm:$0xff]   ;;  %v15755_v28 = vld [vmem:[%s18752_s4 + $0x264] ss:$16 sps:$4 sm:$0xff]   ;;  %v15770_v37 = vld [vmem:[%s18752_s4 + $0x2ac] ss:$16 sps:$4 sm:$0xff]  }
  0xf1   : > { %10818 = vmatprep.subr.bf16.mxu0 %v15680_v29  ;;  %11884 = vmatprep.subr.bf16.mxu1 %v15682_v30  ;;  %v15758_v29 = vld [vmem:[%s18752_s4 + $0x26c] ss:$16 sps:$4 sm:$0xff]   ;;  %v15753_v30 = vld [vmem:[%s18752_s4 + $0x260] ss:$16 sps:$4 sm:$0xff]   ;;  %v15768_v39 = vld [vmem:[%s18752_s4 + $0x2a8] ss:$16 sps:$4 sm:$0xff]  }
  0xf2   : > { %v15765_v38 = vld [vmem:[%s18752_s4 + $0x2a0] ss:$16 sps:$4 sm:$0xff]   ;;  %v15774_v43 = vld [vmem:[%s18752_s4 + $0x2c8] ss:$16 sps:$4 sm:$0xff]   ;;  %v15794_v55 = vld [vmem:[%s18752_s4 + $0x32c] ss:$16 sps:$4 sm:$0xff]  }
  0xf3   : > { %v15786_v53 = vld [vmem:[%s18752_s4 + $0x308] ss:$16 sps:$4 sm:$0xff]   ;;  %v15800_v59 = vld [vmem:[%s18752_s4 + $0x34c] ss:$16 sps:$4 sm:$0xff]   ;;  %v15827_v15 = vld [vmem:[%s18752_s4 + $0x3e4] ss:$16 sps:$4 sm:$0xff]  }
  0xf4   : > { %10819 = vmatpush1.bf16.msra.mxu0 %v15684_v31  ;;  %11885 = vmatpush1.bf16.msra.mxu1 %v15685_v32  ;;  %v15756_v31 = vld [vmem:[%s18752_s4 + $0x268] ss:$16 sps:$4 sm:$0xff]   ;;  %v15761_v32 = vld [vmem:[%s18752_s4 + $0x284] ss:$16 sps:$4 sm:$0xff]  }
  0xf5   : > { %10820 = vmatprep.subr.bf16.mxu0 %v15686_v33  ;;  %11886 = vmatprep.subr.bf16.mxu1 %v15688_v34  ;;  %v15764_v33 = vld [vmem:[%s18752_s4 + $0x28c] ss:$16 sps:$4 sm:$0xff]   ;;  %v15759_v34 = vld [vmem:[%s18752_s4 + $0x280] ss:$16 sps:$4 sm:$0xff]   ;;  %v15798_v61 = vld [vmem:[%s18752_s4 + $0x348] ss:$16 sps:$4 sm:$0xff]  }
  0xf6   : > { %v15810_v5 = vld [vmem:[%s18752_s4 + $0x388] ss:$16 sps:$4 sm:$0xff]  }
  0xf8   : > { %10821 = vmatpush1.bf16.msra.mxu0 %v15690_v35  ;;  %11887 = vmatpush1.bf16.msra.mxu1 %v15691_v36  ;;  %v15762_v35 = vld [vmem:[%s18752_s4 + $0x288] ss:$16 sps:$4 sm:$0xff]   ;;  %v15767_v36 = vld [vmem:[%s18752_s4 + $0x2a4] ss:$16 sps:$4 sm:$0xff]  }
  0xf9   : > { %10822 = vmatprep.subr.bf16.mxu0 %v15692_v40  ;;  %11888 = vmatprep.subr.bf16.mxu1 %v15694_v41  ;;  %v15773_v40 = vld [vmem:[%s18752_s4 + $0x2c4] ss:$16 sps:$4 sm:$0xff]   ;;  %v15776_v41 = vld [vmem:[%s18752_s4 + $0x2cc] ss:$16 sps:$4 sm:$0xff]  }
  0xfc   : > { %10823 = vmatpush1.bf16.msra.mxu0 %v15696_v42  ;;  %11889 = vmatpush1.bf16.msra.mxu1 %v15697_v45  ;;  %v15771_v42 = vld [vmem:[%s18752_s4 + $0x2c0] ss:$16 sps:$4 sm:$0xff]   ;;  %v15779_v45 = vld [vmem:[%s18752_s4 + $0x2e4] ss:$16 sps:$4 sm:$0xff]  }
  0xfd   : > { %10824 = vmatprep.subr.bf16.mxu0 %v15698_v46  ;;  %11890 = vmatprep.subr.bf16.mxu1 %v15700_v47  ;;  %v15782_v46 = vld [vmem:[%s18752_s4 + $0x2ec] ss:$16 sps:$4 sm:$0xff]   ;;  %v15777_v47 = vld [vmem:[%s18752_s4 + $0x2e0] ss:$16 sps:$4 sm:$0xff]  }
 0x100   : > { %10825 = vmatpush1.bf16.msra.mxu0 %v15702_v48  ;;  %11891 = vmatpush1.bf16.msra.mxu1 %v15703_v49  ;;  %v15780_v48 = vld [vmem:[%s18752_s4 + $0x2e8] ss:$16 sps:$4 sm:$0xff]   ;;  %v15785_v49 = vld [vmem:[%s18752_s4 + $0x304] ss:$16 sps:$4 sm:$0xff]  }
 0x101   : > { %10826 = vmatprep.subr.bf16.mxu0 %v15704_v51  ;;  %11892 = vmatprep.subr.bf16.mxu1 %v15706_v52  ;;  %v15788_v51 = vld [vmem:[%s18752_s4 + $0x30c] ss:$16 sps:$4 sm:$0xff]   ;;  %v15783_v52 = vld [vmem:[%s18752_s4 + $0x300] ss:$16 sps:$4 sm:$0xff]  }
 0x104   : > { %10827 = vmatpush1.bf16.msra.mxu0 %v15708_v54  ;;  %11893 = vmatpush1.bf16.msra.mxu1 %v15709_v56  ;;  %v15791_v54 = vld [vmem:[%s18752_s4 + $0x324] ss:$16 sps:$4 sm:$0xff]   ;;  %v15789_v56 = vld [vmem:[%s18752_s4 + $0x320] ss:$16 sps:$4 sm:$0xff]  }
 0x105   : > { %10828 = vmatprep.subr.bf16.mxu0 %v15710_v57  ;;  %11894 = vmatprep.subr.bf16.mxu1 %v15712_v58  ;;  %v15792_v57 = vld [vmem:[%s18752_s4 + $0x328] ss:$16 sps:$4 sm:$0xff]   ;;  %v15797_v58 = vld [vmem:[%s18752_s4 + $0x344] ss:$16 sps:$4 sm:$0xff]  }
 0x108   : > { %10829 = vmatpush1.bf16.msra.mxu0 %v15714_v60  ;;  %11895 = vmatpush1.bf16.msra.mxu1 %v15715_v62  ;;  %v15795_v60 = vld [vmem:[%s18752_s4 + $0x340] ss:$16 sps:$4 sm:$0xff]   ;;  %v15803_v62 = vld [vmem:[%s18752_s4 + $0x364] ss:$16 sps:$4 sm:$0xff]  }
 0x109   : > { %10830 = vmatprep.subr.bf16.mxu0 %v15716_v63  ;;  %11896 = vmatprep.subr.bf16.mxu1 %v15718_v0  ;;  %v15806_v63 = vld [vmem:[%s18752_s4 + $0x36c] ss:$16 sps:$4 sm:$0xff]   ;;  %v15801_v0 = vld [vmem:[%s18752_s4 + $0x360] ss:$16 sps:$4 sm:$0xff]  }
 0x10c   : > { %10831 = vmatpush1.bf16.msra.mxu0 %v15720_v1  ;;  %11897 = vmatpush1.bf16.msra.mxu1 %v15721_v2  ;;  %v15804_v1 = vld [vmem:[%s18752_s4 + $0x368] ss:$16 sps:$4 sm:$0xff]   ;;  %v15809_v2 = vld [vmem:[%s18752_s4 + $0x384] ss:$16 sps:$4 sm:$0xff]  }
 0x10d   : > { %10832 = vmatprep.subr.bf16.mxu0 %v15722_v3  ;;  %11898 = vmatprep.subr.bf16.mxu1 %v15724_v4  ;;  %v15812_v3 = vld [vmem:[%s18752_s4 + $0x38c] ss:$16 sps:$4 sm:$0xff]   ;;  %v15807_v4 = vld [vmem:[%s18752_s4 + $0x380] ss:$16 sps:$4 sm:$0xff]  }
 0x110   : > { %10833 = vmatpush1.bf16.msra.mxu0 %v15726_v6  ;;  %11899 = vmatpush1.bf16.msra.mxu1 %v15727_v7  ;;  %v15815_v6 = vld [vmem:[%s18752_s4 + $0x3a4] ss:$16 sps:$4 sm:$0xff]   ;;  %v15818_v7 = vld [vmem:[%s18752_s4 + $0x3ac] ss:$16 sps:$4 sm:$0xff]  }
 0x111   : > { %10834 = vmatprep.subr.bf16.mxu0 %v15728_v8  ;;  %11900 = vmatprep.subr.bf16.mxu1 %v15730_v9  ;;  %v15813_v8 = vld [vmem:[%s18752_s4 + $0x3a0] ss:$16 sps:$4 sm:$0xff]   ;;  %v15816_v9 = vld [vmem:[%s18752_s4 + $0x3a8] ss:$16 sps:$4 sm:$0xff]  }
 0x114   : > { %10835 = vmatpush1.bf16.msra.mxu0 %v15732_v11  ;;  %11901 = vmatpush1.bf16.msra.mxu1 %v15733_v12  ;;  %v15821_v11 = vld [vmem:[%s18752_s4 + $0x3c4] ss:$16 sps:$4 sm:$0xff]   ;;  %v15824_v12 = vld [vmem:[%s18752_s4 + $0x3cc] ss:$16 sps:$4 sm:$0xff]  }
 0x115   : > { %10845 = vmatprep.subr.bf16.mxu0 %v15737_v13  ;;  %11911 = vmatprep.subr.bf16.mxu1 %v15740_v14  ;;  %v15819_v13 = vld [vmem:[%s18752_s4 + $0x3c0] ss:$16 sps:$4 sm:$0xff]   ;;  %v15822_v14 = vld [vmem:[%s18752_s4 + $0x3c8] ss:$16 sps:$4 sm:$0xff]  }
 0x117   : > { %10837 = vmatmul.mubr.bf16.vlgmr.msra.gmra.mrb[0].mxu0 %v768_v17  ;;  %11903 = vmatmul.mubr.bf16.vlgmr.msra.gmra.mrb[0].mxu1 %v768_v17  ;;  %v15825_v17 = vld [vmem:[%s18752_s4 + $0x3e0] ss:$16 sps:$4 sm:$0xff]  }
 0x118   : > { %10846 = vmatpush1.bf16.msra.mxu0 %v15735_v16  ;;  %11912 = vmatpush1.bf16.msra.mxu1 %v15738_v18  ;;  %v15830_v16 = vld [vmem:[%s18752_s4 + $0x3ec] ss:$16 sps:$4 sm:$0xff]   ;;  %v15828_v18 = vld [vmem:[%s18752_s4 + $0x3e8] ss:$16 sps:$4 sm:$0xff]  }
 0x119   : > { %10847 = vmatprep.subr.bf16.mxu0 %v15743_v19  ;;  %11913 = vmatprep.subr.bf16.mxu1 %v15746_v20  ;;  %v15833_v19 = vld [vmem:[%s18752_s4 + $0x404] ss:$16 sps:$4 sm:$0xff]   ;;  %v15836_v20 = vld [vmem:[%s18752_s4 + $0x40c] ss:$16 sps:$4 sm:$0xff]  }
 0x11a   : > { %10877 = vmatprep.mubr.bf16.mxu0 %v771_v21  ;;  %11943 = vmatprep.mubr.bf16.mxu1 %v771_v21  ;;  %v15831_v21 = vld [vmem:[%s18752_s4 + $0x400] ss:$16 sps:$4 sm:$0xff]  }
 0x11c   : > { %10848 = vmatpush1.bf16.msra.mxu0 %v15741_v22  ;;  %11914 = vmatpush1.bf16.msra.mxu1 %v15744_v23  ;;  %v770_v22 = vpack.c.bf16 %v18860_v10, %v18860_v10  ;;  %v15834_v23 = vld [vmem:[%s18752_s4 + $0x408] ss:$16 sps:$4 sm:$0xff]  }
 0x11d   : > { %10849 = vmatprep.subr.bf16.mxu0 %v15749_v24  ;;  %11915 = vmatprep.subr.bf16.mxu1 %v15752_v25  ;;  %v18937_v24 = vld [vmem:[%s18785_s9 + $0x8] sm:$0xff] }
 0x11e   : > { %v15839_v25 = vld [vmem:[%s18752_s4 + $0x424] ss:$16 sps:$4 sm:$0xff]  }
 0x120   : > { %10850 = vmatpush1.bf16.msra.mxu0 %v15747_v26  ;;  %11916 = vmatpush1.bf16.msra.mxu1 %v15750_v27  ;;  %v15842_v26 = vld [vmem:[%s18752_s4 + $0x42c] ss:$16 sps:$4 sm:$0xff]   ;;  %v18943_v27 = vrot.slane %v18937_v24, %v18837_v50 }
 0x121   : > { %10851 = vmatprep.subr.bf16.mxu0 %v15755_v28  ;;  %11917 = vmatprep.subr.bf16.mxu1 %v15758_v29  ;;  %v15837_v28 = vld [vmem:[%s18752_s4 + $0x420] ss:$16 sps:$4 sm:$0xff]   ;;  %v15840_v29 = vld [vmem:[%s18752_s4 + $0x428] ss:$16 sps:$4 sm:$0xff]  }
 0x122   : > { %v527_v10 = vcombine.high %v18943_v27, %v18943_v27 }
 0x124   : > { %10852 = vmatpush1.bf16.msra.mxu0 %v15753_v30  ;;  %11918 = vmatpush1.bf16.msra.mxu1 %v15756_v31  ;;  %v15845_v30 = vld [vmem:[%s18752_s4 + $0x444] ss:$16 sps:$4 sm:$0xff]   ;;  %v15848_v31 = vld [vmem:[%s18752_s4 + $0x44c] ss:$16 sps:$4 sm:$0xff]  }
 0x125   : > { %10853 = vmatprep.subr.bf16.mxu0 %v15761_v32  ;;  %11919 = vmatprep.subr.bf16.mxu1 %v15764_v33  ;;  %v773_v32 = vpack.c.bf16 %v527_v10, %v527_v10  ;;  %v15843_v33 = vld [vmem:[%s18752_s4 + $0x440] ss:$16 sps:$4 sm:$0xff]   ;;  %v15924_v10 = vld [vmem:[%s18752_s4 + $0x5e8] ss:$16 sps:$4 sm:$0xff]  }
 0x128   : > { %10854 = vmatpush1.bf16.msra.mxu0 %v15759_v34  ;;  %11920 = vmatpush1.bf16.msra.mxu1 %v15762_v35  ;;  %v15846_v34 = vld [vmem:[%s18752_s4 + $0x448] ss:$16 sps:$4 sm:$0xff]   ;;  %v15851_v35 = vld [vmem:[%s18752_s4 + $0x464] ss:$16 sps:$4 sm:$0xff]  }
 0x129   : > { %10855 = vmatprep.subr.bf16.mxu0 %v15767_v36  ;;  %11921 = vmatprep.subr.bf16.mxu1 %v15770_v37  ;;  %v15854_v36 = vld [vmem:[%s18752_s4 + $0x46c] ss:$16 sps:$4 sm:$0xff]   ;;  %v15849_v37 = vld [vmem:[%s18752_s4 + $0x460] ss:$16 sps:$4 sm:$0xff]  }
 0x12c   : > { %10856 = vmatpush1.bf16.msra.mxu0 %v15765_v38  ;;  %11922 = vmatpush1.bf16.msra.mxu1 %v15768_v39  ;;  %v15852_v38 = vld [vmem:[%s18752_s4 + $0x468] ss:$16 sps:$4 sm:$0xff]   ;;  %v15857_v39 = vld [vmem:[%s18752_s4 + $0x484] ss:$16 sps:$4 sm:$0xff]  }
 0x12d   : > { %10857 = vmatprep.subr.bf16.mxu0 %v15773_v40  ;;  %11923 = vmatprep.subr.bf16.mxu1 %v15776_v41  ;;  %v15860_v40 = vld [vmem:[%s18752_s4 + $0x48c] ss:$16 sps:$4 sm:$0xff]   ;;  %v15855_v41 = vld [vmem:[%s18752_s4 + $0x480] ss:$16 sps:$4 sm:$0xff]  }
 0x130   : > { %10858 = vmatpush1.bf16.msra.mxu0 %v15771_v42  ;;  %11924 = vmatpush1.bf16.msra.mxu1 %v15774_v43  ;;  %v15858_v42 = vld [vmem:[%s18752_s4 + $0x488] ss:$16 sps:$4 sm:$0xff]   ;;  %v15863_v43 = vld [vmem:[%s18752_s4 + $0x4a4] ss:$16 sps:$4 sm:$0xff]  }
 0x131   : > { %10859 = vmatprep.subr.bf16.mxu0 %v15779_v45  ;;  %11925 = vmatprep.subr.bf16.mxu1 %v15782_v46  ;;  %v15866_v45 = vld [vmem:[%s18752_s4 + $0x4ac] ss:$16 sps:$4 sm:$0xff]   ;;  %v15861_v46 = vld [vmem:[%s18752_s4 + $0x4a0] ss:$16 sps:$4 sm:$0xff]  }
 0x134   : > { %10860 = vmatpush1.bf16.msra.mxu0 %v15777_v47  ;;  %11926 = vmatpush1.bf16.msra.mxu1 %v15780_v48  ;;  %v15864_v47 = vld [vmem:[%s18752_s4 + $0x4a8] ss:$16 sps:$4 sm:$0xff]   ;;  %v15869_v48 = vld [vmem:[%s18752_s4 + $0x4c4] ss:$16 sps:$4 sm:$0xff]  }
 0x135   : > { %10861 = vmatprep.subr.bf16.mxu0 %v15785_v49  ;;  %11927 = vmatprep.subr.bf16.mxu1 %v15788_v51  ;;  %v15872_v49 = vld [vmem:[%s18752_s4 + $0x4cc] ss:$16 sps:$4 sm:$0xff]   ;;  %v15867_v51 = vld [vmem:[%s18752_s4 + $0x4c0] ss:$16 sps:$4 sm:$0xff]  }
 0x138   : > { %10862 = vmatpush1.bf16.msra.mxu0 %v15783_v52  ;;  %11928 = vmatpush1.bf16.msra.mxu1 %v15786_v53  ;;  %v15870_v52 = vld [vmem:[%s18752_s4 + $0x4c8] ss:$16 sps:$4 sm:$0xff]   ;;  %v15875_v53 = vld [vmem:[%s18752_s4 + $0x4e4] ss:$16 sps:$4 sm:$0xff]  }
 0x139   : > { %10863 = vmatprep.subr.bf16.mxu0 %v15791_v54  ;;  %11929 = vmatprep.subr.bf16.mxu1 %v15794_v55  ;;  %v15878_v54 = vld [vmem:[%s18752_s4 + $0x4ec] ss:$16 sps:$4 sm:$0xff]   ;;  %v15873_v55 = vld [vmem:[%s18752_s4 + $0x4e0] ss:$16 sps:$4 sm:$0xff]  }
 0x13c   : > { %10864 = vmatpush1.bf16.msra.mxu0 %v15789_v56  ;;  %11930 = vmatpush1.bf16.msra.mxu1 %v15792_v57  ;;  %v15876_v56 = vld [vmem:[%s18752_s4 + $0x4e8] ss:$16 sps:$4 sm:$0xff]   ;;  %v15881_v57 = vld [vmem:[%s18752_s4 + $0x504] ss:$16 sps:$4 sm:$0xff]  }
 0x13d   : > { %10865 = vmatprep.subr.bf16.mxu0 %v15797_v58  ;;  %11931 = vmatprep.subr.bf16.mxu1 %v15800_v59  ;;  %v15884_v58 = vld [vmem:[%s18752_s4 + $0x50c] ss:$16 sps:$4 sm:$0xff]   ;;  %v15879_v59 = vld [vmem:[%s18752_s4 + $0x500] ss:$16 sps:$4 sm:$0xff]  }
 0x140   : > { %10866 = vmatpush1.bf16.msra.mxu0 %v15795_v60  ;;  %11932 = vmatpush1.bf16.msra.mxu1 %v15798_v61  ;;  %v15882_v60 = vld [vmem:[%s18752_s4 + $0x508] ss:$16 sps:$4 sm:$0xff]   ;;  %v15887_v61 = vld [vmem:[%s18752_s4 + $0x524] ss:$16 sps:$4 sm:$0xff]  }
 0x141   : > { %10867 = vmatprep.subr.bf16.mxu0 %v15803_v62  ;;  %11933 = vmatprep.subr.bf16.mxu1 %v15806_v63  ;;  %v15890_v62 = vld [vmem:[%s18752_s4 + $0x52c] ss:$16 sps:$4 sm:$0xff]   ;;  %v15885_v63 = vld [vmem:[%s18752_s4 + $0x520] ss:$16 sps:$4 sm:$0xff]  }
 0x144   : > { %10868 = vmatpush1.bf16.msra.mxu0 %v15801_v0  ;;  %11934 = vmatpush1.bf16.msra.mxu1 %v15804_v1  ;;  %v15888_v0 = vld [vmem:[%s18752_s4 + $0x528] ss:$16 sps:$4 sm:$0xff]   ;;  %v15893_v1 = vld [vmem:[%s18752_s4 + $0x544] ss:$16 sps:$4 sm:$0xff]  }
 0x145   : > { %10869 = vmatprep.subr.bf16.mxu0 %v15809_v2  ;;  %11935 = vmatprep.subr.bf16.mxu1 %v15812_v3  ;;  %v15896_v2 = vld [vmem:[%s18752_s4 + $0x54c] ss:$16 sps:$4 sm:$0xff]   ;;  %v15891_v3 = vld [vmem:[%s18752_s4 + $0x540] ss:$16 sps:$4 sm:$0xff]  }
 0x148   : > { %10870 = vmatpush1.bf16.msra.mxu0 %v15807_v4  ;;  %11936 = vmatpush1.bf16.msra.mxu1 %v15810_v5  ;;  %v15894_v4 = vld [vmem:[%s18752_s4 + $0x548] ss:$16 sps:$4 sm:$0xff]   ;;  %v15899_v5 = vld [vmem:[%s18752_s4 + $0x564] ss:$16 sps:$4 sm:$0xff]  }
 0x149   : > { %10871 = vmatprep.subr.bf16.mxu0 %v15815_v6  ;;  %11937 = vmatprep.subr.bf16.mxu1 %v15818_v7  ;;  %v15902_v6 = vld [vmem:[%s18752_s4 + $0x56c] ss:$16 sps:$4 sm:$0xff]   ;;  %v15897_v7 = vld [vmem:[%s18752_s4 + $0x560] ss:$16 sps:$4 sm:$0xff]  }
 0x14c   : > { %10872 = vmatpush1.bf16.msra.mxu0 %v15813_v8  ;;  %11938 = vmatpush1.bf16.msra.mxu1 %v15816_v9  ;;  %v15900_v8 = vld [vmem:[%s18752_s4 + $0x568] ss:$16 sps:$4 sm:$0xff]   ;;  %v15905_v9 = vld [vmem:[%s18752_s4 + $0x584] ss:$16 sps:$4 sm:$0xff]  }
 0x14d   : > { %10873 = vmatprep.subr.bf16.mxu0 %v15821_v11  ;;  %11939 = vmatprep.subr.bf16.mxu1 %v15824_v12  ;;  %v15908_v11 = vld [vmem:[%s18752_s4 + $0x58c] ss:$16 sps:$4 sm:$0xff]   ;;  %v15903_v12 = vld [vmem:[%s18752_s4 + $0x580] ss:$16 sps:$4 sm:$0xff]  }
 0x150   : > { %10874 = vmatpush1.bf16.msra.mxu0 %v15819_v13  ;;  %11940 = vmatpush1.bf16.msra.mxu1 %v15822_v14  ;;  %v15906_v13 = vld [vmem:[%s18752_s4 + $0x588] ss:$16 sps:$4 sm:$0xff]   ;;  %v15911_v14 = vld [vmem:[%s18752_s4 + $0x5a4] ss:$16 sps:$4 sm:$0xff]  }
 0x151   : > { %10875 = vmatprep.subr.bf16.mxu0 %v15827_v15  ;;  %11941 = vmatprep.subr.bf16.mxu1 %v15830_v16  ;;  %v15914_v15 = vld [vmem:[%s18752_s4 + $0x5ac] ss:$16 sps:$4 sm:$0xff]   ;;  %v15909_v16 = vld [vmem:[%s18752_s4 + $0x5a0] ss:$16 sps:$4 sm:$0xff]  }
 0x154   : > { %10876 = vmatpush1.bf16.msra.mxu0 %v15825_v17  ;;  %11942 = vmatpush1.bf16.msra.mxu1 %v15828_v18  ;;  %v15912_v17 = vld [vmem:[%s18752_s4 + $0x5a8] ss:$16 sps:$4 sm:$0xff]   ;;  %v15917_v18 = vld [vmem:[%s18752_s4 + $0x5c4] ss:$16 sps:$4 sm:$0xff]  }
 0x155   : > { %10886 = vmatprep.subr.bf16.mxu0 %v15833_v19  ;;  %11952 = vmatprep.subr.bf16.mxu1 %v15836_v20  ;;  %v15920_v19 = vld [vmem:[%s18752_s4 + $0x5cc] ss:$16 sps:$4 sm:$0xff]   ;;  %v512_v20 = vcombine.high %v18937_v24, %v18937_v24  ;;  %v15921_v24 = vld [vmem:[%s18752_s4 + $0x5e0] ss:$16 sps:$4 sm:$0xff]  }
 0x157   : > { %10878 = vmatmul.mubr.bf16.vlgmr.msra.gmra.mrb[0].mxu0 %v770_v22  ;;  %11944 = vmatmul.mubr.bf16.vlgmr.msra.gmra.mrb[0].mxu1 %v770_v22  ;;  %v15918_v22 = vld [vmem:[%s18752_s4 + $0x5c8] ss:$16 sps:$4 sm:$0xff]  }
 0x158   : > { %10887 = vmatpush1.bf16.msra.mxu0 %v15831_v21  ;;  %11953 = vmatpush1.bf16.msra.mxu1 %v15834_v23  ;;  %v15915_v21 = vld [vmem:[%s18752_s4 + $0x5c0] ss:$16 sps:$4 sm:$0xff]   ;;  %v15923_v23 = vld [vmem:[%s18752_s4 + $0x5e4] ss:$16 sps:$4 sm:$0xff]  }
 0x159   : > { %10888 = vmatprep.subr.bf16.mxu0 %v15839_v25  ;;  %11954 = vmatprep.subr.bf16.mxu1 %v15842_v26  ;;  %v15926_v25 = vld [vmem:[%s18752_s4 + $0x5ec] ss:$16 sps:$4 sm:$0xff]   ;;  %v19006_v26 = vrot.slane %v512_v20, %v18837_v50  ;;  %v16002_v20 = vld [vmem:[%s18752_s4 + $0x788] ss:$16 sps:$4 sm:$0xff]  }
 0x15a   : > { %10918 = vmatprep.mubr.bf16.mxu0 %v773_v32  ;;  %11984 = vmatprep.mubr.bf16.mxu1 %v773_v32  ;;  %v15927_v32 = vld [vmem:[%s18752_s4 + $0x600] ss:$16 sps:$4 sm:$0xff]  }
 0x15c   : > { %10889 = vmatpush1.bf16.msra.mxu0 %v15837_v28  ;;  %11955 = vmatpush1.bf16.msra.mxu1 %v15840_v29  ;;  %v15929_v28 = vld [vmem:[%s18752_s4 + $0x604] ss:$16 sps:$4 sm:$0xff]   ;;  %v15932_v29 = vld [vmem:[%s18752_s4 + $0x60c] ss:$16 sps:$4 sm:$0xff]  }
 0x15d   : > { %10890 = vmatprep.subr.bf16.mxu0 %v15845_v30  ;;  %11956 = vmatprep.subr.bf16.mxu1 %v15848_v31  ;;  %v528_v30 = vcombine.high %v19006_v26, %v19006_v26  ;;  %v772_v31 = vpack.c.bf16 %v18943_v27, %v18943_v27  ;;  %v15933_v27 = vld [vmem:[%s18752_s4 + $0x620] ss:$16 sps:$4 sm:$0xff]  }
 0x160   : > { %10891 = vmatpush1.bf16.msra.mxu0 %v15843_v33  ;;  %11957 = vmatpush1.bf16.msra.mxu1 %v15846_v34  ;;  %v15930_v33 = vld [vmem:[%s18752_s4 + $0x608] ss:$16 sps:$4 sm:$0xff]   ;;  %v15935_v34 = vld [vmem:[%s18752_s4 + $0x624] ss:$16 sps:$4 sm:$0xff]  }
 0x161   : > { %10892 = vmatprep.subr.bf16.mxu0 %v15851_v35  ;;  %11958 = vmatprep.subr.bf16.mxu1 %v15854_v36  ;;  %v15938_v35 = vld [vmem:[%s18752_s4 + $0x62c] ss:$16 sps:$4 sm:$0xff]   ;;  %v775_v36 = vpack.c.bf16 %v528_v30, %v528_v30  ;;  %v16014_v30 = vld [vmem:[%s18752_s4 + $0x7c8] ss:$16 sps:$4 sm:$0xff]  }
 0x164   : > { %10893 = vmatpush1.bf16.msra.mxu0 %v15849_v37  ;;  %11959 = vmatpush1.bf16.msra.mxu1 %v15852_v38  ;;  %v15936_v37 = vld [vmem:[%s18752_s4 + $0x628] ss:$16 sps:$4 sm:$0xff]   ;;  %v15941_v38 = vld [vmem:[%s18752_s4 + $0x644] ss:$16 sps:$4 sm:$0xff]  }
 0x165   : > { %10894 = vmatprep.subr.bf16.mxu0 %v15857_v39  ;;  %11960 = vmatprep.subr.bf16.mxu1 %v15860_v40  ;;  %v15944_v39 = vld [vmem:[%s18752_s4 + $0x64c] ss:$16 sps:$4 sm:$0xff]   ;;  %v15939_v40 = vld [vmem:[%s18752_s4 + $0x640] ss:$16 sps:$4 sm:$0xff]  }
 0x168   : > { %10895 = vmatpush1.bf16.msra.mxu0 %v15855_v41  ;;  %11961 = vmatpush1.bf16.msra.mxu1 %v15858_v42  ;;  %v15942_v41 = vld [vmem:[%s18752_s4 + $0x648] ss:$16 sps:$4 sm:$0xff]   ;;  %v15947_v42 = vld [vmem:[%s18752_s4 + $0x664] ss:$16 sps:$4 sm:$0xff]  }
 0x169   : > { %10896 = vmatprep.subr.bf16.mxu0 %v15863_v43  ;;  %11962 = vmatprep.subr.bf16.mxu1 %v15866_v45  ;;  %v15950_v43 = vld [vmem:[%s18752_s4 + $0x66c] ss:$16 sps:$4 sm:$0xff]   ;;  %v15945_v45 = vld [vmem:[%s18752_s4 + $0x660] ss:$16 sps:$4 sm:$0xff]  }
 0x16c   : > { %10897 = vmatpush1.bf16.msra.mxu0 %v15861_v46  ;;  %11963 = vmatpush1.bf16.msra.mxu1 %v15864_v47  ;;  %v15948_v46 = vld [vmem:[%s18752_s4 + $0x668] ss:$16 sps:$4 sm:$0xff]   ;;  %v15953_v47 = vld [vmem:[%s18752_s4 + $0x684] ss:$16 sps:$4 sm:$0xff]  }
 0x16d   : > { %10898 = vmatprep.subr.bf16.mxu0 %v15869_v48  ;;  %11964 = vmatprep.subr.bf16.mxu1 %v15872_v49  ;;  %v15956_v48 = vld [vmem:[%s18752_s4 + $0x68c] ss:$16 sps:$4 sm:$0xff]   ;;  %v15951_v49 = vld [vmem:[%s18752_s4 + $0x680] ss:$16 sps:$4 sm:$0xff]  }
 0x170   : > { %10899 = vmatpush1.bf16.msra.mxu0 %v15867_v51  ;;  %11965 = vmatpush1.bf16.msra.mxu1 %v15870_v52  ;;  %v15954_v51 = vld [vmem:[%s18752_s4 + $0x688] ss:$16 sps:$4 sm:$0xff]   ;;  %v15959_v52 = vld [vmem:[%s18752_s4 + $0x6a4] ss:$16 sps:$4 sm:$0xff]  }
 0x171   : > { %10900 = vmatprep.subr.bf16.mxu0 %v15875_v53  ;;  %11966 = vmatprep.subr.bf16.mxu1 %v15878_v54  ;;  %v15962_v53 = vld [vmem:[%s18752_s4 + $0x6ac] ss:$16 sps:$4 sm:$0xff]   ;;  %v15957_v54 = vld [vmem:[%s18752_s4 + $0x6a0] ss:$16 sps:$4 sm:$0xff]  }
 0x174   : > { %10901 = vmatpush1.bf16.msra.mxu0 %v15873_v55  ;;  %11967 = vmatpush1.bf16.msra.mxu1 %v15876_v56  ;;  %v15960_v55 = vld [vmem:[%s18752_s4 + $0x6a8] ss:$16 sps:$4 sm:$0xff]   ;;  %v15965_v56 = vld [vmem:[%s18752_s4 + $0x6c4] ss:$16 sps:$4 sm:$0xff]  }
 0x175   : > { %10902 = vmatprep.subr.bf16.mxu0 %v15881_v57  ;;  %11968 = vmatprep.subr.bf16.mxu1 %v15884_v58  ;;  %v15968_v57 = vld [vmem:[%s18752_s4 + $0x6cc] ss:$16 sps:$4 sm:$0xff]   ;;  %v15963_v58 = vld [vmem:[%s18752_s4 + $0x6c0] ss:$16 sps:$4 sm:$0xff]  }
 0x178   : > { %10903 = vmatpush1.bf16.msra.mxu0 %v15879_v59  ;;  %11969 = vmatpush1.bf16.msra.mxu1 %v15882_v60  ;;  %v15966_v59 = vld [vmem:[%s18752_s4 + $0x6c8] ss:$16 sps:$4 sm:$0xff]   ;;  %v15971_v60 = vld [vmem:[%s18752_s4 + $0x6e4] ss:$16 sps:$4 sm:$0xff]  }
 0x179   : > { %10904 = vmatprep.subr.bf16.mxu0 %v15887_v61  ;;  %11970 = vmatprep.subr.bf16.mxu1 %v15890_v62  ;;  %v15974_v61 = vld [vmem:[%s18752_s4 + $0x6ec] ss:$16 sps:$4 sm:$0xff]   ;;  %v15969_v62 = vld [vmem:[%s18752_s4 + $0x6e0] ss:$16 sps:$4 sm:$0xff]  }
 0x17c   : > { %10905 = vmatpush1.bf16.msra.mxu0 %v15885_v63  ;;  %11971 = vmatpush1.bf16.msra.mxu1 %v15888_v0  ;;  %v15972_v63 = vld [vmem:[%s18752_s4 + $0x6e8] ss:$16 sps:$4 sm:$0xff]   ;;  %v15977_v0 = vld [vmem:[%s18752_s4 + $0x704] ss:$16 sps:$4 sm:$0xff]  }
 0x17d   : > { %10906 = vmatprep.subr.bf16.mxu0 %v15893_v1  ;;  %11972 = vmatprep.subr.bf16.mxu1 %v15896_v2  ;;  %v15980_v1 = vld [vmem:[%s18752_s4 + $0x70c] ss:$16 sps:$4 sm:$0xff]   ;;  %v15975_v2 = vld [vmem:[%s18752_s4 + $0x700] ss:$16 sps:$4 sm:$0xff]  }
 0x180   : > { %10907 = vmatpush1.bf16.msra.mxu0 %v15891_v3  ;;  %11973 = vmatpush1.bf16.msra.mxu1 %v15894_v4  ;;  %v15978_v3 = vld [vmem:[%s18752_s4 + $0x708] ss:$16 sps:$4 sm:$0xff]   ;;  %v15983_v4 = vld [vmem:[%s18752_s4 + $0x724] ss:$16 sps:$4 sm:$0xff]  }
 0x181   : > { %10908 = vmatprep.subr.bf16.mxu0 %v15899_v5  ;;  %11974 = vmatprep.subr.bf16.mxu1 %v15902_v6  ;;  %v15986_v5 = vld [vmem:[%s18752_s4 + $0x72c] ss:$16 sps:$4 sm:$0xff]   ;;  %v15981_v6 = vld [vmem:[%s18752_s4 + $0x720] ss:$16 sps:$4 sm:$0xff]  }
 0x184   : > { %10909 = vmatpush1.bf16.msra.mxu0 %v15897_v7  ;;  %11975 = vmatpush1.bf16.msra.mxu1 %v15900_v8  ;;  %v15984_v7 = vld [vmem:[%s18752_s4 + $0x728] ss:$16 sps:$4 sm:$0xff]   ;;  %v15989_v8 = vld [vmem:[%s18752_s4 + $0x744] ss:$16 sps:$4 sm:$0xff]  }
 0x185   : > { %10910 = vmatprep.subr.bf16.mxu0 %v15905_v9  ;;  %11976 = vmatprep.subr.bf16.mxu1 %v15908_v11  ;;  %v15992_v9 = vld [vmem:[%s18752_s4 + $0x74c] ss:$16 sps:$4 sm:$0xff]   ;;  %v15987_v11 = vld [vmem:[%s18752_s4 + $0x740] ss:$16 sps:$4 sm:$0xff]  }
 0x188   : > { %10911 = vmatpush1.bf16.msra.mxu0 %v15903_v12  ;;  %11977 = vmatpush1.bf16.msra.mxu1 %v15906_v13  ;;  %v15990_v12 = vld [vmem:[%s18752_s4 + $0x748] ss:$16 sps:$4 sm:$0xff]   ;;  %v15995_v13 = vld [vmem:[%s18752_s4 + $0x764] ss:$16 sps:$4 sm:$0xff]  }
 0x189   : > { %10912 = vmatprep.subr.bf16.mxu0 %v15911_v14  ;;  %11978 = vmatprep.subr.bf16.mxu1 %v15914_v15  ;;  %v15998_v14 = vld [vmem:[%s18752_s4 + $0x76c] ss:$16 sps:$4 sm:$0xff]   ;;  %v15993_v15 = vld [vmem:[%s18752_s4 + $0x760] ss:$16 sps:$4 sm:$0xff]  }
 0x18c   : > { %10913 = vmatpush1.bf16.msra.mxu0 %v15909_v16  ;;  %11979 = vmatpush1.bf16.msra.mxu1 %v15912_v17  ;;  %v15996_v16 = vld [vmem:[%s18752_s4 + $0x768] ss:$16 sps:$4 sm:$0xff]   ;;  %v16001_v17 = vld [vmem:[%s18752_s4 + $0x784] ss:$16 sps:$4 sm:$0xff]  }
 0x18d   : > { %10914 = vmatprep.subr.bf16.mxu0 %v15917_v18  ;;  %11980 = vmatprep.subr.bf16.mxu1 %v15920_v19  ;;  %v16004_v18 = vld [vmem:[%s18752_s4 + $0x78c] ss:$16 sps:$4 sm:$0xff]   ;;  %v15999_v19 = vld [vmem:[%s18752_s4 + $0x780] ss:$16 sps:$4 sm:$0xff]  }
 0x190   : > { %10915 = vmatpush1.bf16.msra.mxu0 %v15915_v21  ;;  %11981 = vmatpush1.bf16.msra.mxu1 %v15918_v22  ;;  %v16007_v21 = vld [vmem:[%s18752_s4 + $0x7a4] ss:$16 sps:$4 sm:$0xff]   ;;  %v16010_v22 = vld [vmem:[%s18752_s4 + $0x7ac] ss:$16 sps:$4 sm:$0xff]  }
 0x191   : > { %10916 = vmatprep.subr.bf16.mxu0 %v15923_v23  ;;  %11982 = vmatprep.subr.bf16.mxu1 %v15926_v25  ;;  %v16005_v23 = vld [vmem:[%s18752_s4 + $0x7a0] ss:$16 sps:$4 sm:$0xff]   ;;  %v16008_v25 = vld [vmem:[%s18752_s4 + $0x7a8] ss:$16 sps:$4 sm:$0xff]  }
 0x194   : > { %10917 = vmatpush1.bf16.msra.mxu0 %v15921_v24  ;;  %11983 = vmatpush1.bf16.msra.mxu1 %v15924_v10  ;;  %v16013_v24 = vld [vmem:[%s18752_s4 + $0x7c4] ss:$16 sps:$4 sm:$0xff]   ;;  %v16016_v10 = vld [vmem:[%s18752_s4 + $0x7cc] ss:$16 sps:$4 sm:$0xff]  }
 0x195   : > { %10927 = vmatprep.subr.bf16.mxu0 %v15929_v28  ;;  %11993 = vmatprep.subr.bf16.mxu1 %v15932_v29  ;;  %v16011_v28 = vld [vmem:[%s18752_s4 + $0x7c0] ss:$16 sps:$4 sm:$0xff]   ;;  %v19074_v29 = vld [vmem:[%s18785_s9 + $0x10] sm:$0xff] }
 0x197   : > { %10919 = vmatmul.mubr.bf16.vlgmr.msra.gmra.mrb[0].mxu0 %v772_v31  ;;  %11985 = vmatmul.mubr.bf16.vlgmr.msra.gmra.mrb[0].mxu1 %v772_v31  ;;  %v16019_v31 = vld [vmem:[%s18752_s4 + $0x7e4] ss:$16 sps:$4 sm:$0xff]  }
 0x198   : > { %10928 = vmatpush1.bf16.msra.mxu0 %v15927_v32  ;;  %11994 = vmatpush1.bf16.msra.mxu1 %v15930_v33  ;;  %v16022_v32 = vld [vmem:[%s18752_s4 + $0x7ec] ss:$16 sps:$4 sm:$0xff]   ;;  %v19081_v33 = vrot.slane %v19074_v29, %v18837_v50 }
 0x199   : > { %10929 = vmatprep.subr.bf16.mxu0 %v15935_v34  ;;  %11995 = vmatprep.subr.bf16.mxu1 %v15938_v35  ;;  %v16017_v34 = vld [vmem:[%s18752_s4 + $0x7e0] ss:$16 sps:$4 sm:$0xff]   ;;  %v16020_v35 = vld [vmem:[%s18752_s4 + $0x7e8] ss:$16 sps:$4 sm:$0xff]  }
 0x19a   : > { %10959 = vmatprep.mubr.bf16.mxu0 %v775_v36  ;;  %12025 = vmatprep.mubr.bf16.mxu1 %v775_v36  ;;  %v16026_v36 = vld [vmem:[%s18752_s4 + $0x804] ss:$16 sps:$4 sm:$0xff]  }
 0x19c   : > { %10930 = vmatpush1.bf16.msra.mxu0 %v15933_v27  ;;  %11996 = vmatpush1.bf16.msra.mxu1 %v15936_v37  ;;  %v16029_v27 = vld [vmem:[%s18752_s4 + $0x80c] ss:$16 sps:$4 sm:$0xff]   ;;  %v544_v37 = vcombine.high %v19081_v33, %v19081_v33 }
 0x19d   : > { %10931 = vmatprep.subr.bf16.mxu0 %v15941_v38  ;;  %11997 = vmatprep.subr.bf16.mxu1 %v15944_v39  ;;  %v16024_v38 = vld [vmem:[%s18752_s4 + $0x800] ss:$16 sps:$4 sm:$0xff]   ;;  %v774_v39 = vpack.c.bf16 %v19006_v26, %v19006_v26  ;;  %v16038_v26 = vld [vmem:[%s18752_s4 + $0x844] ss:$16 sps:$4 sm:$0xff]  }
 0x1a0   : > { %10932 = vmatpush1.bf16.msra.mxu0 %v15939_v40  ;;  %11998 = vmatpush1.bf16.msra.mxu1 %v15942_v41  ;;  %v16027_v40 = vld [vmem:[%s18752_s4 + $0x808] ss:$16 sps:$4 sm:$0xff]   ;;  %v16032_v41 = vld [vmem:[%s18752_s4 + $0x824] ss:$16 sps:$4 sm:$0xff]  }
 0x1a1   : > { %10933 = vmatprep.subr.bf16.mxu0 %v15947_v42  ;;  %11999 = vmatprep.subr.bf16.mxu1 %v15950_v43  ;;  %v16035_v42 = vld [vmem:[%s18752_s4 + $0x82c] ss:$16 sps:$4 sm:$0xff]   ;;  %v777_v43 = vpack.c.bf16 %v544_v37, %v544_v37  ;;  %v16108_v37 = vld [vmem:[%s18752_s4 + $0x9c0] ss:$16 sps:$4 sm:$0xff]  }
 0x1a4   : > { %10934 = vmatpush1.bf16.msra.mxu0 %v15945_v45  ;;  %12000 = vmatpush1.bf16.msra.mxu1 %v15948_v46  ;;  %v16030_v45 = vld [vmem:[%s18752_s4 + $0x820] ss:$16 sps:$4 sm:$0xff]   ;;  %v16033_v46 = vld [vmem:[%s18752_s4 + $0x828] ss:$16 sps:$4 sm:$0xff]  }
 0x1a5   : > { %10935 = vmatprep.subr.bf16.mxu0 %v15953_v47  ;;  %12001 = vmatprep.subr.bf16.mxu1 %v15956_v48  ;;  %v16041_v47 = vld [vmem:[%s18752_s4 + $0x84c] ss:$16 sps:$4 sm:$0xff]   ;;  %v16036_v48 = vld [vmem:[%s18752_s4 + $0x840] ss:$16 sps:$4 sm:$0xff]  }
 0x1a8   : > { %10936 = vmatpush1.bf16.msra.mxu0 %v15951_v49  ;;  %12002 = vmatpush1.bf16.msra.mxu1 %v15954_v51  ;;  %v16039_v49 = vld [vmem:[%s18752_s4 + $0x848] ss:$16 sps:$4 sm:$0xff]   ;;  %v16044_v51 = vld [vmem:[%s18752_s4 + $0x864] ss:$16 sps:$4 sm:$0xff]  }
 0x1a9   : > { %10937 = vmatprep.subr.bf16.mxu0 %v15959_v52  ;;  %12003 = vmatprep.subr.bf16.mxu1 %v15962_v53  ;;  %v16047_v52 = vld [vmem:[%s18752_s4 + $0x86c] ss:$16 sps:$4 sm:$0xff]   ;;  %v16042_v53 = vld [vmem:[%s18752_s4 + $0x860] ss:$16 sps:$4 sm:$0xff]  }
 0x1ac   : > { %10938 = vmatpush1.bf16.msra.mxu0 %v15957_v54  ;;  %12004 = vmatpush1.bf16.msra.mxu1 %v15960_v55  ;;  %v16045_v54 = vld [vmem:[%s18752_s4 + $0x868] ss:$16 sps:$4 sm:$0xff]   ;;  %v16050_v55 = vld [vmem:[%s18752_s4 + $0x884] ss:$16 sps:$4 sm:$0xff]  }
 0x1ad   : > { %10939 = vmatprep.subr.bf16.mxu0 %v15965_v56  ;;  %12005 = vmatprep.subr.bf16.mxu1 %v15968_v57  ;;  %v16053_v56 = vld [vmem:[%s18752_s4 + $0x88c] ss:$16 sps:$4 sm:$0xff]   ;;  %v16048_v57 = vld [vmem:[%s18752_s4 + $0x880] ss:$16 sps:$4 sm:$0xff]  }
 0x1b0   : > { %10940 = vmatpush1.bf16.msra.mxu0 %v15963_v58  ;;  %12006 = vmatpush1.bf16.msra.mxu1 %v15966_v59  ;;  %v16051_v58 = vld [vmem:[%s18752_s4 + $0x888] ss:$16 sps:$4 sm:$0xff]   ;;  %v16056_v59 = vld [vmem:[%s18752_s4 + $0x8a4] ss:$16 sps:$4 sm:$0xff]  }
 0x1b1   : > { %10941 = vmatprep.subr.bf16.mxu0 %v15971_v60  ;;  %12007 = vmatprep.subr.bf16.mxu1 %v15974_v61  ;;  %v16059_v60 = vld [vmem:[%s18752_s4 + $0x8ac] ss:$16 sps:$4 sm:$0xff]   ;;  %v16054_v61 = vld [vmem:[%s18752_s4 + $0x8a0] ss:$16 sps:$4 sm:$0xff]  }
 0x1b4   : > { %10942 = vmatpush1.bf16.msra.mxu0 %v15969_v62  ;;  %12008 = vmatpush1.bf16.msra.mxu1 %v15972_v63  ;;  %v16057_v62 = vld [vmem:[%s18752_s4 + $0x8a8] ss:$16 sps:$4 sm:$0xff]   ;;  %v16062_v63 = vld [vmem:[%s18752_s4 + $0x8c4] ss:$16 sps:$4 sm:$0xff]  }
 0x1b5   : > { %10943 = vmatprep.subr.bf16.mxu0 %v15977_v0  ;;  %12009 = vmatprep.subr.bf16.mxu1 %v15980_v1  ;;  %v16065_v0 = vld [vmem:[%s18752_s4 + $0x8cc] ss:$16 sps:$4 sm:$0xff]   ;;  %v16060_v1 = vld [vmem:[%s18752_s4 + $0x8c0] ss:$16 sps:$4 sm:$0xff]  }
 0x1b8   : > { %10944 = vmatpush1.bf16.msra.mxu0 %v15975_v2  ;;  %12010 = vmatpush1.bf16.msra.mxu1 %v15978_v3  ;;  %v16063_v2 = vld [vmem:[%s18752_s4 + $0x8c8] ss:$16 sps:$4 sm:$0xff]   ;;  %v16068_v3 = vld [vmem:[%s18752_s4 + $0x8e4] ss:$16 sps:$4 sm:$0xff]  }
 0x1b9   : > { %10945 = vmatprep.subr.bf16.mxu0 %v15983_v4  ;;  %12011 = vmatprep.subr.bf16.mxu1 %v15986_v5  ;;  %v16071_v4 = vld [vmem:[%s18752_s4 + $0x8ec] ss:$16 sps:$4 sm:$0xff]   ;;  %v16066_v5 = vld [vmem:[%s18752_s4 + $0x8e0] ss:$16 sps:$4 sm:$0xff]  }
 0x1bc   : > { %10946 = vmatpush1.bf16.msra.mxu0 %v15981_v6  ;;  %12012 = vmatpush1.bf16.msra.mxu1 %v15984_v7  ;;  %v16069_v6 = vld [vmem:[%s18752_s4 + $0x8e8] ss:$16 sps:$4 sm:$0xff]   ;;  %v16074_v7 = vld [vmem:[%s18752_s4 + $0x904] ss:$16 sps:$4 sm:$0xff]  }
 0x1bd   : > { %10947 = vmatprep.subr.bf16.mxu0 %v15989_v8  ;;  %12013 = vmatprep.subr.bf16.mxu1 %v15992_v9  ;;  %v16077_v8 = vld [vmem:[%s18752_s4 + $0x90c] ss:$16 sps:$4 sm:$0xff]   ;;  %v16072_v9 = vld [vmem:[%s18752_s4 + $0x900] ss:$16 sps:$4 sm:$0xff]  }
 0x1c0   : > { %10948 = vmatpush1.bf16.msra.mxu0 %v15987_v11  ;;  %12014 = vmatpush1.bf16.msra.mxu1 %v15990_v12  ;;  %v16075_v11 = vld [vmem:[%s18752_s4 + $0x908] ss:$16 sps:$4 sm:$0xff]   ;;  %v16080_v12 = vld [vmem:[%s18752_s4 + $0x924] ss:$16 sps:$4 sm:$0xff]  }
 0x1c1   : > { %10949 = vmatprep.subr.bf16.mxu0 %v15995_v13  ;;  %12015 = vmatprep.subr.bf16.mxu1 %v15998_v14  ;;  %v16083_v13 = vld [vmem:[%s18752_s4 + $0x92c] ss:$16 sps:$4 sm:$0xff]   ;;  %v16078_v14 = vld [vmem:[%s18752_s4 + $0x920] ss:$16 sps:$4 sm:$0xff]  }
 0x1c4   : > { %10950 = vmatpush1.bf16.msra.mxu0 %v15993_v15  ;;  %12016 = vmatpush1.bf16.msra.mxu1 %v15996_v16  ;;  %v16081_v15 = vld [vmem:[%s18752_s4 + $0x928] ss:$16 sps:$4 sm:$0xff]   ;;  %v16086_v16 = vld [vmem:[%s18752_s4 + $0x944] ss:$16 sps:$4 sm:$0xff]  }
 0x1c5   : > { %10951 = vmatprep.subr.bf16.mxu0 %v16001_v17  ;;  %12017 = vmatprep.subr.bf16.mxu1 %v16004_v18  ;;  %v16089_v17 = vld [vmem:[%s18752_s4 + $0x94c] ss:$16 sps:$4 sm:$0xff]   ;;  %v16084_v18 = vld [vmem:[%s18752_s4 + $0x940] ss:$16 sps:$4 sm:$0xff]  }
 0x1c8   : > { %10952 = vmatpush1.bf16.msra.mxu0 %v15999_v19  ;;  %12018 = vmatpush1.bf16.msra.mxu1 %v16002_v20  ;;  %v16087_v19 = vld [vmem:[%s18752_s4 + $0x948] ss:$16 sps:$4 sm:$0xff]   ;;  %v16092_v20 = vld [vmem:[%s18752_s4 + $0x964] ss:$16 sps:$4 sm:$0xff]  }
 0x1c9   : > { %10953 = vmatprep.subr.bf16.mxu0 %v16007_v21  ;;  %12019 = vmatprep.subr.bf16.mxu1 %v16010_v22  ;;  %v16095_v21 = vld [vmem:[%s18752_s4 + $0x96c] ss:$16 sps:$4 sm:$0xff]   ;;  %v16090_v22 = vld [vmem:[%s18752_s4 + $0x960] ss:$16 sps:$4 sm:$0xff]  }
 0x1cc   : > { %10954 = vmatpush1.bf16.msra.mxu0 %v16005_v23  ;;  %12020 = vmatpush1.bf16.msra.mxu1 %v16008_v25  ;;  %v16093_v23 = vld [vmem:[%s18752_s4 + $0x968] ss:$16 sps:$4 sm:$0xff]   ;;  %v16098_v25 = vld [vmem:[%s18752_s4 + $0x984] ss:$16 sps:$4 sm:$0xff]  }
 0x1cd   : > { %10955 = vmatprep.subr.bf16.mxu0 %v16013_v24  ;;  %12021 = vmatprep.subr.bf16.mxu1 %v16016_v10  ;;  %v16101_v24 = vld [vmem:[%s18752_s4 + $0x98c] ss:$16 sps:$4 sm:$0xff]   ;;  %v16096_v10 = vld [vmem:[%s18752_s4 + $0x980] ss:$16 sps:$4 sm:$0xff]  }
 0x1d0   : > { %10956 = vmatpush1.bf16.msra.mxu0 %v16011_v28  ;;  %12022 = vmatpush1.bf16.msra.mxu1 %v16014_v30  ;;  %v16099_v28 = vld [vmem:[%s18752_s4 + $0x988] ss:$16 sps:$4 sm:$0xff]   ;;  %v16104_v30 = vld [vmem:[%s18752_s4 + $0x9a4] ss:$16 sps:$4 sm:$0xff]  }
 0x1d1   : > { %10957 = vmatprep.subr.bf16.mxu0 %v16019_v31  ;;  %12023 = vmatprep.subr.bf16.mxu1 %v16022_v32  ;;  %v16107_v31 = vld [vmem:[%s18752_s4 + $0x9ac] ss:$16 sps:$4 sm:$0xff]   ;;  %v16102_v32 = vld [vmem:[%s18752_s4 + $0x9a0] ss:$16 sps:$4 sm:$0xff]  }
 0x1d4   : > { %10958 = vmatpush1.bf16.msra.mxu0 %v16017_v34  ;;  %12024 = vmatpush1.bf16.msra.mxu1 %v16020_v35  ;;  %v16105_v34 = vld [vmem:[%s18752_s4 + $0x9a8] ss:$16 sps:$4 sm:$0xff]   ;;  %v16110_v35 = vld [vmem:[%s18752_s4 + $0x9c4] ss:$16 sps:$4 sm:$0xff]  }
 0x1d5   : > { %10968 = vmatprep.subr.bf16.mxu0 %v16026_v36  ;;  %12034 = vmatprep.subr.bf16.mxu1 %v16029_v27  ;;  %v16113_v36 = vld [vmem:[%s18752_s4 + $0x9cc] ss:$16 sps:$4 sm:$0xff]   ;;  %v529_v27 = vcombine.high %v19074_v29, %v19074_v29  ;;  %v16114_v29 = vld [vmem:[%s18752_s4 + $0x9e0] ss:$16 sps:$4 sm:$0xff]  }
 0x1d7   : > { %10960 = vmatmul.mubr.bf16.vlgmr.msra.gmra.mrb[0].mxu0 %v774_v39  ;;  %12026 = vmatmul.mubr.bf16.vlgmr.msra.gmra.mrb[0].mxu1 %v774_v39  ;;  %v16116_v39 = vld [vmem:[%s18752_s4 + $0x9e4] ss:$16 sps:$4 sm:$0xff]  }
 0x1d8   : > { %10969 = vmatpush1.bf16.msra.mxu0 %v16024_v38  ;;  %12035 = vmatpush1.bf16.msra.mxu1 %v16027_v40  ;;  %v16111_v38 = vld [vmem:[%s18752_s4 + $0x9c8] ss:$16 sps:$4 sm:$0xff]   ;;  %v16119_v40 = vld [vmem:[%s18752_s4 + $0x9ec] ss:$16 sps:$4 sm:$0xff]  }
 0x1d9   : > { %10970 = vmatprep.subr.bf16.mxu0 %v16032_v41  ;;  %12036 = vmatprep.subr.bf16.mxu1 %v16035_v42  ;;  %v19154_v41 = vrot.slane %v529_v27, %v18837_v50  ;;  %v16117_v42 = vld [vmem:[%s18752_s4 + $0x9e8] ss:$16 sps:$4 sm:$0xff]  }
 0x1da   : > { %11000 = vmatprep.mubr.bf16.mxu0 %v777_v43  ;;  %12066 = vmatprep.mubr.bf16.mxu1 %v777_v43  ;;  %v16122_v43 = vld [vmem:[%s18752_s4 + $0xa04] ss:$16 sps:$4 sm:$0xff]   ;;  %v16195_v27 = vld [vmem:[%s18752_s4 + $0xb88] ss:$16 sps:$4 sm:$0xff]  }
 0x1dc   : > { %10971 = vmatpush1.bf16.msra.mxu0 %v16030_v45  ;;  %12037 = vmatpush1.bf16.msra.mxu1 %v16033_v46  ;;  %v16125_v45 = vld [vmem:[%s18752_s4 + $0xa0c] ss:$16 sps:$4 sm:$0xff]   ;;  %v545_v46 = vcombine.high %v19154_v41, %v19154_v41 }
 0x1dd   : > { %10972 = vmatprep.subr.bf16.mxu0 %v16038_v26  ;;  %12038 = vmatprep.subr.bf16.mxu1 %v16041_v47  ;;  %v776_v26 = vpack.c.bf16 %v19081_v33, %v19081_v33  ;;  %v16120_v47 = vld [vmem:[%s18752_s4 + $0xa00] ss:$16 sps:$4 sm:$0xff]  }
 0x1de   : > { %v16126_v33 = vld [vmem:[%s18752_s4 + $0xa20] ss:$16 sps:$4 sm:$0xff]  }
 0x1e0   : > { %10973 = vmatpush1.bf16.msra.mxu0 %v16036_v48  ;;  %12039 = vmatpush1.bf16.msra.mxu1 %v16039_v49  ;;  %v16123_v48 = vld [vmem:[%s18752_s4 + $0xa08] ss:$16 sps:$4 sm:$0xff]   ;;  %v16128_v49 = vld [vmem:[%s18752_s4 + $0xa24] ss:$16 sps:$4 sm:$0xff]  }
 0x1e1   : > { %10974 = vmatprep.subr.bf16.mxu0 %v16044_v51  ;;  %12040 = vmatprep.subr.bf16.mxu1 %v16047_v52  ;;  %v16131_v51 = vld [vmem:[%s18752_s4 + $0xa2c] ss:$16 sps:$4 sm:$0xff]   ;;  %v779_v52 = vpack.c.bf16 %v545_v46, %v545_v46  ;;  %v16207_v46 = vld [vmem:[%s18752_s4 + $0xbc8] ss:$16 sps:$4 sm:$0xff]  }
 0x1e4   : > { %10975 = vmatpush1.bf16.msra.mxu0 %v16042_v53  ;;  %12041 = vmatpush1.bf16.msra.mxu1 %v16045_v54  ;;  %v16129_v53 = vld [vmem:[%s18752_s4 + $0xa28] ss:$16 sps:$4 sm:$0xff]   ;;  %v16134_v54 = vld [vmem:[%s18752_s4 + $0xa44] ss:$16 sps:$4 sm:$0xff]  }
 0x1e5   : > { %10976 = vmatprep.subr.bf16.mxu0 %v16050_v55  ;;  %12042 = vmatprep.subr.bf16.mxu1 %v16053_v56  ;;  %v16137_v55 = vld [vmem:[%s18752_s4 + $0xa4c] ss:$16 sps:$4 sm:$0xff]   ;;  %v16132_v56 = vld [vmem:[%s18752_s4 + $0xa40] ss:$16 sps:$4 sm:$0xff]  }
 0x1e8   : > { %10977 = vmatpush1.bf16.msra.mxu0 %v16048_v57  ;;  %12043 = vmatpush1.bf16.msra.mxu1 %v16051_v58  ;;  %v16135_v57 = vld [vmem:[%s18752_s4 + $0xa48] ss:$16 sps:$4 sm:$0xff]   ;;  %v16140_v58 = vld [vmem:[%s18752_s4 + $0xa64] ss:$16 sps:$4 sm:$0xff]  }
 0x1e9   : > { %10978 = vmatprep.subr.bf16.mxu0 %v16056_v59  ;;  %12044 = vmatprep.subr.bf16.mxu1 %v16059_v60  ;;  %v16143_v59 = vld [vmem:[%s18752_s4 + $0xa6c] ss:$16 sps:$4 sm:$0xff]   ;;  %v16138_v60 = vld [vmem:[%s18752_s4 + $0xa60] ss:$16 sps:$4 sm:$0xff]  }
 0x1ec   : > { %10979 = vmatpush1.bf16.msra.mxu0 %v16054_v61  ;;  %12045 = vmatpush1.bf16.msra.mxu1 %v16057_v62  ;;  %v16141_v61 = vld [vmem:[%s18752_s4 + $0xa68] ss:$16 sps:$4 sm:$0xff]   ;;  %v16146_v62 = vld [vmem:[%s18752_s4 + $0xa84] ss:$16 sps:$4 sm:$0xff]  }
 0x1ed   : > { %10980 = vmatprep.subr.bf16.mxu0 %v16062_v63  ;;  %12046 = vmatprep.subr.bf16.mxu1 %v16065_v0  ;;  %v16149_v63 = vld [vmem:[%s18752_s4 + $0xa8c] ss:$16 sps:$4 sm:$0xff]   ;;  %v16144_v0 = vld [vmem:[%s18752_s4 + $0xa80] ss:$16 sps:$4 sm:$0xff]  }
 0x1f0   : > { %10981 = vmatpush1.bf16.msra.mxu0 %v16060_v1  ;;  %12047 = vmatpush1.bf16.msra.mxu1 %v16063_v2  ;;  %v16147_v1 = vld [vmem:[%s18752_s4 + $0xa88] ss:$16 sps:$4 sm:$0xff]   ;;  %v16152_v2 = vld [vmem:[%s18752_s4 + $0xaa4] ss:$16 sps:$4 sm:$0xff]  }
 0x1f1   : > { %10982 = vmatprep.subr.bf16.mxu0 %v16068_v3  ;;  %12048 = vmatprep.subr.bf16.mxu1 %v16071_v4  ;;  %v16155_v3 = vld [vmem:[%s18752_s4 + $0xaac] ss:$16 sps:$4 sm:$0xff]   ;;  %v16150_v4 = vld [vmem:[%s18752_s4 + $0xaa0] ss:$16 sps:$4 sm:$0xff]  }
 0x1f4   : > { %10983 = vmatpush1.bf16.msra.mxu0 %v16066_v5  ;;  %12049 = vmatpush1.bf16.msra.mxu1 %v16069_v6  ;;  %v16153_v5 = vld [vmem:[%s18752_s4 + $0xaa8] ss:$16 sps:$4 sm:$0xff]   ;;  %v16158_v6 = vld [vmem:[%s18752_s4 + $0xac4] ss:$16 sps:$4 sm:$0xff]  }
 0x1f5   : > { %10984 = vmatprep.subr.bf16.mxu0 %v16074_v7  ;;  %12050 = vmatprep.subr.bf16.mxu1 %v16077_v8  ;;  %v16161_v7 = vld [vmem:[%s18752_s4 + $0xacc] ss:$16 sps:$4 sm:$0xff]   ;;  %v16156_v8 = vld [vmem:[%s18752_s4 + $0xac0] ss:$16 sps:$4 sm:$0xff]  }
 0x1f8   : > { %10985 = vmatpush1.bf16.msra.mxu0 %v16072_v9  ;;  %12051 = vmatpush1.bf16.msra.mxu1 %v16075_v11  ;;  %v16159_v9 = vld [vmem:[%s18752_s4 + $0xac8] ss:$16 sps:$4 sm:$0xff]   ;;  %v16164_v11 = vld [vmem:[%s18752_s4 + $0xae4] ss:$16 sps:$4 sm:$0xff]  }
 0x1f9   : > { %10986 = vmatprep.subr.bf16.mxu0 %v16080_v12  ;;  %12052 = vmatprep.subr.bf16.mxu1 %v16083_v13  ;;  %v16167_v12 = vld [vmem:[%s18752_s4 + $0xaec] ss:$16 sps:$4 sm:$0xff]   ;;  %v16162_v13 = vld [vmem:[%s18752_s4 + $0xae0] ss:$16 sps:$4 sm:$0xff]  }
 0x1fc   : > { %10987 = vmatpush1.bf16.msra.mxu0 %v16078_v14  ;;  %12053 = vmatpush1.bf16.msra.mxu1 %v16081_v15  ;;  %v16165_v14 = vld [vmem:[%s18752_s4 + $0xae8] ss:$16 sps:$4 sm:$0xff]   ;;  %v16170_v15 = vld [vmem:[%s18752_s4 + $0xb04] ss:$16 sps:$4 sm:$0xff]  }
 0x1fd   : > { %10988 = vmatprep.subr.bf16.mxu0 %v16086_v16  ;;  %12054 = vmatprep.subr.bf16.mxu1 %v16089_v17  ;;  %v16173_v16 = vld [vmem:[%s18752_s4 + $0xb0c] ss:$16 sps:$4 sm:$0xff]   ;;  %v16168_v17 = vld [vmem:[%s18752_s4 + $0xb00] ss:$16 sps:$4 sm:$0xff]  }
 0x200   : > { %10989 = vmatpush1.bf16.msra.mxu0 %v16084_v18  ;;  %12055 = vmatpush1.bf16.msra.mxu1 %v16087_v19  ;;  %v16171_v18 = vld [vmem:[%s18752_s4 + $0xb08] ss:$16 sps:$4 sm:$0xff]   ;;  %v16176_v19 = vld [vmem:[%s18752_s4 + $0xb24] ss:$16 sps:$4 sm:$0xff]  }
 0x201   : > { %10990 = vmatprep.subr.bf16.mxu0 %v16092_v20  ;;  %12056 = vmatprep.subr.bf16.mxu1 %v16095_v21  ;;  %v16179_v20 = vld [vmem:[%s18752_s4 + $0xb2c] ss:$16 sps:$4 sm:$0xff]   ;;  %v16174_v21 = vld [vmem:[%s18752_s4 + $0xb20] ss:$16 sps:$4 sm:$0xff]  }
 0x204   : > { %10991 = vmatpush1.bf16.msra.mxu0 %v16090_v22  ;;  %12057 = vmatpush1.bf16.msra.mxu1 %v16093_v23  ;;  %v16177_v22 = vld [vmem:[%s18752_s4 + $0xb28] ss:$16 sps:$4 sm:$0xff]   ;;  %v16182_v23 = vld [vmem:[%s18752_s4 + $0xb44] ss:$16 sps:$4 sm:$0xff]  }
 0x205   : > { %10992 = vmatprep.subr.bf16.mxu0 %v16098_v25  ;;  %12058 = vmatprep.subr.bf16.mxu1 %v16101_v24  ;;  %v16185_v25 = vld [vmem:[%s18752_s4 + $0xb4c] ss:$16 sps:$4 sm:$0xff]   ;;  %v16180_v24 = vld [vmem:[%s18752_s4 + $0xb40] ss:$16 sps:$4 sm:$0xff]  }
 0x208   : > { %10993 = vmatpush1.bf16.msra.mxu0 %v16096_v10  ;;  %12059 = vmatpush1.bf16.msra.mxu1 %v16099_v28  ;;  %v16183_v10 = vld [vmem:[%s18752_s4 + $0xb48] ss:$16 sps:$4 sm:$0xff]   ;;  %v16188_v28 = vld [vmem:[%s18752_s4 + $0xb64] ss:$16 sps:$4 sm:$0xff]  }
 0x209   : > { %10994 = vmatprep.subr.bf16.mxu0 %v16104_v30  ;;  %12060 = vmatprep.subr.bf16.mxu1 %v16107_v31  ;;  %v16191_v30 = vld [vmem:[%s18752_s4 + $0xb6c] ss:$16 sps:$4 sm:$0xff]   ;;  %v16186_v31 = vld [vmem:[%s18752_s4 + $0xb60] ss:$16 sps:$4 sm:$0xff]  }
 0x20c   : > { %10995 = vmatpush1.bf16.msra.mxu0 %v16102_v32  ;;  %12061 = vmatpush1.bf16.msra.mxu1 %v16105_v34  ;;  %v16189_v32 = vld [vmem:[%s18752_s4 + $0xb68] ss:$16 sps:$4 sm:$0xff]   ;;  %v16194_v34 = vld [vmem:[%s18752_s4 + $0xb84] ss:$16 sps:$4 sm:$0xff]  }
 0x20d   : > { %10996 = vmatprep.subr.bf16.mxu0 %v16110_v35  ;;  %12062 = vmatprep.subr.bf16.mxu1 %v16113_v36  ;;  %v16197_v35 = vld [vmem:[%s18752_s4 + $0xb8c] ss:$16 sps:$4 sm:$0xff]   ;;  %v16192_v36 = vld [vmem:[%s18752_s4 + $0xb80] ss:$16 sps:$4 sm:$0xff]  }
 0x210   : > { %10997 = vmatpush1.bf16.msra.mxu0 %v16108_v37  ;;  %12063 = vmatpush1.bf16.msra.mxu1 %v16111_v38  ;;  %v16200_v37 = vld [vmem:[%s18752_s4 + $0xba4] ss:$16 sps:$4 sm:$0xff]   ;;  %v16203_v38 = vld [vmem:[%s18752_s4 + $0xbac] ss:$16 sps:$4 sm:$0xff]  }
 0x211   : > { %10998 = vmatprep.subr.bf16.mxu0 %v16116_v39  ;;  %12064 = vmatprep.subr.bf16.mxu1 %v16119_v40  ;;  %v16198_v39 = vld [vmem:[%s18752_s4 + $0xba0] ss:$16 sps:$4 sm:$0xff]   ;;  %v16201_v40 = vld [vmem:[%s18752_s4 + $0xba8] ss:$16 sps:$4 sm:$0xff]  }
 0x214   : > { %10999 = vmatpush1.bf16.msra.mxu0 %v16114_v29  ;;  %12065 = vmatpush1.bf16.msra.mxu1 %v16117_v42  ;;  %v16206_v29 = vld [vmem:[%s18752_s4 + $0xbc4] ss:$16 sps:$4 sm:$0xff]   ;;  %v16209_v42 = vld [vmem:[%s18752_s4 + $0xbcc] ss:$16 sps:$4 sm:$0xff]  }
 0x215   : > { %11009 = vmatprep.subr.bf16.mxu0 %v16122_v43  ;;  %12075 = vmatprep.subr.bf16.mxu1 %v16125_v45  ;;  %v19221_v43 = vld [vmem:[%s18785_s9 + $0x18] sm:$0xff] }
 0x216   : > { %v16204_v45 = vld [vmem:[%s18752_s4 + $0xbc0] ss:$16 sps:$4 sm:$0xff]  }
 0x217   : > { %11001 = vmatmul.mubr.bf16.vlgmr.msra.gmra.mrb[0].mxu0 %v776_v26  ;;  %12067 = vmatmul.mubr.bf16.vlgmr.msra.gmra.mrb[0].mxu1 %v776_v26  ;;  %v16212_v26 = vld [vmem:[%s18752_s4 + $0xbe4] ss:$16 sps:$4 sm:$0xff]  }
 0x218   : > { %11010 = vmatpush1.bf16.msra.mxu0 %v16120_v47  ;;  %12076 = vmatpush1.bf16.msra.mxu1 %v16123_v48  ;;  %v16215_v47 = vld [vmem:[%s18752_s4 + $0xbec] ss:$16 sps:$4 sm:$0xff]   ;;  %v19229_v48 = vrot.slane %v19221_v43, %v18837_v50 }
 0x219   : > { %11011 = vmatprep.subr.bf16.mxu0 %v16128_v49  ;;  %12077 = vmatprep.subr.bf16.mxu1 %v16131_v51  ;;  %v16210_v49 = vld [vmem:[%s18752_s4 + $0xbe0] ss:$16 sps:$4 sm:$0xff]   ;;  %v16213_v51 = vld [vmem:[%s18752_s4 + $0xbe8] ss:$16 sps:$4 sm:$0xff]  }
 0x21a   : > { %11041 = vmatprep.mubr.bf16.mxu0 %v779_v52  ;;  %12107 = vmatprep.mubr.bf16.mxu1 %v779_v52  ;;  %v16219_v52 = vld [vmem:[%s18752_s4 + $0xc04] ss:$16 sps:$4 sm:$0xff]  }
 0x21c   : > { %11012 = vmatpush1.bf16.msra.mxu0 %v16126_v33  ;;  %12078 = vmatpush1.bf16.msra.mxu1 %v16129_v53  ;;  %v16222_v33 = vld [vmem:[%s18752_s4 + $0xc0c] ss:$16 sps:$4 sm:$0xff]   ;;  %v561_v53 = vcombine.high %v19229_v48, %v19229_v48 }
 0x21d   : > { %11013 = vmatprep.subr.bf16.mxu0 %v16134_v54  ;;  %12079 = vmatprep.subr.bf16.mxu1 %v16137_v55  ;;  %v778_v54 = vpack.c.bf16 %v19154_v41, %v19154_v41  ;;  %v16217_v55 = vld [vmem:[%s18752_s4 + $0xc00] ss:$16 sps:$4 sm:$0xff]  }
 0x21e   : > { %v16223_v41 = vld [vmem:[%s18752_s4 + $0xc20] ss:$16 sps:$4 sm:$0xff]  }
 0x220   : > { %11014 = vmatpush1.bf16.msra.mxu0 %v16132_v56  ;;  %12080 = vmatpush1.bf16.msra.mxu1 %v16135_v57  ;;  %v16220_v56 = vld [vmem:[%s18752_s4 + $0xc08] ss:$16 sps:$4 sm:$0xff]   ;;  %v16225_v57 = vld [vmem:[%s18752_s4 + $0xc24] ss:$16 sps:$4 sm:$0xff]  }
 0x221   : > { %11015 = vmatprep.subr.bf16.mxu0 %v16140_v58  ;;  %12081 = vmatprep.subr.bf16.mxu1 %v16143_v59  ;;  %v16228_v58 = vld [vmem:[%s18752_s4 + $0xc2c] ss:$16 sps:$4 sm:$0xff]   ;;  %v781_v59 = vpack.c.bf16 %v561_v53, %v561_v53  ;;  %v16301_v53 = vld [vmem:[%s18752_s4 + $0xdc0] ss:$16 sps:$4 sm:$0xff]  }
 0x224   : > { %11016 = vmatpush1.bf16.msra.mxu0 %v16138_v60  ;;  %12082 = vmatpush1.bf16.msra.mxu1 %v16141_v61  ;;  %v16226_v60 = vld [vmem:[%s18752_s4 + $0xc28] ss:$16 sps:$4 sm:$0xff]   ;;  %v16231_v61 = vld [vmem:[%s18752_s4 + $0xc44] ss:$16 sps:$4 sm:$0xff]  }
 0x225   : > { %11017 = vmatprep.subr.bf16.mxu0 %v16146_v62  ;;  %12083 = vmatprep.subr.bf16.mxu1 %v16149_v63  ;;  %v16234_v62 = vld [vmem:[%s18752_s4 + $0xc4c] ss:$16 sps:$4 sm:$0xff]   ;;  %v16229_v63 = vld [vmem:[%s18752_s4 + $0xc40] ss:$16 sps:$4 sm:$0xff]  }
 0x228   : > { %11018 = vmatpush1.bf16.msra.mxu0 %v16144_v0  ;;  %12084 = vmatpush1.bf16.msra.mxu1 %v16147_v1  ;;  %v16232_v0 = vld [vmem:[%s18752_s4 + $0xc48] ss:$16 sps:$4 sm:$0xff]   ;;  %v16237_v1 = vld [vmem:[%s18752_s4 + $0xc64] ss:$16 sps:$4 sm:$0xff]  }
 0x229   : > { %11019 = vmatprep.subr.bf16.mxu0 %v16152_v2  ;;  %12085 = vmatprep.subr.bf16.mxu1 %v16155_v3  ;;  %v16240_v2 = vld [vmem:[%s18752_s4 + $0xc6c] ss:$16 sps:$4 sm:$0xff]   ;;  %v16235_v3 = vld [vmem:[%s18752_s4 + $0xc60] ss:$16 sps:$4 sm:$0xff]  }
 0x22c   : > { %11020 = vmatpush1.bf16.msra.mxu0 %v16150_v4  ;;  %12086 = vmatpush1.bf16.msra.mxu1 %v16153_v5  ;;  %v16238_v4 = vld [vmem:[%s18752_s4 + $0xc68] ss:$16 sps:$4 sm:$0xff]   ;;  %v16243_v5 = vld [vmem:[%s18752_s4 + $0xc84] ss:$16 sps:$4 sm:$0xff]  }
 0x22d   : > { %11021 = vmatprep.subr.bf16.mxu0 %v16158_v6  ;;  %12087 = vmatprep.subr.bf16.mxu1 %v16161_v7  ;;  %v16246_v6 = vld [vmem:[%s18752_s4 + $0xc8c] ss:$16 sps:$4 sm:$0xff]   ;;  %v16241_v7 = vld [vmem:[%s18752_s4 + $0xc80] ss:$16 sps:$4 sm:$0xff]  }
 0x230   : > { %11022 = vmatpush1.bf16.msra.mxu0 %v16156_v8  ;;  %12088 = vmatpush1.bf16.msra.mxu1 %v16159_v9  ;;  %v16244_v8 = vld [vmem:[%s18752_s4 + $0xc88] ss:$16 sps:$4 sm:$0xff]   ;;  %v16249_v9 = vld [vmem:[%s18752_s4 + $0xca4] ss:$16 sps:$4 sm:$0xff]  }
 0x231   : > { %11023 = vmatprep.subr.bf16.mxu0 %v16164_v11  ;;  %12089 = vmatprep.subr.bf16.mxu1 %v16167_v12  ;;  %v16252_v11 = vld [vmem:[%s18752_s4 + $0xcac] ss:$16 sps:$4 sm:$0xff]   ;;  %v16247_v12 = vld [vmem:[%s18752_s4 + $0xca0] ss:$16 sps:$4 sm:$0xff]  }
 0x234   : > { %11024 = vmatpush1.bf16.msra.mxu0 %v16162_v13  ;;  %12090 = vmatpush1.bf16.msra.mxu1 %v16165_v14  ;;  %v16250_v13 = vld [vmem:[%s18752_s4 + $0xca8] ss:$16 sps:$4 sm:$0xff]   ;;  %v16255_v14 = vld [vmem:[%s18752_s4 + $0xcc4] ss:$16 sps:$4 sm:$0xff]  }
 0x235   : > { %11025 = vmatprep.subr.bf16.mxu0 %v16170_v15  ;;  %12091 = vmatprep.subr.bf16.mxu1 %v16173_v16  ;;  %v16258_v15 = vld [vmem:[%s18752_s4 + $0xccc] ss:$16 sps:$4 sm:$0xff]   ;;  %v16253_v16 = vld [vmem:[%s18752_s4 + $0xcc0] ss:$16 sps:$4 sm:$0xff]  }
 0x238   : > { %11026 = vmatpush1.bf16.msra.mxu0 %v16168_v17  ;;  %12092 = vmatpush1.bf16.msra.mxu1 %v16171_v18  ;;  %v16256_v17 = vld [vmem:[%s18752_s4 + $0xcc8] ss:$16 sps:$4 sm:$0xff]   ;;  %v16261_v18 = vld [vmem:[%s18752_s4 + $0xce4] ss:$16 sps:$4 sm:$0xff]  }
 0x239   : > { %11027 = vmatprep.subr.bf16.mxu0 %v16176_v19  ;;  %12093 = vmatprep.subr.bf16.mxu1 %v16179_v20  ;;  %v16264_v19 = vld [vmem:[%s18752_s4 + $0xcec] ss:$16 sps:$4 sm:$0xff]   ;;  %v16259_v20 = vld [vmem:[%s18752_s4 + $0xce0] ss:$16 sps:$4 sm:$0xff]  }
 0x23c   : > { %11028 = vmatpush1.bf16.msra.mxu0 %v16174_v21  ;;  %12094 = vmatpush1.bf16.msra.mxu1 %v16177_v22  ;;  %v16262_v21 = vld [vmem:[%s18752_s4 + $0xce8] ss:$16 sps:$4 sm:$0xff]   ;;  %v16267_v22 = vld [vmem:[%s18752_s4 + $0xd04] ss:$16 sps:$4 sm:$0xff]  }
 0x23d   : > { %11029 = vmatprep.subr.bf16.mxu0 %v16182_v23  ;;  %12095 = vmatprep.subr.bf16.mxu1 %v16185_v25  ;;  %v16270_v23 = vld [vmem:[%s18752_s4 + $0xd0c] ss:$16 sps:$4 sm:$0xff]   ;;  %v16265_v25 = vld [vmem:[%s18752_s4 + $0xd00] ss:$16 sps:$4 sm:$0xff]  }
 0x240   : > { %11030 = vmatpush1.bf16.msra.mxu0 %v16180_v24  ;;  %12096 = vmatpush1.bf16.msra.mxu1 %v16183_v10  ;;  %v16268_v24 = vld [vmem:[%s18752_s4 + $0xd08] ss:$16 sps:$4 sm:$0xff]   ;;  %v16273_v10 = vld [vmem:[%s18752_s4 + $0xd24] ss:$16 sps:$4 sm:$0xff]  }
 0x241   : > { %11031 = vmatprep.subr.bf16.mxu0 %v16188_v28  ;;  %12097 = vmatprep.subr.bf16.mxu1 %v16191_v30  ;;  %v16276_v28 = vld [vmem:[%s18752_s4 + $0xd2c] ss:$16 sps:$4 sm:$0xff]   ;;  %v16271_v30 = vld [vmem:[%s18752_s4 + $0xd20] ss:$16 sps:$4 sm:$0xff]  }
 0x244   : > { %11032 = vmatpush1.bf16.msra.mxu0 %v16186_v31  ;;  %12098 = vmatpush1.bf16.msra.mxu1 %v16189_v32  ;;  %v16274_v31 = vld [vmem:[%s18752_s4 + $0xd28] ss:$16 sps:$4 sm:$0xff]   ;;  %v16279_v32 = vld [vmem:[%s18752_s4 + $0xd44] ss:$16 sps:$4 sm:$0xff]  }
 0x245   : > { %11033 = vmatprep.subr.bf16.mxu0 %v16194_v34  ;;  %12099 = vmatprep.subr.bf16.mxu1 %v16197_v35  ;;  %v16282_v34 = vld [vmem:[%s18752_s4 + $0xd4c] ss:$16 sps:$4 sm:$0xff]   ;;  %v16277_v35 = vld [vmem:[%s18752_s4 + $0xd40] ss:$16 sps:$4 sm:$0xff]  }
 0x248   : > { %11034 = vmatpush1.bf16.msra.mxu0 %v16192_v36  ;;  %12100 = vmatpush1.bf16.msra.mxu1 %v16195_v27  ;;  %v16280_v36 = vld [vmem:[%s18752_s4 + $0xd48] ss:$16 sps:$4 sm:$0xff]   ;;  %v16285_v27 = vld [vmem:[%s18752_s4 + $0xd64] ss:$16 sps:$4 sm:$0xff]  }
 0x249   : > { %11035 = vmatprep.subr.bf16.mxu0 %v16200_v37  ;;  %12101 = vmatprep.subr.bf16.mxu1 %v16203_v38  ;;  %v16288_v37 = vld [vmem:[%s18752_s4 + $0xd6c] ss:$16 sps:$4 sm:$0xff]   ;;  %v16283_v38 = vld [vmem:[%s18752_s4 + $0xd60] ss:$16 sps:$4 sm:$0xff]  }
 0x24c   : > { %11036 = vmatpush1.bf16.msra.mxu0 %v16198_v39  ;;  %12102 = vmatpush1.bf16.msra.mxu1 %v16201_v40  ;;  %v16286_v39 = vld [vmem:[%s18752_s4 + $0xd68] ss:$16 sps:$4 sm:$0xff]   ;;  %v16291_v40 = vld [vmem:[%s18752_s4 + $0xd84] ss:$16 sps:$4 sm:$0xff]  }
 0x24d   : > { %11037 = vmatprep.subr.bf16.mxu0 %v16206_v29  ;;  %12103 = vmatprep.subr.bf16.mxu1 %v16209_v42  ;;  %v16294_v29 = vld [vmem:[%s18752_s4 + $0xd8c] ss:$16 sps:$4 sm:$0xff]   ;;  %v16289_v42 = vld [vmem:[%s18752_s4 + $0xd80] ss:$16 sps:$4 sm:$0xff]  }
 0x250   : > { %11038 = vmatpush1.bf16.msra.mxu0 %v16204_v45  ;;  %12104 = vmatpush1.bf16.msra.mxu1 %v16207_v46  ;;  %v16292_v45 = vld [vmem:[%s18752_s4 + $0xd88] ss:$16 sps:$4 sm:$0xff]   ;;  %v16297_v46 = vld [vmem:[%s18752_s4 + $0xda4] ss:$16 sps:$4 sm:$0xff]  }
 0x251   : > { %11039 = vmatprep.subr.bf16.mxu0 %v16212_v26  ;;  %12105 = vmatprep.subr.bf16.mxu1 %v16215_v47  ;;  %v16300_v26 = vld [vmem:[%s18752_s4 + $0xdac] ss:$16 sps:$4 sm:$0xff]   ;;  %v16295_v47 = vld [vmem:[%s18752_s4 + $0xda0] ss:$16 sps:$4 sm:$0xff]  }
 0x254   : > { %11040 = vmatpush1.bf16.msra.mxu0 %v16210_v49  ;;  %12106 = vmatpush1.bf16.msra.mxu1 %v16213_v51  ;;  %v16298_v49 = vld [vmem:[%s18752_s4 + $0xda8] ss:$16 sps:$4 sm:$0xff]   ;;  %v16303_v51 = vld [vmem:[%s18752_s4 + $0xdc4] ss:$16 sps:$4 sm:$0xff]  }
 0x255   : > { %11050 = vmatprep.subr.bf16.mxu0 %v16219_v52  ;;  %12116 = vmatprep.subr.bf16.mxu1 %v16222_v33  ;;  %v16306_v52 = vld [vmem:[%s18752_s4 + $0xdcc] ss:$16 sps:$4 sm:$0xff]   ;;  %v546_v33 = vcombine.high %v19221_v43, %v19221_v43  ;;  %v16307_v43 = vld [vmem:[%s18752_s4 + $0xde0] ss:$16 sps:$4 sm:$0xff]  }
 0x257   : > { %11042 = vmatmul.mubr.bf16.vlgmr.msra.gmra.mrb[0].mxu0 %v778_v54  ;;  %12108 = vmatmul.mubr.bf16.vlgmr.msra.gmra.mrb[0].mxu1 %v778_v54  ;;  %v16304_v54 = vld [vmem:[%s18752_s4 + $0xdc8] ss:$16 sps:$4 sm:$0xff]  }
 0x258   : > { %11051 = vmatpush1.bf16.msra.mxu0 %v16217_v55  ;;  %12117 = vmatpush1.bf16.msra.mxu1 %v16220_v56  ;;  %v16309_v55 = vld [vmem:[%s18752_s4 + $0xde4] ss:$16 sps:$4 sm:$0xff]   ;;  %v16312_v56 = vld [vmem:[%s18752_s4 + $0xdec] ss:$16 sps:$4 sm:$0xff]  }
 0x259   : > { %11052 = vmatprep.subr.bf16.mxu0 %v16225_v57  ;;  %12118 = vmatprep.subr.bf16.mxu1 %v16228_v58  ;;  %v19302_v57 = vrot.slane %v546_v33, %v18837_v50  ;;  %v16310_v58 = vld [vmem:[%s18752_s4 + $0xde8] ss:$16 sps:$4 sm:$0xff]  }
 0x25a   : > { %11082 = vmatprep.mubr.bf16.mxu0 %v781_v59  ;;  %12148 = vmatprep.mubr.bf16.mxu1 %v781_v59  ;;  %v16315_v59 = vld [vmem:[%s18752_s4 + $0xe04] ss:$16 sps:$4 sm:$0xff]   ;;  %v16388_v33 = vld [vmem:[%s18752_s4 + $0xf88] ss:$16 sps:$4 sm:$0xff]  }
 0x25c   : > { %11053 = vmatpush1.bf16.msra.mxu0 %v16223_v41  ;;  %12119 = vmatpush1.bf16.msra.mxu1 %v16226_v60  ;;  %v16318_v41 = vld [vmem:[%s18752_s4 + $0xe0c] ss:$16 sps:$4 sm:$0xff]   ;;  %v562_v60 = vcombine.high %v19302_v57, %v19302_v57 }
 0x25d   : > { %11054 = vmatprep.subr.bf16.mxu0 %v16231_v61  ;;  %12120 = vmatprep.subr.bf16.mxu1 %v16234_v62  ;;  %v780_v61 = vpack.c.bf16 %v19229_v48, %v19229_v48  ;;  %v16313_v62 = vld [vmem:[%s18752_s4 + $0xe00] ss:$16 sps:$4 sm:$0xff]  }
 0x25e   : > { %v16319_v48 = vld [vmem:[%s18752_s4 + $0xe20] ss:$16 sps:$4 sm:$0xff]  }
 0x260   : > { %11055 = vmatpush1.bf16.msra.mxu0 %v16229_v63  ;;  %12121 = vmatpush1.bf16.msra.mxu1 %v16232_v0  ;;  %v16316_v63 = vld [vmem:[%s18752_s4 + $0xe08] ss:$16 sps:$4 sm:$0xff]   ;;  %v16321_v0 = vld [vmem:[%s18752_s4 + $0xe24] ss:$16 sps:$4 sm:$0xff]  }
 0x261   : > { %11056 = vmatprep.subr.bf16.mxu0 %v16237_v1  ;;  %12122 = vmatprep.subr.bf16.mxu1 %v16240_v2  ;;  %v16324_v1 = vld [vmem:[%s18752_s4 + $0xe2c] ss:$16 sps:$4 sm:$0xff]   ;;  %v783_v2 = vpack.c.bf16 %v562_v60, %v562_v60  ;;  %v16400_v60 = vld [vmem:[%s18752_s4 + $0xfc8] ss:$16 sps:$4 sm:$0xff]  }
 0x264   : > { %11057 = vmatpush1.bf16.msra.mxu0 %v16235_v3  ;;  %12123 = vmatpush1.bf16.msra.mxu1 %v16238_v4  ;;  %v16322_v3 = vld [vmem:[%s18752_s4 + $0xe28] ss:$16 sps:$4 sm:$0xff]   ;;  %v16327_v4 = vld [vmem:[%s18752_s4 + $0xe44] ss:$16 sps:$4 sm:$0xff]  }
 0x265   : > { %11058 = vmatprep.subr.bf16.mxu0 %v16243_v5  ;;  %12124 = vmatprep.subr.bf16.mxu1 %v16246_v6  ;;  %v16330_v5 = vld [vmem:[%s18752_s4 + $0xe4c] ss:$16 sps:$4 sm:$0xff]   ;;  %v16325_v6 = vld [vmem:[%s18752_s4 + $0xe40] ss:$16 sps:$4 sm:$0xff]  }
 0x268   : > { %11059 = vmatpush1.bf16.msra.mxu0 %v16241_v7  ;;  %12125 = vmatpush1.bf16.msra.mxu1 %v16244_v8  ;;  %v16328_v7 = vld [vmem:[%s18752_s4 + $0xe48] ss:$16 sps:$4 sm:$0xff]   ;;  %v16333_v8 = vld [vmem:[%s18752_s4 + $0xe64] ss:$16 sps:$4 sm:$0xff]  }
 0x269   : > { %11060 = vmatprep.subr.bf16.mxu0 %v16249_v9  ;;  %12126 = vmatprep.subr.bf16.mxu1 %v16252_v11  ;;  %v16336_v9 = vld [vmem:[%s18752_s4 + $0xe6c] ss:$16 sps:$4 sm:$0xff]   ;;  %v16331_v11 = vld [vmem:[%s18752_s4 + $0xe60] ss:$16 sps:$4 sm:$0xff]  }
 0x26c   : > { %11061 = vmatpush1.bf16.msra.mxu0 %v16247_v12  ;;  %12127 = vmatpush1.bf16.msra.mxu1 %v16250_v13  ;;  %v16334_v12 = vld [vmem:[%s18752_s4 + $0xe68] ss:$16 sps:$4 sm:$0xff]   ;;  %v16339_v13 = vld [vmem:[%s18752_s4 + $0xe84] ss:$16 sps:$4 sm:$0xff]  }
 0x26d   : > { %11062 = vmatprep.subr.bf16.mxu0 %v16255_v14  ;;  %12128 = vmatprep.subr.bf16.mxu1 %v16258_v15  ;;  %v16342_v14 = vld [vmem:[%s18752_s4 + $0xe8c] ss:$16 sps:$4 sm:$0xff]   ;;  %v16337_v15 = vld [vmem:[%s18752_s4 + $0xe80] ss:$16 sps:$4 sm:$0xff]  }
 0x270   : > { %11063 = vmatpush1.bf16.msra.mxu0 %v16253_v16  ;;  %12129 = vmatpush1.bf16.msra.mxu1 %v16256_v17  ;;  %v16340_v16 = vld [vmem:[%s18752_s4 + $0xe88] ss:$16 sps:$4 sm:$0xff]   ;;  %v16345_v17 = vld [vmem:[%s18752_s4 + $0xea4] ss:$16 sps:$4 sm:$0xff]  }
 0x271   : > { %11064 = vmatprep.subr.bf16.mxu0 %v16261_v18  ;;  %12130 = vmatprep.subr.bf16.mxu1 %v16264_v19  ;;  %v16348_v18 = vld [vmem:[%s18752_s4 + $0xeac] ss:$16 sps:$4 sm:$0xff]   ;;  %v16343_v19 = vld [vmem:[%s18752_s4 + $0xea0] ss:$16 sps:$4 sm:$0xff]  }
 0x274   : > { %11065 = vmatpush1.bf16.msra.mxu0 %v16259_v20  ;;  %12131 = vmatpush1.bf16.msra.mxu1 %v16262_v21  ;;  %v16346_v20 = vld [vmem:[%s18752_s4 + $0xea8] ss:$16 sps:$4 sm:$0xff]   ;;  %v16351_v21 = vld [vmem:[%s18752_s4 + $0xec4] ss:$16 sps:$4 sm:$0xff]  }
 0x275   : > { %11066 = vmatprep.subr.bf16.mxu0 %v16267_v22  ;;  %12132 = vmatprep.subr.bf16.mxu1 %v16270_v23  ;;  %v16354_v22 = vld [vmem:[%s18752_s4 + $0xecc] ss:$16 sps:$4 sm:$0xff]   ;;  %v16349_v23 = vld [vmem:[%s18752_s4 + $0xec0] ss:$16 sps:$4 sm:$0xff]  }
 0x278   : > { %11067 = vmatpush1.bf16.msra.mxu0 %v16265_v25  ;;  %12133 = vmatpush1.bf16.msra.mxu1 %v16268_v24  ;;  %v16352_v25 = vld [vmem:[%s18752_s4 + $0xec8] ss:$16 sps:$4 sm:$0xff]   ;;  %v16357_v24 = vld [vmem:[%s18752_s4 + $0xee4] ss:$16 sps:$4 sm:$0xff]  }
 0x279   : > { %11068 = vmatprep.subr.bf16.mxu0 %v16273_v10  ;;  %12134 = vmatprep.subr.bf16.mxu1 %v16276_v28  ;;  %v16360_v10 = vld [vmem:[%s18752_s4 + $0xeec] ss:$16 sps:$4 sm:$0xff]   ;;  %v16355_v28 = vld [vmem:[%s18752_s4 + $0xee0] ss:$16 sps:$4 sm:$0xff]  }
 0x27c   : > { %11069 = vmatpush1.bf16.msra.mxu0 %v16271_v30  ;;  %12135 = vmatpush1.bf16.msra.mxu1 %v16274_v31  ;;  %v16358_v30 = vld [vmem:[%s18752_s4 + $0xee8] ss:$16 sps:$4 sm:$0xff]   ;;  %v16363_v31 = vld [vmem:[%s18752_s4 + $0xf04] ss:$16 sps:$4 sm:$0xff]  }
 0x27d   : > { %11070 = vmatprep.subr.bf16.mxu0 %v16279_v32  ;;  %12136 = vmatprep.subr.bf16.mxu1 %v16282_v34  ;;  %v16366_v32 = vld [vmem:[%s18752_s4 + $0xf0c] ss:$16 sps:$4 sm:$0xff]   ;;  %v16361_v34 = vld [vmem:[%s18752_s4 + $0xf00] ss:$16 sps:$4 sm:$0xff]  }
 0x280   : > { %11071 = vmatpush1.bf16.msra.mxu0 %v16277_v35  ;;  %12137 = vmatpush1.bf16.msra.mxu1 %v16280_v36  ;;  %v16364_v35 = vld [vmem:[%s18752_s4 + $0xf08] ss:$16 sps:$4 sm:$0xff]   ;;  %v16369_v36 = vld [vmem:[%s18752_s4 + $0xf24] ss:$16 sps:$4 sm:$0xff]  }
 0x281   : > { %11072 = vmatprep.subr.bf16.mxu0 %v16285_v27  ;;  %12138 = vmatprep.subr.bf16.mxu1 %v16288_v37  ;;  %v16372_v27 = vld [vmem:[%s18752_s4 + $0xf2c] ss:$16 sps:$4 sm:$0xff]   ;;  %v16367_v37 = vld [vmem:[%s18752_s4 + $0xf20] ss:$16 sps:$4 sm:$0xff]  }
 0x284   : > { %11073 = vmatpush1.bf16.msra.mxu0 %v16283_v38  ;;  %12139 = vmatpush1.bf16.msra.mxu1 %v16286_v39  ;;  %v16370_v38 = vld [vmem:[%s18752_s4 + $0xf28] ss:$16 sps:$4 sm:$0xff]   ;;  %v16375_v39 = vld [vmem:[%s18752_s4 + $0xf44] ss:$16 sps:$4 sm:$0xff]  }
 0x285   : > { %11074 = vmatprep.subr.bf16.mxu0 %v16291_v40  ;;  %12140 = vmatprep.subr.bf16.mxu1 %v16294_v29  ;;  %v16378_v40 = vld [vmem:[%s18752_s4 + $0xf4c] ss:$16 sps:$4 sm:$0xff]   ;;  %v16373_v29 = vld [vmem:[%s18752_s4 + $0xf40] ss:$16 sps:$4 sm:$0xff]  }
 0x288   : > { %11075 = vmatpush1.bf16.msra.mxu0 %v16289_v42  ;;  %12141 = vmatpush1.bf16.msra.mxu1 %v16292_v45  ;;  %v16376_v42 = vld [vmem:[%s18752_s4 + $0xf48] ss:$16 sps:$4 sm:$0xff]   ;;  %v16381_v45 = vld [vmem:[%s18752_s4 + $0xf64] ss:$16 sps:$4 sm:$0xff]  }
 0x289   : > { %11076 = vmatprep.subr.bf16.mxu0 %v16297_v46  ;;  %12142 = vmatprep.subr.bf16.mxu1 %v16300_v26  ;;  %v16384_v46 = vld [vmem:[%s18752_s4 + $0xf6c] ss:$16 sps:$4 sm:$0xff]   ;;  %v16379_v26 = vld [vmem:[%s18752_s4 + $0xf60] ss:$16 sps:$4 sm:$0xff]  }
 0x28c   : > { %11077 = vmatpush1.bf16.msra.mxu0 %v16295_v47  ;;  %12143 = vmatpush1.bf16.msra.mxu1 %v16298_v49  ;;  %v16382_v47 = vld [vmem:[%s18752_s4 + $0xf68] ss:$16 sps:$4 sm:$0xff]   ;;  %v16387_v49 = vld [vmem:[%s18752_s4 + $0xf84] ss:$16 sps:$4 sm:$0xff]  }
 0x28d   : > { %11078 = vmatprep.subr.bf16.mxu0 %v16303_v51  ;;  %12144 = vmatprep.subr.bf16.mxu1 %v16306_v52  ;;  %v16390_v51 = vld [vmem:[%s18752_s4 + $0xf8c] ss:$16 sps:$4 sm:$0xff]   ;;  %v16385_v52 = vld [vmem:[%s18752_s4 + $0xf80] ss:$16 sps:$4 sm:$0xff]  }
 0x290   : > { %11079 = vmatpush1.bf16.msra.mxu0 %v16301_v53  ;;  %12145 = vmatpush1.bf16.msra.mxu1 %v16304_v54  ;;  %v16393_v53 = vld [vmem:[%s18752_s4 + $0xfa4] ss:$16 sps:$4 sm:$0xff]   ;;  %v16396_v54 = vld [vmem:[%s18752_s4 + $0xfac] ss:$16 sps:$4 sm:$0xff]  }
 0x291   : > { %11080 = vmatprep.subr.bf16.mxu0 %v16309_v55  ;;  %12146 = vmatprep.subr.bf16.mxu1 %v16312_v56  ;;  %v16391_v55 = vld [vmem:[%s18752_s4 + $0xfa0] ss:$16 sps:$4 sm:$0xff]   ;;  %v16394_v56 = vld [vmem:[%s18752_s4 + $0xfa8] ss:$16 sps:$4 sm:$0xff]  }
 0x294   : > { %11081 = vmatpush1.bf16.msra.mxu0 %v16307_v43  ;;  %12147 = vmatpush1.bf16.msra.mxu1 %v16310_v58  ;;  %v16399_v43 = vld [vmem:[%s18752_s4 + $0xfc4] ss:$16 sps:$4 sm:$0xff]   ;;  %v16402_v58 = vld [vmem:[%s18752_s4 + $0xfcc] ss:$16 sps:$4 sm:$0xff]  }
 0x295   : > { %11091 = vmatprep.subr.bf16.mxu0 %v16315_v59  ;;  %12157 = vmatprep.subr.bf16.mxu1 %v16318_v41  ;;  %v19369_v59 = vld [vmem:[%s18785_s9 + $0x20] sm:$0xff]  ;;  %v16397_v41 = vld [vmem:[%s18752_s4 + $0xfc0] ss:$16 sps:$4 sm:$0xff]  }
 0x297   : > { %11083 = vmatmul.mubr.bf16.vlgmr.msra.gmra.mrb[0].mxu0 %v780_v61  ;;  %12149 = vmatmul.mubr.bf16.vlgmr.msra.gmra.mrb[0].mxu1 %v780_v61  ;;  %v16405_v61 = vld [vmem:[%s18752_s4 + $0xfe4] ss:$16 sps:$4 sm:$0xff]  }
 0x298   : > { %11092 = vmatpush1.bf16.msra.mxu0 %v16313_v62  ;;  %12158 = vmatpush1.bf16.msra.mxu1 %v16316_v63  ;;  %v16408_v62 = vld [vmem:[%s18752_s4 + $0xfec] ss:$16 sps:$4 sm:$0xff]   ;;  %v19377_v63 = vrot.slane %v19369_v59, %v18837_v50 }
 0x299   : > { %11093 = vmatprep.subr.bf16.mxu0 %v16321_v0  ;;  %12159 = vmatprep.subr.bf16.mxu1 %v16324_v1  ;;  %v16403_v0 = vld [vmem:[%s18752_s4 + $0xfe0] ss:$16 sps:$4 sm:$0xff]   ;;  %v16406_v1 = vld [vmem:[%s18752_s4 + $0xfe8] ss:$16 sps:$4 sm:$0xff]  }
 0x29a   : > { %11123 = vmatprep.mubr.bf16.mxu0 %v783_v2  ;;  %12189 = vmatprep.mubr.bf16.mxu1 %v783_v2  ;;  %v16412_v2 = vld [vmem:[%s18752_s4 + $0x1004] ss:$16 sps:$4 sm:$0xff]  }
 0x29c   : > { %11094 = vmatpush1.bf16.msra.mxu0 %v16319_v48  ;;  %12160 = vmatpush1.bf16.msra.mxu1 %v16322_v3  ;;  %v16415_v48 = vld [vmem:[%s18752_s4 + $0x100c] ss:$16 sps:$4 sm:$0xff]   ;;  %v578_v3 = vcombine.high %v19377_v63, %v19377_v63 }
 0x29d   : > { %11095 = vmatprep.subr.bf16.mxu0 %v16327_v4  ;;  %12161 = vmatprep.subr.bf16.mxu1 %v16330_v5  ;;  %v782_v4 = vpack.c.bf16 %v19302_v57, %v19302_v57  ;;  %v16410_v5 = vld [vmem:[%s18752_s4 + $0x1000] ss:$16 sps:$4 sm:$0xff]  }
 0x29e   : > { %v16416_v57 = vld [vmem:[%s18752_s4 + $0x1020] ss:$16 sps:$4 sm:$0xff]  }
 0x2a0   : > { %11096 = vmatpush1.bf16.msra.mxu0 %v16325_v6  ;;  %12162 = vmatpush1.bf16.msra.mxu1 %v16328_v7  ;;  %v16413_v6 = vld [vmem:[%s18752_s4 + $0x1008] ss:$16 sps:$4 sm:$0xff]   ;;  %v16418_v7 = vld [vmem:[%s18752_s4 + $0x1024] ss:$16 sps:$4 sm:$0xff]  }
 0x2a1   : > { %11097 = vmatprep.subr.bf16.mxu0 %v16333_v8  ;;  %12163 = vmatprep.subr.bf16.mxu1 %v16336_v9  ;;  %v16421_v8 = vld [vmem:[%s18752_s4 + $0x102c] ss:$16 sps:$4 sm:$0xff]   ;;  %v785_v9 = vpack.c.bf16 %v578_v3, %v578_v3  ;;  %v16494_v3 = vld [vmem:[%s18752_s4 + $0x11c0] ss:$16 sps:$4 sm:$0xff]  }
 0x2a4   : > { %11098 = vmatpush1.bf16.msra.mxu0 %v16331_v11  ;;  %12164 = vmatpush1.bf16.msra.mxu1 %v16334_v12  ;;  %v16419_v11 = vld [vmem:[%s18752_s4 + $0x1028] ss:$16 sps:$4 sm:$0xff]   ;;  %v16424_v12 = vld [vmem:[%s18752_s4 + $0x1044] ss:$16 sps:$4 sm:$0xff]  }
 0x2a5   : > { %11099 = vmatprep.subr.bf16.mxu0 %v16339_v13  ;;  %12165 = vmatprep.subr.bf16.mxu1 %v16342_v14  ;;  %v16427_v13 = vld [vmem:[%s18752_s4 + $0x104c] ss:$16 sps:$4 sm:$0xff]   ;;  %v16422_v14 = vld [vmem:[%s18752_s4 + $0x1040] ss:$16 sps:$4 sm:$0xff]  }
 0x2a8   : > { %11100 = vmatpush1.bf16.msra.mxu0 %v16337_v15  ;;  %12166 = vmatpush1.bf16.msra.mxu1 %v16340_v16  ;;  %v16425_v15 = vld [vmem:[%s18752_s4 + $0x1048] ss:$16 sps:$4 sm:$0xff]   ;;  %v16430_v16 = vld [vmem:[%s18752_s4 + $0x1064] ss:$16 sps:$4 sm:$0xff]  }
 0x2a9   : > { %11101 = vmatprep.subr.bf16.mxu0 %v16345_v17  ;;  %12167 = vmatprep.subr.bf16.mxu1 %v16348_v18  ;;  %v16433_v17 = vld [vmem:[%s18752_s4 + $0x106c] ss:$16 sps:$4 sm:$0xff]   ;;  %v16428_v18 = vld [vmem:[%s18752_s4 + $0x1060] ss:$16 sps:$4 sm:$0xff]  }
 0x2ac   : > { %11102 = vmatpush1.bf16.msra.mxu0 %v16343_v19  ;;  %12168 = vmatpush1.bf16.msra.mxu1 %v16346_v20  ;;  %v16431_v19 = vld [vmem:[%s18752_s4 + $0x1068] ss:$16 sps:$4 sm:$0xff]   ;;  %v16436_v20 = vld [vmem:[%s18752_s4 + $0x1084] ss:$16 sps:$4 sm:$0xff]  }
 0x2ad   : > { %11103 = vmatprep.subr.bf16.mxu0 %v16351_v21  ;;  %12169 = vmatprep.subr.bf16.mxu1 %v16354_v22  ;;  %v16439_v21 = vld [vmem:[%s18752_s4 + $0x108c] ss:$16 sps:$4 sm:$0xff]   ;;  %v16434_v22 = vld [vmem:[%s18752_s4 + $0x1080] ss:$16 sps:$4 sm:$0xff]  }
 0x2b0   : > { %11104 = vmatpush1.bf16.msra.mxu0 %v16349_v23  ;;  %12170 = vmatpush1.bf16.msra.mxu1 %v16352_v25  ;;  %v16437_v23 = vld [vmem:[%s18752_s4 + $0x1088] ss:$16 sps:$4 sm:$0xff]   ;;  %v16442_v25 = vld [vmem:[%s18752_s4 + $0x10a4] ss:$16 sps:$4 sm:$0xff]  }
 0x2b1   : > { %11105 = vmatprep.subr.bf16.mxu0 %v16357_v24  ;;  %12171 = vmatprep.subr.bf16.mxu1 %v16360_v10  ;;  %v16445_v24 = vld [vmem:[%s18752_s4 + $0x10ac] ss:$16 sps:$4 sm:$0xff]   ;;  %v16440_v10 = vld [vmem:[%s18752_s4 + $0x10a0] ss:$16 sps:$4 sm:$0xff]  }
 0x2b4   : > { %11106 = vmatpush1.bf16.msra.mxu0 %v16355_v28  ;;  %12172 = vmatpush1.bf16.msra.mxu1 %v16358_v30  ;;  %v16443_v28 = vld [vmem:[%s18752_s4 + $0x10a8] ss:$16 sps:$4 sm:$0xff]   ;;  %v16448_v30 = vld [vmem:[%s18752_s4 + $0x10c4] ss:$16 sps:$4 sm:$0xff]  }
 0x2b5   : > { %11107 = vmatprep.subr.bf16.mxu0 %v16363_v31  ;;  %12173 = vmatprep.subr.bf16.mxu1 %v16366_v32  ;;  %v16451_v31 = vld [vmem:[%s18752_s4 + $0x10cc] ss:$16 sps:$4 sm:$0xff]   ;;  %v16446_v32 = vld [vmem:[%s18752_s4 + $0x10c0] ss:$16 sps:$4 sm:$0xff]  }
 0x2b8   : > { %11108 = vmatpush1.bf16.msra.mxu0 %v16361_v34  ;;  %12174 = vmatpush1.bf16.msra.mxu1 %v16364_v35  ;;  %v16449_v34 = vld [vmem:[%s18752_s4 + $0x10c8] ss:$16 sps:$4 sm:$0xff]   ;;  %v16454_v35 = vld [vmem:[%s18752_s4 + $0x10e4] ss:$16 sps:$4 sm:$0xff]  }
 0x2b9   : > { %11109 = vmatprep.subr.bf16.mxu0 %v16369_v36  ;;  %12175 = vmatprep.subr.bf16.mxu1 %v16372_v27  ;;  %v16457_v36 = vld [vmem:[%s18752_s4 + $0x10ec] ss:$16 sps:$4 sm:$0xff]   ;;  %v16452_v27 = vld [vmem:[%s18752_s4 + $0x10e0] ss:$16 sps:$4 sm:$0xff]  }
 0x2bc   : > { %11110 = vmatpush1.bf16.msra.mxu0 %v16367_v37  ;;  %12176 = vmatpush1.bf16.msra.mxu1 %v16370_v38  ;;  %v16455_v37 = vld [vmem:[%s18752_s4 + $0x10e8] ss:$16 sps:$4 sm:$0xff]   ;;  %v16460_v38 = vld [vmem:[%s18752_s4 + $0x1104] ss:$16 sps:$4 sm:$0xff]  }
 0x2bd   : > { %11111 = vmatprep.subr.bf16.mxu0 %v16375_v39  ;;  %12177 = vmatprep.subr.bf16.mxu1 %v16378_v40  ;;  %v16463_v39 = vld [vmem:[%s18752_s4 + $0x110c] ss:$16 sps:$4 sm:$0xff]   ;;  %v16458_v40 = vld [vmem:[%s18752_s4 + $0x1100] ss:$16 sps:$4 sm:$0xff]  }
 0x2c0   : > { %11112 = vmatpush1.bf16.msra.mxu0 %v16373_v29  ;;  %12178 = vmatpush1.bf16.msra.mxu1 %v16376_v42  ;;  %v16461_v29 = vld [vmem:[%s18752_s4 + $0x1108] ss:$16 sps:$4 sm:$0xff]   ;;  %v16466_v42 = vld [vmem:[%s18752_s4 + $0x1124] ss:$16 sps:$4 sm:$0xff]  }
 0x2c1   : > { %11113 = vmatprep.subr.bf16.mxu0 %v16381_v45  ;;  %12179 = vmatprep.subr.bf16.mxu1 %v16384_v46  ;;  %v16469_v45 = vld [vmem:[%s18752_s4 + $0x112c] ss:$16 sps:$4 sm:$0xff]   ;;  %v16464_v46 = vld [vmem:[%s18752_s4 + $0x1120] ss:$16 sps:$4 sm:$0xff]  }
 0x2c4   : > { %11114 = vmatpush1.bf16.msra.mxu0 %v16379_v26  ;;  %12180 = vmatpush1.bf16.msra.mxu1 %v16382_v47  ;;  %v16467_v26 = vld [vmem:[%s18752_s4 + $0x1128] ss:$16 sps:$4 sm:$0xff]   ;;  %v16472_v47 = vld [vmem:[%s18752_s4 + $0x1144] ss:$16 sps:$4 sm:$0xff]  }
 0x2c5   : > { %11115 = vmatprep.subr.bf16.mxu0 %v16387_v49  ;;  %12181 = vmatprep.subr.bf16.mxu1 %v16390_v51  ;;  %v16475_v49 = vld [vmem:[%s18752_s4 + $0x114c] ss:$16 sps:$4 sm:$0xff]   ;;  %v16470_v51 = vld [vmem:[%s18752_s4 + $0x1140] ss:$16 sps:$4 sm:$0xff]  }
 0x2c8   : > { %11116 = vmatpush1.bf16.msra.mxu0 %v16385_v52  ;;  %12182 = vmatpush1.bf16.msra.mxu1 %v16388_v33  ;;  %v16473_v52 = vld [vmem:[%s18752_s4 + $0x1148] ss:$16 sps:$4 sm:$0xff]   ;;  %v16478_v33 = vld [vmem:[%s18752_s4 + $0x1164] ss:$16 sps:$4 sm:$0xff]  }
 0x2c9   : > { %11117 = vmatprep.subr.bf16.mxu0 %v16393_v53  ;;  %12183 = vmatprep.subr.bf16.mxu1 %v16396_v54  ;;  %v16481_v53 = vld [vmem:[%s18752_s4 + $0x116c] ss:$16 sps:$4 sm:$0xff]   ;;  %v16476_v54 = vld [vmem:[%s18752_s4 + $0x1160] ss:$16 sps:$4 sm:$0xff]  }
 0x2cc   : > { %11118 = vmatpush1.bf16.msra.mxu0 %v16391_v55  ;;  %12184 = vmatpush1.bf16.msra.mxu1 %v16394_v56  ;;  %v16479_v55 = vld [vmem:[%s18752_s4 + $0x1168] ss:$16 sps:$4 sm:$0xff]   ;;  %v16484_v56 = vld [vmem:[%s18752_s4 + $0x1184] ss:$16 sps:$4 sm:$0xff]  }
 0x2cd   : > { %11119 = vmatprep.subr.bf16.mxu0 %v16399_v43  ;;  %12185 = vmatprep.subr.bf16.mxu1 %v16402_v58  ;;  %v16487_v43 = vld [vmem:[%s18752_s4 + $0x118c] ss:$16 sps:$4 sm:$0xff]   ;;  %v16482_v58 = vld [vmem:[%s18752_s4 + $0x1180] ss:$16 sps:$4 sm:$0xff]  }
 0x2d0   : > { %11120 = vmatpush1.bf16.msra.mxu0 %v16397_v41  ;;  %12186 = vmatpush1.bf16.msra.mxu1 %v16400_v60  ;;  %v16485_v41 = vld [vmem:[%s18752_s4 + $0x1188] ss:$16 sps:$4 sm:$0xff]   ;;  %v16490_v60 = vld [vmem:[%s18752_s4 + $0x11a4] ss:$16 sps:$4 sm:$0xff]  }
 0x2d1   : > { %11121 = vmatprep.subr.bf16.mxu0 %v16405_v61  ;;  %12187 = vmatprep.subr.bf16.mxu1 %v16408_v62  ;;  %v16493_v61 = vld [vmem:[%s18752_s4 + $0x11ac] ss:$16 sps:$4 sm:$0xff]   ;;  %v16488_v62 = vld [vmem:[%s18752_s4 + $0x11a0] ss:$16 sps:$4 sm:$0xff]  }
 0x2d4   : > { %11122 = vmatpush1.bf16.msra.mxu0 %v16403_v0  ;;  %12188 = vmatpush1.bf16.msra.mxu1 %v16406_v1  ;;  %v16491_v0 = vld [vmem:[%s18752_s4 + $0x11a8] ss:$16 sps:$4 sm:$0xff]   ;;  %v16496_v1 = vld [vmem:[%s18752_s4 + $0x11c4] ss:$16 sps:$4 sm:$0xff]  }
 0x2d5   : > { %11132 = vmatprep.subr.bf16.mxu0 %v16412_v2  ;;  %12198 = vmatprep.subr.bf16.mxu1 %v16415_v48  ;;  %v16499_v2 = vld [vmem:[%s18752_s4 + $0x11cc] ss:$16 sps:$4 sm:$0xff]   ;;  %v563_v48 = vcombine.high %v19369_v59, %v19369_v59  ;;  %v16500_v59 = vld [vmem:[%s18752_s4 + $0x11e0] ss:$16 sps:$4 sm:$0xff]  }
 0x2d7   : > { %11124 = vmatmul.mubr.bf16.vlgmr.msra.gmra.mrb[0].mxu0 %v782_v4  ;;  %12190 = vmatmul.mubr.bf16.vlgmr.msra.gmra.mrb[0].mxu1 %v782_v4  ;;  %v16497_v4 = vld [vmem:[%s18752_s4 + $0x11c8] ss:$16 sps:$4 sm:$0xff]  }
 0x2d8   : > { %11133 = vmatpush1.bf16.msra.mxu0 %v16410_v5  ;;  %12199 = vmatpush1.bf16.msra.mxu1 %v16413_v6  ;;  %v16502_v5 = vld [vmem:[%s18752_s4 + $0x11e4] ss:$16 sps:$4 sm:$0xff]   ;;  %v16505_v6 = vld [vmem:[%s18752_s4 + $0x11ec] ss:$16 sps:$4 sm:$0xff]  }
 0x2d9   : > { %11134 = vmatprep.subr.bf16.mxu0 %v16418_v7  ;;  %12200 = vmatprep.subr.bf16.mxu1 %v16421_v8  ;;  %v19450_v7 = vrot.slane %v563_v48, %v18837_v50  ;;  %v16503_v8 = vld [vmem:[%s18752_s4 + $0x11e8] ss:$16 sps:$4 sm:$0xff]  }
 0x2da   : > { %11164 = vmatprep.mubr.bf16.mxu0 %v785_v9  ;;  %12230 = vmatprep.mubr.bf16.mxu1 %v785_v9  ;;  %v16508_v9 = vld [vmem:[%s18752_s4 + $0x1204] ss:$16 sps:$4 sm:$0xff]   ;;  %v16581_v48 = vld [vmem:[%s18752_s4 + $0x1388] ss:$16 sps:$4 sm:$0xff]  }
 0x2dc   : > { %11135 = vmatpush1.bf16.msra.mxu0 %v16416_v57  ;;  %12201 = vmatpush1.bf16.msra.mxu1 %v16419_v11  ;;  %v16511_v57 = vld [vmem:[%s18752_s4 + $0x120c] ss:$16 sps:$4 sm:$0xff]   ;;  %v579_v11 = vcombine.high %v19450_v7, %v19450_v7 }
 0x2dd   : > { %11136 = vmatprep.subr.bf16.mxu0 %v16424_v12  ;;  %12202 = vmatprep.subr.bf16.mxu1 %v16427_v13  ;;  %v784_v12 = vpack.c.bf16 %v19377_v63, %v19377_v63  ;;  %v16506_v13 = vld [vmem:[%s18752_s4 + $0x1200] ss:$16 sps:$4 sm:$0xff]  }
 0x2de   : > { %v16512_v63 = vld [vmem:[%s18752_s4 + $0x1220] ss:$16 sps:$4 sm:$0xff]  }
 0x2e0   : > { %11137 = vmatpush1.bf16.msra.mxu0 %v16422_v14  ;;  %12203 = vmatpush1.bf16.msra.mxu1 %v16425_v15  ;;  %v16509_v14 = vld [vmem:[%s18752_s4 + $0x1208] ss:$16 sps:$4 sm:$0xff]   ;;  %v16514_v15 = vld [vmem:[%s18752_s4 + $0x1224] ss:$16 sps:$4 sm:$0xff]  }
 0x2e1   : > { %11138 = vmatprep.subr.bf16.mxu0 %v16430_v16  ;;  %12204 = vmatprep.subr.bf16.mxu1 %v16433_v17  ;;  %v16517_v16 = vld [vmem:[%s18752_s4 + $0x122c] ss:$16 sps:$4 sm:$0xff]   ;;  %v787_v17 = vpack.c.bf16 %v579_v11, %v579_v11  ;;  %v16593_v11 = vld [vmem:[%s18752_s4 + $0x13c8] ss:$16 sps:$4 sm:$0xff]  }
 0x2e4   : > { %11139 = vmatpush1.bf16.msra.mxu0 %v16428_v18  ;;  %12205 = vmatpush1.bf16.msra.mxu1 %v16431_v19  ;;  %v16515_v18 = vld [vmem:[%s18752_s4 + $0x1228] ss:$16 sps:$4 sm:$0xff]   ;;  %v16520_v19 = vld [vmem:[%s18752_s4 + $0x1244] ss:$16 sps:$4 sm:$0xff]  }
 0x2e5   : > { %11140 = vmatprep.subr.bf16.mxu0 %v16436_v20  ;;  %12206 = vmatprep.subr.bf16.mxu1 %v16439_v21  ;;  %v16523_v20 = vld [vmem:[%s18752_s4 + $0x124c] ss:$16 sps:$4 sm:$0xff]   ;;  %v16518_v21 = vld [vmem:[%s18752_s4 + $0x1240] ss:$16 sps:$4 sm:$0xff]  }
 0x2e8   : > { %11141 = vmatpush1.bf16.msra.mxu0 %v16434_v22  ;;  %12207 = vmatpush1.bf16.msra.mxu1 %v16437_v23  ;;  %v16521_v22 = vld [vmem:[%s18752_s4 + $0x1248] ss:$16 sps:$4 sm:$0xff]   ;;  %v16526_v23 = vld [vmem:[%s18752_s4 + $0x1264] ss:$16 sps:$4 sm:$0xff]  }
 0x2e9   : > { %11142 = vmatprep.subr.bf16.mxu0 %v16442_v25  ;;  %12208 = vmatprep.subr.bf16.mxu1 %v16445_v24  ;;  %v16529_v25 = vld [vmem:[%s18752_s4 + $0x126c] ss:$16 sps:$4 sm:$0xff]   ;;  %v16524_v24 = vld [vmem:[%s18752_s4 + $0x1260] ss:$16 sps:$4 sm:$0xff]  }
 0x2ec   : > { %11143 = vmatpush1.bf16.msra.mxu0 %v16440_v10  ;;  %12209 = vmatpush1.bf16.msra.mxu1 %v16443_v28  ;;  %v16527_v10 = vld [vmem:[%s18752_s4 + $0x1268] ss:$16 sps:$4 sm:$0xff]   ;;  %v16532_v28 = vld [vmem:[%s18752_s4 + $0x1284] ss:$16 sps:$4 sm:$0xff]  }
 0x2ed   : > { %11144 = vmatprep.subr.bf16.mxu0 %v16448_v30  ;;  %12210 = vmatprep.subr.bf16.mxu1 %v16451_v31  ;;  %v16535_v30 = vld [vmem:[%s18752_s4 + $0x128c] ss:$16 sps:$4 sm:$0xff]   ;;  %v16530_v31 = vld [vmem:[%s18752_s4 + $0x1280] ss:$16 sps:$4 sm:$0xff]  }
 0x2f0   : > { %11145 = vmatpush1.bf16.msra.mxu0 %v16446_v32  ;;  %12211 = vmatpush1.bf16.msra.mxu1 %v16449_v34  ;;  %v16533_v32 = vld [vmem:[%s18752_s4 + $0x1288] ss:$16 sps:$4 sm:$0xff]   ;;  %v16538_v34 = vld [vmem:[%s18752_s4 + $0x12a4] ss:$16 sps:$4 sm:$0xff]  }
 0x2f1   : > { %11146 = vmatprep.subr.bf16.mxu0 %v16454_v35  ;;  %12212 = vmatprep.subr.bf16.mxu1 %v16457_v36  ;;  %v16541_v35 = vld [vmem:[%s18752_s4 + $0x12ac] ss:$16 sps:$4 sm:$0xff]   ;;  %v16536_v36 = vld [vmem:[%s18752_s4 + $0x12a0] ss:$16 sps:$4 sm:$0xff]  }
 0x2f4   : > { %11147 = vmatpush1.bf16.msra.mxu0 %v16452_v27  ;;  %12213 = vmatpush1.bf16.msra.mxu1 %v16455_v37  ;;  %v16539_v27 = vld [vmem:[%s18752_s4 + $0x12a8] ss:$16 sps:$4 sm:$0xff]   ;;  %v16544_v37 = vld [vmem:[%s18752_s4 + $0x12c4] ss:$16 sps:$4 sm:$0xff]  }
 0x2f5   : > { %11148 = vmatprep.subr.bf16.mxu0 %v16460_v38  ;;  %12214 = vmatprep.subr.bf16.mxu1 %v16463_v39  ;;  %v16547_v38 = vld [vmem:[%s18752_s4 + $0x12cc] ss:$16 sps:$4 sm:$0xff]   ;;  %v16542_v39 = vld [vmem:[%s18752_s4 + $0x12c0] ss:$16 sps:$4 sm:$0xff]  }
 0x2f8   : > { %11149 = vmatpush1.bf16.msra.mxu0 %v16458_v40  ;;  %12215 = vmatpush1.bf16.msra.mxu1 %v16461_v29  ;;  %v16545_v40 = vld [vmem:[%s18752_s4 + $0x12c8] ss:$16 sps:$4 sm:$0xff]   ;;  %v16550_v29 = vld [vmem:[%s18752_s4 + $0x12e4] ss:$16 sps:$4 sm:$0xff]  }
 0x2f9   : > { %11150 = vmatprep.subr.bf16.mxu0 %v16466_v42  ;;  %12216 = vmatprep.subr.bf16.mxu1 %v16469_v45  ;;  %v16553_v42 = vld [vmem:[%s18752_s4 + $0x12ec] ss:$16 sps:$4 sm:$0xff]   ;;  %v16548_v45 = vld [vmem:[%s18752_s4 + $0x12e0] ss:$16 sps:$4 sm:$0xff]  }
 0x2fc   : > { %11151 = vmatpush1.bf16.msra.mxu0 %v16464_v46  ;;  %12217 = vmatpush1.bf16.msra.mxu1 %v16467_v26  ;;  %v16551_v46 = vld [vmem:[%s18752_s4 + $0x12e8] ss:$16 sps:$4 sm:$0xff]   ;;  %v16556_v26 = vld [vmem:[%s18752_s4 + $0x1304] ss:$16 sps:$4 sm:$0xff]  }
 0x2fd   : > { %11152 = vmatprep.subr.bf16.mxu0 %v16472_v47  ;;  %12218 = vmatprep.subr.bf16.mxu1 %v16475_v49  ;;  %v16559_v47 = vld [vmem:[%s18752_s4 + $0x130c] ss:$16 sps:$4 sm:$0xff]   ;;  %v16554_v49 = vld [vmem:[%s18752_s4 + $0x1300] ss:$16 sps:$4 sm:$0xff]  }
 0x300   : > { %11153 = vmatpush1.bf16.msra.mxu0 %v16470_v51  ;;  %12219 = vmatpush1.bf16.msra.mxu1 %v16473_v52  ;;  %v16557_v51 = vld [vmem:[%s18752_s4 + $0x1308] ss:$16 sps:$4 sm:$0xff]   ;;  %v16562_v52 = vld [vmem:[%s18752_s4 + $0x1324] ss:$16 sps:$4 sm:$0xff]  }
 0x301   : > { %11154 = vmatprep.subr.bf16.mxu0 %v16478_v33  ;;  %12220 = vmatprep.subr.bf16.mxu1 %v16481_v53  ;;  %v16565_v33 = vld [vmem:[%s18752_s4 + $0x132c] ss:$16 sps:$4 sm:$0xff]   ;;  %v16560_v53 = vld [vmem:[%s18752_s4 + $0x1320] ss:$16 sps:$4 sm:$0xff]  }
 0x304   : > { %11155 = vmatpush1.bf16.msra.mxu0 %v16476_v54  ;;  %12221 = vmatpush1.bf16.msra.mxu1 %v16479_v55  ;;  %v16563_v54 = vld [vmem:[%s18752_s4 + $0x1328] ss:$16 sps:$4 sm:$0xff]   ;;  %v16568_v55 = vld [vmem:[%s18752_s4 + $0x1344] ss:$16 sps:$4 sm:$0xff]  }
 0x305   : > { %11156 = vmatprep.subr.bf16.mxu0 %v16484_v56  ;;  %12222 = vmatprep.subr.bf16.mxu1 %v16487_v43  ;;  %v16571_v56 = vld [vmem:[%s18752_s4 + $0x134c] ss:$16 sps:$4 sm:$0xff]   ;;  %v16566_v43 = vld [vmem:[%s18752_s4 + $0x1340] ss:$16 sps:$4 sm:$0xff]  }
 0x308   : > { %11157 = vmatpush1.bf16.msra.mxu0 %v16482_v58  ;;  %12223 = vmatpush1.bf16.msra.mxu1 %v16485_v41  ;;  %v16569_v58 = vld [vmem:[%s18752_s4 + $0x1348] ss:$16 sps:$4 sm:$0xff]   ;;  %v16574_v41 = vld [vmem:[%s18752_s4 + $0x1364] ss:$16 sps:$4 sm:$0xff]  }
 0x309   : > { %11158 = vmatprep.subr.bf16.mxu0 %v16490_v60  ;;  %12224 = vmatprep.subr.bf16.mxu1 %v16493_v61  ;;  %v16577_v60 = vld [vmem:[%s18752_s4 + $0x136c] ss:$16 sps:$4 sm:$0xff]   ;;  %v16572_v61 = vld [vmem:[%s18752_s4 + $0x1360] ss:$16 sps:$4 sm:$0xff]  }
 0x30c   : > { %11159 = vmatpush1.bf16.msra.mxu0 %v16488_v62  ;;  %12225 = vmatpush1.bf16.msra.mxu1 %v16491_v0  ;;  %v16575_v62 = vld [vmem:[%s18752_s4 + $0x1368] ss:$16 sps:$4 sm:$0xff]   ;;  %v16580_v0 = vld [vmem:[%s18752_s4 + $0x1384] ss:$16 sps:$4 sm:$0xff]  }
 0x30d   : > { %11160 = vmatprep.subr.bf16.mxu0 %v16496_v1  ;;  %12226 = vmatprep.subr.bf16.mxu1 %v16499_v2  ;;  %v16583_v1 = vld [vmem:[%s18752_s4 + $0x138c] ss:$16 sps:$4 sm:$0xff]   ;;  %v16578_v2 = vld [vmem:[%s18752_s4 + $0x1380] ss:$16 sps:$4 sm:$0xff]  }
 0x310   : > { %11161 = vmatpush1.bf16.msra.mxu0 %v16494_v3  ;;  %12227 = vmatpush1.bf16.msra.mxu1 %v16497_v4  ;;  %v16586_v3 = vld [vmem:[%s18752_s4 + $0x13a4] ss:$16 sps:$4 sm:$0xff]   ;;  %v16589_v4 = vld [vmem:[%s18752_s4 + $0x13ac] ss:$16 sps:$4 sm:$0xff]  }
 0x311   : > { %11162 = vmatprep.subr.bf16.mxu0 %v16502_v5  ;;  %12228 = vmatprep.subr.bf16.mxu1 %v16505_v6  ;;  %v16584_v5 = vld [vmem:[%s18752_s4 + $0x13a0] ss:$16 sps:$4 sm:$0xff]   ;;  %v16587_v6 = vld [vmem:[%s18752_s4 + $0x13a8] ss:$16 sps:$4 sm:$0xff]  }
 0x314   : > { %11163 = vmatpush1.bf16.msra.mxu0 %v16500_v59  ;;  %12229 = vmatpush1.bf16.msra.mxu1 %v16503_v8  ;;  %v16592_v59 = vld [vmem:[%s18752_s4 + $0x13c4] ss:$16 sps:$4 sm:$0xff]   ;;  %v16595_v8 = vld [vmem:[%s18752_s4 + $0x13cc] ss:$16 sps:$4 sm:$0xff]  }
 0x315   : > { %11173 = vmatprep.subr.bf16.mxu0 %v16508_v9  ;;  %12239 = vmatprep.subr.bf16.mxu1 %v16511_v57  ;;  %v19517_v9 = vld [vmem:[%s18785_s9 + $0x28] sm:$0xff] }
 0x316   : > { %v16590_v57 = vld [vmem:[%s18752_s4 + $0x13c0] ss:$16 sps:$4 sm:$0xff]  }
 0x317   : > { %11165 = vmatmul.mubr.bf16.vlgmr.msra.gmra.mrb[0].mxu0 %v784_v12  ;;  %12231 = vmatmul.mubr.bf16.vlgmr.msra.gmra.mrb[0].mxu1 %v784_v12  ;;  %v16598_v12 = vld [vmem:[%s18752_s4 + $0x13e4] ss:$16 sps:$4 sm:$0xff]  }
 0x318   : > { %11174 = vmatpush1.bf16.msra.mxu0 %v16506_v13  ;;  %12240 = vmatpush1.bf16.msra.mxu1 %v16509_v14  ;;  %v16601_v13 = vld [vmem:[%s18752_s4 + $0x13ec] ss:$16 sps:$4 sm:$0xff]   ;;  %v19525_v14 = vrot.slane %v19517_v9, %v18837_v50 }
 0x319   : > { %11175 = vmatprep.subr.bf16.mxu0 %v16514_v15  ;;  %12241 = vmatprep.subr.bf16.mxu1 %v16517_v16  ;;  %v16596_v15 = vld [vmem:[%s18752_s4 + $0x13e0] ss:$16 sps:$4 sm:$0xff]   ;;  %v16599_v16 = vld [vmem:[%s18752_s4 + $0x13e8] ss:$16 sps:$4 sm:$0xff]  }
 0x31a   : > { %11205 = vmatprep.mubr.bf16.mxu0 %v787_v17  ;;  %12271 = vmatprep.mubr.bf16.mxu1 %v787_v17  ;;  %v16605_v17 = vld [vmem:[%s18752_s4 + $0x1404] ss:$16 sps:$4 sm:$0xff]  }
 0x31c   : > { %11176 = vmatpush1.bf16.msra.mxu0 %v16512_v63  ;;  %12242 = vmatpush1.bf16.msra.mxu1 %v16515_v18  ;;  %v16608_v63 = vld [vmem:[%s18752_s4 + $0x140c] ss:$16 sps:$4 sm:$0xff]   ;;  %v595_v18 = vcombine.high %v19525_v14, %v19525_v14 }
 0x31d   : > { %11177 = vmatprep.subr.bf16.mxu0 %v16520_v19  ;;  %12243 = vmatprep.subr.bf16.mxu1 %v16523_v20  ;;  %v786_v19 = vpack.c.bf16 %v19450_v7, %v19450_v7  ;;  %v16603_v20 = vld [vmem:[%s18752_s4 + $0x1400] ss:$16 sps:$4 sm:$0xff]  }
 0x31e   : > { %v16609_v7 = vld [vmem:[%s18752_s4 + $0x1420] ss:$16 sps:$4 sm:$0xff]  }
 0x320   : > { %11178 = vmatpush1.bf16.msra.mxu0 %v16518_v21  ;;  %12244 = vmatpush1.bf16.msra.mxu1 %v16521_v22  ;;  %v16606_v21 = vld [vmem:[%s18752_s4 + $0x1408] ss:$16 sps:$4 sm:$0xff]   ;;  %v16611_v22 = vld [vmem:[%s18752_s4 + $0x1424] ss:$16 sps:$4 sm:$0xff]  }
 0x321   : > { %11179 = vmatprep.subr.bf16.mxu0 %v16526_v23  ;;  %12245 = vmatprep.subr.bf16.mxu1 %v16529_v25  ;;  %v16614_v23 = vld [vmem:[%s18752_s4 + $0x142c] ss:$16 sps:$4 sm:$0xff]   ;;  %v789_v25 = vpack.c.bf16 %v595_v18, %v595_v18  ;;  %v16687_v18 = vld [vmem:[%s18752_s4 + $0x15c0] ss:$16 sps:$4 sm:$0xff]  }
 0x324   : > { %11180 = vmatpush1.bf16.msra.mxu0 %v16524_v24  ;;  %12246 = vmatpush1.bf16.msra.mxu1 %v16527_v10  ;;  %v16612_v24 = vld [vmem:[%s18752_s4 + $0x1428] ss:$16 sps:$4 sm:$0xff]   ;;  %v16617_v10 = vld [vmem:[%s18752_s4 + $0x1444] ss:$16 sps:$4 sm:$0xff]  }
 0x325   : > { %11181 = vmatprep.subr.bf16.mxu0 %v16532_v28  ;;  %12247 = vmatprep.subr.bf16.mxu1 %v16535_v30  ;;  %v16620_v28 = vld [vmem:[%s18752_s4 + $0x144c] ss:$16 sps:$4 sm:$0xff]   ;;  %v16615_v30 = vld [vmem:[%s18752_s4 + $0x1440] ss:$16 sps:$4 sm:$0xff]  }
 0x328   : > { %11182 = vmatpush1.bf16.msra.mxu0 %v16530_v31  ;;  %12248 = vmatpush1.bf16.msra.mxu1 %v16533_v32  ;;  %v16618_v31 = vld [vmem:[%s18752_s4 + $0x1448] ss:$16 sps:$4 sm:$0xff]   ;;  %v16623_v32 = vld [vmem:[%s18752_s4 + $0x1464] ss:$16 sps:$4 sm:$0xff]  }
 0x329   : > { %11183 = vmatprep.subr.bf16.mxu0 %v16538_v34  ;;  %12249 = vmatprep.subr.bf16.mxu1 %v16541_v35  ;;  %v16626_v34 = vld [vmem:[%s18752_s4 + $0x146c] ss:$16 sps:$4 sm:$0xff]   ;;  %v16621_v35 = vld [vmem:[%s18752_s4 + $0x1460] ss:$16 sps:$4 sm:$0xff]  }
 0x32c   : > { %11184 = vmatpush1.bf16.msra.mxu0 %v16536_v36  ;;  %12250 = vmatpush1.bf16.msra.mxu1 %v16539_v27  ;;  %v16624_v36 = vld [vmem:[%s18752_s4 + $0x1468] ss:$16 sps:$4 sm:$0xff]   ;;  %v16629_v27 = vld [vmem:[%s18752_s4 + $0x1484] ss:$16 sps:$4 sm:$0xff]  }
 0x32d   : > { %11185 = vmatprep.subr.bf16.mxu0 %v16544_v37  ;;  %12251 = vmatprep.subr.bf16.mxu1 %v16547_v38  ;;  %v16632_v37 = vld [vmem:[%s18752_s4 + $0x148c] ss:$16 sps:$4 sm:$0xff]   ;;  %v16627_v38 = vld [vmem:[%s18752_s4 + $0x1480] ss:$16 sps:$4 sm:$0xff]  }
 0x330   : > { %11186 = vmatpush1.bf16.msra.mxu0 %v16542_v39  ;;  %12252 = vmatpush1.bf16.msra.mxu1 %v16545_v40  ;;  %v16630_v39 = vld [vmem:[%s18752_s4 + $0x1488] ss:$16 sps:$4 sm:$0xff]   ;;  %v16635_v40 = vld [vmem:[%s18752_s4 + $0x14a4] ss:$16 sps:$4 sm:$0xff]  }
 0x331   : > { %11187 = vmatprep.subr.bf16.mxu0 %v16550_v29  ;;  %12253 = vmatprep.subr.bf16.mxu1 %v16553_v42  ;;  %v16638_v29 = vld [vmem:[%s18752_s4 + $0x14ac] ss:$16 sps:$4 sm:$0xff]   ;;  %v16633_v42 = vld [vmem:[%s18752_s4 + $0x14a0] ss:$16 sps:$4 sm:$0xff]  }
 0x334   : > { %11188 = vmatpush1.bf16.msra.mxu0 %v16548_v45  ;;  %12254 = vmatpush1.bf16.msra.mxu1 %v16551_v46  ;;  %v16636_v45 = vld [vmem:[%s18752_s4 + $0x14a8] ss:$16 sps:$4 sm:$0xff]   ;;  %v16641_v46 = vld [vmem:[%s18752_s4 + $0x14c4] ss:$16 sps:$4 sm:$0xff]  }
 0x335   : > { %11189 = vmatprep.subr.bf16.mxu0 %v16556_v26  ;;  %12255 = vmatprep.subr.bf16.mxu1 %v16559_v47  ;;  %v16644_v26 = vld [vmem:[%s18752_s4 + $0x14cc] ss:$16 sps:$4 sm:$0xff]   ;;  %v16639_v47 = vld [vmem:[%s18752_s4 + $0x14c0] ss:$16 sps:$4 sm:$0xff]  }
 0x338   : > { %11190 = vmatpush1.bf16.msra.mxu0 %v16554_v49  ;;  %12256 = vmatpush1.bf16.msra.mxu1 %v16557_v51  ;;  %v16642_v49 = vld [vmem:[%s18752_s4 + $0x14c8] ss:$16 sps:$4 sm:$0xff]   ;;  %v16647_v51 = vld [vmem:[%s18752_s4 + $0x14e4] ss:$16 sps:$4 sm:$0xff]  }
 0x339   : > { %11191 = vmatprep.subr.bf16.mxu0 %v16562_v52  ;;  %12257 = vmatprep.subr.bf16.mxu1 %v16565_v33  ;;  %v16650_v52 = vld [vmem:[%s18752_s4 + $0x14ec] ss:$16 sps:$4 sm:$0xff]   ;;  %v16645_v33 = vld [vmem:[%s18752_s4 + $0x14e0] ss:$16 sps:$4 sm:$0xff]  }
 0x33c   : > { %11192 = vmatpush1.bf16.msra.mxu0 %v16560_v53  ;;  %12258 = vmatpush1.bf16.msra.mxu1 %v16563_v54  ;;  %v16648_v53 = vld [vmem:[%s18752_s4 + $0x14e8] ss:$16 sps:$4 sm:$0xff]   ;;  %v16653_v54 = vld [vmem:[%s18752_s4 + $0x1504] ss:$16 sps:$4 sm:$0xff]  }
 0x33d   : > { %11193 = vmatprep.subr.bf16.mxu0 %v16568_v55  ;;  %12259 = vmatprep.subr.bf16.mxu1 %v16571_v56  ;;  %v16656_v55 = vld [vmem:[%s18752_s4 + $0x150c] ss:$16 sps:$4 sm:$0xff]   ;;  %v16651_v56 = vld [vmem:[%s18752_s4 + $0x1500] ss:$16 sps:$4 sm:$0xff]  }
 0x340   : > { %11194 = vmatpush1.bf16.msra.mxu0 %v16566_v43  ;;  %12260 = vmatpush1.bf16.msra.mxu1 %v16569_v58  ;;  %v16654_v43 = vld [vmem:[%s18752_s4 + $0x1508] ss:$16 sps:$4 sm:$0xff]   ;;  %v16659_v58 = vld [vmem:[%s18752_s4 + $0x1524] ss:$16 sps:$4 sm:$0xff]  }
 0x341   : > { %11195 = vmatprep.subr.bf16.mxu0 %v16574_v41  ;;  %12261 = vmatprep.subr.bf16.mxu1 %v16577_v60  ;;  %v16662_v41 = vld [vmem:[%s18752_s4 + $0x152c] ss:$16 sps:$4 sm:$0xff]   ;;  %v16657_v60 = vld [vmem:[%s18752_s4 + $0x1520] ss:$16 sps:$4 sm:$0xff]  }
 0x344   : > { %11196 = vmatpush1.bf16.msra.mxu0 %v16572_v61  ;;  %12262 = vmatpush1.bf16.msra.mxu1 %v16575_v62  ;;  %v16660_v61 = vld [vmem:[%s18752_s4 + $0x1528] ss:$16 sps:$4 sm:$0xff]   ;;  %v16665_v62 = vld [vmem:[%s18752_s4 + $0x1544] ss:$16 sps:$4 sm:$0xff]  }
 0x345   : > { %11197 = vmatprep.subr.bf16.mxu0 %v16580_v0  ;;  %12263 = vmatprep.subr.bf16.mxu1 %v16583_v1  ;;  %v16668_v0 = vld [vmem:[%s18752_s4 + $0x154c] ss:$16 sps:$4 sm:$0xff]   ;;  %v16663_v1 = vld [vmem:[%s18752_s4 + $0x1540] ss:$16 sps:$4 sm:$0xff]  }
 0x348   : > { %11198 = vmatpush1.bf16.msra.mxu0 %v16578_v2  ;;  %12264 = vmatpush1.bf16.msra.mxu1 %v16581_v48  ;;  %v16666_v2 = vld [vmem:[%s18752_s4 + $0x1548] ss:$16 sps:$4 sm:$0xff]   ;;  %v16671_v48 = vld [vmem:[%s18752_s4 + $0x1564] ss:$16 sps:$4 sm:$0xff]  }
 0x349   : > { %11199 = vmatprep.subr.bf16.mxu0 %v16586_v3  ;;  %12265 = vmatprep.subr.bf16.mxu1 %v16589_v4  ;;  %v16674_v3 = vld [vmem:[%s18752_s4 + $0x156c] ss:$16 sps:$4 sm:$0xff]   ;;  %v16669_v4 = vld [vmem:[%s18752_s4 + $0x1560] ss:$16 sps:$4 sm:$0xff]  }
 0x34c   : > { %11200 = vmatpush1.bf16.msra.mxu0 %v16584_v5  ;;  %12266 = vmatpush1.bf16.msra.mxu1 %v16587_v6  ;;  %v16672_v5 = vld [vmem:[%s18752_s4 + $0x1568] ss:$16 sps:$4 sm:$0xff]   ;;  %v16677_v6 = vld [vmem:[%s18752_s4 + $0x1584] ss:$16 sps:$4 sm:$0xff]  }
 0x34d   : > { %11201 = vmatprep.subr.bf16.mxu0 %v16592_v59  ;;  %12267 = vmatprep.subr.bf16.mxu1 %v16595_v8  ;;  %v16680_v59 = vld [vmem:[%s18752_s4 + $0x158c] ss:$16 sps:$4 sm:$0xff]   ;;  %v16675_v8 = vld [vmem:[%s18752_s4 + $0x1580] ss:$16 sps:$4 sm:$0xff]  }
 0x350   : > { %11202 = vmatpush1.bf16.msra.mxu0 %v16590_v57  ;;  %12268 = vmatpush1.bf16.msra.mxu1 %v16593_v11  ;;  %v16678_v57 = vld [vmem:[%s18752_s4 + $0x1588] ss:$16 sps:$4 sm:$0xff]   ;;  %v16683_v11 = vld [vmem:[%s18752_s4 + $0x15a4] ss:$16 sps:$4 sm:$0xff]  }
 0x351   : > { %11203 = vmatprep.subr.bf16.mxu0 %v16598_v12  ;;  %12269 = vmatprep.subr.bf16.mxu1 %v16601_v13  ;;  %v16686_v12 = vld [vmem:[%s18752_s4 + $0x15ac] ss:$16 sps:$4 sm:$0xff]   ;;  %v16681_v13 = vld [vmem:[%s18752_s4 + $0x15a0] ss:$16 sps:$4 sm:$0xff]  }
 0x354   : > { %11204 = vmatpush1.bf16.msra.mxu0 %v16596_v15  ;;  %12270 = vmatpush1.bf16.msra.mxu1 %v16599_v16  ;;  %v16684_v15 = vld [vmem:[%s18752_s4 + $0x15a8] ss:$16 sps:$4 sm:$0xff]   ;;  %v16689_v16 = vld [vmem:[%s18752_s4 + $0x15c4] ss:$16 sps:$4 sm:$0xff]  }
 0x355   : > { %11214 = vmatprep.subr.bf16.mxu0 %v16605_v17  ;;  %12280 = vmatprep.subr.bf16.mxu1 %v16608_v63  ;;  %v16692_v17 = vld [vmem:[%s18752_s4 + $0x15cc] ss:$16 sps:$4 sm:$0xff]   ;;  %v580_v63 = vcombine.high %v19517_v9, %v19517_v9  ;;  %v16693_v9 = vld [vmem:[%s18752_s4 + $0x15e0] ss:$16 sps:$4 sm:$0xff]  }
 0x357   : > { %11206 = vmatmul.mubr.bf16.vlgmr.msra.gmra.mrb[0].mxu0 %v786_v19  ;;  %12272 = vmatmul.mubr.bf16.vlgmr.msra.gmra.mrb[0].mxu1 %v786_v19  ;;  %v16690_v19 = vld [vmem:[%s18752_s4 + $0x15c8] ss:$16 sps:$4 sm:$0xff]  }
 0x358   : > { %11215 = vmatpush1.bf16.msra.mxu0 %v16603_v20  ;;  %12281 = vmatpush1.bf16.msra.mxu1 %v16606_v21  ;;  %v16695_v20 = vld [vmem:[%s18752_s4 + $0x15e4] ss:$16 sps:$4 sm:$0xff]   ;;  %v16698_v21 = vld [vmem:[%s18752_s4 + $0x15ec] ss:$16 sps:$4 sm:$0xff]  }
 0x359   : > { %11216 = vmatprep.subr.bf16.mxu0 %v16611_v22  ;;  %12282 = vmatprep.subr.bf16.mxu1 %v16614_v23  ;;  %v19598_v22 = vrot.slane %v580_v63, %v18837_v50  ;;  %v16696_v23 = vld [vmem:[%s18752_s4 + $0x15e8] ss:$16 sps:$4 sm:$0xff]  }
 0x35a   : > { %11246 = vmatprep.mubr.bf16.mxu0 %v789_v25  ;;  %12312 = vmatprep.mubr.bf16.mxu1 %v789_v25  ;;  %v16701_v25 = vld [vmem:[%s18752_s4 + $0x1604] ss:$16 sps:$4 sm:$0xff]   ;;  %v16774_v63 = vld [vmem:[%s18752_s4 + $0x1788] ss:$16 sps:$4 sm:$0xff]  }
 0x35c   : > { %11217 = vmatpush1.bf16.msra.mxu0 %v16609_v7  ;;  %12283 = vmatpush1.bf16.msra.mxu1 %v16612_v24  ;;  %v16704_v7 = vld [vmem:[%s18752_s4 + $0x160c] ss:$16 sps:$4 sm:$0xff]   ;;  %v596_v24 = vcombine.high %v19598_v22, %v19598_v22 }
 0x35d   : > { %11218 = vmatprep.subr.bf16.mxu0 %v16617_v10  ;;  %12284 = vmatprep.subr.bf16.mxu1 %v16620_v28  ;;  %v788_v10 = vpack.c.bf16 %v19525_v14, %v19525_v14  ;;  %v16699_v28 = vld [vmem:[%s18752_s4 + $0x1600] ss:$16 sps:$4 sm:$0xff]  }
 0x35e   : > { %v16705_v14 = vld [vmem:[%s18752_s4 + $0x1620] ss:$16 sps:$4 sm:$0xff]  }
 0x360   : > { %11219 = vmatpush1.bf16.msra.mxu0 %v16615_v30  ;;  %12285 = vmatpush1.bf16.msra.mxu1 %v16618_v31  ;;  %v16702_v30 = vld [vmem:[%s18752_s4 + $0x1608] ss:$16 sps:$4 sm:$0xff]   ;;  %v16707_v31 = vld [vmem:[%s18752_s4 + $0x1624] ss:$16 sps:$4 sm:$0xff]  }
 0x361   : > { %11220 = vmatprep.subr.bf16.mxu0 %v16623_v32  ;;  %12286 = vmatprep.subr.bf16.mxu1 %v16626_v34  ;;  %v16710_v32 = vld [vmem:[%s18752_s4 + $0x162c] ss:$16 sps:$4 sm:$0xff]   ;;  %v791_v34 = vpack.c.bf16 %v596_v24, %v596_v24  ;;  %v16786_v24 = vld [vmem:[%s18752_s4 + $0x17c8] ss:$16 sps:$4 sm:$0xff]  }
 0x364   : > { %11221 = vmatpush1.bf16.msra.mxu0 %v16621_v35  ;;  %12287 = vmatpush1.bf16.msra.mxu1 %v16624_v36  ;;  %v16708_v35 = vld [vmem:[%s18752_s4 + $0x1628] ss:$16 sps:$4 sm:$0xff]   ;;  %v16713_v36 = vld [vmem:[%s18752_s4 + $0x1644] ss:$16 sps:$4 sm:$0xff]  }
 0x365   : > { %11222 = vmatprep.subr.bf16.mxu0 %v16629_v27  ;;  %12288 = vmatprep.subr.bf16.mxu1 %v16632_v37  ;;  %v16716_v27 = vld [vmem:[%s18752_s4 + $0x164c] ss:$16 sps:$4 sm:$0xff]   ;;  %v16711_v37 = vld [vmem:[%s18752_s4 + $0x1640] ss:$16 sps:$4 sm:$0xff]  }
 0x368   : > { %11223 = vmatpush1.bf16.msra.mxu0 %v16627_v38  ;;  %12289 = vmatpush1.bf16.msra.mxu1 %v16630_v39  ;;  %v16714_v38 = vld [vmem:[%s18752_s4 + $0x1648] ss:$16 sps:$4 sm:$0xff]   ;;  %v16719_v39 = vld [vmem:[%s18752_s4 + $0x1664] ss:$16 sps:$4 sm:$0xff]  }
 0x369   : > { %11224 = vmatprep.subr.bf16.mxu0 %v16635_v40  ;;  %12290 = vmatprep.subr.bf16.mxu1 %v16638_v29  ;;  %v16722_v40 = vld [vmem:[%s18752_s4 + $0x166c] ss:$16 sps:$4 sm:$0xff]   ;;  %v16717_v29 = vld [vmem:[%s18752_s4 + $0x1660] ss:$16 sps:$4 sm:$0xff]  }
 0x36c   : > { %11225 = vmatpush1.bf16.msra.mxu0 %v16633_v42  ;;  %12291 = vmatpush1.bf16.msra.mxu1 %v16636_v45  ;;  %v16720_v42 = vld [vmem:[%s18752_s4 + $0x1668] ss:$16 sps:$4 sm:$0xff]   ;;  %v16725_v45 = vld [vmem:[%s18752_s4 + $0x1684] ss:$16 sps:$4 sm:$0xff]  }
 0x36d   : > { %11226 = vmatprep.subr.bf16.mxu0 %v16641_v46  ;;  %12292 = vmatprep.subr.bf16.mxu1 %v16644_v26  ;;  %v16728_v46 = vld [vmem:[%s18752_s4 + $0x168c] ss:$16 sps:$4 sm:$0xff]   ;;  %v16723_v26 = vld [vmem:[%s18752_s4 + $0x1680] ss:$16 sps:$4 sm:$0xff]  }
 0x370   : > { %11227 = vmatpush1.bf16.msra.mxu0 %v16639_v47  ;;  %12293 = vmatpush1.bf16.msra.mxu1 %v16642_v49  ;;  %v16726_v47 = vld [vmem:[%s18752_s4 + $0x1688] ss:$16 sps:$4 sm:$0xff]   ;;  %v16731_v49 = vld [vmem:[%s18752_s4 + $0x16a4] ss:$16 sps:$4 sm:$0xff]  }
 0x371   : > { %11228 = vmatprep.subr.bf16.mxu0 %v16647_v51  ;;  %12294 = vmatprep.subr.bf16.mxu1 %v16650_v52  ;;  %v16734_v51 = vld [vmem:[%s18752_s4 + $0x16ac] ss:$16 sps:$4 sm:$0xff]   ;;  %v16729_v52 = vld [vmem:[%s18752_s4 + $0x16a0] ss:$16 sps:$4 sm:$0xff]  }
 0x374   : > { %11229 = vmatpush1.bf16.msra.mxu0 %v16645_v33  ;;  %12295 = vmatpush1.bf16.msra.mxu1 %v16648_v53  ;;  %v16732_v33 = vld [vmem:[%s18752_s4 + $0x16a8] ss:$16 sps:$4 sm:$0xff]   ;;  %v16737_v53 = vld [vmem:[%s18752_s4 + $0x16c4] ss:$16 sps:$4 sm:$0xff]  }
 0x375   : > { %11230 = vmatprep.subr.bf16.mxu0 %v16653_v54  ;;  %12296 = vmatprep.subr.bf16.mxu1 %v16656_v55  ;;  %v16740_v54 = vld [vmem:[%s18752_s4 + $0x16cc] ss:$16 sps:$4 sm:$0xff]   ;;  %v16735_v55 = vld [vmem:[%s18752_s4 + $0x16c0] ss:$16 sps:$4 sm:$0xff]  }
 0x378   : > { %11231 = vmatpush1.bf16.msra.mxu0 %v16651_v56  ;;  %12297 = vmatpush1.bf16.msra.mxu1 %v16654_v43  ;;  %v16738_v56 = vld [vmem:[%s18752_s4 + $0x16c8] ss:$16 sps:$4 sm:$0xff]   ;;  %v16743_v43 = vld [vmem:[%s18752_s4 + $0x16e4] ss:$16 sps:$4 sm:$0xff]  }
 0x379   : > { %11232 = vmatprep.subr.bf16.mxu0 %v16659_v58  ;;  %12298 = vmatprep.subr.bf16.mxu1 %v16662_v41  ;;  %v16746_v58 = vld [vmem:[%s18752_s4 + $0x16ec] ss:$16 sps:$4 sm:$0xff]   ;;  %v16741_v41 = vld [vmem:[%s18752_s4 + $0x16e0] ss:$16 sps:$4 sm:$0xff]  }
 0x37c   : > { %11233 = vmatpush1.bf16.msra.mxu0 %v16657_v60  ;;  %12299 = vmatpush1.bf16.msra.mxu1 %v16660_v61  ;;  %v16744_v60 = vld [vmem:[%s18752_s4 + $0x16e8] ss:$16 sps:$4 sm:$0xff]   ;;  %v16749_v61 = vld [vmem:[%s18752_s4 + $0x1704] ss:$16 sps:$4 sm:$0xff]  }
 0x37d   : > { %11234 = vmatprep.subr.bf16.mxu0 %v16665_v62  ;;  %12300 = vmatprep.subr.bf16.mxu1 %v16668_v0  ;;  %v16752_v62 = vld [vmem:[%s18752_s4 + $0x170c] ss:$16 sps:$4 sm:$0xff]   ;;  %v16747_v0 = vld [vmem:[%s18752_s4 + $0x1700] ss:$16 sps:$4 sm:$0xff]  }
 0x380   : > { %11235 = vmatpush1.bf16.msra.mxu0 %v16663_v1  ;;  %12301 = vmatpush1.bf16.msra.mxu1 %v16666_v2  ;;  %v16750_v1 = vld [vmem:[%s18752_s4 + $0x1708] ss:$16 sps:$4 sm:$0xff]   ;;  %v16755_v2 = vld [vmem:[%s18752_s4 + $0x1724] ss:$16 sps:$4 sm:$0xff]  }
 0x381   : > { %11236 = vmatprep.subr.bf16.mxu0 %v16671_v48  ;;  %12302 = vmatprep.subr.bf16.mxu1 %v16674_v3  ;;  %v16758_v48 = vld [vmem:[%s18752_s4 + $0x172c] ss:$16 sps:$4 sm:$0xff]   ;;  %v16753_v3 = vld [vmem:[%s18752_s4 + $0x1720] ss:$16 sps:$4 sm:$0xff]  }
 0x384   : > { %11237 = vmatpush1.bf16.msra.mxu0 %v16669_v4  ;;  %12303 = vmatpush1.bf16.msra.mxu1 %v16672_v5  ;;  %v16756_v4 = vld [vmem:[%s18752_s4 + $0x1728] ss:$16 sps:$4 sm:$0xff]   ;;  %v16761_v5 = vld [vmem:[%s18752_s4 + $0x1744] ss:$16 sps:$4 sm:$0xff]  }
 0x385   : > { %11238 = vmatprep.subr.bf16.mxu0 %v16677_v6  ;;  %12304 = vmatprep.subr.bf16.mxu1 %v16680_v59  ;;  %v16764_v6 = vld [vmem:[%s18752_s4 + $0x174c] ss:$16 sps:$4 sm:$0xff]   ;;  %v16759_v59 = vld [vmem:[%s18752_s4 + $0x1740] ss:$16 sps:$4 sm:$0xff]  }
 0x388   : > { %11239 = vmatpush1.bf16.msra.mxu0 %v16675_v8  ;;  %12305 = vmatpush1.bf16.msra.mxu1 %v16678_v57  ;;  %v16762_v8 = vld [vmem:[%s18752_s4 + $0x1748] ss:$16 sps:$4 sm:$0xff]   ;;  %v16767_v57 = vld [vmem:[%s18752_s4 + $0x1764] ss:$16 sps:$4 sm:$0xff]  }
 0x389   : > { %11240 = vmatprep.subr.bf16.mxu0 %v16683_v11  ;;  %12306 = vmatprep.subr.bf16.mxu1 %v16686_v12  ;;  %v16770_v11 = vld [vmem:[%s18752_s4 + $0x176c] ss:$16 sps:$4 sm:$0xff]   ;;  %v16765_v12 = vld [vmem:[%s18752_s4 + $0x1760] ss:$16 sps:$4 sm:$0xff]  }
 0x38c   : > { %11241 = vmatpush1.bf16.msra.mxu0 %v16681_v13  ;;  %12307 = vmatpush1.bf16.msra.mxu1 %v16684_v15  ;;  %v16768_v13 = vld [vmem:[%s18752_s4 + $0x1768] ss:$16 sps:$4 sm:$0xff]   ;;  %v16773_v15 = vld [vmem:[%s18752_s4 + $0x1784] ss:$16 sps:$4 sm:$0xff]  }
 0x38d   : > { %11242 = vmatprep.subr.bf16.mxu0 %v16689_v16  ;;  %12308 = vmatprep.subr.bf16.mxu1 %v16692_v17  ;;  %v16776_v16 = vld [vmem:[%s18752_s4 + $0x178c] ss:$16 sps:$4 sm:$0xff]   ;;  %v16771_v17 = vld [vmem:[%s18752_s4 + $0x1780] ss:$16 sps:$4 sm:$0xff]  }
 0x390   : > { %11243 = vmatpush1.bf16.msra.mxu0 %v16687_v18  ;;  %12309 = vmatpush1.bf16.msra.mxu1 %v16690_v19  ;;  %v16779_v18 = vld [vmem:[%s18752_s4 + $0x17a4] ss:$16 sps:$4 sm:$0xff]   ;;  %v16782_v19 = vld [vmem:[%s18752_s4 + $0x17ac] ss:$16 sps:$4 sm:$0xff]  }
 0x391   : > { %11244 = vmatprep.subr.bf16.mxu0 %v16695_v20  ;;  %12310 = vmatprep.subr.bf16.mxu1 %v16698_v21  ;;  %v16777_v20 = vld [vmem:[%s18752_s4 + $0x17a0] ss:$16 sps:$4 sm:$0xff]   ;;  %v16780_v21 = vld [vmem:[%s18752_s4 + $0x17a8] ss:$16 sps:$4 sm:$0xff]  }
 0x394   : > { %11245 = vmatpush1.bf16.msra.mxu0 %v16693_v9  ;;  %12311 = vmatpush1.bf16.msra.mxu1 %v16696_v23  ;;  %v16785_v9 = vld [vmem:[%s18752_s4 + $0x17c4] ss:$16 sps:$4 sm:$0xff]   ;;  %v16788_v23 = vld [vmem:[%s18752_s4 + $0x17cc] ss:$16 sps:$4 sm:$0xff]  }
 0x395   : > { %11255 = vmatprep.subr.bf16.mxu0 %v16701_v25  ;;  %12321 = vmatprep.subr.bf16.mxu1 %v16704_v7  ;;  %v19665_v25 = vld [vmem:[%s18785_s9 + $0x30] sm:$0xff]  ;;  %v16783_v7 = vld [vmem:[%s18752_s4 + $0x17c0] ss:$16 sps:$4 sm:$0xff]  }
 0x397   : > { %11247 = vmatmul.mubr.bf16.vlgmr.msra.gmra.mrb[0].mxu0 %v788_v10  ;;  %12313 = vmatmul.mubr.bf16.vlgmr.msra.gmra.mrb[0].mxu1 %v788_v10  ;;  %v16791_v10 = vld [vmem:[%s18752_s4 + $0x17e4] ss:$16 sps:$4 sm:$0xff]  }
 0x398   : > { %11256 = vmatpush1.bf16.msra.mxu0 %v16699_v28  ;;  %12322 = vmatpush1.bf16.msra.mxu1 %v16702_v30  ;;  %v16794_v28 = vld [vmem:[%s18752_s4 + $0x17ec] ss:$16 sps:$4 sm:$0xff]   ;;  %v19673_v30 = vrot.slane %v19665_v25, %v18837_v50 }
 0x399   : > { %11257 = vmatprep.subr.bf16.mxu0 %v16707_v31  ;;  %12323 = vmatprep.subr.bf16.mxu1 %v16710_v32  ;;  %v16789_v31 = vld [vmem:[%s18752_s4 + $0x17e0] ss:$16 sps:$4 sm:$0xff]   ;;  %v16792_v32 = vld [vmem:[%s18752_s4 + $0x17e8] ss:$16 sps:$4 sm:$0xff]  }
 0x39a   : > { %11287 = vmatprep.mubr.bf16.mxu0 %v791_v34  ;;  %12353 = vmatprep.mubr.bf16.mxu1 %v791_v34  ;;  %v16798_v34 = vld [vmem:[%s18752_s4 + $0x1804] ss:$16 sps:$4 sm:$0xff]  }
 0x39c   : > { %11258 = vmatpush1.bf16.msra.mxu0 %v16705_v14  ;;  %12324 = vmatpush1.bf16.msra.mxu1 %v16708_v35  ;;  %v16801_v14 = vld [vmem:[%s18752_s4 + $0x180c] ss:$16 sps:$4 sm:$0xff]   ;;  %v612_v35 = vcombine.high %v19673_v30, %v19673_v30 }
 0x39d   : > { %11259 = vmatprep.subr.bf16.mxu0 %v16713_v36  ;;  %12325 = vmatprep.subr.bf16.mxu1 %v16716_v27  ;;  %v790_v36 = vpack.c.bf16 %v19598_v22, %v19598_v22  ;;  %v16796_v27 = vld [vmem:[%s18752_s4 + $0x1800] ss:$16 sps:$4 sm:$0xff]  }
 0x39e   : > { %v16802_v22 = vld [vmem:[%s18752_s4 + $0x1820] ss:$16 sps:$4 sm:$0xff]  }
 0x3a0   : > { %11260 = vmatpush1.bf16.msra.mxu0 %v16711_v37  ;;  %12326 = vmatpush1.bf16.msra.mxu1 %v16714_v38  ;;  %v16799_v37 = vld [vmem:[%s18752_s4 + $0x1808] ss:$16 sps:$4 sm:$0xff]   ;;  %v16804_v38 = vld [vmem:[%s18752_s4 + $0x1824] ss:$16 sps:$4 sm:$0xff]  }
 0x3a1   : > { %11261 = vmatprep.subr.bf16.mxu0 %v16719_v39  ;;  %12327 = vmatprep.subr.bf16.mxu1 %v16722_v40  ;;  %v16807_v39 = vld [vmem:[%s18752_s4 + $0x182c] ss:$16 sps:$4 sm:$0xff]   ;;  %v793_v40 = vpack.c.bf16 %v612_v35, %v612_v35  ;;  %v16880_v35 = vld [vmem:[%s18752_s4 + $0x19c0] ss:$16 sps:$4 sm:$0xff]  }
 0x3a4   : > { %11262 = vmatpush1.bf16.msra.mxu0 %v16717_v29  ;;  %12328 = vmatpush1.bf16.msra.mxu1 %v16720_v42  ;;  %v16805_v29 = vld [vmem:[%s18752_s4 + $0x1828] ss:$16 sps:$4 sm:$0xff]   ;;  %v16810_v42 = vld [vmem:[%s18752_s4 + $0x1844] ss:$16 sps:$4 sm:$0xff]  }
 0x3a5   : > { %11263 = vmatprep.subr.bf16.mxu0 %v16725_v45  ;;  %12329 = vmatprep.subr.bf16.mxu1 %v16728_v46  ;;  %v16813_v45 = vld [vmem:[%s18752_s4 + $0x184c] ss:$16 sps:$4 sm:$0xff]   ;;  %v16808_v46 = vld [vmem:[%s18752_s4 + $0x1840] ss:$16 sps:$4 sm:$0xff]  }
 0x3a8   : > { %11264 = vmatpush1.bf16.msra.mxu0 %v16723_v26  ;;  %12330 = vmatpush1.bf16.msra.mxu1 %v16726_v47  ;;  %v16811_v26 = vld [vmem:[%s18752_s4 + $0x1848] ss:$16 sps:$4 sm:$0xff]   ;;  %v16816_v47 = vld [vmem:[%s18752_s4 + $0x1864] ss:$16 sps:$4 sm:$0xff]  }
 0x3a9   : > { %11265 = vmatprep.subr.bf16.mxu0 %v16731_v49  ;;  %12331 = vmatprep.subr.bf16.mxu1 %v16734_v51  ;;  %v16819_v49 = vld [vmem:[%s18752_s4 + $0x186c] ss:$16 sps:$4 sm:$0xff]   ;;  %v16814_v51 = vld [vmem:[%s18752_s4 + $0x1860] ss:$16 sps:$4 sm:$0xff]  }
 0x3ac   : > { %11266 = vmatpush1.bf16.msra.mxu0 %v16729_v52  ;;  %12332 = vmatpush1.bf16.msra.mxu1 %v16732_v33  ;;  %v16817_v52 = vld [vmem:[%s18752_s4 + $0x1868] ss:$16 sps:$4 sm:$0xff]   ;;  %v16822_v33 = vld [vmem:[%s18752_s4 + $0x1884] ss:$16 sps:$4 sm:$0xff]  }
 0x3ad   : > { %11267 = vmatprep.subr.bf16.mxu0 %v16737_v53  ;;  %12333 = vmatprep.subr.bf16.mxu1 %v16740_v54  ;;  %v16825_v53 = vld [vmem:[%s18752_s4 + $0x188c] ss:$16 sps:$4 sm:$0xff]   ;;  %v16820_v54 = vld [vmem:[%s18752_s4 + $0x1880] ss:$16 sps:$4 sm:$0xff]  }
 0x3b0   : > { %11268 = vmatpush1.bf16.msra.mxu0 %v16735_v55  ;;  %12334 = vmatpush1.bf16.msra.mxu1 %v16738_v56  ;;  %v16823_v55 = vld [vmem:[%s18752_s4 + $0x1888] ss:$16 sps:$4 sm:$0xff]   ;;  %v16828_v56 = vld [vmem:[%s18752_s4 + $0x18a4] ss:$16 sps:$4 sm:$0xff]  }
 0x3b1   : > { %11269 = vmatprep.subr.bf16.mxu0 %v16743_v43  ;;  %12335 = vmatprep.subr.bf16.mxu1 %v16746_v58  ;;  %v16831_v43 = vld [vmem:[%s18752_s4 + $0x18ac] ss:$16 sps:$4 sm:$0xff]   ;;  %v16826_v58 = vld [vmem:[%s18752_s4 + $0x18a0] ss:$16 sps:$4 sm:$0xff]  }
 0x3b4   : > { %11270 = vmatpush1.bf16.msra.mxu0 %v16741_v41  ;;  %12336 = vmatpush1.bf16.msra.mxu1 %v16744_v60  ;;  %v16829_v41 = vld [vmem:[%s18752_s4 + $0x18a8] ss:$16 sps:$4 sm:$0xff]   ;;  %v16834_v60 = vld [vmem:[%s18752_s4 + $0x18c4] ss:$16 sps:$4 sm:$0xff]  }
 0x3b5   : > { %11271 = vmatprep.subr.bf16.mxu0 %v16749_v61  ;;  %12337 = vmatprep.subr.bf16.mxu1 %v16752_v62  ;;  %v16837_v61 = vld [vmem:[%s18752_s4 + $0x18cc] ss:$16 sps:$4 sm:$0xff]   ;;  %v16832_v62 = vld [vmem:[%s18752_s4 + $0x18c0] ss:$16 sps:$4 sm:$0xff]  }
 0x3b8   : > { %11272 = vmatpush1.bf16.msra.mxu0 %v16747_v0  ;;  %12338 = vmatpush1.bf16.msra.mxu1 %v16750_v1  ;;  %v16835_v0 = vld [vmem:[%s18752_s4 + $0x18c8] ss:$16 sps:$4 sm:$0xff]   ;;  %v16840_v1 = vld [vmem:[%s18752_s4 + $0x18e4] ss:$16 sps:$4 sm:$0xff]  }
 0x3b9   : > { %11273 = vmatprep.subr.bf16.mxu0 %v16755_v2  ;;  %12339 = vmatprep.subr.bf16.mxu1 %v16758_v48  ;;  %v16843_v2 = vld [vmem:[%s18752_s4 + $0x18ec] ss:$16 sps:$4 sm:$0xff]   ;;  %v16838_v48 = vld [vmem:[%s18752_s4 + $0x18e0] ss:$16 sps:$4 sm:$0xff]  }
 0x3bc   : > { %11274 = vmatpush1.bf16.msra.mxu0 %v16753_v3  ;;  %12340 = vmatpush1.bf16.msra.mxu1 %v16756_v4  ;;  %v16841_v3 = vld [vmem:[%s18752_s4 + $0x18e8] ss:$16 sps:$4 sm:$0xff]   ;;  %v16846_v4 = vld [vmem:[%s18752_s4 + $0x1904] ss:$16 sps:$4 sm:$0xff]  }
 0x3bd   : > { %11275 = vmatprep.subr.bf16.mxu0 %v16761_v5  ;;  %12341 = vmatprep.subr.bf16.mxu1 %v16764_v6  ;;  %v16849_v5 = vld [vmem:[%s18752_s4 + $0x190c] ss:$16 sps:$4 sm:$0xff]   ;;  %v16844_v6 = vld [vmem:[%s18752_s4 + $0x1900] ss:$16 sps:$4 sm:$0xff]  }
 0x3c0   : > { %11276 = vmatpush1.bf16.msra.mxu0 %v16759_v59  ;;  %12342 = vmatpush1.bf16.msra.mxu1 %v16762_v8  ;;  %v16847_v59 = vld [vmem:[%s18752_s4 + $0x1908] ss:$16 sps:$4 sm:$0xff]   ;;  %v16852_v8 = vld [vmem:[%s18752_s4 + $0x1924] ss:$16 sps:$4 sm:$0xff]  }
 0x3c1   : > { %11277 = vmatprep.subr.bf16.mxu0 %v16767_v57  ;;  %12343 = vmatprep.subr.bf16.mxu1 %v16770_v11  ;;  %v16855_v57 = vld [vmem:[%s18752_s4 + $0x192c] ss:$16 sps:$4 sm:$0xff]   ;;  %v16850_v11 = vld [vmem:[%s18752_s4 + $0x1920] ss:$16 sps:$4 sm:$0xff]  }
 0x3c4   : > { %11278 = vmatpush1.bf16.msra.mxu0 %v16765_v12  ;;  %12344 = vmatpush1.bf16.msra.mxu1 %v16768_v13  ;;  %v16853_v12 = vld [vmem:[%s18752_s4 + $0x1928] ss:$16 sps:$4 sm:$0xff]   ;;  %v16858_v13 = vld [vmem:[%s18752_s4 + $0x1944] ss:$16 sps:$4 sm:$0xff]  }
 0x3c5   : > { %11279 = vmatprep.subr.bf16.mxu0 %v16773_v15  ;;  %12345 = vmatprep.subr.bf16.mxu1 %v16776_v16  ;;  %v16861_v15 = vld [vmem:[%s18752_s4 + $0x194c] ss:$16 sps:$4 sm:$0xff]   ;;  %v16856_v16 = vld [vmem:[%s18752_s4 + $0x1940] ss:$16 sps:$4 sm:$0xff]  }
 0x3c8   : > { %11280 = vmatpush1.bf16.msra.mxu0 %v16771_v17  ;;  %12346 = vmatpush1.bf16.msra.mxu1 %v16774_v63  ;;  %v16859_v17 = vld [vmem:[%s18752_s4 + $0x1948] ss:$16 sps:$4 sm:$0xff]   ;;  %v16864_v63 = vld [vmem:[%s18752_s4 + $0x1964] ss:$16 sps:$4 sm:$0xff]  }
 0x3c9   : > { %11281 = vmatprep.subr.bf16.mxu0 %v16779_v18  ;;  %12347 = vmatprep.subr.bf16.mxu1 %v16782_v19  ;;  %v16867_v18 = vld [vmem:[%s18752_s4 + $0x196c] ss:$16 sps:$4 sm:$0xff]   ;;  %v16862_v19 = vld [vmem:[%s18752_s4 + $0x1960] ss:$16 sps:$4 sm:$0xff]  }
 0x3cc   : > { %11282 = vmatpush1.bf16.msra.mxu0 %v16777_v20  ;;  %12348 = vmatpush1.bf16.msra.mxu1 %v16780_v21  ;;  %v16865_v20 = vld [vmem:[%s18752_s4 + $0x1968] ss:$16 sps:$4 sm:$0xff]   ;;  %v16870_v21 = vld [vmem:[%s18752_s4 + $0x1984] ss:$16 sps:$4 sm:$0xff]  }
 0x3cd   : > { %11283 = vmatprep.subr.bf16.mxu0 %v16785_v9  ;;  %12349 = vmatprep.subr.bf16.mxu1 %v16788_v23  ;;  %v16873_v9 = vld [vmem:[%s18752_s4 + $0x198c] ss:$16 sps:$4 sm:$0xff]   ;;  %v16868_v23 = vld [vmem:[%s18752_s4 + $0x1980] ss:$16 sps:$4 sm:$0xff]  }
 0x3d0   : > { %11284 = vmatpush1.bf16.msra.mxu0 %v16783_v7  ;;  %12350 = vmatpush1.bf16.msra.mxu1 %v16786_v24  ;;  %v16871_v7 = vld [vmem:[%s18752_s4 + $0x1988] ss:$16 sps:$4 sm:$0xff]   ;;  %v16876_v24 = vld [vmem:[%s18752_s4 + $0x19a4] ss:$16 sps:$4 sm:$0xff]  }
 0x3d1   : > { %11285 = vmatprep.subr.bf16.mxu0 %v16791_v10  ;;  %12351 = vmatprep.subr.bf16.mxu1 %v16794_v28  ;;  %v16879_v10 = vld [vmem:[%s18752_s4 + $0x19ac] ss:$16 sps:$4 sm:$0xff]   ;;  %v16874_v28 = vld [vmem:[%s18752_s4 + $0x19a0] ss:$16 sps:$4 sm:$0xff]  }
 0x3d4   : > { %11286 = vmatpush1.bf16.msra.mxu0 %v16789_v31  ;;  %12352 = vmatpush1.bf16.msra.mxu1 %v16792_v32  ;;  %v16877_v31 = vld [vmem:[%s18752_s4 + $0x19a8] ss:$16 sps:$4 sm:$0xff]   ;;  %v16882_v32 = vld [vmem:[%s18752_s4 + $0x19c4] ss:$16 sps:$4 sm:$0xff]  }
 0x3d5   : > { %11296 = vmatprep.subr.bf16.mxu0 %v16798_v34  ;;  %12362 = vmatprep.subr.bf16.mxu1 %v16801_v14  ;;  %v16885_v34 = vld [vmem:[%s18752_s4 + $0x19cc] ss:$16 sps:$4 sm:$0xff]   ;;  %v597_v14 = vcombine.high %v19665_v25, %v19665_v25  ;;  %v16886_v25 = vld [vmem:[%s18752_s4 + $0x19e0] ss:$16 sps:$4 sm:$0xff]  }
 0x3d7   : > { %11288 = vmatmul.mubr.bf16.vlgmr.msra.gmra.mrb[0].mxu0 %v790_v36  ;;  %12354 = vmatmul.mubr.bf16.vlgmr.msra.gmra.mrb[0].mxu1 %v790_v36  ;;  %v16883_v36 = vld [vmem:[%s18752_s4 + $0x19c8] ss:$16 sps:$4 sm:$0xff]  }
 0x3d8   : > { %11297 = vmatpush1.bf16.msra.mxu0 %v16796_v27  ;;  %12363 = vmatpush1.bf16.msra.mxu1 %v16799_v37  ;;  %v16888_v27 = vld [vmem:[%s18752_s4 + $0x19e4] ss:$16 sps:$4 sm:$0xff]   ;;  %v16891_v37 = vld [vmem:[%s18752_s4 + $0x19ec] ss:$16 sps:$4 sm:$0xff]  }
 0x3d9   : > { %11298 = vmatprep.subr.bf16.mxu0 %v16804_v38  ;;  %12364 = vmatprep.subr.bf16.mxu1 %v16807_v39  ;;  %v19746_v38 = vrot.slane %v597_v14, %v18837_v50  ;;  %v16889_v39 = vld [vmem:[%s18752_s4 + $0x19e8] ss:$16 sps:$4 sm:$0xff]  }
 0x3da   : > { %11328 = vmatprep.mubr.bf16.mxu0 %v793_v40  ;;  %12394 = vmatprep.mubr.bf16.mxu1 %v793_v40  ;;  %v16894_v40 = vld [vmem:[%s18752_s4 + $0x1a04] ss:$16 sps:$4 sm:$0xff]   ;;  %v16967_v14 = vld [vmem:[%s18752_s4 + $0x1b88] ss:$16 sps:$4 sm:$0xff]  }
 0x3dc   : > { %11299 = vmatpush1.bf16.msra.mxu0 %v16802_v22  ;;  %12365 = vmatpush1.bf16.msra.mxu1 %v16805_v29  ;;  %v16897_v22 = vld [vmem:[%s18752_s4 + $0x1a0c] ss:$16 sps:$4 sm:$0xff]   ;;  %v613_v29 = vcombine.high %v19746_v38, %v19746_v38 }
 0x3dd   : > { %11300 = vmatprep.subr.bf16.mxu0 %v16810_v42  ;;  %12366 = vmatprep.subr.bf16.mxu1 %v16813_v45  ;;  %v792_v42 = vpack.c.bf16 %v19673_v30, %v19673_v30  ;;  %v16892_v45 = vld [vmem:[%s18752_s4 + $0x1a00] ss:$16 sps:$4 sm:$0xff]  }
 0x3de   : > { %v16898_v30 = vld [vmem:[%s18752_s4 + $0x1a20] ss:$16 sps:$4 sm:$0xff]  }
 0x3e0   : > { %11301 = vmatpush1.bf16.msra.mxu0 %v16808_v46  ;;  %12367 = vmatpush1.bf16.msra.mxu1 %v16811_v26  ;;  %v16895_v46 = vld [vmem:[%s18752_s4 + $0x1a08] ss:$16 sps:$4 sm:$0xff]   ;;  %v16900_v26 = vld [vmem:[%s18752_s4 + $0x1a24] ss:$16 sps:$4 sm:$0xff]  }
 0x3e1   : > { %11302 = vmatprep.subr.bf16.mxu0 %v16816_v47  ;;  %12368 = vmatprep.subr.bf16.mxu1 %v16819_v49  ;;  %v16903_v47 = vld [vmem:[%s18752_s4 + $0x1a2c] ss:$16 sps:$4 sm:$0xff]   ;;  %v795_v49 = vpack.c.bf16 %v613_v29, %v613_v29  ;;  %v16979_v29 = vld [vmem:[%s18752_s4 + $0x1bc8] ss:$16 sps:$4 sm:$0xff]  }
 0x3e4   : > { %11303 = vmatpush1.bf16.msra.mxu0 %v16814_v51  ;;  %12369 = vmatpush1.bf16.msra.mxu1 %v16817_v52  ;;  %v16901_v51 = vld [vmem:[%s18752_s4 + $0x1a28] ss:$16 sps:$4 sm:$0xff]   ;;  %v16906_v52 = vld [vmem:[%s18752_s4 + $0x1a44] ss:$16 sps:$4 sm:$0xff]  }
 0x3e5   : > { %11304 = vmatprep.subr.bf16.mxu0 %v16822_v33  ;;  %12370 = vmatprep.subr.bf16.mxu1 %v16825_v53  ;;  %v16909_v33 = vld [vmem:[%s18752_s4 + $0x1a4c] ss:$16 sps:$4 sm:$0xff]   ;;  %v16904_v53 = vld [vmem:[%s18752_s4 + $0x1a40] ss:$16 sps:$4 sm:$0xff]  }
 0x3e8   : > { %11305 = vmatpush1.bf16.msra.mxu0 %v16820_v54  ;;  %12371 = vmatpush1.bf16.msra.mxu1 %v16823_v55  ;;  %v16907_v54 = vld [vmem:[%s18752_s4 + $0x1a48] ss:$16 sps:$4 sm:$0xff]   ;;  %v16912_v55 = vld [vmem:[%s18752_s4 + $0x1a64] ss:$16 sps:$4 sm:$0xff]  }
 0x3e9   : > { %11306 = vmatprep.subr.bf16.mxu0 %v16828_v56  ;;  %12372 = vmatprep.subr.bf16.mxu1 %v16831_v43  ;;  %v16915_v56 = vld [vmem:[%s18752_s4 + $0x1a6c] ss:$16 sps:$4 sm:$0xff]   ;;  %v16910_v43 = vld [vmem:[%s18752_s4 + $0x1a60] ss:$16 sps:$4 sm:$0xff]  }
 0x3ec   : > { %11307 = vmatpush1.bf16.msra.mxu0 %v16826_v58  ;;  %12373 = vmatpush1.bf16.msra.mxu1 %v16829_v41  ;;  %v16913_v58 = vld [vmem:[%s18752_s4 + $0x1a68] ss:$16 sps:$4 sm:$0xff]   ;;  %v16918_v41 = vld [vmem:[%s18752_s4 + $0x1a84] ss:$16 sps:$4 sm:$0xff]  }
 0x3ed   : > { %11308 = vmatprep.subr.bf16.mxu0 %v16834_v60  ;;  %12374 = vmatprep.subr.bf16.mxu1 %v16837_v61  ;;  %v16921_v60 = vld [vmem:[%s18752_s4 + $0x1a8c] ss:$16 sps:$4 sm:$0xff]   ;;  %v16916_v61 = vld [vmem:[%s18752_s4 + $0x1a80] ss:$16 sps:$4 sm:$0xff]  }
 0x3f0   : > { %11309 = vmatpush1.bf16.msra.mxu0 %v16832_v62  ;;  %12375 = vmatpush1.bf16.msra.mxu1 %v16835_v0  ;;  %v16919_v62 = vld [vmem:[%s18752_s4 + $0x1a88] ss:$16 sps:$4 sm:$0xff]   ;;  %v16924_v0 = vld [vmem:[%s18752_s4 + $0x1aa4] ss:$16 sps:$4 sm:$0xff]  }
 0x3f1   : > { %11310 = vmatprep.subr.bf16.mxu0 %v16840_v1  ;;  %12376 = vmatprep.subr.bf16.mxu1 %v16843_v2  ;;  %v16927_v1 = vld [vmem:[%s18752_s4 + $0x1aac] ss:$16 sps:$4 sm:$0xff]   ;;  %v16922_v2 = vld [vmem:[%s18752_s4 + $0x1aa0] ss:$16 sps:$4 sm:$0xff]  }
 0x3f4   : > { %11311 = vmatpush1.bf16.msra.mxu0 %v16838_v48  ;;  %12377 = vmatpush1.bf16.msra.mxu1 %v16841_v3  ;;  %v16925_v48 = vld [vmem:[%s18752_s4 + $0x1aa8] ss:$16 sps:$4 sm:$0xff]   ;;  %v16930_v3 = vld [vmem:[%s18752_s4 + $0x1ac4] ss:$16 sps:$4 sm:$0xff]  }
 0x3f5   : > { %11312 = vmatprep.subr.bf16.mxu0 %v16846_v4  ;;  %12378 = vmatprep.subr.bf16.mxu1 %v16849_v5  ;;  %v16933_v4 = vld [vmem:[%s18752_s4 + $0x1acc] ss:$16 sps:$4 sm:$0xff]   ;;  %v16928_v5 = vld [vmem:[%s18752_s4 + $0x1ac0] ss:$16 sps:$4 sm:$0xff]  }
 0x3f8   : > { %11313 = vmatpush1.bf16.msra.mxu0 %v16844_v6  ;;  %12379 = vmatpush1.bf16.msra.mxu1 %v16847_v59  ;;  %v16931_v6 = vld [vmem:[%s18752_s4 + $0x1ac8] ss:$16 sps:$4 sm:$0xff]   ;;  %v16936_v59 = vld [vmem:[%s18752_s4 + $0x1ae4] ss:$16 sps:$4 sm:$0xff]  }
 0x3f9   : > { %11314 = vmatprep.subr.bf16.mxu0 %v16852_v8  ;;  %12380 = vmatprep.subr.bf16.mxu1 %v16855_v57  ;;  %v16939_v8 = vld [vmem:[%s18752_s4 + $0x1aec] ss:$16 sps:$4 sm:$0xff]   ;;  %v16934_v57 = vld [vmem:[%s18752_s4 + $0x1ae0] ss:$16 sps:$4 sm:$0xff]  }
 0x3fc   : > { %11315 = vmatpush1.bf16.msra.mxu0 %v16850_v11  ;;  %12381 = vmatpush1.bf16.msra.mxu1 %v16853_v12  ;;  %v16937_v11 = vld [vmem:[%s18752_s4 + $0x1ae8] ss:$16 sps:$4 sm:$0xff]   ;;  %v16942_v12 = vld [vmem:[%s18752_s4 + $0x1b04] ss:$16 sps:$4 sm:$0xff]  }
 0x3fd   : > { %11316 = vmatprep.subr.bf16.mxu0 %v16858_v13  ;;  %12382 = vmatprep.subr.bf16.mxu1 %v16861_v15  ;;  %v16945_v13 = vld [vmem:[%s18752_s4 + $0x1b0c] ss:$16 sps:$4 sm:$0xff]   ;;  %v16940_v15 = vld [vmem:[%s18752_s4 + $0x1b00] ss:$16 sps:$4 sm:$0xff]  }
 0x400   : > { %11317 = vmatpush1.bf16.msra.mxu0 %v16856_v16  ;;  %12383 = vmatpush1.bf16.msra.mxu1 %v16859_v17  ;;  %v16943_v16 = vld [vmem:[%s18752_s4 + $0x1b08] ss:$16 sps:$4 sm:$0xff]   ;;  %v16948_v17 = vld [vmem:[%s18752_s4 + $0x1b24] ss:$16 sps:$4 sm:$0xff]  }
 0x401   : > { %11318 = vmatprep.subr.bf16.mxu0 %v16864_v63  ;;  %12384 = vmatprep.subr.bf16.mxu1 %v16867_v18  ;;  %v16951_v63 = vld [vmem:[%s18752_s4 + $0x1b2c] ss:$16 sps:$4 sm:$0xff]   ;;  %v16946_v18 = vld [vmem:[%s18752_s4 + $0x1b20] ss:$16 sps:$4 sm:$0xff]  }
 0x404   : > { %11319 = vmatpush1.bf16.msra.mxu0 %v16862_v19  ;;  %12385 = vmatpush1.bf16.msra.mxu1 %v16865_v20  ;;  %v16949_v19 = vld [vmem:[%s18752_s4 + $0x1b28] ss:$16 sps:$4 sm:$0xff]   ;;  %v16954_v20 = vld [vmem:[%s18752_s4 + $0x1b44] ss:$16 sps:$4 sm:$0xff]  }
 0x405   : > { %11320 = vmatprep.subr.bf16.mxu0 %v16870_v21  ;;  %12386 = vmatprep.subr.bf16.mxu1 %v16873_v9  ;;  %v16957_v21 = vld [vmem:[%s18752_s4 + $0x1b4c] ss:$16 sps:$4 sm:$0xff]   ;;  %v16952_v9 = vld [vmem:[%s18752_s4 + $0x1b40] ss:$16 sps:$4 sm:$0xff]  }
 0x408   : > { %11321 = vmatpush1.bf16.msra.mxu0 %v16868_v23  ;;  %12387 = vmatpush1.bf16.msra.mxu1 %v16871_v7  ;;  %v16955_v23 = vld [vmem:[%s18752_s4 + $0x1b48] ss:$16 sps:$4 sm:$0xff]   ;;  %v16960_v7 = vld [vmem:[%s18752_s4 + $0x1b64] ss:$16 sps:$4 sm:$0xff]  }
 0x409   : > { %11322 = vmatprep.subr.bf16.mxu0 %v16876_v24  ;;  %12388 = vmatprep.subr.bf16.mxu1 %v16879_v10  ;;  %v16963_v24 = vld [vmem:[%s18752_s4 + $0x1b6c] ss:$16 sps:$4 sm:$0xff]   ;;  %v16958_v10 = vld [vmem:[%s18752_s4 + $0x1b60] ss:$16 sps:$4 sm:$0xff]  }
 0x40c   : > { %11323 = vmatpush1.bf16.msra.mxu0 %v16874_v28  ;;  %12389 = vmatpush1.bf16.msra.mxu1 %v16877_v31  ;;  %v16961_v28 = vld [vmem:[%s18752_s4 + $0x1b68] ss:$16 sps:$4 sm:$0xff]   ;;  %v16966_v31 = vld [vmem:[%s18752_s4 + $0x1b84] ss:$16 sps:$4 sm:$0xff]  }
 0x40d   : > { %11324 = vmatprep.subr.bf16.mxu0 %v16882_v32  ;;  %12390 = vmatprep.subr.bf16.mxu1 %v16885_v34  ;;  %v16969_v32 = vld [vmem:[%s18752_s4 + $0x1b8c] ss:$16 sps:$4 sm:$0xff]   ;;  %v16964_v34 = vld [vmem:[%s18752_s4 + $0x1b80] ss:$16 sps:$4 sm:$0xff]  }
 0x410   : > { %11325 = vmatpush1.bf16.msra.mxu0 %v16880_v35  ;;  %12391 = vmatpush1.bf16.msra.mxu1 %v16883_v36  ;;  %v16972_v35 = vld [vmem:[%s18752_s4 + $0x1ba4] ss:$16 sps:$4 sm:$0xff]   ;;  %v16975_v36 = vld [vmem:[%s18752_s4 + $0x1bac] ss:$16 sps:$4 sm:$0xff]  }
 0x411   : > { %11326 = vmatprep.subr.bf16.mxu0 %v16888_v27  ;;  %12392 = vmatprep.subr.bf16.mxu1 %v16891_v37  ;;  %v16970_v27 = vld [vmem:[%s18752_s4 + $0x1ba0] ss:$16 sps:$4 sm:$0xff]   ;;  %v16973_v37 = vld [vmem:[%s18752_s4 + $0x1ba8] ss:$16 sps:$4 sm:$0xff]  }
 0x414   : > { %11327 = vmatpush1.bf16.msra.mxu0 %v16886_v25  ;;  %12393 = vmatpush1.bf16.msra.mxu1 %v16889_v39  ;;  %v16978_v25 = vld [vmem:[%s18752_s4 + $0x1bc4] ss:$16 sps:$4 sm:$0xff]   ;;  %v16981_v39 = vld [vmem:[%s18752_s4 + $0x1bcc] ss:$16 sps:$4 sm:$0xff]  }
 0x415   : > { %11337 = vmatprep.subr.bf16.mxu0 %v16894_v40  ;;  %12403 = vmatprep.subr.bf16.mxu1 %v16897_v22  ;;  %v19813_v40 = vld [vmem:[%s18785_s9 + $0x38] sm:$0xff] }
 0x416   : > { %v16976_v22 = vld [vmem:[%s18752_s4 + $0x1bc0] ss:$16 sps:$4 sm:$0xff]  }
 0x417   : > { %11329 = vmatmul.mubr.bf16.vlgmr.msra.gmra.mrb[0].mxu0 %v792_v42  ;;  %12395 = vmatmul.mubr.bf16.vlgmr.msra.gmra.mrb[0].mxu1 %v792_v42  ;;  %v16984_v42 = vld [vmem:[%s18752_s4 + $0x1be4] ss:$16 sps:$4 sm:$0xff]  }
 0x418   : > { %11338 = vmatpush1.bf16.msra.mxu0 %v16892_v45  ;;  %12404 = vmatpush1.bf16.msra.mxu1 %v16895_v46  ;;  %v16987_v45 = vld [vmem:[%s18752_s4 + $0x1bec] ss:$16 sps:$4 sm:$0xff]   ;;  %v19821_v46 = vrot.slane %v19813_v40, %v18837_v50 }
 0x419   : > { %11339 = vmatprep.subr.bf16.mxu0 %v16900_v26  ;;  %12405 = vmatprep.subr.bf16.mxu1 %v16903_v47  ;;  %v16982_v26 = vld [vmem:[%s18752_s4 + $0x1be0] ss:$16 sps:$4 sm:$0xff]   ;;  %v16985_v47 = vld [vmem:[%s18752_s4 + $0x1be8] ss:$16 sps:$4 sm:$0xff]  }
 0x41a   : > { %11369 = vmatprep.mubr.bf16.mxu0 %v795_v49  ;;  %12435 = vmatprep.mubr.bf16.mxu1 %v795_v49  ;;  %v16991_v49 = vld [vmem:[%s18752_s4 + $0x1c04] ss:$16 sps:$4 sm:$0xff]  }
 0x41c   : > { %11340 = vmatpush1.bf16.msra.mxu0 %v16898_v30  ;;  %12406 = vmatpush1.bf16.msra.mxu1 %v16901_v51  ;;  %v16994_v30 = vld [vmem:[%s18752_s4 + $0x1c0c] ss:$16 sps:$4 sm:$0xff]   ;;  %v629_v51 = vcombine.high %v19821_v46, %v19821_v46 }
 0x41d   : > { %11341 = vmatprep.subr.bf16.mxu0 %v16906_v52  ;;  %12407 = vmatprep.subr.bf16.mxu1 %v16909_v33  ;;  %v794_v52 = vpack.c.bf16 %v19746_v38, %v19746_v38  ;;  %v16989_v33 = vld [vmem:[%s18752_s4 + $0x1c00] ss:$16 sps:$4 sm:$0xff]  }
 0x41e   : > { %v16995_v38 = vld [vmem:[%s18752_s4 + $0x1c20] ss:$16 sps:$4 sm:$0xff]  }
 0x420   : > { %11342 = vmatpush1.bf16.msra.mxu0 %v16904_v53  ;;  %12408 = vmatpush1.bf16.msra.mxu1 %v16907_v54  ;;  %v16992_v53 = vld [vmem:[%s18752_s4 + $0x1c08] ss:$16 sps:$4 sm:$0xff]   ;;  %v16997_v54 = vld [vmem:[%s18752_s4 + $0x1c24] ss:$16 sps:$4 sm:$0xff]  }
 0x421   : > { %11343 = vmatprep.subr.bf16.mxu0 %v16912_v55  ;;  %12409 = vmatprep.subr.bf16.mxu1 %v16915_v56  ;;  %v17000_v55 = vld [vmem:[%s18752_s4 + $0x1c2c] ss:$16 sps:$4 sm:$0xff]   ;;  %v797_v56 = vpack.c.bf16 %v629_v51, %v629_v51  ;;  %v17073_v51 = vld [vmem:[%s18752_s4 + $0x1dc0] ss:$16 sps:$4 sm:$0xff]  }
 0x424   : > { %11344 = vmatpush1.bf16.msra.mxu0 %v16910_v43  ;;  %12410 = vmatpush1.bf16.msra.mxu1 %v16913_v58  ;;  %v16998_v43 = vld [vmem:[%s18752_s4 + $0x1c28] ss:$16 sps:$4 sm:$0xff]   ;;  %v17003_v58 = vld [vmem:[%s18752_s4 + $0x1c44] ss:$16 sps:$4 sm:$0xff]  }
 0x425   : > { %11345 = vmatprep.subr.bf16.mxu0 %v16918_v41  ;;  %12411 = vmatprep.subr.bf16.mxu1 %v16921_v60  ;;  %v17006_v41 = vld [vmem:[%s18752_s4 + $0x1c4c] ss:$16 sps:$4 sm:$0xff]   ;;  %v17001_v60 = vld [vmem:[%s18752_s4 + $0x1c40] ss:$16 sps:$4 sm:$0xff]  }
 0x428   : > { %11346 = vmatpush1.bf16.msra.mxu0 %v16916_v61  ;;  %12412 = vmatpush1.bf16.msra.mxu1 %v16919_v62  ;;  %v17004_v61 = vld [vmem:[%s18752_s4 + $0x1c48] ss:$16 sps:$4 sm:$0xff]   ;;  %v17009_v62 = vld [vmem:[%s18752_s4 + $0x1c64] ss:$16 sps:$4 sm:$0xff]  }
 0x429   : > { %11347 = vmatprep.subr.bf16.mxu0 %v16924_v0  ;;  %12413 = vmatprep.subr.bf16.mxu1 %v16927_v1  ;;  %v17012_v0 = vld [vmem:[%s18752_s4 + $0x1c6c] ss:$16 sps:$4 sm:$0xff]   ;;  %v17007_v1 = vld [vmem:[%s18752_s4 + $0x1c60] ss:$16 sps:$4 sm:$0xff]  }
 0x42c   : > { %11348 = vmatpush1.bf16.msra.mxu0 %v16922_v2  ;;  %12414 = vmatpush1.bf16.msra.mxu1 %v16925_v48  ;;  %v17010_v2 = vld [vmem:[%s18752_s4 + $0x1c68] ss:$16 sps:$4 sm:$0xff]   ;;  %v17015_v48 = vld [vmem:[%s18752_s4 + $0x1c84] ss:$16 sps:$4 sm:$0xff]  }
 0x42d   : > { %11349 = vmatprep.subr.bf16.mxu0 %v16930_v3  ;;  %12415 = vmatprep.subr.bf16.mxu1 %v16933_v4  ;;  %v17018_v3 = vld [vmem:[%s18752_s4 + $0x1c8c] ss:$16 sps:$4 sm:$0xff]   ;;  %v17013_v4 = vld [vmem:[%s18752_s4 + $0x1c80] ss:$16 sps:$4 sm:$0xff]  }
 0x430   : > { %11350 = vmatpush1.bf16.msra.mxu0 %v16928_v5  ;;  %12416 = vmatpush1.bf16.msra.mxu1 %v16931_v6  ;;  %v17016_v5 = vld [vmem:[%s18752_s4 + $0x1c88] ss:$16 sps:$4 sm:$0xff]   ;;  %v17021_v6 = vld [vmem:[%s18752_s4 + $0x1ca4] ss:$16 sps:$4 sm:$0xff]  }
 0x431   : > { %11351 = vmatprep.subr.bf16.mxu0 %v16936_v59  ;;  %12417 = vmatprep.subr.bf16.mxu1 %v16939_v8  ;;  %v17024_v59 = vld [vmem:[%s18752_s4 + $0x1cac] ss:$16 sps:$4 sm:$0xff]   ;;  %v17019_v8 = vld [vmem:[%s18752_s4 + $0x1ca0] ss:$16 sps:$4 sm:$0xff]  }
 0x434   : > { %11352 = vmatpush1.bf16.msra.mxu0 %v16934_v57  ;;  %12418 = vmatpush1.bf16.msra.mxu1 %v16937_v11  ;;  %v17022_v57 = vld [vmem:[%s18752_s4 + $0x1ca8] ss:$16 sps:$4 sm:$0xff]   ;;  %v17027_v11 = vld [vmem:[%s18752_s4 + $0x1cc4] ss:$16 sps:$4 sm:$0xff]  }
 0x435   : > { %11353 = vmatprep.subr.bf16.mxu0 %v16942_v12  ;;  %12419 = vmatprep.subr.bf16.mxu1 %v16945_v13  ;;  %v17030_v12 = vld [vmem:[%s18752_s4 + $0x1ccc] ss:$16 sps:$4 sm:$0xff]   ;;  %v17025_v13 = vld [vmem:[%s18752_s4 + $0x1cc0] ss:$16 sps:$4 sm:$0xff]  }
 0x438   : > { %11354 = vmatpush1.bf16.msra.mxu0 %v16940_v15  ;;  %12420 = vmatpush1.bf16.msra.mxu1 %v16943_v16  ;;  %v17028_v15 = vld [vmem:[%s18752_s4 + $0x1cc8] ss:$16 sps:$4 sm:$0xff]   ;;  %v17033_v16 = vld [vmem:[%s18752_s4 + $0x1ce4] ss:$16 sps:$4 sm:$0xff]  }
 0x439   : > { %11355 = vmatprep.subr.bf16.mxu0 %v16948_v17  ;;  %12421 = vmatprep.subr.bf16.mxu1 %v16951_v63  ;;  %v17036_v17 = vld [vmem:[%s18752_s4 + $0x1cec] ss:$16 sps:$4 sm:$0xff]   ;;  %v17031_v63 = vld [vmem:[%s18752_s4 + $0x1ce0] ss:$16 sps:$4 sm:$0xff]  }
 0x43c   : > { %11356 = vmatpush1.bf16.msra.mxu0 %v16946_v18  ;;  %12422 = vmatpush1.bf16.msra.mxu1 %v16949_v19  ;;  %v17034_v18 = vld [vmem:[%s18752_s4 + $0x1ce8] ss:$16 sps:$4 sm:$0xff]   ;;  %v17039_v19 = vld [vmem:[%s18752_s4 + $0x1d04] ss:$16 sps:$4 sm:$0xff]  }
 0x43d   : > { %11357 = vmatprep.subr.bf16.mxu0 %v16954_v20  ;;  %12423 = vmatprep.subr.bf16.mxu1 %v16957_v21  ;;  %v17042_v20 = vld [vmem:[%s18752_s4 + $0x1d0c] ss:$16 sps:$4 sm:$0xff]   ;;  %v17037_v21 = vld [vmem:[%s18752_s4 + $0x1d00] ss:$16 sps:$4 sm:$0xff]  }
 0x440   : > { %11358 = vmatpush1.bf16.msra.mxu0 %v16952_v9  ;;  %12424 = vmatpush1.bf16.msra.mxu1 %v16955_v23  ;;  %v17040_v9 = vld [vmem:[%s18752_s4 + $0x1d08] ss:$16 sps:$4 sm:$0xff]   ;;  %v17045_v23 = vld [vmem:[%s18752_s4 + $0x1d24] ss:$16 sps:$4 sm:$0xff]  }
 0x441   : > { %11359 = vmatprep.subr.bf16.mxu0 %v16960_v7  ;;  %12425 = vmatprep.subr.bf16.mxu1 %v16963_v24  ;;  %v17048_v7 = vld [vmem:[%s18752_s4 + $0x1d2c] ss:$16 sps:$4 sm:$0xff]   ;;  %v17043_v24 = vld [vmem:[%s18752_s4 + $0x1d20] ss:$16 sps:$4 sm:$0xff]  }
 0x444   : > { %11360 = vmatpush1.bf16.msra.mxu0 %v16958_v10  ;;  %12426 = vmatpush1.bf16.msra.mxu1 %v16961_v28  ;;  %v17046_v10 = vld [vmem:[%s18752_s4 + $0x1d28] ss:$16 sps:$4 sm:$0xff]   ;;  %v17051_v28 = vld [vmem:[%s18752_s4 + $0x1d44] ss:$16 sps:$4 sm:$0xff]  }
 0x445   : > { %11361 = vmatprep.subr.bf16.mxu0 %v16966_v31  ;;  %12427 = vmatprep.subr.bf16.mxu1 %v16969_v32  ;;  %v17054_v31 = vld [vmem:[%s18752_s4 + $0x1d4c] ss:$16 sps:$4 sm:$0xff]   ;;  %v17049_v32 = vld [vmem:[%s18752_s4 + $0x1d40] ss:$16 sps:$4 sm:$0xff]  }
 0x448   : > { %11362 = vmatpush1.bf16.msra.mxu0 %v16964_v34  ;;  %12428 = vmatpush1.bf16.msra.mxu1 %v16967_v14  ;;  %v17052_v34 = vld [vmem:[%s18752_s4 + $0x1d48] ss:$16 sps:$4 sm:$0xff]   ;;  %v17057_v14 = vld [vmem:[%s18752_s4 + $0x1d64] ss:$16 sps:$4 sm:$0xff]  }
 0x449   : > { %11363 = vmatprep.subr.bf16.mxu0 %v16972_v35  ;;  %12429 = vmatprep.subr.bf16.mxu1 %v16975_v36  ;;  %v17060_v35 = vld [vmem:[%s18752_s4 + $0x1d6c] ss:$16 sps:$4 sm:$0xff]   ;;  %v17055_v36 = vld [vmem:[%s18752_s4 + $0x1d60] ss:$16 sps:$4 sm:$0xff]  }
 0x44c   : > { %11364 = vmatpush1.bf16.msra.mxu0 %v16970_v27  ;;  %12430 = vmatpush1.bf16.msra.mxu1 %v16973_v37  ;;  %v17058_v27 = vld [vmem:[%s18752_s4 + $0x1d68] ss:$16 sps:$4 sm:$0xff]   ;;  %v17063_v37 = vld [vmem:[%s18752_s4 + $0x1d84] ss:$16 sps:$4 sm:$0xff]  }
 0x44d   : > { %11365 = vmatprep.subr.bf16.mxu0 %v16978_v25  ;;  %12431 = vmatprep.subr.bf16.mxu1 %v16981_v39  ;;  %v17066_v25 = vld [vmem:[%s18752_s4 + $0x1d8c] ss:$16 sps:$4 sm:$0xff]   ;;  %v17061_v39 = vld [vmem:[%s18752_s4 + $0x1d80] ss:$16 sps:$4 sm:$0xff]  }
 0x450   : > { %11366 = vmatpush1.bf16.msra.mxu0 %v16976_v22  ;;  %12432 = vmatpush1.bf16.msra.mxu1 %v16979_v29  ;;  %v17064_v22 = vld [vmem:[%s18752_s4 + $0x1d88] ss:$16 sps:$4 sm:$0xff]   ;;  %v17069_v29 = vld [vmem:[%s18752_s4 + $0x1da4] ss:$16 sps:$4 sm:$0xff]  }
 0x451   : > { %11367 = vmatprep.subr.bf16.mxu0 %v16984_v42  ;;  %12433 = vmatprep.subr.bf16.mxu1 %v16987_v45  ;;  %v17072_v42 = vld [vmem:[%s18752_s4 + $0x1dac] ss:$16 sps:$4 sm:$0xff]   ;;  %v17067_v45 = vld [vmem:[%s18752_s4 + $0x1da0] ss:$16 sps:$4 sm:$0xff]  }
 0x454   : > { %11368 = vmatpush1.bf16.msra.mxu0 %v16982_v26  ;;  %12434 = vmatpush1.bf16.msra.mxu1 %v16985_v47  ;;  %v17070_v26 = vld [vmem:[%s18752_s4 + $0x1da8] ss:$16 sps:$4 sm:$0xff]   ;;  %v17075_v47 = vld [vmem:[%s18752_s4 + $0x1dc4] ss:$16 sps:$4 sm:$0xff]  }
 0x455   : > { %11378 = vmatprep.subr.bf16.mxu0 %v16991_v49  ;;  %12444 = vmatprep.subr.bf16.mxu1 %v16994_v30  ;;  %v17078_v49 = vld [vmem:[%s18752_s4 + $0x1dcc] ss:$16 sps:$4 sm:$0xff]   ;;  %v614_v30 = vcombine.high %v19813_v40, %v19813_v40  ;;  %v17079_v40 = vld [vmem:[%s18752_s4 + $0x1de0] ss:$16 sps:$4 sm:$0xff]  }
 0x457   : > { %11370 = vmatmul.mubr.bf16.vlgmr.msra.gmra.mrb[0].mxu0 %v794_v52  ;;  %12436 = vmatmul.mubr.bf16.vlgmr.msra.gmra.mrb[0].mxu1 %v794_v52  ;;  %v17076_v52 = vld [vmem:[%s18752_s4 + $0x1dc8] ss:$16 sps:$4 sm:$0xff]  }
 0x458   : > { %11379 = vmatpush1.bf16.msra.mxu0 %v16989_v33  ;;  %12445 = vmatpush1.bf16.msra.mxu1 %v16992_v53  ;;  %v17081_v33 = vld [vmem:[%s18752_s4 + $0x1de4] ss:$16 sps:$4 sm:$0xff]   ;;  %v17084_v53 = vld [vmem:[%s18752_s4 + $0x1dec] ss:$16 sps:$4 sm:$0xff]  }
 0x459   : > { %11380 = vmatprep.subr.bf16.mxu0 %v16997_v54  ;;  %12446 = vmatprep.subr.bf16.mxu1 %v17000_v55  ;;  %v19894_v54 = vrot.slane %v614_v30, %v18837_v50  ;;  %v17082_v55 = vld [vmem:[%s18752_s4 + $0x1de8] ss:$16 sps:$4 sm:$0xff]  }
 0x45a   : > { %11410 = vmatprep.mubr.bf16.mxu0 %v797_v56  ;;  %12476 = vmatprep.mubr.bf16.mxu1 %v797_v56  ;;  %v17087_v56 = vld [vmem:[%s18752_s4 + $0x1e04] ss:$16 sps:$4 sm:$0xff]   ;;  %v17160_v30 = vld [vmem:[%s18752_s4 + $0x1f88] ss:$16 sps:$4 sm:$0xff]  }
 0x45c   : > { %11381 = vmatpush1.bf16.msra.mxu0 %v16995_v38  ;;  %12447 = vmatpush1.bf16.msra.mxu1 %v16998_v43  ;;  %v17090_v38 = vld [vmem:[%s18752_s4 + $0x1e0c] ss:$16 sps:$4 sm:$0xff]   ;;  %v630_v43 = vcombine.high %v19894_v54, %v19894_v54 }
 0x45d   : > { %11382 = vmatprep.subr.bf16.mxu0 %v17003_v58  ;;  %12448 = vmatprep.subr.bf16.mxu1 %v17006_v41  ;;  %v796_v58 = vpack.c.bf16 %v19821_v46, %v19821_v46  ;;  %v17085_v41 = vld [vmem:[%s18752_s4 + $0x1e00] ss:$16 sps:$4 sm:$0xff]  }
 0x45e   : > { %v17091_v46 = vld [vmem:[%s18752_s4 + $0x1e20] ss:$16 sps:$4 sm:$0xff]  }
 0x460   : > { %11383 = vmatpush1.bf16.msra.mxu0 %v17001_v60  ;;  %12449 = vmatpush1.bf16.msra.mxu1 %v17004_v61  ;;  %v17088_v60 = vld [vmem:[%s18752_s4 + $0x1e08] ss:$16 sps:$4 sm:$0xff]   ;;  %v17093_v61 = vld [vmem:[%s18752_s4 + $0x1e24] ss:$16 sps:$4 sm:$0xff]  }
 0x461   : > { %11384 = vmatprep.subr.bf16.mxu0 %v17009_v62  ;;  %12450 = vmatprep.subr.bf16.mxu1 %v17012_v0  ;;  %v17096_v62 = vld [vmem:[%s18752_s4 + $0x1e2c] ss:$16 sps:$4 sm:$0xff]   ;;  %v799_v0 = vpack.c.bf16 %v630_v43, %v630_v43  ;;  %v17172_v43 = vld [vmem:[%s18752_s4 + $0x1fc8] ss:$16 sps:$4 sm:$0xff]  }
 0x464   : > { %11385 = vmatpush1.bf16.msra.mxu0 %v17007_v1  ;;  %12451 = vmatpush1.bf16.msra.mxu1 %v17010_v2  ;;  %v17094_v1 = vld [vmem:[%s18752_s4 + $0x1e28] ss:$16 sps:$4 sm:$0xff]   ;;  %v17099_v2 = vld [vmem:[%s18752_s4 + $0x1e44] ss:$16 sps:$4 sm:$0xff]  }
 0x465   : > { %11386 = vmatprep.subr.bf16.mxu0 %v17015_v48  ;;  %12452 = vmatprep.subr.bf16.mxu1 %v17018_v3  ;;  %v17102_v48 = vld [vmem:[%s18752_s4 + $0x1e4c] ss:$16 sps:$4 sm:$0xff]   ;;  %v17097_v3 = vld [vmem:[%s18752_s4 + $0x1e40] ss:$16 sps:$4 sm:$0xff]  }
 0x468   : > { %11387 = vmatpush1.bf16.msra.mxu0 %v17013_v4  ;;  %12453 = vmatpush1.bf16.msra.mxu1 %v17016_v5  ;;  %v17100_v4 = vld [vmem:[%s18752_s4 + $0x1e48] ss:$16 sps:$4 sm:$0xff]   ;;  %v17105_v5 = vld [vmem:[%s18752_s4 + $0x1e64] ss:$16 sps:$4 sm:$0xff]  }
 0x469   : > { %11388 = vmatprep.subr.bf16.mxu0 %v17021_v6  ;;  %12454 = vmatprep.subr.bf16.mxu1 %v17024_v59  ;;  %v17108_v6 = vld [vmem:[%s18752_s4 + $0x1e6c] ss:$16 sps:$4 sm:$0xff]   ;;  %v17103_v59 = vld [vmem:[%s18752_s4 + $0x1e60] ss:$16 sps:$4 sm:$0xff]  }
 0x46c   : > { %11389 = vmatpush1.bf16.msra.mxu0 %v17019_v8  ;;  %12455 = vmatpush1.bf16.msra.mxu1 %v17022_v57  ;;  %v17106_v8 = vld [vmem:[%s18752_s4 + $0x1e68] ss:$16 sps:$4 sm:$0xff]   ;;  %v17111_v57 = vld [vmem:[%s18752_s4 + $0x1e84] ss:$16 sps:$4 sm:$0xff]  }
 0x46d   : > { %11390 = vmatprep.subr.bf16.mxu0 %v17027_v11  ;;  %12456 = vmatprep.subr.bf16.mxu1 %v17030_v12  ;;  %v17114_v11 = vld [vmem:[%s18752_s4 + $0x1e8c] ss:$16 sps:$4 sm:$0xff]   ;;  %v17109_v12 = vld [vmem:[%s18752_s4 + $0x1e80] ss:$16 sps:$4 sm:$0xff]  }
 0x470   : > { %11391 = vmatpush1.bf16.msra.mxu0 %v17025_v13  ;;  %12457 = vmatpush1.bf16.msra.mxu1 %v17028_v15  ;;  %v17112_v13 = vld [vmem:[%s18752_s4 + $0x1e88] ss:$16 sps:$4 sm:$0xff]   ;;  %v17117_v15 = vld [vmem:[%s18752_s4 + $0x1ea4] ss:$16 sps:$4 sm:$0xff]  }
 0x471   : > { %11392 = vmatprep.subr.bf16.mxu0 %v17033_v16  ;;  %12458 = vmatprep.subr.bf16.mxu1 %v17036_v17  ;;  %v17120_v16 = vld [vmem:[%s18752_s4 + $0x1eac] ss:$16 sps:$4 sm:$0xff]   ;;  %v17115_v17 = vld [vmem:[%s18752_s4 + $0x1ea0] ss:$16 sps:$4 sm:$0xff]  }
 0x474   : > { %11393 = vmatpush1.bf16.msra.mxu0 %v17031_v63  ;;  %12459 = vmatpush1.bf16.msra.mxu1 %v17034_v18  ;;  %v17118_v63 = vld [vmem:[%s18752_s4 + $0x1ea8] ss:$16 sps:$4 sm:$0xff]   ;;  %v17123_v18 = vld [vmem:[%s18752_s4 + $0x1ec4] ss:$16 sps:$4 sm:$0xff]  }
 0x475   : > { %11394 = vmatprep.subr.bf16.mxu0 %v17039_v19  ;;  %12460 = vmatprep.subr.bf16.mxu1 %v17042_v20  ;;  %v17126_v19 = vld [vmem:[%s18752_s4 + $0x1ecc] ss:$16 sps:$4 sm:$0xff]   ;;  %v17121_v20 = vld [vmem:[%s18752_s4 + $0x1ec0] ss:$16 sps:$4 sm:$0xff]  }
 0x478   : > { %11395 = vmatpush1.bf16.msra.mxu0 %v17037_v21  ;;  %12461 = vmatpush1.bf16.msra.mxu1 %v17040_v9  ;;  %v17124_v21 = vld [vmem:[%s18752_s4 + $0x1ec8] ss:$16 sps:$4 sm:$0xff]   ;;  %v17129_v9 = vld [vmem:[%s18752_s4 + $0x1ee4] ss:$16 sps:$4 sm:$0xff]  }
 0x479   : > { %11396 = vmatprep.subr.bf16.mxu0 %v17045_v23  ;;  %12462 = vmatprep.subr.bf16.mxu1 %v17048_v7  ;;  %v17132_v23 = vld [vmem:[%s18752_s4 + $0x1eec] ss:$16 sps:$4 sm:$0xff]   ;;  %v17127_v7 = vld [vmem:[%s18752_s4 + $0x1ee0] ss:$16 sps:$4 sm:$0xff]  }
 0x47c   : > { %11397 = vmatpush1.bf16.msra.mxu0 %v17043_v24  ;;  %12463 = vmatpush1.bf16.msra.mxu1 %v17046_v10  ;;  %v17130_v24 = vld [vmem:[%s18752_s4 + $0x1ee8] ss:$16 sps:$4 sm:$0xff]   ;;  %v17135_v10 = vld [vmem:[%s18752_s4 + $0x1f04] ss:$16 sps:$4 sm:$0xff]  }
 0x47d   : > { %11398 = vmatprep.subr.bf16.mxu0 %v17051_v28  ;;  %12464 = vmatprep.subr.bf16.mxu1 %v17054_v31  ;;  %v17138_v28 = vld [vmem:[%s18752_s4 + $0x1f0c] ss:$16 sps:$4 sm:$0xff]   ;;  %v17133_v31 = vld [vmem:[%s18752_s4 + $0x1f00] ss:$16 sps:$4 sm:$0xff]  }
 0x480   : > { %11399 = vmatpush1.bf16.msra.mxu0 %v17049_v32  ;;  %12465 = vmatpush1.bf16.msra.mxu1 %v17052_v34  ;;  %v17136_v32 = vld [vmem:[%s18752_s4 + $0x1f08] ss:$16 sps:$4 sm:$0xff]   ;;  %v17141_v34 = vld [vmem:[%s18752_s4 + $0x1f24] ss:$16 sps:$4 sm:$0xff]  }
 0x481   : > { %11400 = vmatprep.subr.bf16.mxu0 %v17057_v14  ;;  %12466 = vmatprep.subr.bf16.mxu1 %v17060_v35  ;;  %v17144_v14 = vld [vmem:[%s18752_s4 + $0x1f2c] ss:$16 sps:$4 sm:$0xff]   ;;  %v17139_v35 = vld [vmem:[%s18752_s4 + $0x1f20] ss:$16 sps:$4 sm:$0xff]  }
 0x484   : > { %11401 = vmatpush1.bf16.msra.mxu0 %v17055_v36  ;;  %12467 = vmatpush1.bf16.msra.mxu1 %v17058_v27  ;;  %v17142_v36 = vld [vmem:[%s18752_s4 + $0x1f28] ss:$16 sps:$4 sm:$0xff]   ;;  %v17147_v27 = vld [vmem:[%s18752_s4 + $0x1f44] ss:$16 sps:$4 sm:$0xff]  }
 0x485   : > { %11402 = vmatprep.subr.bf16.mxu0 %v17063_v37  ;;  %12468 = vmatprep.subr.bf16.mxu1 %v17066_v25  ;;  %v17150_v37 = vld [vmem:[%s18752_s4 + $0x1f4c] ss:$16 sps:$4 sm:$0xff]   ;;  %v17145_v25 = vld [vmem:[%s18752_s4 + $0x1f40] ss:$16 sps:$4 sm:$0xff]  }
 0x488   : > { %11403 = vmatpush1.bf16.msra.mxu0 %v17061_v39  ;;  %12469 = vmatpush1.bf16.msra.mxu1 %v17064_v22  ;;  %v17148_v39 = vld [vmem:[%s18752_s4 + $0x1f48] ss:$16 sps:$4 sm:$0xff]   ;;  %v17153_v22 = vld [vmem:[%s18752_s4 + $0x1f64] ss:$16 sps:$4 sm:$0xff]  }
 0x489   : > { %11404 = vmatprep.subr.bf16.mxu0 %v17069_v29  ;;  %12470 = vmatprep.subr.bf16.mxu1 %v17072_v42  ;;  %v17156_v29 = vld [vmem:[%s18752_s4 + $0x1f6c] ss:$16 sps:$4 sm:$0xff]   ;;  %v17151_v42 = vld [vmem:[%s18752_s4 + $0x1f60] ss:$16 sps:$4 sm:$0xff]  }
 0x48c   : > { %11405 = vmatpush1.bf16.msra.mxu0 %v17067_v45  ;;  %12471 = vmatpush1.bf16.msra.mxu1 %v17070_v26  ;;  %v17154_v45 = vld [vmem:[%s18752_s4 + $0x1f68] ss:$16 sps:$4 sm:$0xff]   ;;  %v17159_v26 = vld [vmem:[%s18752_s4 + $0x1f84] ss:$16 sps:$4 sm:$0xff]  }
 0x48d   : > { %11406 = vmatprep.subr.bf16.mxu0 %v17075_v47  ;;  %12472 = vmatprep.subr.bf16.mxu1 %v17078_v49  ;;  %v17162_v47 = vld [vmem:[%s18752_s4 + $0x1f8c] ss:$16 sps:$4 sm:$0xff]   ;;  %v17157_v49 = vld [vmem:[%s18752_s4 + $0x1f80] ss:$16 sps:$4 sm:$0xff]  }
 0x490   : > { %11407 = vmatpush1.bf16.msra.mxu0 %v17073_v51  ;;  %12473 = vmatpush1.bf16.msra.mxu1 %v17076_v52  ;;  %v17165_v51 = vld [vmem:[%s18752_s4 + $0x1fa4] ss:$16 sps:$4 sm:$0xff]   ;;  %v17168_v52 = vld [vmem:[%s18752_s4 + $0x1fac] ss:$16 sps:$4 sm:$0xff]  }
 0x491   : > { %11408 = vmatprep.subr.bf16.mxu0 %v17081_v33  ;;  %12474 = vmatprep.subr.bf16.mxu1 %v17084_v53  ;;  %v17163_v33 = vld [vmem:[%s18752_s4 + $0x1fa0] ss:$16 sps:$4 sm:$0xff]   ;;  %v17166_v53 = vld [vmem:[%s18752_s4 + $0x1fa8] ss:$16 sps:$4 sm:$0xff]  }
 0x494   : > { %11409 = vmatpush1.bf16.msra.mxu0 %v17079_v40  ;;  %12475 = vmatpush1.bf16.msra.mxu1 %v17082_v55  ;;  %v17171_v40 = vld [vmem:[%s18752_s4 + $0x1fc4] ss:$16 sps:$4 sm:$0xff]   ;;  %v17174_v55 = vld [vmem:[%s18752_s4 + $0x1fcc] ss:$16 sps:$4 sm:$0xff]  }
 0x495   : > { %11419 = vmatprep.subr.bf16.mxu0 %v17087_v56  ;;  %12485 = vmatprep.subr.bf16.mxu1 %v17090_v38  ;;  %v19961_v56 = vld [vmem:[%s18785_s9 + $0x40] sm:$0xff]  ;;  %v17169_v38 = vld [vmem:[%s18752_s4 + $0x1fc0] ss:$16 sps:$4 sm:$0xff]  }
 0x497   : > { %11411 = vmatmul.mubr.bf16.vlgmr.msra.gmra.mrb[0].mxu0 %v796_v58  ;;  %12477 = vmatmul.mubr.bf16.vlgmr.msra.gmra.mrb[0].mxu1 %v796_v58  ;;  %v17177_v58 = vld [vmem:[%s18752_s4 + $0x1fe4] ss:$16 sps:$4 sm:$0xff]  }
 0x498   : > { %11420 = vmatpush1.bf16.msra.mxu0 %v17085_v41  ;;  %12486 = vmatpush1.bf16.msra.mxu1 %v17088_v60  ;;  %v17180_v41 = vld [vmem:[%s18752_s4 + $0x1fec] ss:$16 sps:$4 sm:$0xff]   ;;  %v19969_v60 = vrot.slane %v19961_v56, %v18837_v50 }
 0x499   : > { %11421 = vmatprep.subr.bf16.mxu0 %v17093_v61  ;;  %12487 = vmatprep.subr.bf16.mxu1 %v17096_v62  ;;  %v17175_v61 = vld [vmem:[%s18752_s4 + $0x1fe0] ss:$16 sps:$4 sm:$0xff]   ;;  %v17178_v62 = vld [vmem:[%s18752_s4 + $0x1fe8] ss:$16 sps:$4 sm:$0xff]  }
 0x49a   : > { %11451 = vmatprep.mubr.bf16.mxu0 %v799_v0  ;;  %12517 = vmatprep.mubr.bf16.mxu1 %v799_v0  ;;  %v17184_v0 = vld [vmem:[%s18752_s4 + $0x2004] ss:$16 sps:$4 sm:$0xff]  }
 0x49c   : > { %11422 = vmatpush1.bf16.msra.mxu0 %v17091_v46  ;;  %12488 = vmatpush1.bf16.msra.mxu1 %v17094_v1  ;;  %v17187_v46 = vld [vmem:[%s18752_s4 + $0x200c] ss:$16 sps:$4 sm:$0xff]   ;;  %v646_v1 = vcombine.high %v19969_v60, %v19969_v60 }
 0x49d   : > { %11423 = vmatprep.subr.bf16.mxu0 %v17099_v2  ;;  %12489 = vmatprep.subr.bf16.mxu1 %v17102_v48  ;;  %v798_v2 = vpack.c.bf16 %v19894_v54, %v19894_v54  ;;  %v17182_v48 = vld [vmem:[%s18752_s4 + $0x2000] ss:$16 sps:$4 sm:$0xff]  }
 0x49e   : > { %v17188_v54 = vld [vmem:[%s18752_s4 + $0x2020] ss:$16 sps:$4 sm:$0xff]  }
 0x4a0   : > { %11424 = vmatpush1.bf16.msra.mxu0 %v17097_v3  ;;  %12490 = vmatpush1.bf16.msra.mxu1 %v17100_v4  ;;  %v17185_v3 = vld [vmem:[%s18752_s4 + $0x2008] ss:$16 sps:$4 sm:$0xff]   ;;  %v17190_v4 = vld [vmem:[%s18752_s4 + $0x2024] ss:$16 sps:$4 sm:$0xff]  }
 0x4a1   : > { %11425 = vmatprep.subr.bf16.mxu0 %v17105_v5  ;;  %12491 = vmatprep.subr.bf16.mxu1 %v17108_v6  ;;  %v17193_v5 = vld [vmem:[%s18752_s4 + $0x202c] ss:$16 sps:$4 sm:$0xff]   ;;  %v801_v6 = vpack.c.bf16 %v646_v1, %v646_v1  ;;  %v17266_v1 = vld [vmem:[%s18752_s4 + $0x21c0] ss:$16 sps:$4 sm:$0xff]  }
 0x4a4   : > { %11426 = vmatpush1.bf16.msra.mxu0 %v17103_v59  ;;  %12492 = vmatpush1.bf16.msra.mxu1 %v17106_v8  ;;  %v17191_v59 = vld [vmem:[%s18752_s4 + $0x2028] ss:$16 sps:$4 sm:$0xff]   ;;  %v17196_v8 = vld [vmem:[%s18752_s4 + $0x2044] ss:$16 sps:$4 sm:$0xff]  }
 0x4a5   : > { %11427 = vmatprep.subr.bf16.mxu0 %v17111_v57  ;;  %12493 = vmatprep.subr.bf16.mxu1 %v17114_v11  ;;  %v17199_v57 = vld [vmem:[%s18752_s4 + $0x204c] ss:$16 sps:$4 sm:$0xff]   ;;  %v17194_v11 = vld [vmem:[%s18752_s4 + $0x2040] ss:$16 sps:$4 sm:$0xff]  }
 0x4a8   : > { %11428 = vmatpush1.bf16.msra.mxu0 %v17109_v12  ;;  %12494 = vmatpush1.bf16.msra.mxu1 %v17112_v13  ;;  %v17197_v12 = vld [vmem:[%s18752_s4 + $0x2048] ss:$16 sps:$4 sm:$0xff]   ;;  %v17202_v13 = vld [vmem:[%s18752_s4 + $0x2064] ss:$16 sps:$4 sm:$0xff]  }
 0x4a9   : > { %11429 = vmatprep.subr.bf16.mxu0 %v17117_v15  ;;  %12495 = vmatprep.subr.bf16.mxu1 %v17120_v16  ;;  %v17205_v15 = vld [vmem:[%s18752_s4 + $0x206c] ss:$16 sps:$4 sm:$0xff]   ;;  %v17200_v16 = vld [vmem:[%s18752_s4 + $0x2060] ss:$16 sps:$4 sm:$0xff]  }
 0x4ac   : > { %11430 = vmatpush1.bf16.msra.mxu0 %v17115_v17  ;;  %12496 = vmatpush1.bf16.msra.mxu1 %v17118_v63  ;;  %v17203_v17 = vld [vmem:[%s18752_s4 + $0x2068] ss:$16 sps:$4 sm:$0xff]   ;;  %v17208_v63 = vld [vmem:[%s18752_s4 + $0x2084] ss:$16 sps:$4 sm:$0xff]  }
 0x4ad   : > { %11431 = vmatprep.subr.bf16.mxu0 %v17123_v18  ;;  %12497 = vmatprep.subr.bf16.mxu1 %v17126_v19  ;;  %v17211_v18 = vld [vmem:[%s18752_s4 + $0x208c] ss:$16 sps:$4 sm:$0xff]   ;;  %v17206_v19 = vld [vmem:[%s18752_s4 + $0x2080] ss:$16 sps:$4 sm:$0xff]  }
 0x4b0   : > { %11432 = vmatpush1.bf16.msra.mxu0 %v17121_v20  ;;  %12498 = vmatpush1.bf16.msra.mxu1 %v17124_v21  ;;  %v17209_v20 = vld [vmem:[%s18752_s4 + $0x2088] ss:$16 sps:$4 sm:$0xff]   ;;  %v17214_v21 = vld [vmem:[%s18752_s4 + $0x20a4] ss:$16 sps:$4 sm:$0xff]  }
 0x4b1   : > { %11433 = vmatprep.subr.bf16.mxu0 %v17129_v9  ;;  %12499 = vmatprep.subr.bf16.mxu1 %v17132_v23  ;;  %v17217_v9 = vld [vmem:[%s18752_s4 + $0x20ac] ss:$16 sps:$4 sm:$0xff]   ;;  %v17212_v23 = vld [vmem:[%s18752_s4 + $0x20a0] ss:$16 sps:$4 sm:$0xff]  }
 0x4b4   : > { %11434 = vmatpush1.bf16.msra.mxu0 %v17127_v7  ;;  %12500 = vmatpush1.bf16.msra.mxu1 %v17130_v24  ;;  %v17215_v7 = vld [vmem:[%s18752_s4 + $0x20a8] ss:$16 sps:$4 sm:$0xff]   ;;  %v17220_v24 = vld [vmem:[%s18752_s4 + $0x20c4] ss:$16 sps:$4 sm:$0xff]  }
 0x4b5   : > { %11435 = vmatprep.subr.bf16.mxu0 %v17135_v10  ;;  %12501 = vmatprep.subr.bf16.mxu1 %v17138_v28  ;;  %v17223_v10 = vld [vmem:[%s18752_s4 + $0x20cc] ss:$16 sps:$4 sm:$0xff]   ;;  %v17218_v28 = vld [vmem:[%s18752_s4 + $0x20c0] ss:$16 sps:$4 sm:$0xff]  }
 0x4b8   : > { %11436 = vmatpush1.bf16.msra.mxu0 %v17133_v31  ;;  %12502 = vmatpush1.bf16.msra.mxu1 %v17136_v32  ;;  %v17221_v31 = vld [vmem:[%s18752_s4 + $0x20c8] ss:$16 sps:$4 sm:$0xff]   ;;  %v17226_v32 = vld [vmem:[%s18752_s4 + $0x20e4] ss:$16 sps:$4 sm:$0xff]  }
 0x4b9   : > { %11437 = vmatprep.subr.bf16.mxu0 %v17141_v34  ;;  %12503 = vmatprep.subr.bf16.mxu1 %v17144_v14  ;;  %v17229_v34 = vld [vmem:[%s18752_s4 + $0x20ec] ss:$16 sps:$4 sm:$0xff]   ;;  %v17224_v14 = vld [vmem:[%s18752_s4 + $0x20e0] ss:$16 sps:$4 sm:$0xff]  }
 0x4bc   : > { %11438 = vmatpush1.bf16.msra.mxu0 %v17139_v35  ;;  %12504 = vmatpush1.bf16.msra.mxu1 %v17142_v36  ;;  %v17227_v35 = vld [vmem:[%s18752_s4 + $0x20e8] ss:$16 sps:$4 sm:$0xff]   ;;  %v17232_v36 = vld [vmem:[%s18752_s4 + $0x2104] ss:$16 sps:$4 sm:$0xff]  }
 0x4bd   : > { %11439 = vmatprep.subr.bf16.mxu0 %v17147_v27  ;;  %12505 = vmatprep.subr.bf16.mxu1 %v17150_v37  ;;  %v17235_v27 = vld [vmem:[%s18752_s4 + $0x210c] ss:$16 sps:$4 sm:$0xff]   ;;  %v17230_v37 = vld [vmem:[%s18752_s4 + $0x2100] ss:$16 sps:$4 sm:$0xff]  }
 0x4c0   : > { %11440 = vmatpush1.bf16.msra.mxu0 %v17145_v25  ;;  %12506 = vmatpush1.bf16.msra.mxu1 %v17148_v39  ;;  %v17233_v25 = vld [vmem:[%s18752_s4 + $0x2108] ss:$16 sps:$4 sm:$0xff]   ;;  %v17238_v39 = vld [vmem:[%s18752_s4 + $0x2124] ss:$16 sps:$4 sm:$0xff]  }
 0x4c1   : > { %11441 = vmatprep.subr.bf16.mxu0 %v17153_v22  ;;  %12507 = vmatprep.subr.bf16.mxu1 %v17156_v29  ;;  %v17241_v22 = vld [vmem:[%s18752_s4 + $0x212c] ss:$16 sps:$4 sm:$0xff]   ;;  %v17236_v29 = vld [vmem:[%s18752_s4 + $0x2120] ss:$16 sps:$4 sm:$0xff]  }
 0x4c4   : > { %11442 = vmatpush1.bf16.msra.mxu0 %v17151_v42  ;;  %12508 = vmatpush1.bf16.msra.mxu1 %v17154_v45  ;;  %v17239_v42 = vld [vmem:[%s18752_s4 + $0x2128] ss:$16 sps:$4 sm:$0xff]   ;;  %v17244_v45 = vld [vmem:[%s18752_s4 + $0x2144] ss:$16 sps:$4 sm:$0xff]  }
 0x4c5   : > { %11443 = vmatprep.subr.bf16.mxu0 %v17159_v26  ;;  %12509 = vmatprep.subr.bf16.mxu1 %v17162_v47  ;;  %v17247_v26 = vld [vmem:[%s18752_s4 + $0x214c] ss:$16 sps:$4 sm:$0xff]   ;;  %v17242_v47 = vld [vmem:[%s18752_s4 + $0x2140] ss:$16 sps:$4 sm:$0xff]  }
 0x4c8   : > { %11444 = vmatpush1.bf16.msra.mxu0 %v17157_v49  ;;  %12510 = vmatpush1.bf16.msra.mxu1 %v17160_v30  ;;  %v17245_v49 = vld [vmem:[%s18752_s4 + $0x2148] ss:$16 sps:$4 sm:$0xff]   ;;  %v17250_v30 = vld [vmem:[%s18752_s4 + $0x2164] ss:$16 sps:$4 sm:$0xff]  }
 0x4c9   : > { %11445 = vmatprep.subr.bf16.mxu0 %v17165_v51  ;;  %12511 = vmatprep.subr.bf16.mxu1 %v17168_v52  ;;  %v17253_v51 = vld [vmem:[%s18752_s4 + $0x216c] ss:$16 sps:$4 sm:$0xff]   ;;  %v17248_v52 = vld [vmem:[%s18752_s4 + $0x2160] ss:$16 sps:$4 sm:$0xff]  }
 0x4cc   : > { %11446 = vmatpush1.bf16.msra.mxu0 %v17163_v33  ;;  %12512 = vmatpush1.bf16.msra.mxu1 %v17166_v53  ;;  %v17251_v33 = vld [vmem:[%s18752_s4 + $0x2168] ss:$16 sps:$4 sm:$0xff]   ;;  %v17256_v53 = vld [vmem:[%s18752_s4 + $0x2184] ss:$16 sps:$4 sm:$0xff]  }
 0x4cd   : > { %11447 = vmatprep.subr.bf16.mxu0 %v17171_v40  ;;  %12513 = vmatprep.subr.bf16.mxu1 %v17174_v55  ;;  %v17259_v40 = vld [vmem:[%s18752_s4 + $0x218c] ss:$16 sps:$4 sm:$0xff]   ;;  %v17254_v55 = vld [vmem:[%s18752_s4 + $0x2180] ss:$16 sps:$4 sm:$0xff]  }
 0x4d0   : > { %11448 = vmatpush1.bf16.msra.mxu0 %v17169_v38  ;;  %12514 = vmatpush1.bf16.msra.mxu1 %v17172_v43  ;;  %v17257_v38 = vld [vmem:[%s18752_s4 + $0x2188] ss:$16 sps:$4 sm:$0xff]   ;;  %v17262_v43 = vld [vmem:[%s18752_s4 + $0x21a4] ss:$16 sps:$4 sm:$0xff]  }
 0x4d1   : > { %11449 = vmatprep.subr.bf16.mxu0 %v17177_v58  ;;  %12515 = vmatprep.subr.bf16.mxu1 %v17180_v41  ;;  %v17265_v58 = vld [vmem:[%s18752_s4 + $0x21ac] ss:$16 sps:$4 sm:$0xff]   ;;  %v17260_v41 = vld [vmem:[%s18752_s4 + $0x21a0] ss:$16 sps:$4 sm:$0xff]  }
 0x4d4   : > { %11450 = vmatpush1.bf16.msra.mxu0 %v17175_v61  ;;  %12516 = vmatpush1.bf16.msra.mxu1 %v17178_v62  ;;  %v17263_v61 = vld [vmem:[%s18752_s4 + $0x21a8] ss:$16 sps:$4 sm:$0xff]   ;;  %v17268_v62 = vld [vmem:[%s18752_s4 + $0x21c4] ss:$16 sps:$4 sm:$0xff]  }
 0x4d5   : > { %11460 = vmatprep.subr.bf16.mxu0 %v17184_v0  ;;  %12526 = vmatprep.subr.bf16.mxu1 %v17187_v46  ;;  %v17271_v0 = vld [vmem:[%s18752_s4 + $0x21cc] ss:$16 sps:$4 sm:$0xff]   ;;  %v631_v46 = vcombine.high %v19961_v56, %v19961_v56  ;;  %v17272_v56 = vld [vmem:[%s18752_s4 + $0x21e0] ss:$16 sps:$4 sm:$0xff]  }
 0x4d7   : > { %11452 = vmatmul.mubr.bf16.vlgmr.msra.gmra.mrb[0].mxu0 %v798_v2  ;;  %12518 = vmatmul.mubr.bf16.vlgmr.msra.gmra.mrb[0].mxu1 %v798_v2  ;;  %v17269_v2 = vld [vmem:[%s18752_s4 + $0x21c8] ss:$16 sps:$4 sm:$0xff]  }
 0x4d8   : > { %11461 = vmatpush1.bf16.msra.mxu0 %v17182_v48  ;;  %12527 = vmatpush1.bf16.msra.mxu1 %v17185_v3  ;;  %v17274_v48 = vld [vmem:[%s18752_s4 + $0x21e4] ss:$16 sps:$4 sm:$0xff]   ;;  %v17277_v3 = vld [vmem:[%s18752_s4 + $0x21ec] ss:$16 sps:$4 sm:$0xff]  }
 0x4d9   : > { %11462 = vmatprep.subr.bf16.mxu0 %v17190_v4  ;;  %12528 = vmatprep.subr.bf16.mxu1 %v17193_v5  ;;  %v20042_v4 = vrot.slane %v631_v46, %v18837_v50  ;;  %v17275_v5 = vld [vmem:[%s18752_s4 + $0x21e8] ss:$16 sps:$4 sm:$0xff]  }
 0x4da   : > { %11492 = vmatprep.mubr.bf16.mxu0 %v801_v6  ;;  %12558 = vmatprep.mubr.bf16.mxu1 %v801_v6  ;;  %v17280_v6 = vld [vmem:[%s18752_s4 + $0x2204] ss:$16 sps:$4 sm:$0xff]   ;;  %v17353_v46 = vld [vmem:[%s18752_s4 + $0x2388] ss:$16 sps:$4 sm:$0xff]  }
 0x4dc   : > { %11463 = vmatpush1.bf16.msra.mxu0 %v17188_v54  ;;  %12529 = vmatpush1.bf16.msra.mxu1 %v17191_v59  ;;  %v17283_v54 = vld [vmem:[%s18752_s4 + $0x220c] ss:$16 sps:$4 sm:$0xff]   ;;  %v647_v59 = vcombine.high %v20042_v4, %v20042_v4 }
 0x4dd   : > { %11464 = vmatprep.subr.bf16.mxu0 %v17196_v8  ;;  %12530 = vmatprep.subr.bf16.mxu1 %v17199_v57  ;;  %v800_v8 = vpack.c.bf16 %v19969_v60, %v19969_v60  ;;  %v17278_v57 = vld [vmem:[%s18752_s4 + $0x2200] ss:$16 sps:$4 sm:$0xff]  }
 0x4de   : > { %v17284_v60 = vld [vmem:[%s18752_s4 + $0x2220] ss:$16 sps:$4 sm:$0xff]  }
 0x4e0   : > { %11465 = vmatpush1.bf16.msra.mxu0 %v17194_v11  ;;  %12531 = vmatpush1.bf16.msra.mxu1 %v17197_v12  ;;  %v17281_v11 = vld [vmem:[%s18752_s4 + $0x2208] ss:$16 sps:$4 sm:$0xff]   ;;  %v17286_v12 = vld [vmem:[%s18752_s4 + $0x2224] ss:$16 sps:$4 sm:$0xff]  }
 0x4e1   : > { %11466 = vmatprep.subr.bf16.mxu0 %v17202_v13  ;;  %12532 = vmatprep.subr.bf16.mxu1 %v17205_v15  ;;  %v17289_v13 = vld [vmem:[%s18752_s4 + $0x222c] ss:$16 sps:$4 sm:$0xff]   ;;  %v803_v15 = vpack.c.bf16 %v647_v59, %v647_v59  ;;  %v17365_v59 = vld [vmem:[%s18752_s4 + $0x23c8] ss:$16 sps:$4 sm:$0xff]  }
 0x4e4   : > { %11467 = vmatpush1.bf16.msra.mxu0 %v17200_v16  ;;  %12533 = vmatpush1.bf16.msra.mxu1 %v17203_v17  ;;  %v17287_v16 = vld [vmem:[%s18752_s4 + $0x2228] ss:$16 sps:$4 sm:$0xff]   ;;  %v17292_v17 = vld [vmem:[%s18752_s4 + $0x2244] ss:$16 sps:$4 sm:$0xff]  }
 0x4e5   : > { %11468 = vmatprep.subr.bf16.mxu0 %v17208_v63  ;;  %12534 = vmatprep.subr.bf16.mxu1 %v17211_v18  ;;  %v17295_v63 = vld [vmem:[%s18752_s4 + $0x224c] ss:$16 sps:$4 sm:$0xff]   ;;  %v17290_v18 = vld [vmem:[%s18752_s4 + $0x2240] ss:$16 sps:$4 sm:$0xff]  }
 0x4e8   : > { %11469 = vmatpush1.bf16.msra.mxu0 %v17206_v19  ;;  %12535 = vmatpush1.bf16.msra.mxu1 %v17209_v20  ;;  %v17293_v19 = vld [vmem:[%s18752_s4 + $0x2248] ss:$16 sps:$4 sm:$0xff]   ;;  %v17298_v20 = vld [vmem:[%s18752_s4 + $0x2264] ss:$16 sps:$4 sm:$0xff]  }
 0x4e9   : > { %11470 = vmatprep.subr.bf16.mxu0 %v17214_v21  ;;  %12536 = vmatprep.subr.bf16.mxu1 %v17217_v9  ;;  %v17301_v21 = vld [vmem:[%s18752_s4 + $0x226c] ss:$16 sps:$4 sm:$0xff]   ;;  %v17296_v9 = vld [vmem:[%s18752_s4 + $0x2260] ss:$16 sps:$4 sm:$0xff]  }
 0x4ec   : > { %11471 = vmatpush1.bf16.msra.mxu0 %v17212_v23  ;;  %12537 = vmatpush1.bf16.msra.mxu1 %v17215_v7  ;;  %v17299_v23 = vld [vmem:[%s18752_s4 + $0x2268] ss:$16 sps:$4 sm:$0xff]   ;;  %v17304_v7 = vld [vmem:[%s18752_s4 + $0x2284] ss:$16 sps:$4 sm:$0xff]  }
 0x4ed   : > { %11472 = vmatprep.subr.bf16.mxu0 %v17220_v24  ;;  %12538 = vmatprep.subr.bf16.mxu1 %v17223_v10  ;;  %v17307_v24 = vld [vmem:[%s18752_s4 + $0x228c] ss:$16 sps:$4 sm:$0xff]   ;;  %v17302_v10 = vld [vmem:[%s18752_s4 + $0x2280] ss:$16 sps:$4 sm:$0xff]  }
 0x4f0   : > { %11473 = vmatpush1.bf16.msra.mxu0 %v17218_v28  ;;  %12539 = vmatpush1.bf16.msra.mxu1 %v17221_v31  ;;  %v17305_v28 = vld [vmem:[%s18752_s4 + $0x2288] ss:$16 sps:$4 sm:$0xff]   ;;  %v17310_v31 = vld [vmem:[%s18752_s4 + $0x22a4] ss:$16 sps:$4 sm:$0xff]  }
 0x4f1   : > { %11474 = vmatprep.subr.bf16.mxu0 %v17226_v32  ;;  %12540 = vmatprep.subr.bf16.mxu1 %v17229_v34  ;;  %v17313_v32 = vld [vmem:[%s18752_s4 + $0x22ac] ss:$16 sps:$4 sm:$0xff]   ;;  %v17308_v34 = vld [vmem:[%s18752_s4 + $0x22a0] ss:$16 sps:$4 sm:$0xff]  }
 0x4f4   : > { %11475 = vmatpush1.bf16.msra.mxu0 %v17224_v14  ;;  %12541 = vmatpush1.bf16.msra.mxu1 %v17227_v35  ;;  %v17311_v14 = vld [vmem:[%s18752_s4 + $0x22a8] ss:$16 sps:$4 sm:$0xff]   ;;  %v17316_v35 = vld [vmem:[%s18752_s4 + $0x22c4] ss:$16 sps:$4 sm:$0xff]  }
 0x4f5   : > { %11476 = vmatprep.subr.bf16.mxu0 %v17232_v36  ;;  %12542 = vmatprep.subr.bf16.mxu1 %v17235_v27  ;;  %v17319_v36 = vld [vmem:[%s18752_s4 + $0x22cc] ss:$16 sps:$4 sm:$0xff]   ;;  %v17314_v27 = vld [vmem:[%s18752_s4 + $0x22c0] ss:$16 sps:$4 sm:$0xff]  }
 0x4f8   : > { %11477 = vmatpush1.bf16.msra.mxu0 %v17230_v37  ;;  %12543 = vmatpush1.bf16.msra.mxu1 %v17233_v25  ;;  %v17317_v37 = vld [vmem:[%s18752_s4 + $0x22c8] ss:$16 sps:$4 sm:$0xff]   ;;  %v17322_v25 = vld [vmem:[%s18752_s4 + $0x22e4] ss:$16 sps:$4 sm:$0xff]  }
 0x4f9   : > { %11478 = vmatprep.subr.bf16.mxu0 %v17238_v39  ;;  %12544 = vmatprep.subr.bf16.mxu1 %v17241_v22  ;;  %v17325_v39 = vld [vmem:[%s18752_s4 + $0x22ec] ss:$16 sps:$4 sm:$0xff]   ;;  %v17320_v22 = vld [vmem:[%s18752_s4 + $0x22e0] ss:$16 sps:$4 sm:$0xff]  }
 0x4fc   : > { %11479 = vmatpush1.bf16.msra.mxu0 %v17236_v29  ;;  %12545 = vmatpush1.bf16.msra.mxu1 %v17239_v42  ;;  %v17323_v29 = vld [vmem:[%s18752_s4 + $0x22e8] ss:$16 sps:$4 sm:$0xff]   ;;  %v17328_v42 = vld [vmem:[%s18752_s4 + $0x2304] ss:$16 sps:$4 sm:$0xff]  }
 0x4fd   : > { %11480 = vmatprep.subr.bf16.mxu0 %v17244_v45  ;;  %12546 = vmatprep.subr.bf16.mxu1 %v17247_v26  ;;  %v17331_v45 = vld [vmem:[%s18752_s4 + $0x230c] ss:$16 sps:$4 sm:$0xff]   ;;  %v17326_v26 = vld [vmem:[%s18752_s4 + $0x2300] ss:$16 sps:$4 sm:$0xff]  }
 0x500   : > { %11481 = vmatpush1.bf16.msra.mxu0 %v17242_v47  ;;  %12547 = vmatpush1.bf16.msra.mxu1 %v17245_v49  ;;  %v17329_v47 = vld [vmem:[%s18752_s4 + $0x2308] ss:$16 sps:$4 sm:$0xff]   ;;  %v17334_v49 = vld [vmem:[%s18752_s4 + $0x2324] ss:$16 sps:$4 sm:$0xff]  }
 0x501   : > { %11482 = vmatprep.subr.bf16.mxu0 %v17250_v30  ;;  %12548 = vmatprep.subr.bf16.mxu1 %v17253_v51  ;;  %v17337_v30 = vld [vmem:[%s18752_s4 + $0x232c] ss:$16 sps:$4 sm:$0xff]   ;;  %v17332_v51 = vld [vmem:[%s18752_s4 + $0x2320] ss:$16 sps:$4 sm:$0xff]  }
 0x504   : > { %11483 = vmatpush1.bf16.msra.mxu0 %v17248_v52  ;;  %12549 = vmatpush1.bf16.msra.mxu1 %v17251_v33  ;;  %v17335_v52 = vld [vmem:[%s18752_s4 + $0x2328] ss:$16 sps:$4 sm:$0xff]   ;;  %v17340_v33 = vld [vmem:[%s18752_s4 + $0x2344] ss:$16 sps:$4 sm:$0xff]  }
 0x505   : > { %11484 = vmatprep.subr.bf16.mxu0 %v17256_v53  ;;  %12550 = vmatprep.subr.bf16.mxu1 %v17259_v40  ;;  %v17343_v53 = vld [vmem:[%s18752_s4 + $0x234c] ss:$16 sps:$4 sm:$0xff]   ;;  %v17338_v40 = vld [vmem:[%s18752_s4 + $0x2340] ss:$16 sps:$4 sm:$0xff]  }
 0x508   : > { %11485 = vmatpush1.bf16.msra.mxu0 %v17254_v55  ;;  %12551 = vmatpush1.bf16.msra.mxu1 %v17257_v38  ;;  %v17341_v55 = vld [vmem:[%s18752_s4 + $0x2348] ss:$16 sps:$4 sm:$0xff]   ;;  %v17346_v38 = vld [vmem:[%s18752_s4 + $0x2364] ss:$16 sps:$4 sm:$0xff]  }
 0x509   : > { %11486 = vmatprep.subr.bf16.mxu0 %v17262_v43  ;;  %12552 = vmatprep.subr.bf16.mxu1 %v17265_v58  ;;  %v17349_v43 = vld [vmem:[%s18752_s4 + $0x236c] ss:$16 sps:$4 sm:$0xff]   ;;  %v17344_v58 = vld [vmem:[%s18752_s4 + $0x2360] ss:$16 sps:$4 sm:$0xff]  }
 0x50c   : > { %11487 = vmatpush1.bf16.msra.mxu0 %v17260_v41  ;;  %12553 = vmatpush1.bf16.msra.mxu1 %v17263_v61  ;;  %v17347_v41 = vld [vmem:[%s18752_s4 + $0x2368] ss:$16 sps:$4 sm:$0xff]   ;;  %v17352_v61 = vld [vmem:[%s18752_s4 + $0x2384] ss:$16 sps:$4 sm:$0xff]  }
 0x50d   : > { %11488 = vmatprep.subr.bf16.mxu0 %v17268_v62  ;;  %12554 = vmatprep.subr.bf16.mxu1 %v17271_v0  ;;  %v17355_v62 = vld [vmem:[%s18752_s4 + $0x238c] ss:$16 sps:$4 sm:$0xff]   ;;  %v17350_v0 = vld [vmem:[%s18752_s4 + $0x2380] ss:$16 sps:$4 sm:$0xff]  }
 0x510   : > { %11489 = vmatpush1.bf16.msra.mxu0 %v17266_v1  ;;  %12555 = vmatpush1.bf16.msra.mxu1 %v17269_v2  ;;  %v17358_v1 = vld [vmem:[%s18752_s4 + $0x23a4] ss:$16 sps:$4 sm:$0xff]   ;;  %v17361_v2 = vld [vmem:[%s18752_s4 + $0x23ac] ss:$16 sps:$4 sm:$0xff]  }
 0x511   : > { %11490 = vmatprep.subr.bf16.mxu0 %v17274_v48  ;;  %12556 = vmatprep.subr.bf16.mxu1 %v17277_v3  ;;  %v17356_v48 = vld [vmem:[%s18752_s4 + $0x23a0] ss:$16 sps:$4 sm:$0xff]   ;;  %v17359_v3 = vld [vmem:[%s18752_s4 + $0x23a8] ss:$16 sps:$4 sm:$0xff]  }
 0x514   : > { %11491 = vmatpush1.bf16.msra.mxu0 %v17272_v56  ;;  %12557 = vmatpush1.bf16.msra.mxu1 %v17275_v5  ;;  %v17364_v56 = vld [vmem:[%s18752_s4 + $0x23c4] ss:$16 sps:$4 sm:$0xff]   ;;  %v17367_v5 = vld [vmem:[%s18752_s4 + $0x23cc] ss:$16 sps:$4 sm:$0xff]  }
 0x515   : > { %11501 = vmatprep.subr.bf16.mxu0 %v17280_v6  ;;  %12567 = vmatprep.subr.bf16.mxu1 %v17283_v54  ;;  %v20109_v6 = vld [vmem:[%s18785_s9 + $0x48] sm:$0xff] }
 0x516   : > { %v17362_v54 = vld [vmem:[%s18752_s4 + $0x23c0] ss:$16 sps:$4 sm:$0xff]  }
 0x517   : > { %11493 = vmatmul.mubr.bf16.vlgmr.msra.gmra.mrb[0].mxu0 %v800_v8  ;;  %12559 = vmatmul.mubr.bf16.vlgmr.msra.gmra.mrb[0].mxu1 %v800_v8  ;;  %v17370_v8 = vld [vmem:[%s18752_s4 + $0x23e4] ss:$16 sps:$4 sm:$0xff]  }
 0x518   : > { %11502 = vmatpush1.bf16.msra.mxu0 %v17278_v57  ;;  %12568 = vmatpush1.bf16.msra.mxu1 %v17281_v11  ;;  %v17373_v57 = vld [vmem:[%s18752_s4 + $0x23ec] ss:$16 sps:$4 sm:$0xff]   ;;  %v20117_v11 = vrot.slane %v20109_v6, %v18837_v50 }
 0x519   : > { %11503 = vmatprep.subr.bf16.mxu0 %v17286_v12  ;;  %12569 = vmatprep.subr.bf16.mxu1 %v17289_v13  ;;  %v17368_v12 = vld [vmem:[%s18752_s4 + $0x23e0] ss:$16 sps:$4 sm:$0xff]   ;;  %v17371_v13 = vld [vmem:[%s18752_s4 + $0x23e8] ss:$16 sps:$4 sm:$0xff]  }
 0x51a   : > { %11533 = vmatprep.mubr.bf16.mxu0 %v803_v15  ;;  %12599 = vmatprep.mubr.bf16.mxu1 %v803_v15  ;;  %v17377_v15 = vld [vmem:[%s18752_s4 + $0x2404] ss:$16 sps:$4 sm:$0xff]  }
 0x51c   : > { %11504 = vmatpush1.bf16.msra.mxu0 %v17284_v60  ;;  %12570 = vmatpush1.bf16.msra.mxu1 %v17287_v16  ;;  %v17380_v60 = vld [vmem:[%s18752_s4 + $0x240c] ss:$16 sps:$4 sm:$0xff]   ;;  %v663_v16 = vcombine.high %v20117_v11, %v20117_v11 }
 0x51d   : > { %11505 = vmatprep.subr.bf16.mxu0 %v17292_v17  ;;  %12571 = vmatprep.subr.bf16.mxu1 %v17295_v63  ;;  %v802_v17 = vpack.c.bf16 %v20042_v4, %v20042_v4  ;;  %v17375_v63 = vld [vmem:[%s18752_s4 + $0x2400] ss:$16 sps:$4 sm:$0xff]  }
 0x51e   : > { %v17381_v4 = vld [vmem:[%s18752_s4 + $0x2420] ss:$16 sps:$4 sm:$0xff]  }
 0x520   : > { %11506 = vmatpush1.bf16.msra.mxu0 %v17290_v18  ;;  %12572 = vmatpush1.bf16.msra.mxu1 %v17293_v19  ;;  %v17378_v18 = vld [vmem:[%s18752_s4 + $0x2408] ss:$16 sps:$4 sm:$0xff]   ;;  %v17383_v19 = vld [vmem:[%s18752_s4 + $0x2424] ss:$16 sps:$4 sm:$0xff]  }
 0x521   : > { %11507 = vmatprep.subr.bf16.mxu0 %v17298_v20  ;;  %12573 = vmatprep.subr.bf16.mxu1 %v17301_v21  ;;  %v17386_v20 = vld [vmem:[%s18752_s4 + $0x242c] ss:$16 sps:$4 sm:$0xff]   ;;  %v805_v21 = vpack.c.bf16 %v663_v16, %v663_v16  ;;  %v17459_v16 = vld [vmem:[%s18752_s4 + $0x25c0] ss:$16 sps:$4 sm:$0xff]  }
 0x524   : > { %11508 = vmatpush1.bf16.msra.mxu0 %v17296_v9  ;;  %12574 = vmatpush1.bf16.msra.mxu1 %v17299_v23  ;;  %v17384_v9 = vld [vmem:[%s18752_s4 + $0x2428] ss:$16 sps:$4 sm:$0xff]   ;;  %v17389_v23 = vld [vmem:[%s18752_s4 + $0x2444] ss:$16 sps:$4 sm:$0xff]  }
 0x525   : > { %11509 = vmatprep.subr.bf16.mxu0 %v17304_v7  ;;  %12575 = vmatprep.subr.bf16.mxu1 %v17307_v24  ;;  %v17392_v7 = vld [vmem:[%s18752_s4 + $0x244c] ss:$16 sps:$4 sm:$0xff]   ;;  %v17387_v24 = vld [vmem:[%s18752_s4 + $0x2440] ss:$16 sps:$4 sm:$0xff]  }
 0x528   : > { %11510 = vmatpush1.bf16.msra.mxu0 %v17302_v10  ;;  %12576 = vmatpush1.bf16.msra.mxu1 %v17305_v28  ;;  %v17390_v10 = vld [vmem:[%s18752_s4 + $0x2448] ss:$16 sps:$4 sm:$0xff]   ;;  %v17395_v28 = vld [vmem:[%s18752_s4 + $0x2464] ss:$16 sps:$4 sm:$0xff]  }
 0x529   : > { %11511 = vmatprep.subr.bf16.mxu0 %v17310_v31  ;;  %12577 = vmatprep.subr.bf16.mxu1 %v17313_v32  ;;  %v17398_v31 = vld [vmem:[%s18752_s4 + $0x246c] ss:$16 sps:$4 sm:$0xff]   ;;  %v17393_v32 = vld [vmem:[%s18752_s4 + $0x2460] ss:$16 sps:$4 sm:$0xff]  }
 0x52c   : > { %11512 = vmatpush1.bf16.msra.mxu0 %v17308_v34  ;;  %12578 = vmatpush1.bf16.msra.mxu1 %v17311_v14  ;;  %v17396_v34 = vld [vmem:[%s18752_s4 + $0x2468] ss:$16 sps:$4 sm:$0xff]   ;;  %v17401_v14 = vld [vmem:[%s18752_s4 + $0x2484] ss:$16 sps:$4 sm:$0xff]  }
 0x52d   : > { %11513 = vmatprep.subr.bf16.mxu0 %v17316_v35  ;;  %12579 = vmatprep.subr.bf16.mxu1 %v17319_v36  ;;  %v17404_v35 = vld [vmem:[%s18752_s4 + $0x248c] ss:$16 sps:$4 sm:$0xff]   ;;  %v17399_v36 = vld [vmem:[%s18752_s4 + $0x2480] ss:$16 sps:$4 sm:$0xff]  }
 0x530   : > { %11514 = vmatpush1.bf16.msra.mxu0 %v17314_v27  ;;  %12580 = vmatpush1.bf16.msra.mxu1 %v17317_v37  ;;  %v17402_v27 = vld [vmem:[%s18752_s4 + $0x2488] ss:$16 sps:$4 sm:$0xff]   ;;  %v17407_v37 = vld [vmem:[%s18752_s4 + $0x24a4] ss:$16 sps:$4 sm:$0xff]  }
 0x531   : > { %11515 = vmatprep.subr.bf16.mxu0 %v17322_v25  ;;  %12581 = vmatprep.subr.bf16.mxu1 %v17325_v39  ;;  %v17410_v25 = vld [vmem:[%s18752_s4 + $0x24ac] ss:$16 sps:$4 sm:$0xff]   ;;  %v17405_v39 = vld [vmem:[%s18752_s4 + $0x24a0] ss:$16 sps:$4 sm:$0xff]  }
 0x534   : > { %11516 = vmatpush1.bf16.msra.mxu0 %v17320_v22  ;;  %12582 = vmatpush1.bf16.msra.mxu1 %v17323_v29  ;;  %v17408_v22 = vld [vmem:[%s18752_s4 + $0x24a8] ss:$16 sps:$4 sm:$0xff]   ;;  %v17413_v29 = vld [vmem:[%s18752_s4 + $0x24c4] ss:$16 sps:$4 sm:$0xff]  }
 0x535   : > { %11517 = vmatprep.subr.bf16.mxu0 %v17328_v42  ;;  %12583 = vmatprep.subr.bf16.mxu1 %v17331_v45  ;;  %v17416_v42 = vld [vmem:[%s18752_s4 + $0x24cc] ss:$16 sps:$4 sm:$0xff]   ;;  %v17411_v45 = vld [vmem:[%s18752_s4 + $0x24c0] ss:$16 sps:$4 sm:$0xff]  }
 0x538   : > { %11518 = vmatpush1.bf16.msra.mxu0 %v17326_v26  ;;  %12584 = vmatpush1.bf16.msra.mxu1 %v17329_v47  ;;  %v17414_v26 = vld [vmem:[%s18752_s4 + $0x24c8] ss:$16 sps:$4 sm:$0xff]   ;;  %v17419_v47 = vld [vmem:[%s18752_s4 + $0x24e4] ss:$16 sps:$4 sm:$0xff]  }
 0x539   : > { %11519 = vmatprep.subr.bf16.mxu0 %v17334_v49  ;;  %12585 = vmatprep.subr.bf16.mxu1 %v17337_v30  ;;  %v17422_v49 = vld [vmem:[%s18752_s4 + $0x24ec] ss:$16 sps:$4 sm:$0xff]   ;;  %v17417_v30 = vld [vmem:[%s18752_s4 + $0x24e0] ss:$16 sps:$4 sm:$0xff]  }
 0x53c   : > { %11520 = vmatpush1.bf16.msra.mxu0 %v17332_v51  ;;  %12586 = vmatpush1.bf16.msra.mxu1 %v17335_v52  ;;  %v17420_v51 = vld [vmem:[%s18752_s4 + $0x24e8] ss:$16 sps:$4 sm:$0xff]   ;;  %v17425_v52 = vld [vmem:[%s18752_s4 + $0x2504] ss:$16 sps:$4 sm:$0xff]  }
 0x53d   : > { %11521 = vmatprep.subr.bf16.mxu0 %v17340_v33  ;;  %12587 = vmatprep.subr.bf16.mxu1 %v17343_v53  ;;  %v17428_v33 = vld [vmem:[%s18752_s4 + $0x250c] ss:$16 sps:$4 sm:$0xff]   ;;  %v17423_v53 = vld [vmem:[%s18752_s4 + $0x2500] ss:$16 sps:$4 sm:$0xff]  }
 0x540   : > { %11522 = vmatpush1.bf16.msra.mxu0 %v17338_v40  ;;  %12588 = vmatpush1.bf16.msra.mxu1 %v17341_v55  ;;  %v17426_v40 = vld [vmem:[%s18752_s4 + $0x2508] ss:$16 sps:$4 sm:$0xff]   ;;  %v17431_v55 = vld [vmem:[%s18752_s4 + $0x2524] ss:$16 sps:$4 sm:$0xff]  }
 0x541   : > { %11523 = vmatprep.subr.bf16.mxu0 %v17346_v38  ;;  %12589 = vmatprep.subr.bf16.mxu1 %v17349_v43  ;;  %v17434_v38 = vld [vmem:[%s18752_s4 + $0x252c] ss:$16 sps:$4 sm:$0xff]   ;;  %v17429_v43 = vld [vmem:[%s18752_s4 + $0x2520] ss:$16 sps:$4 sm:$0xff]  }
 0x544   : > { %11524 = vmatpush1.bf16.msra.mxu0 %v17344_v58  ;;  %12590 = vmatpush1.bf16.msra.mxu1 %v17347_v41  ;;  %v17432_v58 = vld [vmem:[%s18752_s4 + $0x2528] ss:$16 sps:$4 sm:$0xff]   ;;  %v17437_v41 = vld [vmem:[%s18752_s4 + $0x2544] ss:$16 sps:$4 sm:$0xff]  }
 0x545   : > { %11525 = vmatprep.subr.bf16.mxu0 %v17352_v61  ;;  %12591 = vmatprep.subr.bf16.mxu1 %v17355_v62  ;;  %v17440_v61 = vld [vmem:[%s18752_s4 + $0x254c] ss:$16 sps:$4 sm:$0xff]   ;;  %v17435_v62 = vld [vmem:[%s18752_s4 + $0x2540] ss:$16 sps:$4 sm:$0xff]  }
 0x548   : > { %11526 = vmatpush1.bf16.msra.mxu0 %v17350_v0  ;;  %12592 = vmatpush1.bf16.msra.mxu1 %v17353_v46  ;;  %v17438_v0 = vld [vmem:[%s18752_s4 + $0x2548] ss:$16 sps:$4 sm:$0xff]   ;;  %v17443_v46 = vld [vmem:[%s18752_s4 + $0x2564] ss:$16 sps:$4 sm:$0xff]  }
 0x549   : > { %11527 = vmatprep.subr.bf16.mxu0 %v17358_v1  ;;  %12593 = vmatprep.subr.bf16.mxu1 %v17361_v2  ;;  %v17446_v1 = vld [vmem:[%s18752_s4 + $0x256c] ss:$16 sps:$4 sm:$0xff]   ;;  %v17441_v2 = vld [vmem:[%s18752_s4 + $0x2560] ss:$16 sps:$4 sm:$0xff]  }
 0x54c   : > { %11528 = vmatpush1.bf16.msra.mxu0 %v17356_v48  ;;  %12594 = vmatpush1.bf16.msra.mxu1 %v17359_v3  ;;  %v17444_v48 = vld [vmem:[%s18752_s4 + $0x2568] ss:$16 sps:$4 sm:$0xff]   ;;  %v17449_v3 = vld [vmem:[%s18752_s4 + $0x2584] ss:$16 sps:$4 sm:$0xff]  }
 0x54d   : > { %11529 = vmatprep.subr.bf16.mxu0 %v17364_v56  ;;  %12595 = vmatprep.subr.bf16.mxu1 %v17367_v5  ;;  %v17452_v56 = vld [vmem:[%s18752_s4 + $0x258c] ss:$16 sps:$4 sm:$0xff]   ;;  %v17447_v5 = vld [vmem:[%s18752_s4 + $0x2580] ss:$16 sps:$4 sm:$0xff]  }
 0x550   : > { %11530 = vmatpush1.bf16.msra.mxu0 %v17362_v54  ;;  %12596 = vmatpush1.bf16.msra.mxu1 %v17365_v59  ;;  %v17450_v54 = vld [vmem:[%s18752_s4 + $0x2588] ss:$16 sps:$4 sm:$0xff]   ;;  %v17455_v59 = vld [vmem:[%s18752_s4 + $0x25a4] ss:$16 sps:$4 sm:$0xff]  }
 0x551   : > { %11531 = vmatprep.subr.bf16.mxu0 %v17370_v8  ;;  %12597 = vmatprep.subr.bf16.mxu1 %v17373_v57  ;;  %v17458_v8 = vld [vmem:[%s18752_s4 + $0x25ac] ss:$16 sps:$4 sm:$0xff]   ;;  %v17453_v57 = vld [vmem:[%s18752_s4 + $0x25a0] ss:$16 sps:$4 sm:$0xff]  }
 0x554   : > { %11532 = vmatpush1.bf16.msra.mxu0 %v17368_v12  ;;  %12598 = vmatpush1.bf16.msra.mxu1 %v17371_v13  ;;  %v17456_v12 = vld [vmem:[%s18752_s4 + $0x25a8] ss:$16 sps:$4 sm:$0xff]   ;;  %v17461_v13 = vld [vmem:[%s18752_s4 + $0x25c4] ss:$16 sps:$4 sm:$0xff]  }
 0x555   : > { %11542 = vmatprep.subr.bf16.mxu0 %v17377_v15  ;;  %12608 = vmatprep.subr.bf16.mxu1 %v17380_v60  ;;  %v17464_v15 = vld [vmem:[%s18752_s4 + $0x25cc] ss:$16 sps:$4 sm:$0xff]   ;;  %v648_v60 = vcombine.high %v20109_v6, %v20109_v6  ;;  %v17465_v6 = vld [vmem:[%s18752_s4 + $0x25e0] ss:$16 sps:$4 sm:$0xff]  }
 0x557   : > { %11534 = vmatmul.mubr.bf16.vlgmr.msra.gmra.mrb[0].mxu0 %v802_v17  ;;  %12600 = vmatmul.mubr.bf16.vlgmr.msra.gmra.mrb[0].mxu1 %v802_v17  ;;  %v17462_v17 = vld [vmem:[%s18752_s4 + $0x25c8] ss:$16 sps:$4 sm:$0xff]  }
 0x558   : > { %11543 = vmatpush1.bf16.msra.mxu0 %v17375_v63  ;;  %12609 = vmatpush1.bf16.msra.mxu1 %v17378_v18  ;;  %v17467_v63 = vld [vmem:[%s18752_s4 + $0x25e4] ss:$16 sps:$4 sm:$0xff]   ;;  %v17470_v18 = vld [vmem:[%s18752_s4 + $0x25ec] ss:$16 sps:$4 sm:$0xff]  }
 0x559   : > { %11544 = vmatprep.subr.bf16.mxu0 %v17383_v19  ;;  %12610 = vmatprep.subr.bf16.mxu1 %v17386_v20  ;;  %v20190_v19 = vrot.slane %v648_v60, %v18837_v50  ;;  %v17468_v20 = vld [vmem:[%s18752_s4 + $0x25e8] ss:$16 sps:$4 sm:$0xff]  }
 0x55a   : > { %11574 = vmatprep.mubr.bf16.mxu0 %v805_v21  ;;  %12640 = vmatprep.mubr.bf16.mxu1 %v805_v21  ;;  %v17473_v21 = vld [vmem:[%s18752_s4 + $0x2604] ss:$16 sps:$4 sm:$0xff]   ;;  %v17546_v60 = vld [vmem:[%s18752_s4 + $0x2788] ss:$16 sps:$4 sm:$0xff]  }
 0x55c   : > { %11545 = vmatpush1.bf16.msra.mxu0 %v17381_v4  ;;  %12611 = vmatpush1.bf16.msra.mxu1 %v17384_v9  ;;  %v17476_v4 = vld [vmem:[%s18752_s4 + $0x260c] ss:$16 sps:$4 sm:$0xff]   ;;  %v664_v9 = vcombine.high %v20190_v19, %v20190_v19 }
 0x55d   : > { %11546 = vmatprep.subr.bf16.mxu0 %v17389_v23  ;;  %12612 = vmatprep.subr.bf16.mxu1 %v17392_v7  ;;  %v804_v23 = vpack.c.bf16 %v20117_v11, %v20117_v11  ;;  %v17471_v7 = vld [vmem:[%s18752_s4 + $0x2600] ss:$16 sps:$4 sm:$0xff]  }
 0x55e   : > { %v17477_v11 = vld [vmem:[%s18752_s4 + $0x2620] ss:$16 sps:$4 sm:$0xff]  }
 0x560   : > { %11547 = vmatpush1.bf16.msra.mxu0 %v17387_v24  ;;  %12613 = vmatpush1.bf16.msra.mxu1 %v17390_v10  ;;  %v17474_v24 = vld [vmem:[%s18752_s4 + $0x2608] ss:$16 sps:$4 sm:$0xff]   ;;  %v17479_v10 = vld [vmem:[%s18752_s4 + $0x2624] ss:$16 sps:$4 sm:$0xff]  }
 0x561   : > { %11548 = vmatprep.subr.bf16.mxu0 %v17395_v28  ;;  %12614 = vmatprep.subr.bf16.mxu1 %v17398_v31  ;;  %v17482_v28 = vld [vmem:[%s18752_s4 + $0x262c] ss:$16 sps:$4 sm:$0xff]   ;;  %v807_v31 = vpack.c.bf16 %v664_v9, %v664_v9  ;;  %v17558_v9 = vld [vmem:[%s18752_s4 + $0x27c8] ss:$16 sps:$4 sm:$0xff]  }
 0x564   : > { %11549 = vmatpush1.bf16.msra.mxu0 %v17393_v32  ;;  %12615 = vmatpush1.bf16.msra.mxu1 %v17396_v34  ;;  %v17480_v32 = vld [vmem:[%s18752_s4 + $0x2628] ss:$16 sps:$4 sm:$0xff]   ;;  %v17485_v34 = vld [vmem:[%s18752_s4 + $0x2644] ss:$16 sps:$4 sm:$0xff]  }
 0x565   : > { %11550 = vmatprep.subr.bf16.mxu0 %v17401_v14  ;;  %12616 = vmatprep.subr.bf16.mxu1 %v17404_v35  ;;  %v17488_v14 = vld [vmem:[%s18752_s4 + $0x264c] ss:$16 sps:$4 sm:$0xff]   ;;  %v17483_v35 = vld [vmem:[%s18752_s4 + $0x2640] ss:$16 sps:$4 sm:$0xff]  }
 0x568   : > { %11551 = vmatpush1.bf16.msra.mxu0 %v17399_v36  ;;  %12617 = vmatpush1.bf16.msra.mxu1 %v17402_v27  ;;  %v17486_v36 = vld [vmem:[%s18752_s4 + $0x2648] ss:$16 sps:$4 sm:$0xff]   ;;  %v17491_v27 = vld [vmem:[%s18752_s4 + $0x2664] ss:$16 sps:$4 sm:$0xff]  }
 0x569   : > { %11552 = vmatprep.subr.bf16.mxu0 %v17407_v37  ;;  %12618 = vmatprep.subr.bf16.mxu1 %v17410_v25  ;;  %v17494_v37 = vld [vmem:[%s18752_s4 + $0x266c] ss:$16 sps:$4 sm:$0xff]   ;;  %v17489_v25 = vld [vmem:[%s18752_s4 + $0x2660] ss:$16 sps:$4 sm:$0xff]  }
 0x56c   : > { %11553 = vmatpush1.bf16.msra.mxu0 %v17405_v39  ;;  %12619 = vmatpush1.bf16.msra.mxu1 %v17408_v22  ;;  %v17492_v39 = vld [vmem:[%s18752_s4 + $0x2668] ss:$16 sps:$4 sm:$0xff]   ;;  %v17497_v22 = vld [vmem:[%s18752_s4 + $0x2684] ss:$16 sps:$4 sm:$0xff]  }
 0x56d   : > { %11554 = vmatprep.subr.bf16.mxu0 %v17413_v29  ;;  %12620 = vmatprep.subr.bf16.mxu1 %v17416_v42  ;;  %v17500_v29 = vld [vmem:[%s18752_s4 + $0x268c] ss:$16 sps:$4 sm:$0xff]   ;;  %v17495_v42 = vld [vmem:[%s18752_s4 + $0x2680] ss:$16 sps:$4 sm:$0xff]  }
 0x570   : > { %11555 = vmatpush1.bf16.msra.mxu0 %v17411_v45  ;;  %12621 = vmatpush1.bf16.msra.mxu1 %v17414_v26  ;;  %v17498_v45 = vld [vmem:[%s18752_s4 + $0x2688] ss:$16 sps:$4 sm:$0xff]   ;;  %v17503_v26 = vld [vmem:[%s18752_s4 + $0x26a4] ss:$16 sps:$4 sm:$0xff]  }
 0x571   : > { %11556 = vmatprep.subr.bf16.mxu0 %v17419_v47  ;;  %12622 = vmatprep.subr.bf16.mxu1 %v17422_v49  ;;  %v17506_v47 = vld [vmem:[%s18752_s4 + $0x26ac] ss:$16 sps:$4 sm:$0xff]   ;;  %v17501_v49 = vld [vmem:[%s18752_s4 + $0x26a0] ss:$16 sps:$4 sm:$0xff]  }
 0x574   : > { %11557 = vmatpush1.bf16.msra.mxu0 %v17417_v30  ;;  %12623 = vmatpush1.bf16.msra.mxu1 %v17420_v51  ;;  %v17504_v30 = vld [vmem:[%s18752_s4 + $0x26a8] ss:$16 sps:$4 sm:$0xff]   ;;  %v17509_v51 = vld [vmem:[%s18752_s4 + $0x26c4] ss:$16 sps:$4 sm:$0xff]  }
 0x575   : > { %11558 = vmatprep.subr.bf16.mxu0 %v17425_v52  ;;  %12624 = vmatprep.subr.bf16.mxu1 %v17428_v33  ;;  %v17512_v52 = vld [vmem:[%s18752_s4 + $0x26cc] ss:$16 sps:$4 sm:$0xff]   ;;  %v17507_v33 = vld [vmem:[%s18752_s4 + $0x26c0] ss:$16 sps:$4 sm:$0xff]  }
 0x578   : > { %11559 = vmatpush1.bf16.msra.mxu0 %v17423_v53  ;;  %12625 = vmatpush1.bf16.msra.mxu1 %v17426_v40  ;;  %v17510_v53 = vld [vmem:[%s18752_s4 + $0x26c8] ss:$16 sps:$4 sm:$0xff]   ;;  %v17515_v40 = vld [vmem:[%s18752_s4 + $0x26e4] ss:$16 sps:$4 sm:$0xff]  }
 0x579   : > { %11560 = vmatprep.subr.bf16.mxu0 %v17431_v55  ;;  %12626 = vmatprep.subr.bf16.mxu1 %v17434_v38  ;;  %v17518_v55 = vld [vmem:[%s18752_s4 + $0x26ec] ss:$16 sps:$4 sm:$0xff]   ;;  %v17513_v38 = vld [vmem:[%s18752_s4 + $0x26e0] ss:$16 sps:$4 sm:$0xff]  }
 0x57c   : > { %11561 = vmatpush1.bf16.msra.mxu0 %v17429_v43  ;;  %12627 = vmatpush1.bf16.msra.mxu1 %v17432_v58  ;;  %v17516_v43 = vld [vmem:[%s18752_s4 + $0x26e8] ss:$16 sps:$4 sm:$0xff]   ;;  %v17521_v58 = vld [vmem:[%s18752_s4 + $0x2704] ss:$16 sps:$4 sm:$0xff]  }
 0x57d   : > { %11562 = vmatprep.subr.bf16.mxu0 %v17437_v41  ;;  %12628 = vmatprep.subr.bf16.mxu1 %v17440_v61  ;;  %v17524_v41 = vld [vmem:[%s18752_s4 + $0x270c] ss:$16 sps:$4 sm:$0xff]   ;;  %v17519_v61 = vld [vmem:[%s18752_s4 + $0x2700] ss:$16 sps:$4 sm:$0xff]  }
 0x580   : > { %11563 = vmatpush1.bf16.msra.mxu0 %v17435_v62  ;;  %12629 = vmatpush1.bf16.msra.mxu1 %v17438_v0  ;;  %v17522_v62 = vld [vmem:[%s18752_s4 + $0x2708] ss:$16 sps:$4 sm:$0xff]   ;;  %v17527_v0 = vld [vmem:[%s18752_s4 + $0x2724] ss:$16 sps:$4 sm:$0xff]  }
 0x581   : > { %11564 = vmatprep.subr.bf16.mxu0 %v17443_v46  ;;  %12630 = vmatprep.subr.bf16.mxu1 %v17446_v1  ;;  %v17530_v46 = vld [vmem:[%s18752_s4 + $0x272c] ss:$16 sps:$4 sm:$0xff]   ;;  %v17525_v1 = vld [vmem:[%s18752_s4 + $0x2720] ss:$16 sps:$4 sm:$0xff]  }
 0x584   : > { %11565 = vmatpush1.bf16.msra.mxu0 %v17441_v2  ;;  %12631 = vmatpush1.bf16.msra.mxu1 %v17444_v48  ;;  %v17528_v2 = vld [vmem:[%s18752_s4 + $0x2728] ss:$16 sps:$4 sm:$0xff]   ;;  %v17533_v48 = vld [vmem:[%s18752_s4 + $0x2744] ss:$16 sps:$4 sm:$0xff]  }
 0x585   : > { %11566 = vmatprep.subr.bf16.mxu0 %v17449_v3  ;;  %12632 = vmatprep.subr.bf16.mxu1 %v17452_v56  ;;  %v17536_v3 = vld [vmem:[%s18752_s4 + $0x274c] ss:$16 sps:$4 sm:$0xff]   ;;  %v17531_v56 = vld [vmem:[%s18752_s4 + $0x2740] ss:$16 sps:$4 sm:$0xff]  }
 0x588   : > { %11567 = vmatpush1.bf16.msra.mxu0 %v17447_v5  ;;  %12633 = vmatpush1.bf16.msra.mxu1 %v17450_v54  ;;  %v17534_v5 = vld [vmem:[%s18752_s4 + $0x2748] ss:$16 sps:$4 sm:$0xff]   ;;  %v17539_v54 = vld [vmem:[%s18752_s4 + $0x2764] ss:$16 sps:$4 sm:$0xff]  }
 0x589   : > { %11568 = vmatprep.subr.bf16.mxu0 %v17455_v59  ;;  %12634 = vmatprep.subr.bf16.mxu1 %v17458_v8  ;;  %v17542_v59 = vld [vmem:[%s18752_s4 + $0x276c] ss:$16 sps:$4 sm:$0xff]   ;;  %v17537_v8 = vld [vmem:[%s18752_s4 + $0x2760] ss:$16 sps:$4 sm:$0xff]  }
 0x58c   : > { %11569 = vmatpush1.bf16.msra.mxu0 %v17453_v57  ;;  %12635 = vmatpush1.bf16.msra.mxu1 %v17456_v12  ;;  %v17540_v57 = vld [vmem:[%s18752_s4 + $0x2768] ss:$16 sps:$4 sm:$0xff]   ;;  %v17545_v12 = vld [vmem:[%s18752_s4 + $0x2784] ss:$16 sps:$4 sm:$0xff]  }
 0x58d   : > { %11570 = vmatprep.subr.bf16.mxu0 %v17461_v13  ;;  %12636 = vmatprep.subr.bf16.mxu1 %v17464_v15  ;;  %v17548_v13 = vld [vmem:[%s18752_s4 + $0x278c] ss:$16 sps:$4 sm:$0xff]   ;;  %v17543_v15 = vld [vmem:[%s18752_s4 + $0x2780] ss:$16 sps:$4 sm:$0xff]  }
 0x590   : > { %11571 = vmatpush1.bf16.msra.mxu0 %v17459_v16  ;;  %12637 = vmatpush1.bf16.msra.mxu1 %v17462_v17  ;;  %v17551_v16 = vld [vmem:[%s18752_s4 + $0x27a4] ss:$16 sps:$4 sm:$0xff]   ;;  %v17554_v17 = vld [vmem:[%s18752_s4 + $0x27ac] ss:$16 sps:$4 sm:$0xff]  }
 0x591   : > { %11572 = vmatprep.subr.bf16.mxu0 %v17467_v63  ;;  %12638 = vmatprep.subr.bf16.mxu1 %v17470_v18  ;;  %v17549_v63 = vld [vmem:[%s18752_s4 + $0x27a0] ss:$16 sps:$4 sm:$0xff]   ;;  %v17552_v18 = vld [vmem:[%s18752_s4 + $0x27a8] ss:$16 sps:$4 sm:$0xff]  }
 0x594   : > { %11573 = vmatpush1.bf16.msra.mxu0 %v17465_v6  ;;  %12639 = vmatpush1.bf16.msra.mxu1 %v17468_v20  ;;  %v17557_v6 = vld [vmem:[%s18752_s4 + $0x27c4] ss:$16 sps:$4 sm:$0xff]   ;;  %v17560_v20 = vld [vmem:[%s18752_s4 + $0x27cc] ss:$16 sps:$4 sm:$0xff]  }
 0x595   : > { %11583 = vmatprep.subr.bf16.mxu0 %v17473_v21  ;;  %12649 = vmatprep.subr.bf16.mxu1 %v17476_v4  ;;  %v20257_v21 = vld [vmem:[%s18785_s9 + $0x50] sm:$0xff]  ;;  %v17555_v4 = vld [vmem:[%s18752_s4 + $0x27c0] ss:$16 sps:$4 sm:$0xff]  }
 0x597   : > { %11575 = vmatmul.mubr.bf16.vlgmr.msra.gmra.mrb[0].mxu0 %v804_v23  ;;  %12641 = vmatmul.mubr.bf16.vlgmr.msra.gmra.mrb[0].mxu1 %v804_v23  ;;  %v17563_v23 = vld [vmem:[%s18752_s4 + $0x27e4] ss:$16 sps:$4 sm:$0xff]  }
 0x598   : > { %11584 = vmatpush1.bf16.msra.mxu0 %v17471_v7  ;;  %12650 = vmatpush1.bf16.msra.mxu1 %v17474_v24  ;;  %v17566_v7 = vld [vmem:[%s18752_s4 + $0x27ec] ss:$16 sps:$4 sm:$0xff]   ;;  %v20265_v24 = vrot.slane %v20257_v21, %v18837_v50 }
 0x599   : > { %11585 = vmatprep.subr.bf16.mxu0 %v17479_v10  ;;  %12651 = vmatprep.subr.bf16.mxu1 %v17482_v28  ;;  %v17561_v10 = vld [vmem:[%s18752_s4 + $0x27e0] ss:$16 sps:$4 sm:$0xff]   ;;  %v17564_v28 = vld [vmem:[%s18752_s4 + $0x27e8] ss:$16 sps:$4 sm:$0xff]  }
 0x59a   : > { %11615 = vmatprep.mubr.bf16.mxu0 %v807_v31  ;;  %12681 = vmatprep.mubr.bf16.mxu1 %v807_v31  ;;  %v17570_v31 = vld [vmem:[%s18752_s4 + $0x2804] ss:$16 sps:$4 sm:$0xff]  }
 0x59c   : > { %11586 = vmatpush1.bf16.msra.mxu0 %v17477_v11  ;;  %12652 = vmatpush1.bf16.msra.mxu1 %v17480_v32  ;;  %v17573_v11 = vld [vmem:[%s18752_s4 + $0x280c] ss:$16 sps:$4 sm:$0xff]   ;;  %v680_v32 = vcombine.high %v20265_v24, %v20265_v24 }
 0x59d   : > { %11587 = vmatprep.subr.bf16.mxu0 %v17485_v34  ;;  %12653 = vmatprep.subr.bf16.mxu1 %v17488_v14  ;;  %v806_v34 = vpack.c.bf16 %v20190_v19, %v20190_v19  ;;  %v17568_v14 = vld [vmem:[%s18752_s4 + $0x2800] ss:$16 sps:$4 sm:$0xff]  }
 0x59e   : > { %v17574_v19 = vld [vmem:[%s18752_s4 + $0x2820] ss:$16 sps:$4 sm:$0xff]  }
 0x5a0   : > { %11588 = vmatpush1.bf16.msra.mxu0 %v17483_v35  ;;  %12654 = vmatpush1.bf16.msra.mxu1 %v17486_v36  ;;  %v17571_v35 = vld [vmem:[%s18752_s4 + $0x2808] ss:$16 sps:$4 sm:$0xff]   ;;  %v17576_v36 = vld [vmem:[%s18752_s4 + $0x2824] ss:$16 sps:$4 sm:$0xff]  }
 0x5a1   : > { %11589 = vmatprep.subr.bf16.mxu0 %v17491_v27  ;;  %12655 = vmatprep.subr.bf16.mxu1 %v17494_v37  ;;  %v17579_v27 = vld [vmem:[%s18752_s4 + $0x282c] ss:$16 sps:$4 sm:$0xff]   ;;  %v809_v37 = vpack.c.bf16 %v680_v32, %v680_v32  ;;  %v17652_v32 = vld [vmem:[%s18752_s4 + $0x29c0] ss:$16 sps:$4 sm:$0xff]  }
 0x5a4   : > { %11590 = vmatpush1.bf16.msra.mxu0 %v17489_v25  ;;  %12656 = vmatpush1.bf16.msra.mxu1 %v17492_v39  ;;  %v17577_v25 = vld [vmem:[%s18752_s4 + $0x2828] ss:$16 sps:$4 sm:$0xff]   ;;  %v17582_v39 = vld [vmem:[%s18752_s4 + $0x2844] ss:$16 sps:$4 sm:$0xff]  }
 0x5a5   : > { %11591 = vmatprep.subr.bf16.mxu0 %v17497_v22  ;;  %12657 = vmatprep.subr.bf16.mxu1 %v17500_v29  ;;  %v17585_v22 = vld [vmem:[%s18752_s4 + $0x284c] ss:$16 sps:$4 sm:$0xff]   ;;  %v17580_v29 = vld [vmem:[%s18752_s4 + $0x2840] ss:$16 sps:$4 sm:$0xff]  }
 0x5a8   : > { %11592 = vmatpush1.bf16.msra.mxu0 %v17495_v42  ;;  %12658 = vmatpush1.bf16.msra.mxu1 %v17498_v45  ;;  %v17583_v42 = vld [vmem:[%s18752_s4 + $0x2848] ss:$16 sps:$4 sm:$0xff]   ;;  %v17588_v45 = vld [vmem:[%s18752_s4 + $0x2864] ss:$16 sps:$4 sm:$0xff]  }
 0x5a9   : > { %11593 = vmatprep.subr.bf16.mxu0 %v17503_v26  ;;  %12659 = vmatprep.subr.bf16.mxu1 %v17506_v47  ;;  %v17591_v26 = vld [vmem:[%s18752_s4 + $0x286c] ss:$16 sps:$4 sm:$0xff]   ;;  %v17586_v47 = vld [vmem:[%s18752_s4 + $0x2860] ss:$16 sps:$4 sm:$0xff]  }
 0x5ac   : > { %11594 = vmatpush1.bf16.msra.mxu0 %v17501_v49  ;;  %12660 = vmatpush1.bf16.msra.mxu1 %v17504_v30  ;;  %v17589_v49 = vld [vmem:[%s18752_s4 + $0x2868] ss:$16 sps:$4 sm:$0xff]   ;;  %v17594_v30 = vld [vmem:[%s18752_s4 + $0x2884] ss:$16 sps:$4 sm:$0xff]  }
 0x5ad   : > { %11595 = vmatprep.subr.bf16.mxu0 %v17509_v51  ;;  %12661 = vmatprep.subr.bf16.mxu1 %v17512_v52  ;;  %v17597_v51 = vld [vmem:[%s18752_s4 + $0x288c] ss:$16 sps:$4 sm:$0xff]   ;;  %v17592_v52 = vld [vmem:[%s18752_s4 + $0x2880] ss:$16 sps:$4 sm:$0xff]  }
 0x5b0   : > { %11596 = vmatpush1.bf16.msra.mxu0 %v17507_v33  ;;  %12662 = vmatpush1.bf16.msra.mxu1 %v17510_v53  ;;  %v17595_v33 = vld [vmem:[%s18752_s4 + $0x2888] ss:$16 sps:$4 sm:$0xff]   ;;  %v17600_v53 = vld [vmem:[%s18752_s4 + $0x28a4] ss:$16 sps:$4 sm:$0xff]  }
 0x5b1   : > { %11597 = vmatprep.subr.bf16.mxu0 %v17515_v40  ;;  %12663 = vmatprep.subr.bf16.mxu1 %v17518_v55  ;;  %v17603_v40 = vld [vmem:[%s18752_s4 + $0x28ac] ss:$16 sps:$4 sm:$0xff]   ;;  %v17598_v55 = vld [vmem:[%s18752_s4 + $0x28a0] ss:$16 sps:$4 sm:$0xff]  }
 0x5b4   : > { %11598 = vmatpush1.bf16.msra.mxu0 %v17513_v38  ;;  %12664 = vmatpush1.bf16.msra.mxu1 %v17516_v43  ;;  %v17601_v38 = vld [vmem:[%s18752_s4 + $0x28a8] ss:$16 sps:$4 sm:$0xff]   ;;  %v17606_v43 = vld [vmem:[%s18752_s4 + $0x28c4] ss:$16 sps:$4 sm:$0xff]  }
 0x5b5   : > { %11599 = vmatprep.subr.bf16.mxu0 %v17521_v58  ;;  %12665 = vmatprep.subr.bf16.mxu1 %v17524_v41  ;;  %v17609_v58 = vld [vmem:[%s18752_s4 + $0x28cc] ss:$16 sps:$4 sm:$0xff]   ;;  %v17604_v41 = vld [vmem:[%s18752_s4 + $0x28c0] ss:$16 sps:$4 sm:$0xff]  }
 0x5b8   : > { %11600 = vmatpush1.bf16.msra.mxu0 %v17519_v61  ;;  %12666 = vmatpush1.bf16.msra.mxu1 %v17522_v62  ;;  %v17607_v61 = vld [vmem:[%s18752_s4 + $0x28c8] ss:$16 sps:$4 sm:$0xff]   ;;  %v17612_v62 = vld [vmem:[%s18752_s4 + $0x28e4] ss:$16 sps:$4 sm:$0xff]  }
 0x5b9   : > { %11601 = vmatprep.subr.bf16.mxu0 %v17527_v0  ;;  %12667 = vmatprep.subr.bf16.mxu1 %v17530_v46  ;;  %v17615_v0 = vld [vmem:[%s18752_s4 + $0x28ec] ss:$16 sps:$4 sm:$0xff]   ;;  %v17610_v46 = vld [vmem:[%s18752_s4 + $0x28e0] ss:$16 sps:$4 sm:$0xff]  }
 0x5bc   : > { %11602 = vmatpush1.bf16.msra.mxu0 %v17525_v1  ;;  %12668 = vmatpush1.bf16.msra.mxu1 %v17528_v2  ;;  %v17613_v1 = vld [vmem:[%s18752_s4 + $0x28e8] ss:$16 sps:$4 sm:$0xff]   ;;  %v17618_v2 = vld [vmem:[%s18752_s4 + $0x2904] ss:$16 sps:$4 sm:$0xff]  }
 0x5bd   : > { %11603 = vmatprep.subr.bf16.mxu0 %v17533_v48  ;;  %12669 = vmatprep.subr.bf16.mxu1 %v17536_v3  ;;  %v17621_v48 = vld [vmem:[%s18752_s4 + $0x290c] ss:$16 sps:$4 sm:$0xff]   ;;  %v17616_v3 = vld [vmem:[%s18752_s4 + $0x2900] ss:$16 sps:$4 sm:$0xff]  }
 0x5c0   : > { %11604 = vmatpush1.bf16.msra.mxu0 %v17531_v56  ;;  %12670 = vmatpush1.bf16.msra.mxu1 %v17534_v5  ;;  %v17619_v56 = vld [vmem:[%s18752_s4 + $0x2908] ss:$16 sps:$4 sm:$0xff]   ;;  %v17624_v5 = vld [vmem:[%s18752_s4 + $0x2924] ss:$16 sps:$4 sm:$0xff]  }
 0x5c1   : > { %11605 = vmatprep.subr.bf16.mxu0 %v17539_v54  ;;  %12671 = vmatprep.subr.bf16.mxu1 %v17542_v59  ;;  %v17627_v54 = vld [vmem:[%s18752_s4 + $0x292c] ss:$16 sps:$4 sm:$0xff]   ;;  %v17622_v59 = vld [vmem:[%s18752_s4 + $0x2920] ss:$16 sps:$4 sm:$0xff]  }
 0x5c4   : > { %11606 = vmatpush1.bf16.msra.mxu0 %v17537_v8  ;;  %12672 = vmatpush1.bf16.msra.mxu1 %v17540_v57  ;;  %v17625_v8 = vld [vmem:[%s18752_s4 + $0x2928] ss:$16 sps:$4 sm:$0xff]   ;;  %v17630_v57 = vld [vmem:[%s18752_s4 + $0x2944] ss:$16 sps:$4 sm:$0xff]  }
 0x5c5   : > { %11607 = vmatprep.subr.bf16.mxu0 %v17545_v12  ;;  %12673 = vmatprep.subr.bf16.mxu1 %v17548_v13  ;;  %v17633_v12 = vld [vmem:[%s18752_s4 + $0x294c] ss:$16 sps:$4 sm:$0xff]   ;;  %v17628_v13 = vld [vmem:[%s18752_s4 + $0x2940] ss:$16 sps:$4 sm:$0xff]  }
 0x5c8   : > { %11608 = vmatpush1.bf16.msra.mxu0 %v17543_v15  ;;  %12674 = vmatpush1.bf16.msra.mxu1 %v17546_v60  ;;  %v17631_v15 = vld [vmem:[%s18752_s4 + $0x2948] ss:$16 sps:$4 sm:$0xff]   ;;  %v17636_v60 = vld [vmem:[%s18752_s4 + $0x2964] ss:$16 sps:$4 sm:$0xff]  }
 0x5c9   : > { %11609 = vmatprep.subr.bf16.mxu0 %v17551_v16  ;;  %12675 = vmatprep.subr.bf16.mxu1 %v17554_v17  ;;  %v17639_v16 = vld [vmem:[%s18752_s4 + $0x296c] ss:$16 sps:$4 sm:$0xff]   ;;  %v17634_v17 = vld [vmem:[%s18752_s4 + $0x2960] ss:$16 sps:$4 sm:$0xff]  }
 0x5cc   : > { %11610 = vmatpush1.bf16.msra.mxu0 %v17549_v63  ;;  %12676 = vmatpush1.bf16.msra.mxu1 %v17552_v18  ;;  %v17637_v63 = vld [vmem:[%s18752_s4 + $0x2968] ss:$16 sps:$4 sm:$0xff]   ;;  %v17642_v18 = vld [vmem:[%s18752_s4 + $0x2984] ss:$16 sps:$4 sm:$0xff]  }
 0x5cd   : > { %11611 = vmatprep.subr.bf16.mxu0 %v17557_v6  ;;  %12677 = vmatprep.subr.bf16.mxu1 %v17560_v20  ;;  %v17645_v6 = vld [vmem:[%s18752_s4 + $0x298c] ss:$16 sps:$4 sm:$0xff]   ;;  %v17640_v20 = vld [vmem:[%s18752_s4 + $0x2980] ss:$16 sps:$4 sm:$0xff]  }
 0x5d0   : > { %11612 = vmatpush1.bf16.msra.mxu0 %v17555_v4  ;;  %12678 = vmatpush1.bf16.msra.mxu1 %v17558_v9  ;;  %v17643_v4 = vld [vmem:[%s18752_s4 + $0x2988] ss:$16 sps:$4 sm:$0xff]   ;;  %v17648_v9 = vld [vmem:[%s18752_s4 + $0x29a4] ss:$16 sps:$4 sm:$0xff]  }
 0x5d1   : > { %11613 = vmatprep.subr.bf16.mxu0 %v17563_v23  ;;  %12679 = vmatprep.subr.bf16.mxu1 %v17566_v7  ;;  %v17651_v23 = vld [vmem:[%s18752_s4 + $0x29ac] ss:$16 sps:$4 sm:$0xff]   ;;  %v17646_v7 = vld [vmem:[%s18752_s4 + $0x29a0] ss:$16 sps:$4 sm:$0xff]  }
 0x5d4   : > { %11614 = vmatpush1.bf16.msra.mxu0 %v17561_v10  ;;  %12680 = vmatpush1.bf16.msra.mxu1 %v17564_v28  ;;  %v17649_v10 = vld [vmem:[%s18752_s4 + $0x29a8] ss:$16 sps:$4 sm:$0xff]   ;;  %v17654_v28 = vld [vmem:[%s18752_s4 + $0x29c4] ss:$16 sps:$4 sm:$0xff]  }
 0x5d5   : > { %11624 = vmatprep.subr.bf16.mxu0 %v17570_v31  ;;  %12690 = vmatprep.subr.bf16.mxu1 %v17573_v11  ;;  %v17657_v31 = vld [vmem:[%s18752_s4 + $0x29cc] ss:$16 sps:$4 sm:$0xff]   ;;  %v665_v11 = vcombine.high %v20257_v21, %v20257_v21  ;;  %v17658_v21 = vld [vmem:[%s18752_s4 + $0x29e0] ss:$16 sps:$4 sm:$0xff]  }
 0x5d7   : > { %11616 = vmatmul.mubr.bf16.vlgmr.msra.gmra.mrb[0].mxu0 %v806_v34  ;;  %12682 = vmatmul.mubr.bf16.vlgmr.msra.gmra.mrb[0].mxu1 %v806_v34  ;;  %v17655_v34 = vld [vmem:[%s18752_s4 + $0x29c8] ss:$16 sps:$4 sm:$0xff]  }
 0x5d8   : > { %11625 = vmatpush1.bf16.msra.mxu0 %v17568_v14  ;;  %12691 = vmatpush1.bf16.msra.mxu1 %v17571_v35  ;;  %v17660_v14 = vld [vmem:[%s18752_s4 + $0x29e4] ss:$16 sps:$4 sm:$0xff]   ;;  %v17663_v35 = vld [vmem:[%s18752_s4 + $0x29ec] ss:$16 sps:$4 sm:$0xff]  }
 0x5d9   : > { %11626 = vmatprep.subr.bf16.mxu0 %v17576_v36  ;;  %12692 = vmatprep.subr.bf16.mxu1 %v17579_v27  ;;  %v20338_v36 = vrot.slane %v665_v11, %v18837_v50  ;;  %v17661_v27 = vld [vmem:[%s18752_s4 + $0x29e8] ss:$16 sps:$4 sm:$0xff]  }
 0x5da   : > { %11656 = vmatprep.mubr.bf16.mxu0 %v809_v37  ;;  %12722 = vmatprep.mubr.bf16.mxu1 %v809_v37  ;;  %v17666_v37 = vld [vmem:[%s18752_s4 + $0x2a04] ss:$16 sps:$4 sm:$0xff]   ;;  %v17739_v11 = vld [vmem:[%s18752_s4 + $0x2b88] ss:$16 sps:$4 sm:$0xff]  }
 0x5dc   : > { %11627 = vmatpush1.bf16.msra.mxu0 %v17574_v19  ;;  %12693 = vmatpush1.bf16.msra.mxu1 %v17577_v25  ;;  %v17669_v19 = vld [vmem:[%s18752_s4 + $0x2a0c] ss:$16 sps:$4 sm:$0xff]   ;;  %v681_v25 = vcombine.high %v20338_v36, %v20338_v36 }
 0x5dd   : > { %11628 = vmatprep.subr.bf16.mxu0 %v17582_v39  ;;  %12694 = vmatprep.subr.bf16.mxu1 %v17585_v22  ;;  %v808_v39 = vpack.c.bf16 %v20265_v24, %v20265_v24  ;;  %v17664_v22 = vld [vmem:[%s18752_s4 + $0x2a00] ss:$16 sps:$4 sm:$0xff]  }
 0x5de   : > { %v17670_v24 = vld [vmem:[%s18752_s4 + $0x2a20] ss:$16 sps:$4 sm:$0xff]  }
 0x5e0   : > { %11629 = vmatpush1.bf16.msra.mxu0 %v17580_v29  ;;  %12695 = vmatpush1.bf16.msra.mxu1 %v17583_v42  ;;  %v17667_v29 = vld [vmem:[%s18752_s4 + $0x2a08] ss:$16 sps:$4 sm:$0xff]   ;;  %v17672_v42 = vld [vmem:[%s18752_s4 + $0x2a24] ss:$16 sps:$4 sm:$0xff]  }
 0x5e1   : > { %11630 = vmatprep.subr.bf16.mxu0 %v17588_v45  ;;  %12696 = vmatprep.subr.bf16.mxu1 %v17591_v26  ;;  %v17675_v45 = vld [vmem:[%s18752_s4 + $0x2a2c] ss:$16 sps:$4 sm:$0xff]   ;;  %v811_v26 = vpack.c.bf16 %v681_v25, %v681_v25  ;;  %v17751_v25 = vld [vmem:[%s18752_s4 + $0x2bc8] ss:$16 sps:$4 sm:$0xff]  }
 0x5e4   : > { %11631 = vmatpush1.bf16.msra.mxu0 %v17586_v47  ;;  %12697 = vmatpush1.bf16.msra.mxu1 %v17589_v49  ;;  %v17673_v47 = vld [vmem:[%s18752_s4 + $0x2a28] ss:$16 sps:$4 sm:$0xff]   ;;  %v17678_v49 = vld [vmem:[%s18752_s4 + $0x2a44] ss:$16 sps:$4 sm:$0xff]  }
 0x5e5   : > { %11632 = vmatprep.subr.bf16.mxu0 %v17594_v30  ;;  %12698 = vmatprep.subr.bf16.mxu1 %v17597_v51  ;;  %v17681_v30 = vld [vmem:[%s18752_s4 + $0x2a4c] ss:$16 sps:$4 sm:$0xff]   ;;  %v17676_v51 = vld [vmem:[%s18752_s4 + $0x2a40] ss:$16 sps:$4 sm:$0xff]  }
 0x5e8   : > { %11633 = vmatpush1.bf16.msra.mxu0 %v17592_v52  ;;  %12699 = vmatpush1.bf16.msra.mxu1 %v17595_v33  ;;  %v17679_v52 = vld [vmem:[%s18752_s4 + $0x2a48] ss:$16 sps:$4 sm:$0xff]   ;;  %v17684_v33 = vld [vmem:[%s18752_s4 + $0x2a64] ss:$16 sps:$4 sm:$0xff]  }
 0x5e9   : > { %11634 = vmatprep.subr.bf16.mxu0 %v17600_v53  ;;  %12700 = vmatprep.subr.bf16.mxu1 %v17603_v40  ;;  %v17687_v53 = vld [vmem:[%s18752_s4 + $0x2a6c] ss:$16 sps:$4 sm:$0xff]   ;;  %v17682_v40 = vld [vmem:[%s18752_s4 + $0x2a60] ss:$16 sps:$4 sm:$0xff]  }
 0x5ec   : > { %11635 = vmatpush1.bf16.msra.mxu0 %v17598_v55  ;;  %12701 = vmatpush1.bf16.msra.mxu1 %v17601_v38  ;;  %v17685_v55 = vld [vmem:[%s18752_s4 + $0x2a68] ss:$16 sps:$4 sm:$0xff]   ;;  %v17690_v38 = vld [vmem:[%s18752_s4 + $0x2a84] ss:$16 sps:$4 sm:$0xff]  }
 0x5ed   : > { %11636 = vmatprep.subr.bf16.mxu0 %v17606_v43  ;;  %12702 = vmatprep.subr.bf16.mxu1 %v17609_v58  ;;  %v17693_v43 = vld [vmem:[%s18752_s4 + $0x2a8c] ss:$16 sps:$4 sm:$0xff]   ;;  %v17688_v58 = vld [vmem:[%s18752_s4 + $0x2a80] ss:$16 sps:$4 sm:$0xff]  }
 0x5f0   : > { %11637 = vmatpush1.bf16.msra.mxu0 %v17604_v41  ;;  %12703 = vmatpush1.bf16.msra.mxu1 %v17607_v61  ;;  %v17691_v41 = vld [vmem:[%s18752_s4 + $0x2a88] ss:$16 sps:$4 sm:$0xff]   ;;  %v17696_v61 = vld [vmem:[%s18752_s4 + $0x2aa4] ss:$16 sps:$4 sm:$0xff]  }
 0x5f1   : > { %11638 = vmatprep.subr.bf16.mxu0 %v17612_v62  ;;  %12704 = vmatprep.subr.bf16.mxu1 %v17615_v0  ;;  %v17699_v62 = vld [vmem:[%s18752_s4 + $0x2aac] ss:$16 sps:$4 sm:$0xff]   ;;  %v17694_v0 = vld [vmem:[%s18752_s4 + $0x2aa0] ss:$16 sps:$4 sm:$0xff]  }
 0x5f4   : > { %11639 = vmatpush1.bf16.msra.mxu0 %v17610_v46  ;;  %12705 = vmatpush1.bf16.msra.mxu1 %v17613_v1  ;;  %v17697_v46 = vld [vmem:[%s18752_s4 + $0x2aa8] ss:$16 sps:$4 sm:$0xff]   ;;  %v17702_v1 = vld [vmem:[%s18752_s4 + $0x2ac4] ss:$16 sps:$4 sm:$0xff]  }
 0x5f5   : > { %11640 = vmatprep.subr.bf16.mxu0 %v17618_v2  ;;  %12706 = vmatprep.subr.bf16.mxu1 %v17621_v48  ;;  %v17705_v2 = vld [vmem:[%s18752_s4 + $0x2acc] ss:$16 sps:$4 sm:$0xff]   ;;  %v17700_v48 = vld [vmem:[%s18752_s4 + $0x2ac0] ss:$16 sps:$4 sm:$0xff]  }
 0x5f8   : > { %11641 = vmatpush1.bf16.msra.mxu0 %v17616_v3  ;;  %12707 = vmatpush1.bf16.msra.mxu1 %v17619_v56  ;;  %v17703_v3 = vld [vmem:[%s18752_s4 + $0x2ac8] ss:$16 sps:$4 sm:$0xff]   ;;  %v17708_v56 = vld [vmem:[%s18752_s4 + $0x2ae4] ss:$16 sps:$4 sm:$0xff]  }
 0x5f9   : > { %11642 = vmatprep.subr.bf16.mxu0 %v17624_v5  ;;  %12708 = vmatprep.subr.bf16.mxu1 %v17627_v54  ;;  %v17711_v5 = vld [vmem:[%s18752_s4 + $0x2aec] ss:$16 sps:$4 sm:$0xff]   ;;  %v17706_v54 = vld [vmem:[%s18752_s4 + $0x2ae0] ss:$16 sps:$4 sm:$0xff]  }
 0x5fc   : > { %11643 = vmatpush1.bf16.msra.mxu0 %v17622_v59  ;;  %12709 = vmatpush1.bf16.msra.mxu1 %v17625_v8  ;;  %v17709_v59 = vld [vmem:[%s18752_s4 + $0x2ae8] ss:$16 sps:$4 sm:$0xff]   ;;  %v17714_v8 = vld [vmem:[%s18752_s4 + $0x2b04] ss:$16 sps:$4 sm:$0xff]  }
 0x5fd   : > { %11644 = vmatprep.subr.bf16.mxu0 %v17630_v57  ;;  %12710 = vmatprep.subr.bf16.mxu1 %v17633_v12  ;;  %v17717_v57 = vld [vmem:[%s18752_s4 + $0x2b0c] ss:$16 sps:$4 sm:$0xff]   ;;  %v17712_v12 = vld [vmem:[%s18752_s4 + $0x2b00] ss:$16 sps:$4 sm:$0xff]  }
 0x600   : > { %11645 = vmatpush1.bf16.msra.mxu0 %v17628_v13  ;;  %12711 = vmatpush1.bf16.msra.mxu1 %v17631_v15  ;;  %v17715_v13 = vld [vmem:[%s18752_s4 + $0x2b08] ss:$16 sps:$4 sm:$0xff]   ;;  %v17720_v15 = vld [vmem:[%s18752_s4 + $0x2b24] ss:$16 sps:$4 sm:$0xff]  }
 0x601   : > { %11646 = vmatprep.subr.bf16.mxu0 %v17636_v60  ;;  %12712 = vmatprep.subr.bf16.mxu1 %v17639_v16  ;;  %v17723_v60 = vld [vmem:[%s18752_s4 + $0x2b2c] ss:$16 sps:$4 sm:$0xff]   ;;  %v17718_v16 = vld [vmem:[%s18752_s4 + $0x2b20] ss:$16 sps:$4 sm:$0xff]  }
 0x604   : > { %11647 = vmatpush1.bf16.msra.mxu0 %v17634_v17  ;;  %12713 = vmatpush1.bf16.msra.mxu1 %v17637_v63  ;;  %v17721_v17 = vld [vmem:[%s18752_s4 + $0x2b28] ss:$16 sps:$4 sm:$0xff]   ;;  %v17726_v63 = vld [vmem:[%s18752_s4 + $0x2b44] ss:$16 sps:$4 sm:$0xff]  }
 0x605   : > { %11648 = vmatprep.subr.bf16.mxu0 %v17642_v18  ;;  %12714 = vmatprep.subr.bf16.mxu1 %v17645_v6  ;;  %v17729_v18 = vld [vmem:[%s18752_s4 + $0x2b4c] ss:$16 sps:$4 sm:$0xff]   ;;  %v17724_v6 = vld [vmem:[%s18752_s4 + $0x2b40] ss:$16 sps:$4 sm:$0xff]  }
 0x608   : > { %11649 = vmatpush1.bf16.msra.mxu0 %v17640_v20  ;;  %12715 = vmatpush1.bf16.msra.mxu1 %v17643_v4  ;;  %v17727_v20 = vld [vmem:[%s18752_s4 + $0x2b48] ss:$16 sps:$4 sm:$0xff]   ;;  %v17732_v4 = vld [vmem:[%s18752_s4 + $0x2b64] ss:$16 sps:$4 sm:$0xff]  }
 0x609   : > { %11650 = vmatprep.subr.bf16.mxu0 %v17648_v9  ;;  %12716 = vmatprep.subr.bf16.mxu1 %v17651_v23  ;;  %v17735_v9 = vld [vmem:[%s18752_s4 + $0x2b6c] ss:$16 sps:$4 sm:$0xff]   ;;  %v17730_v23 = vld [vmem:[%s18752_s4 + $0x2b60] ss:$16 sps:$4 sm:$0xff]  }
 0x60c   : > { %11651 = vmatpush1.bf16.msra.mxu0 %v17646_v7  ;;  %12717 = vmatpush1.bf16.msra.mxu1 %v17649_v10  ;;  %v17733_v7 = vld [vmem:[%s18752_s4 + $0x2b68] ss:$16 sps:$4 sm:$0xff]   ;;  %v17738_v10 = vld [vmem:[%s18752_s4 + $0x2b84] ss:$16 sps:$4 sm:$0xff]  }
 0x60d   : > { %11652 = vmatprep.subr.bf16.mxu0 %v17654_v28  ;;  %12718 = vmatprep.subr.bf16.mxu1 %v17657_v31  ;;  %v17741_v28 = vld [vmem:[%s18752_s4 + $0x2b8c] ss:$16 sps:$4 sm:$0xff]   ;;  %v17736_v31 = vld [vmem:[%s18752_s4 + $0x2b80] ss:$16 sps:$4 sm:$0xff]  }
 0x610   : > { %11653 = vmatpush1.bf16.msra.mxu0 %v17652_v32  ;;  %12719 = vmatpush1.bf16.msra.mxu1 %v17655_v34  ;;  %v17744_v32 = vld [vmem:[%s18752_s4 + $0x2ba4] ss:$16 sps:$4 sm:$0xff]   ;;  %v17747_v34 = vld [vmem:[%s18752_s4 + $0x2bac] ss:$16 sps:$4 sm:$0xff]  }
 0x611   : > { %11654 = vmatprep.subr.bf16.mxu0 %v17660_v14  ;;  %12720 = vmatprep.subr.bf16.mxu1 %v17663_v35  ;;  %v17742_v14 = vld [vmem:[%s18752_s4 + $0x2ba0] ss:$16 sps:$4 sm:$0xff]   ;;  %v17745_v35 = vld [vmem:[%s18752_s4 + $0x2ba8] ss:$16 sps:$4 sm:$0xff]  }
 0x614   : > { %11655 = vmatpush1.bf16.msra.mxu0 %v17658_v21  ;;  %12721 = vmatpush1.bf16.msra.mxu1 %v17661_v27  ;;  %v17750_v21 = vld [vmem:[%s18752_s4 + $0x2bc4] ss:$16 sps:$4 sm:$0xff]   ;;  %v17753_v27 = vld [vmem:[%s18752_s4 + $0x2bcc] ss:$16 sps:$4 sm:$0xff]  }
 0x615   : > { %11665 = vmatprep.subr.bf16.mxu0 %v17666_v37  ;;  %12731 = vmatprep.subr.bf16.mxu1 %v17669_v19  ;;  %v20405_v37 = vld [vmem:[%s18785_s9 + $0x58] sm:$0xff] }
 0x616   : > { %v17748_v19 = vld [vmem:[%s18752_s4 + $0x2bc0] ss:$16 sps:$4 sm:$0xff]  }
 0x617   : > { %11657 = vmatmul.mubr.bf16.vlgmr.msra.gmra.mrb[0].mxu0 %v808_v39  ;;  %12723 = vmatmul.mubr.bf16.vlgmr.msra.gmra.mrb[0].mxu1 %v808_v39  ;;  %v17756_v39 = vld [vmem:[%s18752_s4 + $0x2be4] ss:$16 sps:$4 sm:$0xff]  }
 0x618   : > { %11666 = vmatpush1.bf16.msra.mxu0 %v17664_v22  ;;  %12732 = vmatpush1.bf16.msra.mxu1 %v17667_v29  ;;  %v17759_v22 = vld [vmem:[%s18752_s4 + $0x2bec] ss:$16 sps:$4 sm:$0xff]   ;;  %v20413_v29 = vrot.slane %v20405_v37, %v18837_v50 }
 0x619   : > { %11667 = vmatprep.subr.bf16.mxu0 %v17672_v42  ;;  %12733 = vmatprep.subr.bf16.mxu1 %v17675_v45  ;;  %v17754_v42 = vld [vmem:[%s18752_s4 + $0x2be0] ss:$16 sps:$4 sm:$0xff]   ;;  %v17757_v45 = vld [vmem:[%s18752_s4 + $0x2be8] ss:$16 sps:$4 sm:$0xff]  }
 0x61a   : > { %11697 = vmatprep.mubr.bf16.mxu0 %v811_v26  ;;  %12763 = vmatprep.mubr.bf16.mxu1 %v811_v26  ;;  %v17763_v26 = vld [vmem:[%s18752_s4 + $0x2c04] ss:$16 sps:$4 sm:$0xff]  }
 0x61c   : > { %11668 = vmatpush1.bf16.msra.mxu0 %v17670_v24  ;;  %12734 = vmatpush1.bf16.msra.mxu1 %v17673_v47  ;;  %v17766_v24 = vld [vmem:[%s18752_s4 + $0x2c0c] ss:$16 sps:$4 sm:$0xff]   ;;  %v697_v47 = vcombine.high %v20413_v29, %v20413_v29 }
 0x61d   : > { %11669 = vmatprep.subr.bf16.mxu0 %v17678_v49  ;;  %12735 = vmatprep.subr.bf16.mxu1 %v17681_v30  ;;  %v810_v49 = vpack.c.bf16 %v20338_v36, %v20338_v36  ;;  %v17761_v30 = vld [vmem:[%s18752_s4 + $0x2c00] ss:$16 sps:$4 sm:$0xff]  }
 0x61e   : > { %v17767_v36 = vld [vmem:[%s18752_s4 + $0x2c20] ss:$16 sps:$4 sm:$0xff]  }
 0x620   : > { %11670 = vmatpush1.bf16.msra.mxu0 %v17676_v51  ;;  %12736 = vmatpush1.bf16.msra.mxu1 %v17679_v52  ;;  %v17764_v51 = vld [vmem:[%s18752_s4 + $0x2c08] ss:$16 sps:$4 sm:$0xff]   ;;  %v17769_v52 = vld [vmem:[%s18752_s4 + $0x2c24] ss:$16 sps:$4 sm:$0xff]  }
 0x621   : > { %11671 = vmatprep.subr.bf16.mxu0 %v17684_v33  ;;  %12737 = vmatprep.subr.bf16.mxu1 %v17687_v53  ;;  %v17772_v33 = vld [vmem:[%s18752_s4 + $0x2c2c] ss:$16 sps:$4 sm:$0xff]   ;;  %v813_v53 = vpack.c.bf16 %v697_v47, %v697_v47  ;;  %v17845_v47 = vld [vmem:[%s18752_s4 + $0x2dc0] ss:$16 sps:$4 sm:$0xff]  }
 0x624   : > { %11672 = vmatpush1.bf16.msra.mxu0 %v17682_v40  ;;  %12738 = vmatpush1.bf16.msra.mxu1 %v17685_v55  ;;  %v17770_v40 = vld [vmem:[%s18752_s4 + $0x2c28] ss:$16 sps:$4 sm:$0xff]   ;;  %v17775_v55 = vld [vmem:[%s18752_s4 + $0x2c44] ss:$16 sps:$4 sm:$0xff]  }
 0x625   : > { %11673 = vmatprep.subr.bf16.mxu0 %v17690_v38  ;;  %12739 = vmatprep.subr.bf16.mxu1 %v17693_v43  ;;  %v17778_v38 = vld [vmem:[%s18752_s4 + $0x2c4c] ss:$16 sps:$4 sm:$0xff]   ;;  %v17773_v43 = vld [vmem:[%s18752_s4 + $0x2c40] ss:$16 sps:$4 sm:$0xff]  }
 0x628   : > { %11674 = vmatpush1.bf16.msra.mxu0 %v17688_v58  ;;  %12740 = vmatpush1.bf16.msra.mxu1 %v17691_v41  ;;  %v17776_v58 = vld [vmem:[%s18752_s4 + $0x2c48] ss:$16 sps:$4 sm:$0xff]   ;;  %v17781_v41 = vld [vmem:[%s18752_s4 + $0x2c64] ss:$16 sps:$4 sm:$0xff]  }
 0x629   : > { %11675 = vmatprep.subr.bf16.mxu0 %v17696_v61  ;;  %12741 = vmatprep.subr.bf16.mxu1 %v17699_v62  ;;  %v17784_v61 = vld [vmem:[%s18752_s4 + $0x2c6c] ss:$16 sps:$4 sm:$0xff]   ;;  %v17779_v62 = vld [vmem:[%s18752_s4 + $0x2c60] ss:$16 sps:$4 sm:$0xff]  }
 0x62c   : > { %11676 = vmatpush1.bf16.msra.mxu0 %v17694_v0  ;;  %12742 = vmatpush1.bf16.msra.mxu1 %v17697_v46  ;;  %v17782_v0 = vld [vmem:[%s18752_s4 + $0x2c68] ss:$16 sps:$4 sm:$0xff]   ;;  %v17787_v46 = vld [vmem:[%s18752_s4 + $0x2c84] ss:$16 sps:$4 sm:$0xff]  }
 0x62d   : > { %11677 = vmatprep.subr.bf16.mxu0 %v17702_v1  ;;  %12743 = vmatprep.subr.bf16.mxu1 %v17705_v2  ;;  %v17790_v1 = vld [vmem:[%s18752_s4 + $0x2c8c] ss:$16 sps:$4 sm:$0xff]   ;;  %v17785_v2 = vld [vmem:[%s18752_s4 + $0x2c80] ss:$16 sps:$4 sm:$0xff]  }
 0x630   : > { %11678 = vmatpush1.bf16.msra.mxu0 %v17700_v48  ;;  %12744 = vmatpush1.bf16.msra.mxu1 %v17703_v3  ;;  %v17788_v48 = vld [vmem:[%s18752_s4 + $0x2c88] ss:$16 sps:$4 sm:$0xff]   ;;  %v17793_v3 = vld [vmem:[%s18752_s4 + $0x2ca4] ss:$16 sps:$4 sm:$0xff]  }
 0x631   : > { %11679 = vmatprep.subr.bf16.mxu0 %v17708_v56  ;;  %12745 = vmatprep.subr.bf16.mxu1 %v17711_v5  ;;  %v17796_v56 = vld [vmem:[%s18752_s4 + $0x2cac] ss:$16 sps:$4 sm:$0xff]   ;;  %v17791_v5 = vld [vmem:[%s18752_s4 + $0x2ca0] ss:$16 sps:$4 sm:$0xff]  }
 0x634   : > { %11680 = vmatpush1.bf16.msra.mxu0 %v17706_v54  ;;  %12746 = vmatpush1.bf16.msra.mxu1 %v17709_v59  ;;  %v17794_v54 = vld [vmem:[%s18752_s4 + $0x2ca8] ss:$16 sps:$4 sm:$0xff]   ;;  %v17799_v59 = vld [vmem:[%s18752_s4 + $0x2cc4] ss:$16 sps:$4 sm:$0xff]  }
 0x635   : > { %11681 = vmatprep.subr.bf16.mxu0 %v17714_v8  ;;  %12747 = vmatprep.subr.bf16.mxu1 %v17717_v57  ;;  %v17802_v8 = vld [vmem:[%s18752_s4 + $0x2ccc] ss:$16 sps:$4 sm:$0xff]   ;;  %v17797_v57 = vld [vmem:[%s18752_s4 + $0x2cc0] ss:$16 sps:$4 sm:$0xff]  }
 0x638   : > { %11682 = vmatpush1.bf16.msra.mxu0 %v17712_v12  ;;  %12748 = vmatpush1.bf16.msra.mxu1 %v17715_v13  ;;  %v17800_v12 = vld [vmem:[%s18752_s4 + $0x2cc8] ss:$16 sps:$4 sm:$0xff]   ;;  %v17805_v13 = vld [vmem:[%s18752_s4 + $0x2ce4] ss:$16 sps:$4 sm:$0xff]  }
 0x639   : > { %11683 = vmatprep.subr.bf16.mxu0 %v17720_v15  ;;  %12749 = vmatprep.subr.bf16.mxu1 %v17723_v60  ;;  %v17808_v15 = vld [vmem:[%s18752_s4 + $0x2cec] ss:$16 sps:$4 sm:$0xff]   ;;  %v17803_v60 = vld [vmem:[%s18752_s4 + $0x2ce0] ss:$16 sps:$4 sm:$0xff]  }
 0x63c   : > { %11684 = vmatpush1.bf16.msra.mxu0 %v17718_v16  ;;  %12750 = vmatpush1.bf16.msra.mxu1 %v17721_v17  ;;  %v17806_v16 = vld [vmem:[%s18752_s4 + $0x2ce8] ss:$16 sps:$4 sm:$0xff]   ;;  %v17811_v17 = vld [vmem:[%s18752_s4 + $0x2d04] ss:$16 sps:$4 sm:$0xff]  }
 0x63d   : > { %11685 = vmatprep.subr.bf16.mxu0 %v17726_v63  ;;  %12751 = vmatprep.subr.bf16.mxu1 %v17729_v18  ;;  %v17814_v63 = vld [vmem:[%s18752_s4 + $0x2d0c] ss:$16 sps:$4 sm:$0xff]   ;;  %v17809_v18 = vld [vmem:[%s18752_s4 + $0x2d00] ss:$16 sps:$4 sm:$0xff]  }
 0x640   : > { %11686 = vmatpush1.bf16.msra.mxu0 %v17724_v6  ;;  %12752 = vmatpush1.bf16.msra.mxu1 %v17727_v20  ;;  %v17812_v6 = vld [vmem:[%s18752_s4 + $0x2d08] ss:$16 sps:$4 sm:$0xff]   ;;  %v17817_v20 = vld [vmem:[%s18752_s4 + $0x2d24] ss:$16 sps:$4 sm:$0xff]  }
 0x641   : > { %11687 = vmatprep.subr.bf16.mxu0 %v17732_v4  ;;  %12753 = vmatprep.subr.bf16.mxu1 %v17735_v9  ;;  %v17820_v4 = vld [vmem:[%s18752_s4 + $0x2d2c] ss:$16 sps:$4 sm:$0xff]   ;;  %v17815_v9 = vld [vmem:[%s18752_s4 + $0x2d20] ss:$16 sps:$4 sm:$0xff]  }
 0x644   : > { %11688 = vmatpush1.bf16.msra.mxu0 %v17730_v23  ;;  %12754 = vmatpush1.bf16.msra.mxu1 %v17733_v7  ;;  %v17818_v23 = vld [vmem:[%s18752_s4 + $0x2d28] ss:$16 sps:$4 sm:$0xff]   ;;  %v17823_v7 = vld [vmem:[%s18752_s4 + $0x2d44] ss:$16 sps:$4 sm:$0xff]  }
 0x645   : > { %11689 = vmatprep.subr.bf16.mxu0 %v17738_v10  ;;  %12755 = vmatprep.subr.bf16.mxu1 %v17741_v28  ;;  %v17826_v10 = vld [vmem:[%s18752_s4 + $0x2d4c] ss:$16 sps:$4 sm:$0xff]   ;;  %v17821_v28 = vld [vmem:[%s18752_s4 + $0x2d40] ss:$16 sps:$4 sm:$0xff]  }
 0x648   : > { %11690 = vmatpush1.bf16.msra.mxu0 %v17736_v31  ;;  %12756 = vmatpush1.bf16.msra.mxu1 %v17739_v11  ;;  %v17824_v31 = vld [vmem:[%s18752_s4 + $0x2d48] ss:$16 sps:$4 sm:$0xff]   ;;  %v17829_v11 = vld [vmem:[%s18752_s4 + $0x2d64] ss:$16 sps:$4 sm:$0xff]  }
 0x649   : > { %11691 = vmatprep.subr.bf16.mxu0 %v17744_v32  ;;  %12757 = vmatprep.subr.bf16.mxu1 %v17747_v34  ;;  %v17832_v32 = vld [vmem:[%s18752_s4 + $0x2d6c] ss:$16 sps:$4 sm:$0xff]   ;;  %v17827_v34 = vld [vmem:[%s18752_s4 + $0x2d60] ss:$16 sps:$4 sm:$0xff]  }
 0x64c   : > { %11692 = vmatpush1.bf16.msra.mxu0 %v17742_v14  ;;  %12758 = vmatpush1.bf16.msra.mxu1 %v17745_v35  ;;  %v17830_v14 = vld [vmem:[%s18752_s4 + $0x2d68] ss:$16 sps:$4 sm:$0xff]   ;;  %v17835_v35 = vld [vmem:[%s18752_s4 + $0x2d84] ss:$16 sps:$4 sm:$0xff]  }
 0x64d   : > { %11693 = vmatprep.subr.bf16.mxu0 %v17750_v21  ;;  %12759 = vmatprep.subr.bf16.mxu1 %v17753_v27  ;;  %v17838_v21 = vld [vmem:[%s18752_s4 + $0x2d8c] ss:$16 sps:$4 sm:$0xff]   ;;  %v17833_v27 = vld [vmem:[%s18752_s4 + $0x2d80] ss:$16 sps:$4 sm:$0xff]  }
 0x650   : > { %11694 = vmatpush1.bf16.msra.mxu0 %v17748_v19  ;;  %12760 = vmatpush1.bf16.msra.mxu1 %v17751_v25  ;;  %v17836_v19 = vld [vmem:[%s18752_s4 + $0x2d88] ss:$16 sps:$4 sm:$0xff]   ;;  %v17841_v25 = vld [vmem:[%s18752_s4 + $0x2da4] ss:$16 sps:$4 sm:$0xff]  }
 0x651   : > { %11695 = vmatprep.subr.bf16.mxu0 %v17756_v39  ;;  %12761 = vmatprep.subr.bf16.mxu1 %v17759_v22  ;;  %v17844_v39 = vld [vmem:[%s18752_s4 + $0x2dac] ss:$16 sps:$4 sm:$0xff]   ;;  %v17839_v22 = vld [vmem:[%s18752_s4 + $0x2da0] ss:$16 sps:$4 sm:$0xff]  }
 0x654   : > { %11696 = vmatpush1.bf16.msra.mxu0 %v17754_v42  ;;  %12762 = vmatpush1.bf16.msra.mxu1 %v17757_v45  ;;  %v17842_v42 = vld [vmem:[%s18752_s4 + $0x2da8] ss:$16 sps:$4 sm:$0xff]   ;;  %v17847_v45 = vld [vmem:[%s18752_s4 + $0x2dc4] ss:$16 sps:$4 sm:$0xff]  }
 0x655   : > { %11706 = vmatprep.subr.bf16.mxu0 %v17763_v26  ;;  %12772 = vmatprep.subr.bf16.mxu1 %v17766_v24  ;;  %v17850_v26 = vld [vmem:[%s18752_s4 + $0x2dcc] ss:$16 sps:$4 sm:$0xff]   ;;  %v682_v24 = vcombine.high %v20405_v37, %v20405_v37  ;;  %v17851_v37 = vld [vmem:[%s18752_s4 + $0x2de0] ss:$16 sps:$4 sm:$0xff]  }
 0x657   : > { %11698 = vmatmul.mubr.bf16.vlgmr.msra.gmra.mrb[0].mxu0 %v810_v49  ;;  %12764 = vmatmul.mubr.bf16.vlgmr.msra.gmra.mrb[0].mxu1 %v810_v49  ;;  %v17848_v49 = vld [vmem:[%s18752_s4 + $0x2dc8] ss:$16 sps:$4 sm:$0xff]  }
 0x658   : > { %11707 = vmatpush1.bf16.msra.mxu0 %v17761_v30  ;;  %12773 = vmatpush1.bf16.msra.mxu1 %v17764_v51  ;;  %v17853_v30 = vld [vmem:[%s18752_s4 + $0x2de4] ss:$16 sps:$4 sm:$0xff]   ;;  %v17856_v51 = vld [vmem:[%s18752_s4 + $0x2dec] ss:$16 sps:$4 sm:$0xff]  }
 0x659   : > { %11708 = vmatprep.subr.bf16.mxu0 %v17769_v52  ;;  %12774 = vmatprep.subr.bf16.mxu1 %v17772_v33  ;;  %v20486_v52 = vrot.slane %v682_v24, %v18837_v50  ;;  %v17854_v33 = vld [vmem:[%s18752_s4 + $0x2de8] ss:$16 sps:$4 sm:$0xff]  }
 0x65a   : > { %11738 = vmatprep.mubr.bf16.mxu0 %v813_v53  ;;  %12804 = vmatprep.mubr.bf16.mxu1 %v813_v53  ;;  %v17859_v53 = vld [vmem:[%s18752_s4 + $0x2e04] ss:$16 sps:$4 sm:$0xff]   ;;  %v17932_v24 = vld [vmem:[%s18752_s4 + $0x2f88] ss:$16 sps:$4 sm:$0xff]  }
 0x65c   : > { %11709 = vmatpush1.bf16.msra.mxu0 %v17767_v36  ;;  %12775 = vmatpush1.bf16.msra.mxu1 %v17770_v40  ;;  %v17862_v36 = vld [vmem:[%s18752_s4 + $0x2e0c] ss:$16 sps:$4 sm:$0xff]   ;;  %v698_v40 = vcombine.high %v20486_v52, %v20486_v52 }
 0x65d   : > { %11710 = vmatprep.subr.bf16.mxu0 %v17775_v55  ;;  %12776 = vmatprep.subr.bf16.mxu1 %v17778_v38  ;;  %v812_v55 = vpack.c.bf16 %v20413_v29, %v20413_v29  ;;  %v17857_v38 = vld [vmem:[%s18752_s4 + $0x2e00] ss:$16 sps:$4 sm:$0xff]  }
 0x65e   : > { %v17863_v29 = vld [vmem:[%s18752_s4 + $0x2e20] ss:$16 sps:$4 sm:$0xff]  }
 0x660   : > { %11711 = vmatpush1.bf16.msra.mxu0 %v17773_v43  ;;  %12777 = vmatpush1.bf16.msra.mxu1 %v17776_v58  ;;  %v17860_v43 = vld [vmem:[%s18752_s4 + $0x2e08] ss:$16 sps:$4 sm:$0xff]   ;;  %v17865_v58 = vld [vmem:[%s18752_s4 + $0x2e24] ss:$16 sps:$4 sm:$0xff]  }
 0x661   : > { %11712 = vmatprep.subr.bf16.mxu0 %v17781_v41  ;;  %12778 = vmatprep.subr.bf16.mxu1 %v17784_v61  ;;  %v17868_v41 = vld [vmem:[%s18752_s4 + $0x2e2c] ss:$16 sps:$4 sm:$0xff]   ;;  %v815_v61 = vpack.c.bf16 %v698_v40, %v698_v40  ;;  %v17944_v40 = vld [vmem:[%s18752_s4 + $0x2fc8] ss:$16 sps:$4 sm:$0xff]  }
 0x664   : > { %11713 = vmatpush1.bf16.msra.mxu0 %v17779_v62  ;;  %12779 = vmatpush1.bf16.msra.mxu1 %v17782_v0  ;;  %v17866_v62 = vld [vmem:[%s18752_s4 + $0x2e28] ss:$16 sps:$4 sm:$0xff]   ;;  %v17871_v0 = vld [vmem:[%s18752_s4 + $0x2e44] ss:$16 sps:$4 sm:$0xff]  }
 0x665   : > { %11714 = vmatprep.subr.bf16.mxu0 %v17787_v46  ;;  %12780 = vmatprep.subr.bf16.mxu1 %v17790_v1  ;;  %v17874_v46 = vld [vmem:[%s18752_s4 + $0x2e4c] ss:$16 sps:$4 sm:$0xff]   ;;  %v17869_v1 = vld [vmem:[%s18752_s4 + $0x2e40] ss:$16 sps:$4 sm:$0xff]  }
 0x668   : > { %11715 = vmatpush1.bf16.msra.mxu0 %v17785_v2  ;;  %12781 = vmatpush1.bf16.msra.mxu1 %v17788_v48  ;;  %v17872_v2 = vld [vmem:[%s18752_s4 + $0x2e48] ss:$16 sps:$4 sm:$0xff]   ;;  %v17877_v48 = vld [vmem:[%s18752_s4 + $0x2e64] ss:$16 sps:$4 sm:$0xff]  }
 0x669   : > { %11716 = vmatprep.subr.bf16.mxu0 %v17793_v3  ;;  %12782 = vmatprep.subr.bf16.mxu1 %v17796_v56  ;;  %v17880_v3 = vld [vmem:[%s18752_s4 + $0x2e6c] ss:$16 sps:$4 sm:$0xff]   ;;  %v17875_v56 = vld [vmem:[%s18752_s4 + $0x2e60] ss:$16 sps:$4 sm:$0xff]  }
 0x66c   : > { %11717 = vmatpush1.bf16.msra.mxu0 %v17791_v5  ;;  %12783 = vmatpush1.bf16.msra.mxu1 %v17794_v54  ;;  %v17878_v5 = vld [vmem:[%s18752_s4 + $0x2e68] ss:$16 sps:$4 sm:$0xff]   ;;  %v17883_v54 = vld [vmem:[%s18752_s4 + $0x2e84] ss:$16 sps:$4 sm:$0xff]  }
 0x66d   : > { %11718 = vmatprep.subr.bf16.mxu0 %v17799_v59  ;;  %12784 = vmatprep.subr.bf16.mxu1 %v17802_v8  ;;  %v17886_v59 = vld [vmem:[%s18752_s4 + $0x2e8c] ss:$16 sps:$4 sm:$0xff]   ;;  %v17881_v8 = vld [vmem:[%s18752_s4 + $0x2e80] ss:$16 sps:$4 sm:$0xff]  }
 0x670   : > { %11719 = vmatpush1.bf16.msra.mxu0 %v17797_v57  ;;  %12785 = vmatpush1.bf16.msra.mxu1 %v17800_v12  ;;  %v17884_v57 = vld [vmem:[%s18752_s4 + $0x2e88] ss:$16 sps:$4 sm:$0xff]   ;;  %v17889_v12 = vld [vmem:[%s18752_s4 + $0x2ea4] ss:$16 sps:$4 sm:$0xff]  }
 0x671   : > { %11720 = vmatprep.subr.bf16.mxu0 %v17805_v13  ;;  %12786 = vmatprep.subr.bf16.mxu1 %v17808_v15  ;;  %v17892_v13 = vld [vmem:[%s18752_s4 + $0x2eac] ss:$16 sps:$4 sm:$0xff]   ;;  %v17887_v15 = vld [vmem:[%s18752_s4 + $0x2ea0] ss:$16 sps:$4 sm:$0xff]  }
 0x674   : > { %11721 = vmatpush1.bf16.msra.mxu0 %v17803_v60  ;;  %12787 = vmatpush1.bf16.msra.mxu1 %v17806_v16  ;;  %v17890_v60 = vld [vmem:[%s18752_s4 + $0x2ea8] ss:$16 sps:$4 sm:$0xff]   ;;  %v17895_v16 = vld [vmem:[%s18752_s4 + $0x2ec4] ss:$16 sps:$4 sm:$0xff]  }
 0x675   : > { %11722 = vmatprep.subr.bf16.mxu0 %v17811_v17  ;;  %12788 = vmatprep.subr.bf16.mxu1 %v17814_v63  ;;  %v17898_v17 = vld [vmem:[%s18752_s4 + $0x2ecc] ss:$16 sps:$4 sm:$0xff]   ;;  %v17893_v63 = vld [vmem:[%s18752_s4 + $0x2ec0] ss:$16 sps:$4 sm:$0xff]  }
 0x678   : > { %11723 = vmatpush1.bf16.msra.mxu0 %v17809_v18  ;;  %12789 = vmatpush1.bf16.msra.mxu1 %v17812_v6  ;;  %v17896_v18 = vld [vmem:[%s18752_s4 + $0x2ec8] ss:$16 sps:$4 sm:$0xff]   ;;  %v17901_v6 = vld [vmem:[%s18752_s4 + $0x2ee4] ss:$16 sps:$4 sm:$0xff]  }
 0x679   : > { %11724 = vmatprep.subr.bf16.mxu0 %v17817_v20  ;;  %12790 = vmatprep.subr.bf16.mxu1 %v17820_v4  ;;  %v17904_v20 = vld [vmem:[%s18752_s4 + $0x2eec] ss:$16 sps:$4 sm:$0xff]   ;;  %v17899_v4 = vld [vmem:[%s18752_s4 + $0x2ee0] ss:$16 sps:$4 sm:$0xff]  }
 0x67c   : > { %11725 = vmatpush1.bf16.msra.mxu0 %v17815_v9  ;;  %12791 = vmatpush1.bf16.msra.mxu1 %v17818_v23  ;;  %v17902_v9 = vld [vmem:[%s18752_s4 + $0x2ee8] ss:$16 sps:$4 sm:$0xff]   ;;  %v17907_v23 = vld [vmem:[%s18752_s4 + $0x2f04] ss:$16 sps:$4 sm:$0xff]  }
 0x67d   : > { %11726 = vmatprep.subr.bf16.mxu0 %v17823_v7  ;;  %12792 = vmatprep.subr.bf16.mxu1 %v17826_v10  ;;  %v17910_v7 = vld [vmem:[%s18752_s4 + $0x2f0c] ss:$16 sps:$4 sm:$0xff]   ;;  %v17905_v10 = vld [vmem:[%s18752_s4 + $0x2f00] ss:$16 sps:$4 sm:$0xff]  }
 0x680   : > { %11727 = vmatpush1.bf16.msra.mxu0 %v17821_v28  ;;  %12793 = vmatpush1.bf16.msra.mxu1 %v17824_v31  ;;  %v17908_v28 = vld [vmem:[%s18752_s4 + $0x2f08] ss:$16 sps:$4 sm:$0xff]   ;;  %v17913_v31 = vld [vmem:[%s18752_s4 + $0x2f24] ss:$16 sps:$4 sm:$0xff]  }
 0x681   : > { %11728 = vmatprep.subr.bf16.mxu0 %v17829_v11  ;;  %12794 = vmatprep.subr.bf16.mxu1 %v17832_v32  ;;  %v17916_v11 = vld [vmem:[%s18752_s4 + $0x2f2c] ss:$16 sps:$4 sm:$0xff]   ;;  %v17911_v32 = vld [vmem:[%s18752_s4 + $0x2f20] ss:$16 sps:$4 sm:$0xff]  }
 0x684   : > { %11729 = vmatpush1.bf16.msra.mxu0 %v17827_v34  ;;  %12795 = vmatpush1.bf16.msra.mxu1 %v17830_v14  ;;  %v17914_v34 = vld [vmem:[%s18752_s4 + $0x2f28] ss:$16 sps:$4 sm:$0xff]   ;;  %v17919_v14 = vld [vmem:[%s18752_s4 + $0x2f44] ss:$16 sps:$4 sm:$0xff]  }
 0x685   : > { %11730 = vmatprep.subr.bf16.mxu0 %v17835_v35  ;;  %12796 = vmatprep.subr.bf16.mxu1 %v17838_v21  ;;  %v17922_v35 = vld [vmem:[%s18752_s4 + $0x2f4c] ss:$16 sps:$4 sm:$0xff]   ;;  %v17917_v21 = vld [vmem:[%s18752_s4 + $0x2f40] ss:$16 sps:$4 sm:$0xff]  }
 0x688   : > { %11731 = vmatpush1.bf16.msra.mxu0 %v17833_v27  ;;  %12797 = vmatpush1.bf16.msra.mxu1 %v17836_v19  ;;  %v17920_v27 = vld [vmem:[%s18752_s4 + $0x2f48] ss:$16 sps:$4 sm:$0xff]   ;;  %v17925_v19 = vld [vmem:[%s18752_s4 + $0x2f64] ss:$16 sps:$4 sm:$0xff]  }
 0x689   : > { %11732 = vmatprep.subr.bf16.mxu0 %v17841_v25  ;;  %12798 = vmatprep.subr.bf16.mxu1 %v17844_v39  ;;  %v17928_v25 = vld [vmem:[%s18752_s4 + $0x2f6c] ss:$16 sps:$4 sm:$0xff]   ;;  %v17923_v39 = vld [vmem:[%s18752_s4 + $0x2f60] ss:$16 sps:$4 sm:$0xff]  }
 0x68c   : > { %11733 = vmatpush1.bf16.msra.mxu0 %v17839_v22  ;;  %12799 = vmatpush1.bf16.msra.mxu1 %v17842_v42  ;;  %v17926_v22 = vld [vmem:[%s18752_s4 + $0x2f68] ss:$16 sps:$4 sm:$0xff]   ;;  %v17931_v42 = vld [vmem:[%s18752_s4 + $0x2f84] ss:$16 sps:$4 sm:$0xff]  }
 0x68d   : > { %11734 = vmatprep.subr.bf16.mxu0 %v17847_v45  ;;  %12800 = vmatprep.subr.bf16.mxu1 %v17850_v26  ;;  %v17934_v45 = vld [vmem:[%s18752_s4 + $0x2f8c] ss:$16 sps:$4 sm:$0xff]   ;;  %v17929_v26 = vld [vmem:[%s18752_s4 + $0x2f80] ss:$16 sps:$4 sm:$0xff]  }
 0x690   : > { %11735 = vmatpush1.bf16.msra.mxu0 %v17845_v47  ;;  %12801 = vmatpush1.bf16.msra.mxu1 %v17848_v49  ;;  %v17937_v47 = vld [vmem:[%s18752_s4 + $0x2fa4] ss:$16 sps:$4 sm:$0xff]   ;;  %v17940_v49 = vld [vmem:[%s18752_s4 + $0x2fac] ss:$16 sps:$4 sm:$0xff]  }
 0x691   : > { %11736 = vmatprep.subr.bf16.mxu0 %v17853_v30  ;;  %12802 = vmatprep.subr.bf16.mxu1 %v17856_v51  ;;  %v17935_v30 = vld [vmem:[%s18752_s4 + $0x2fa0] ss:$16 sps:$4 sm:$0xff]   ;;  %v17938_v51 = vld [vmem:[%s18752_s4 + $0x2fa8] ss:$16 sps:$4 sm:$0xff]  }
 0x694   : > { %11737 = vmatpush1.bf16.msra.mxu0 %v17851_v37  ;;  %12803 = vmatpush1.bf16.msra.mxu1 %v17854_v33  ;;  %v17943_v37 = vld [vmem:[%s18752_s4 + $0x2fc4] ss:$16 sps:$4 sm:$0xff]   ;;  %v17946_v33 = vld [vmem:[%s18752_s4 + $0x2fcc] ss:$16 sps:$4 sm:$0xff]  }
 0x695   : > { %11747 = vmatprep.subr.bf16.mxu0 %v17859_v53  ;;  %12813 = vmatprep.subr.bf16.mxu1 %v17862_v36  ;;  %v20553_v53 = vld [vmem:[%s18785_s9 + $0x60] sm:$0xff]  ;;  %v17941_v36 = vld [vmem:[%s18752_s4 + $0x2fc0] ss:$16 sps:$4 sm:$0xff]  }
 0x697   : > { %11739 = vmatmul.mubr.bf16.vlgmr.msra.gmra.mrb[0].mxu0 %v812_v55  ;;  %12805 = vmatmul.mubr.bf16.vlgmr.msra.gmra.mrb[0].mxu1 %v812_v55  ;;  %v17949_v55 = vld [vmem:[%s18752_s4 + $0x2fe4] ss:$16 sps:$4 sm:$0xff]  }
 0x698   : > { %11748 = vmatpush1.bf16.msra.mxu0 %v17857_v38  ;;  %12814 = vmatpush1.bf16.msra.mxu1 %v17860_v43  ;;  %v17952_v38 = vld [vmem:[%s18752_s4 + $0x2fec] ss:$16 sps:$4 sm:$0xff]   ;;  %v20561_v43 = vrot.slane %v20553_v53, %v18837_v50 }
 0x699   : > { %11749 = vmatprep.subr.bf16.mxu0 %v17865_v58  ;;  %12815 = vmatprep.subr.bf16.mxu1 %v17868_v41  ;;  %v17947_v58 = vld [vmem:[%s18752_s4 + $0x2fe0] ss:$16 sps:$4 sm:$0xff]   ;;  %v17950_v41 = vld [vmem:[%s18752_s4 + $0x2fe8] ss:$16 sps:$4 sm:$0xff]  }
 0x69a   : > { %11779 = vmatprep.mubr.bf16.mxu0 %v815_v61  ;;  %12845 = vmatprep.mubr.bf16.mxu1 %v815_v61  ;;  %v17956_v61 = vld [vmem:[%s18752_s4 + $0x3004] ss:$16 sps:$4 sm:$0xff]  }
 0x69c   : > { %11750 = vmatpush1.bf16.msra.mxu0 %v17863_v29  ;;  %12816 = vmatpush1.bf16.msra.mxu1 %v17866_v62  ;;  %v17959_v29 = vld [vmem:[%s18752_s4 + $0x300c] ss:$16 sps:$4 sm:$0xff]   ;;  %v714_v62 = vcombine.high %v20561_v43, %v20561_v43 }
 0x69d   : > { %11751 = vmatprep.subr.bf16.mxu0 %v17871_v0  ;;  %12817 = vmatprep.subr.bf16.mxu1 %v17874_v46  ;;  %v814_v0 = vpack.c.bf16 %v20486_v52, %v20486_v52  ;;  %v17954_v46 = vld [vmem:[%s18752_s4 + $0x3000] ss:$16 sps:$4 sm:$0xff]  }
 0x69e   : > { %v17960_v52 = vld [vmem:[%s18752_s4 + $0x3020] ss:$16 sps:$4 sm:$0xff]  }
 0x6a0   : > { %11752 = vmatpush1.bf16.msra.mxu0 %v17869_v1  ;;  %12818 = vmatpush1.bf16.msra.mxu1 %v17872_v2  ;;  %v17957_v1 = vld [vmem:[%s18752_s4 + $0x3008] ss:$16 sps:$4 sm:$0xff]   ;;  %v17962_v2 = vld [vmem:[%s18752_s4 + $0x3024] ss:$16 sps:$4 sm:$0xff]  }
 0x6a1   : > { %11753 = vmatprep.subr.bf16.mxu0 %v17877_v48  ;;  %12819 = vmatprep.subr.bf16.mxu1 %v17880_v3  ;;  %v17965_v48 = vld [vmem:[%s18752_s4 + $0x302c] ss:$16 sps:$4 sm:$0xff]   ;;  %v817_v3 = vpack.c.bf16 %v714_v62, %v714_v62  ;;  %v18038_v62 = vld [vmem:[%s18752_s4 + $0x31c0] ss:$16 sps:$4 sm:$0xff]  }
 0x6a4   : > { %11754 = vmatpush1.bf16.msra.mxu0 %v17875_v56  ;;  %12820 = vmatpush1.bf16.msra.mxu1 %v17878_v5  ;;  %v17963_v56 = vld [vmem:[%s18752_s4 + $0x3028] ss:$16 sps:$4 sm:$0xff]   ;;  %v17968_v5 = vld [vmem:[%s18752_s4 + $0x3044] ss:$16 sps:$4 sm:$0xff]  }
 0x6a5   : > { %11755 = vmatprep.subr.bf16.mxu0 %v17883_v54  ;;  %12821 = vmatprep.subr.bf16.mxu1 %v17886_v59  ;;  %v17971_v54 = vld [vmem:[%s18752_s4 + $0x304c] ss:$16 sps:$4 sm:$0xff]   ;;  %v17966_v59 = vld [vmem:[%s18752_s4 + $0x3040] ss:$16 sps:$4 sm:$0xff]  }
 0x6a8   : > { %11756 = vmatpush1.bf16.msra.mxu0 %v17881_v8  ;;  %12822 = vmatpush1.bf16.msra.mxu1 %v17884_v57  ;;  %v17969_v8 = vld [vmem:[%s18752_s4 + $0x3048] ss:$16 sps:$4 sm:$0xff]   ;;  %v17974_v57 = vld [vmem:[%s18752_s4 + $0x3064] ss:$16 sps:$4 sm:$0xff]  }
 0x6a9   : > { %11757 = vmatprep.subr.bf16.mxu0 %v17889_v12  ;;  %12823 = vmatprep.subr.bf16.mxu1 %v17892_v13  ;;  %v17977_v12 = vld [vmem:[%s18752_s4 + $0x306c] ss:$16 sps:$4 sm:$0xff]   ;;  %v17972_v13 = vld [vmem:[%s18752_s4 + $0x3060] ss:$16 sps:$4 sm:$0xff]  }
 0x6ac   : > { %11758 = vmatpush1.bf16.msra.mxu0 %v17887_v15  ;;  %12824 = vmatpush1.bf16.msra.mxu1 %v17890_v60  ;;  %v17975_v15 = vld [vmem:[%s18752_s4 + $0x3068] ss:$16 sps:$4 sm:$0xff]   ;;  %v17980_v60 = vld [vmem:[%s18752_s4 + $0x3084] ss:$16 sps:$4 sm:$0xff]  }
 0x6ad   : > { %11759 = vmatprep.subr.bf16.mxu0 %v17895_v16  ;;  %12825 = vmatprep.subr.bf16.mxu1 %v17898_v17  ;;  %v17983_v16 = vld [vmem:[%s18752_s4 + $0x308c] ss:$16 sps:$4 sm:$0xff]   ;;  %v17978_v17 = vld [vmem:[%s18752_s4 + $0x3080] ss:$16 sps:$4 sm:$0xff]  }
 0x6b0   : > { %11760 = vmatpush1.bf16.msra.mxu0 %v17893_v63  ;;  %12826 = vmatpush1.bf16.msra.mxu1 %v17896_v18  ;;  %v17981_v63 = vld [vmem:[%s18752_s4 + $0x3088] ss:$16 sps:$4 sm:$0xff]   ;;  %v17986_v18 = vld [vmem:[%s18752_s4 + $0x30a4] ss:$16 sps:$4 sm:$0xff]  }
 0x6b1   : > { %11761 = vmatprep.subr.bf16.mxu0 %v17901_v6  ;;  %12827 = vmatprep.subr.bf16.mxu1 %v17904_v20  ;;  %v17989_v6 = vld [vmem:[%s18752_s4 + $0x30ac] ss:$16 sps:$4 sm:$0xff]   ;;  %v17984_v20 = vld [vmem:[%s18752_s4 + $0x30a0] ss:$16 sps:$4 sm:$0xff]  }
 0x6b4   : > { %11762 = vmatpush1.bf16.msra.mxu0 %v17899_v4  ;;  %12828 = vmatpush1.bf16.msra.mxu1 %v17902_v9  ;;  %v17987_v4 = vld [vmem:[%s18752_s4 + $0x30a8] ss:$16 sps:$4 sm:$0xff]   ;;  %v17992_v9 = vld [vmem:[%s18752_s4 + $0x30c4] ss:$16 sps:$4 sm:$0xff]  }
 0x6b5   : > { %11763 = vmatprep.subr.bf16.mxu0 %v17907_v23  ;;  %12829 = vmatprep.subr.bf16.mxu1 %v17910_v7  ;;  %v17995_v23 = vld [vmem:[%s18752_s4 + $0x30cc] ss:$16 sps:$4 sm:$0xff]   ;;  %v17990_v7 = vld [vmem:[%s18752_s4 + $0x30c0] ss:$16 sps:$4 sm:$0xff]  }
 0x6b8   : > { %11764 = vmatpush1.bf16.msra.mxu0 %v17905_v10  ;;  %12830 = vmatpush1.bf16.msra.mxu1 %v17908_v28  ;;  %v17993_v10 = vld [vmem:[%s18752_s4 + $0x30c8] ss:$16 sps:$4 sm:$0xff]   ;;  %v17998_v28 = vld [vmem:[%s18752_s4 + $0x30e4] ss:$16 sps:$4 sm:$0xff]  }
 0x6b9   : > { %11765 = vmatprep.subr.bf16.mxu0 %v17913_v31  ;;  %12831 = vmatprep.subr.bf16.mxu1 %v17916_v11  ;;  %v18001_v31 = vld [vmem:[%s18752_s4 + $0x30ec] ss:$16 sps:$4 sm:$0xff]   ;;  %v17996_v11 = vld [vmem:[%s18752_s4 + $0x30e0] ss:$16 sps:$4 sm:$0xff]  }
 0x6bc   : > { %11766 = vmatpush1.bf16.msra.mxu0 %v17911_v32  ;;  %12832 = vmatpush1.bf16.msra.mxu1 %v17914_v34  ;;  %v17999_v32 = vld [vmem:[%s18752_s4 + $0x30e8] ss:$16 sps:$4 sm:$0xff]   ;;  %v18004_v34 = vld [vmem:[%s18752_s4 + $0x3104] ss:$16 sps:$4 sm:$0xff]  }
 0x6bd   : > { %11767 = vmatprep.subr.bf16.mxu0 %v17919_v14  ;;  %12833 = vmatprep.subr.bf16.mxu1 %v17922_v35  ;;  %v18007_v14 = vld [vmem:[%s18752_s4 + $0x310c] ss:$16 sps:$4 sm:$0xff]   ;;  %v18002_v35 = vld [vmem:[%s18752_s4 + $0x3100] ss:$16 sps:$4 sm:$0xff]  }
 0x6c0   : > { %11768 = vmatpush1.bf16.msra.mxu0 %v17917_v21  ;;  %12834 = vmatpush1.bf16.msra.mxu1 %v17920_v27  ;;  %v18005_v21 = vld [vmem:[%s18752_s4 + $0x3108] ss:$16 sps:$4 sm:$0xff]   ;;  %v18010_v27 = vld [vmem:[%s18752_s4 + $0x3124] ss:$16 sps:$4 sm:$0xff]  }
 0x6c1   : > { %11769 = vmatprep.subr.bf16.mxu0 %v17925_v19  ;;  %12835 = vmatprep.subr.bf16.mxu1 %v17928_v25  ;;  %v18013_v19 = vld [vmem:[%s18752_s4 + $0x312c] ss:$16 sps:$4 sm:$0xff]   ;;  %v18008_v25 = vld [vmem:[%s18752_s4 + $0x3120] ss:$16 sps:$4 sm:$0xff]  }
 0x6c4   : > { %11770 = vmatpush1.bf16.msra.mxu0 %v17923_v39  ;;  %12836 = vmatpush1.bf16.msra.mxu1 %v17926_v22  ;;  %v18011_v39 = vld [vmem:[%s18752_s4 + $0x3128] ss:$16 sps:$4 sm:$0xff]   ;;  %v18016_v22 = vld [vmem:[%s18752_s4 + $0x3144] ss:$16 sps:$4 sm:$0xff]  }
 0x6c5   : > { %11771 = vmatprep.subr.bf16.mxu0 %v17931_v42  ;;  %12837 = vmatprep.subr.bf16.mxu1 %v17934_v45  ;;  %v18019_v42 = vld [vmem:[%s18752_s4 + $0x314c] ss:$16 sps:$4 sm:$0xff]   ;;  %v18014_v45 = vld [vmem:[%s18752_s4 + $0x3140] ss:$16 sps:$4 sm:$0xff]  }
 0x6c8   : > { %11772 = vmatpush1.bf16.msra.mxu0 %v17929_v26  ;;  %12838 = vmatpush1.bf16.msra.mxu1 %v17932_v24  ;;  %v18017_v26 = vld [vmem:[%s18752_s4 + $0x3148] ss:$16 sps:$4 sm:$0xff]   ;;  %v18022_v24 = vld [vmem:[%s18752_s4 + $0x3164] ss:$16 sps:$4 sm:$0xff]  }
 0x6c9   : > { %11773 = vmatprep.subr.bf16.mxu0 %v17937_v47  ;;  %12839 = vmatprep.subr.bf16.mxu1 %v17940_v49  ;;  %v18025_v47 = vld [vmem:[%s18752_s4 + $0x316c] ss:$16 sps:$4 sm:$0xff]   ;;  %v18020_v49 = vld [vmem:[%s18752_s4 + $0x3160] ss:$16 sps:$4 sm:$0xff]  }
 0x6cc   : > { %11774 = vmatpush1.bf16.msra.mxu0 %v17935_v30  ;;  %12840 = vmatpush1.bf16.msra.mxu1 %v17938_v51  ;;  %v18023_v30 = vld [vmem:[%s18752_s4 + $0x3168] ss:$16 sps:$4 sm:$0xff]   ;;  %v18028_v51 = vld [vmem:[%s18752_s4 + $0x3184] ss:$16 sps:$4 sm:$0xff]  }
 0x6cd   : > { %11775 = vmatprep.subr.bf16.mxu0 %v17943_v37  ;;  %12841 = vmatprep.subr.bf16.mxu1 %v17946_v33  ;;  %v18031_v37 = vld [vmem:[%s18752_s4 + $0x318c] ss:$16 sps:$4 sm:$0xff]   ;;  %v18026_v33 = vld [vmem:[%s18752_s4 + $0x3180] ss:$16 sps:$4 sm:$0xff]  }
 0x6d0   : > { %11776 = vmatpush1.bf16.msra.mxu0 %v17941_v36  ;;  %12842 = vmatpush1.bf16.msra.mxu1 %v17944_v40  ;;  %v18029_v36 = vld [vmem:[%s18752_s4 + $0x3188] ss:$16 sps:$4 sm:$0xff]   ;;  %v18034_v40 = vld [vmem:[%s18752_s4 + $0x31a4] ss:$16 sps:$4 sm:$0xff]  }
 0x6d1   : > { %11777 = vmatprep.subr.bf16.mxu0 %v17949_v55  ;;  %12843 = vmatprep.subr.bf16.mxu1 %v17952_v38  ;;  %v18037_v55 = vld [vmem:[%s18752_s4 + $0x31ac] ss:$16 sps:$4 sm:$0xff]   ;;  %v18032_v38 = vld [vmem:[%s18752_s4 + $0x31a0] ss:$16 sps:$4 sm:$0xff]  }
 0x6d4   : > { %11778 = vmatpush1.bf16.msra.mxu0 %v17947_v58  ;;  %12844 = vmatpush1.bf16.msra.mxu1 %v17950_v41  ;;  %v18035_v58 = vld [vmem:[%s18752_s4 + $0x31a8] ss:$16 sps:$4 sm:$0xff]   ;;  %v18040_v41 = vld [vmem:[%s18752_s4 + $0x31c4] ss:$16 sps:$4 sm:$0xff]  }
 0x6d5   : > { %11788 = vmatprep.subr.bf16.mxu0 %v17956_v61  ;;  %12854 = vmatprep.subr.bf16.mxu1 %v17959_v29  ;;  %v18043_v61 = vld [vmem:[%s18752_s4 + $0x31cc] ss:$16 sps:$4 sm:$0xff]   ;;  %v699_v29 = vcombine.high %v20553_v53, %v20553_v53  ;;  %v18044_v53 = vld [vmem:[%s18752_s4 + $0x31e0] ss:$16 sps:$4 sm:$0xff]  }
 0x6d7   : > { %11780 = vmatmul.mubr.bf16.vlgmr.msra.gmra.mrb[0].mxu0 %v814_v0  ;;  %12846 = vmatmul.mubr.bf16.vlgmr.msra.gmra.mrb[0].mxu1 %v814_v0  ;;  %v18041_v0 = vld [vmem:[%s18752_s4 + $0x31c8] ss:$16 sps:$4 sm:$0xff]  }
 0x6d8   : > { %11789 = vmatpush1.bf16.msra.mxu0 %v17954_v46  ;;  %12855 = vmatpush1.bf16.msra.mxu1 %v17957_v1  ;;  %v18046_v46 = vld [vmem:[%s18752_s4 + $0x31e4] ss:$16 sps:$4 sm:$0xff]   ;;  %v18049_v1 = vld [vmem:[%s18752_s4 + $0x31ec] ss:$16 sps:$4 sm:$0xff]  }
 0x6d9   : > { %11790 = vmatprep.subr.bf16.mxu0 %v17962_v2  ;;  %12856 = vmatprep.subr.bf16.mxu1 %v17965_v48  ;;  %v20634_v2 = vrot.slane %v699_v29, %v18837_v50  ;;  %v18047_v48 = vld [vmem:[%s18752_s4 + $0x31e8] ss:$16 sps:$4 sm:$0xff]  }
 0x6da   : > { %11820 = vmatprep.mubr.bf16.mxu0 %v817_v3  ;;  %12886 = vmatprep.mubr.bf16.mxu1 %v817_v3  ;;  %v18052_v3 = vld [vmem:[%s18752_s4 + $0x3204] ss:$16 sps:$4 sm:$0xff]   ;;  %v18125_v29 = vld [vmem:[%s18752_s4 + $0x3388] ss:$16 sps:$4 sm:$0xff]  }
 0x6dc   : > { %11791 = vmatpush1.bf16.msra.mxu0 %v17960_v52  ;;  %12857 = vmatpush1.bf16.msra.mxu1 %v17963_v56  ;;  %v18055_v52 = vld [vmem:[%s18752_s4 + $0x320c] ss:$16 sps:$4 sm:$0xff]   ;;  %v715_v56 = vcombine.high %v20634_v2, %v20634_v2 }
 0x6dd   : > { %11792 = vmatprep.subr.bf16.mxu0 %v17968_v5  ;;  %12858 = vmatprep.subr.bf16.mxu1 %v17971_v54  ;;  %v816_v5 = vpack.c.bf16 %v20561_v43, %v20561_v43  ;;  %v18050_v54 = vld [vmem:[%s18752_s4 + $0x3200] ss:$16 sps:$4 sm:$0xff]  }
 0x6de   : > { %v18056_v43 = vld [vmem:[%s18752_s4 + $0x3220] ss:$16 sps:$4 sm:$0xff]  }
 0x6e0   : > { %11793 = vmatpush1.bf16.msra.mxu0 %v17966_v59  ;;  %12859 = vmatpush1.bf16.msra.mxu1 %v17969_v8  ;;  %v18053_v59 = vld [vmem:[%s18752_s4 + $0x3208] ss:$16 sps:$4 sm:$0xff]   ;;  %v18058_v8 = vld [vmem:[%s18752_s4 + $0x3224] ss:$16 sps:$4 sm:$0xff]  }
 0x6e1   : > { %11794 = vmatprep.subr.bf16.mxu0 %v17974_v57  ;;  %12860 = vmatprep.subr.bf16.mxu1 %v17977_v12  ;;  %v18061_v57 = vld [vmem:[%s18752_s4 + $0x322c] ss:$16 sps:$4 sm:$0xff]   ;;  %v819_v12 = vpack.c.bf16 %v715_v56, %v715_v56  ;;  %v18142_v56 = vld [vmem:[%s18752_s4 + $0x33e4] ss:$16 sps:$4 sm:$0xff]  }
 0x6e4   : > { %11795 = vmatpush1.bf16.msra.mxu0 %v17972_v13  ;;  %12861 = vmatpush1.bf16.msra.mxu1 %v17975_v15  ;;  %v18059_v13 = vld [vmem:[%s18752_s4 + $0x3228] ss:$16 sps:$4 sm:$0xff]   ;;  %v18064_v15 = vld [vmem:[%s18752_s4 + $0x3244] ss:$16 sps:$4 sm:$0xff]  }
 0x6e5   : > { %11796 = vmatprep.subr.bf16.mxu0 %v17980_v60  ;;  %12862 = vmatprep.subr.bf16.mxu1 %v17983_v16  ;;  %v18067_v60 = vld [vmem:[%s18752_s4 + $0x324c] ss:$16 sps:$4 sm:$0xff]   ;;  %v18062_v16 = vld [vmem:[%s18752_s4 + $0x3240] ss:$16 sps:$4 sm:$0xff]  }
 0x6e8   : > { %11797 = vmatpush1.bf16.msra.mxu0 %v17978_v17  ;;  %12863 = vmatpush1.bf16.msra.mxu1 %v17981_v63  ;;  %v18065_v17 = vld [vmem:[%s18752_s4 + $0x3248] ss:$16 sps:$4 sm:$0xff]   ;;  %v18070_v63 = vld [vmem:[%s18752_s4 + $0x3264] ss:$16 sps:$4 sm:$0xff]  }
 0x6e9   : > { %11798 = vmatprep.subr.bf16.mxu0 %v17986_v18  ;;  %12864 = vmatprep.subr.bf16.mxu1 %v17989_v6  ;;  %v18073_v18 = vld [vmem:[%s18752_s4 + $0x326c] ss:$16 sps:$4 sm:$0xff]   ;;  %v18068_v6 = vld [vmem:[%s18752_s4 + $0x3260] ss:$16 sps:$4 sm:$0xff]  }
 0x6ec   : > { %11799 = vmatpush1.bf16.msra.mxu0 %v17984_v20  ;;  %12865 = vmatpush1.bf16.msra.mxu1 %v17987_v4  ;;  %v18071_v20 = vld [vmem:[%s18752_s4 + $0x3268] ss:$16 sps:$4 sm:$0xff]   ;;  %v18076_v4 = vld [vmem:[%s18752_s4 + $0x3284] ss:$16 sps:$4 sm:$0xff]  }
 0x6ed   : > { %11800 = vmatprep.subr.bf16.mxu0 %v17992_v9  ;;  %12866 = vmatprep.subr.bf16.mxu1 %v17995_v23  ;;  %v18079_v9 = vld [vmem:[%s18752_s4 + $0x328c] ss:$16 sps:$4 sm:$0xff]   ;;  %v18074_v23 = vld [vmem:[%s18752_s4 + $0x3280] ss:$16 sps:$4 sm:$0xff]  }
 0x6f0   : > { %11801 = vmatpush1.bf16.msra.mxu0 %v17990_v7  ;;  %12867 = vmatpush1.bf16.msra.mxu1 %v17993_v10  ;;  %v18077_v7 = vld [vmem:[%s18752_s4 + $0x3288] ss:$16 sps:$4 sm:$0xff]   ;;  %v18082_v10 = vld [vmem:[%s18752_s4 + $0x32a4] ss:$16 sps:$4 sm:$0xff]  }
 0x6f1   : > { %11802 = vmatprep.subr.bf16.mxu0 %v17998_v28  ;;  %12868 = vmatprep.subr.bf16.mxu1 %v18001_v31  ;;  %v18085_v28 = vld [vmem:[%s18752_s4 + $0x32ac] ss:$16 sps:$4 sm:$0xff]   ;;  %v18080_v31 = vld [vmem:[%s18752_s4 + $0x32a0] ss:$16 sps:$4 sm:$0xff]  }
 0x6f4   : > { %11803 = vmatpush1.bf16.msra.mxu0 %v17996_v11  ;;  %12869 = vmatpush1.bf16.msra.mxu1 %v17999_v32  ;;  %v18083_v11 = vld [vmem:[%s18752_s4 + $0x32a8] ss:$16 sps:$4 sm:$0xff]   ;;  %v18088_v32 = vld [vmem:[%s18752_s4 + $0x32c4] ss:$16 sps:$4 sm:$0xff]  }
 0x6f5   : > { %11804 = vmatprep.subr.bf16.mxu0 %v18004_v34  ;;  %12870 = vmatprep.subr.bf16.mxu1 %v18007_v14  ;;  %v18091_v34 = vld [vmem:[%s18752_s4 + $0x32cc] ss:$16 sps:$4 sm:$0xff]   ;;  %v18086_v14 = vld [vmem:[%s18752_s4 + $0x32c0] ss:$16 sps:$4 sm:$0xff]  }
 0x6f8   : > { %11805 = vmatpush1.bf16.msra.mxu0 %v18002_v35  ;;  %12871 = vmatpush1.bf16.msra.mxu1 %v18005_v21  ;;  %v18089_v35 = vld [vmem:[%s18752_s4 + $0x32c8] ss:$16 sps:$4 sm:$0xff]   ;;  %v18094_v21 = vld [vmem:[%s18752_s4 + $0x32e4] ss:$16 sps:$4 sm:$0xff]  }
 0x6f9   : > { %11806 = vmatprep.subr.bf16.mxu0 %v18010_v27  ;;  %12872 = vmatprep.subr.bf16.mxu1 %v18013_v19  ;;  %v18097_v27 = vld [vmem:[%s18752_s4 + $0x32ec] ss:$16 sps:$4 sm:$0xff]   ;;  %v18092_v19 = vld [vmem:[%s18752_s4 + $0x32e0] ss:$16 sps:$4 sm:$0xff]  }
 0x6fc   : > { %11807 = vmatpush1.bf16.msra.mxu0 %v18008_v25  ;;  %12873 = vmatpush1.bf16.msra.mxu1 %v18011_v39  ;;  %v18095_v25 = vld [vmem:[%s18752_s4 + $0x32e8] ss:$16 sps:$4 sm:$0xff]   ;;  %v18100_v39 = vld [vmem:[%s18752_s4 + $0x3304] ss:$16 sps:$4 sm:$0xff]  }
 0x6fd   : > { %11808 = vmatprep.subr.bf16.mxu0 %v18016_v22  ;;  %12874 = vmatprep.subr.bf16.mxu1 %v18019_v42  ;;  %v18103_v22 = vld [vmem:[%s18752_s4 + $0x330c] ss:$16 sps:$4 sm:$0xff]   ;;  %v18098_v42 = vld [vmem:[%s18752_s4 + $0x3300] ss:$16 sps:$4 sm:$0xff]  }
 0x700   : > { %11809 = vmatpush1.bf16.msra.mxu0 %v18014_v45  ;;  %12875 = vmatpush1.bf16.msra.mxu1 %v18017_v26  ;;  %v18101_v45 = vld [vmem:[%s18752_s4 + $0x3308] ss:$16 sps:$4 sm:$0xff]   ;;  %v18106_v26 = vld [vmem:[%s18752_s4 + $0x3324] ss:$16 sps:$4 sm:$0xff]  }
 0x701   : > { %11810 = vmatprep.subr.bf16.mxu0 %v18022_v24  ;;  %12876 = vmatprep.subr.bf16.mxu1 %v18025_v47  ;;  %v18109_v24 = vld [vmem:[%s18752_s4 + $0x332c] ss:$16 sps:$4 sm:$0xff]   ;;  %v18104_v47 = vld [vmem:[%s18752_s4 + $0x3320] ss:$16 sps:$4 sm:$0xff]  }
 0x704   : > { %11811 = vmatpush1.bf16.msra.mxu0 %v18020_v49  ;;  %12877 = vmatpush1.bf16.msra.mxu1 %v18023_v30  ;;  %v18107_v49 = vld [vmem:[%s18752_s4 + $0x3328] ss:$16 sps:$4 sm:$0xff]   ;;  %v18112_v30 = vld [vmem:[%s18752_s4 + $0x3344] ss:$16 sps:$4 sm:$0xff]  }
 0x705   : > { %11812 = vmatprep.subr.bf16.mxu0 %v18028_v51  ;;  %12878 = vmatprep.subr.bf16.mxu1 %v18031_v37  ;;  %v18115_v51 = vld [vmem:[%s18752_s4 + $0x334c] ss:$16 sps:$4 sm:$0xff]   ;;  %v18110_v37 = vld [vmem:[%s18752_s4 + $0x3340] ss:$16 sps:$4 sm:$0xff]  }
 0x708   : > { %11813 = vmatpush1.bf16.msra.mxu0 %v18026_v33  ;;  %12879 = vmatpush1.bf16.msra.mxu1 %v18029_v36  ;;  %v18113_v33 = vld [vmem:[%s18752_s4 + $0x3348] ss:$16 sps:$4 sm:$0xff]   ;;  %v18118_v36 = vld [vmem:[%s18752_s4 + $0x3364] ss:$16 sps:$4 sm:$0xff]  }
 0x709   : > { %11814 = vmatprep.subr.bf16.mxu0 %v18034_v40  ;;  %12880 = vmatprep.subr.bf16.mxu1 %v18037_v55  ;;  %v18121_v40 = vld [vmem:[%s18752_s4 + $0x336c] ss:$16 sps:$4 sm:$0xff]   ;;  %v18116_v55 = vld [vmem:[%s18752_s4 + $0x3360] ss:$16 sps:$4 sm:$0xff]  }
 0x70c   : > { %11815 = vmatpush1.bf16.msra.mxu0 %v18032_v38  ;;  %12881 = vmatpush1.bf16.msra.mxu1 %v18035_v58  ;;  %v18119_v38 = vld [vmem:[%s18752_s4 + $0x3368] ss:$16 sps:$4 sm:$0xff]   ;;  %v18124_v58 = vld [vmem:[%s18752_s4 + $0x3384] ss:$16 sps:$4 sm:$0xff]  }
 0x70d   : > { %11816 = vmatprep.subr.bf16.mxu0 %v18040_v41  ;;  %12882 = vmatprep.subr.bf16.mxu1 %v18043_v61  ;;  %v18127_v41 = vld [vmem:[%s18752_s4 + $0x338c] ss:$16 sps:$4 sm:$0xff]   ;;  %v18122_v61 = vld [vmem:[%s18752_s4 + $0x3380] ss:$16 sps:$4 sm:$0xff]  }
 0x710   : > { %11817 = vmatpush1.bf16.msra.mxu0 %v18038_v62  ;;  %12883 = vmatpush1.bf16.msra.mxu1 %v18041_v0  ;;  %v18130_v62 = vld [vmem:[%s18752_s4 + $0x33a4] ss:$16 sps:$4 sm:$0xff]   ;;  %v18133_v0 = vld [vmem:[%s18752_s4 + $0x33ac] ss:$16 sps:$4 sm:$0xff]  }
 0x711   : > { %11818 = vmatprep.subr.bf16.mxu0 %v18046_v46  ;;  %12884 = vmatprep.subr.bf16.mxu1 %v18049_v1  ;;  %v18128_v46 = vld [vmem:[%s18752_s4 + $0x33a0] ss:$16 sps:$4 sm:$0xff]   ;;  %v18131_v1 = vld [vmem:[%s18752_s4 + $0x33a8] ss:$16 sps:$4 sm:$0xff]  }
 0x714   : > { %11819 = vmatpush1.bf16.msra.mxu0 %v18044_v53  ;;  %12885 = vmatpush1.bf16.msra.mxu1 %v18047_v48  ;;  %v18136_v53 = vld [vmem:[%s18752_s4 + $0x33c4] ss:$16 sps:$4 sm:$0xff]   ;;  %v18139_v48 = vld [vmem:[%s18752_s4 + $0x33cc] ss:$16 sps:$4 sm:$0xff]  }
 0x715   : > { %11829 = vmatprep.subr.bf16.mxu0 %v18052_v3  ;;  %12895 = vmatprep.subr.bf16.mxu1 %v18055_v52  ;;  %v18134_v3 = vld [vmem:[%s18752_s4 + $0x33c0] ss:$16 sps:$4 sm:$0xff]   ;;  %v18137_v52 = vld [vmem:[%s18752_s4 + $0x33c8] ss:$16 sps:$4 sm:$0xff]  }
 0x717   : > { %11821 = vmatmul.mubr.bf16.vlgmr.msra.gmra.mrb[0].mxu0 %v816_v5  ;;  %12887 = vmatmul.mubr.bf16.vlgmr.msra.gmra.mrb[0].mxu1 %v816_v5  ;;  %v18145_v5 = vld [vmem:[%s18752_s4 + $0x33ec] ss:$16 sps:$4 sm:$0xff]  }
 0x718   : > { %11830 = vmatpush1.bf16.msra.mxu0 %v18050_v54  ;;  %12896 = vmatpush1.bf16.msra.mxu1 %v18053_v59  ;;  %v18140_v54 = vld [vmem:[%s18752_s4 + $0x33e0] ss:$16 sps:$4 sm:$0xff]   ;;  %v18143_v59 = vld [vmem:[%s18752_s4 + $0x33e8] ss:$16 sps:$4 sm:$0xff]   ;;  %s20888_s4 = sld [smem:[#allocation16_spill]] }
 0x719   : > { %11831 = vmatprep.subr.bf16.mxu0 %v18058_v8  ;;  %12897 = vmatprep.subr.bf16.mxu1 %v18061_v57  ;;  %v818_v8 = vpack.c.bf16 %v20634_v2, %v20634_v2 }
 0x71a   : > { %11861 = vmatprep.mubr.bf16.mxu0 %v819_v12  ;;  %12927 = vmatprep.mubr.bf16.mxu1 %v819_v12 }
 0x71c   : > { %11832 = vmatpush1.bf16.msra.mxu0 %v18056_v43  ;;  %12898 = vmatpush1.bf16.msra.mxu1 %v18059_v13 }
 0x71d   : > { %11833 = vmatprep.subr.bf16.mxu0 %v18064_v15  ;;  %12899 = vmatprep.subr.bf16.mxu1 %v18067_v60 }
 0x71e   : > { %p15172_p3 = scmp.ne.s32.totalorder %s20888_s4, 1 }
 0x720   : > { %11834 = vmatpush1.bf16.msra.mxu0 %v18062_v16  ;;  %12900 = vmatpush1.bf16.msra.mxu1 %v18065_v17 }
 0x721   : > { %11835 = vmatprep.subr.bf16.mxu0 %v18070_v63  ;;  %12901 = vmatprep.subr.bf16.mxu1 %v18073_v18 }
 0x724   : > { %11836 = vmatpush1.bf16.msra.mxu0 %v18068_v6  ;;  %12902 = vmatpush1.bf16.msra.mxu1 %v18071_v20 }
 0x725   : > { %11837 = vmatprep.subr.bf16.mxu0 %v18076_v4  ;;  %12903 = vmatprep.subr.bf16.mxu1 %v18079_v9  ;;  %v468_v4 = vld [vmem:[#allocation2] sm:$0xff] }
 0x728   : > { %11838 = vmatpush1.bf16.msra.mxu0 %v18074_v23  ;;  %12904 = vmatpush1.bf16.msra.mxu1 %v18077_v7  ;;  %v13093_v23 = vld [vmem:[%s18787_s20 + $0x80] sm:$0xff] (!%p15172_p3)  ;;  %v13094_v7 = vld [vmem:[%s18787_s20 + $0x88] sm:$0xff] (!%p15172_p3) }
 0x729   : > { %11839 = vmatprep.subr.bf16.mxu0 %v18082_v10  ;;  %12905 = vmatprep.subr.bf16.mxu1 %v18085_v28  ;;  %v13125_v10 = vld [vmem:[%s18787_s20 + $0x180] sm:$0xff] (!%p15172_p3)  ;;  %v15250_v28 = vpack.c.bf16 (!%p15172_p3), %v13094_v7, %v13093_v23  ;;  %v13087_v23 = vld [vmem:[%s18787_s20 + $0x50] sm:$0xff] (!%p15172_p3)  ;;  %v13088_v7 = vld [vmem:[%s18787_s20 + $0x58] sm:$0xff] (!%p15172_p3) }
 0x72c   : > { %11840 = vmatpush1.bf16.msra.mxu0 %v18080_v31  ;;  %12906 = vmatpush1.bf16.msra.mxu1 %v18083_v11  ;;  %v13126_v31 = vld [vmem:[%s18787_s20 + $0x188] sm:$0xff] (!%p15172_p3)  ;;  %v13077_v11 = vld [vmem:[%s18787_s20] sm:$0xff] (!%p15172_p3) }
 0x72d   : > { %11841 = vmatprep.subr.bf16.mxu0 %v18088_v32  ;;  %12907 = vmatprep.subr.bf16.mxu1 %v18091_v34  ;;  %v13078_v32 = vld [vmem:[%s18787_s20 + $0x8] sm:$0xff] (!%p15172_p3)  ;;  %v15282_v34 = vpack.c.bf16 (!%p15172_p3), %v13126_v31, %v13125_v10  ;;  %v13119_v10 = vld [vmem:[%s18787_s20 + $0x150] sm:$0xff] (!%p15172_p3) }
 0x730   : > { %11842 = vmatpush1.bf16.msra.mxu0 %v18086_v14  ;;  %12908 = vmatpush1.bf16.msra.mxu1 %v18089_v35  ;;  %v15252_v14 = vpack.c.bf16 (!%p15172_p3), %v13078_v32, %v13077_v11  ;;  %v13109_v35 = vld [vmem:[%s18787_s20 + $0x100] sm:$0xff] (!%p15172_p3)  ;;  %v13106_v32 = vld [vmem:[%s18787_s20 + $0xe8] sm:$0xff] (!%p15172_p3) }
 0x731   : > { %11843 = vmatprep.subr.bf16.mxu0 %v18094_v21  ;;  %12909 = vmatprep.subr.bf16.mxu1 %v18097_v27  ;;  %v13110_v21 = vld [vmem:[%s18787_s20 + $0x108] sm:$0xff] (!%p15172_p3)  ;;  %v13095_v27 = vld [vmem:[%s18787_s20 + $0x90] sm:$0xff] (!%p15172_p3)  ;;  %v13105_v11 = vld [vmem:[%s18787_s20 + $0xe0] sm:$0xff] (!%p15172_p3) }
 0x734   : > { %11844 = vmatpush1.bf16.msra.mxu0 %v18092_v19  ;;  %12910 = vmatpush1.bf16.msra.mxu1 %v18095_v25  ;;  %v15284_v19 = vpack.c.bf16 (!%p15172_p3), %v13110_v21, %v13109_v35  ;;  %v13096_v25 = vld [vmem:[%s18787_s20 + $0x98] sm:$0xff] (!%p15172_p3)  ;;  %v13138_v21 = vld [vmem:[%s18787_s20 + $0x1e8] sm:$0xff] (!%p15172_p3) }
 0x735   : > { %11845 = vmatprep.subr.bf16.mxu0 %v18100_v39  ;;  %12911 = vmatprep.subr.bf16.mxu1 %v18103_v22  ;;  %v13127_v39 = vld [vmem:[%s18787_s20 + $0x190] sm:$0xff] (!%p15172_p3)  ;;  %v13128_v22 = vld [vmem:[%s18787_s20 + $0x198] sm:$0xff] (!%p15172_p3) }
 0x738   : > { %11846 = vmatpush1.bf16.msra.mxu0 %v18098_v42  ;;  %12912 = vmatpush1.bf16.msra.mxu1 %v18101_v45  ;;  %v15254_v42 = vpack.c.bf16 (!%p15172_p3), %v13096_v25, %v13095_v27  ;;  %v15286_v45 = vpack.c.bf16 (!%p15172_p3), %v13128_v22, %v13127_v39  ;;  %v13089_v27 = vld [vmem:[%s18787_s20 + $0x60] sm:$0xff] (!%p15172_p3)  ;;  %v13122_v22 = vld [vmem:[%s18787_s20 + $0x168] sm:$0xff] (!%p15172_p3) }
 0x739   : > { %11847 = vmatprep.subr.bf16.mxu0 %v18106_v26  ;;  %12913 = vmatprep.subr.bf16.mxu1 %v18109_v24  ;;  %v13079_v26 = vld [vmem:[%s18787_s20 + $0x10] sm:$0xff] (!%p15172_p3)  ;;  %v13080_v24 = vld [vmem:[%s18787_s20 + $0x18] sm:$0xff] (!%p15172_p3)  ;;  %v13121_v39 = vld [vmem:[%s18787_s20 + $0x160] sm:$0xff] (!%p15172_p3) }
 0x73c   : > { %11848 = vmatpush1.bf16.msra.mxu0 %v18104_v47  ;;  %12914 = vmatpush1.bf16.msra.mxu1 %v18107_v49  ;;  %v13111_v47 = vld [vmem:[%s18787_s20 + $0x110] sm:$0xff] (!%p15172_p3)  ;;  %v15256_v49 = vpack.c.bf16 (!%p15172_p3), %v13080_v24, %v13079_v26  ;;  %v12973_v26 = vsub.s32 (!%p15172_p3), 1, %v18829_v44  ;;  %v12977_v24 = vsub.s32 (!%p15172_p3), 2, %v18829_v44 }
 0x73d   : > { %11849 = vmatprep.subr.bf16.mxu0 %v18112_v30  ;;  %12915 = vmatprep.subr.bf16.mxu1 %v18115_v51  ;;  %v13112_v30 = vld [vmem:[%s18787_s20 + $0x118] sm:$0xff] (!%p15172_p3)  ;;  %v13097_v51 = vld [vmem:[%s18787_s20 + $0xa0] sm:$0xff] (!%p15172_p3) }
 0x740   : > { %11850 = vmatpush1.bf16.msra.mxu0 %v18110_v37  ;;  %12916 = vmatpush1.bf16.msra.mxu1 %v18113_v33  ;;  %v13098_v37 = vld [vmem:[%s18787_s20 + $0xa8] sm:$0xff] (!%p15172_p3)  ;;  %v15288_v33 = vpack.c.bf16 (!%p15172_p3), %v13112_v30, %v13111_v47  ;;  %v13108_v47 = vld [vmem:[%s18787_s20 + $0xf8] sm:$0xff] (!%p15172_p3) }
 0x741   : > { %11851 = vmatprep.subr.bf16.mxu0 %v18118_v36  ;;  %12917 = vmatprep.subr.bf16.mxu1 %v18121_v40  ;;  %v15258_v36 = vpack.c.bf16 (!%p15172_p3), %v13098_v37, %v13097_v51  ;;  %v13129_v40 = vld [vmem:[%s18787_s20 + $0x1a0] sm:$0xff] (!%p15172_p3)  ;;  %v13140_v30 = vld [vmem:[%s18787_s20 + $0x1f8] sm:$0xff] (!%p15172_p3)  ;;  %v12981_v51 = vsub.s32 (!%p15172_p3), 3, %v18829_v44  ;;  %v15272_v37 = vpack.c.bf16 (!%p15172_p3), %v13088_v7, %v13087_v23 }
 0x744   : > { %11852 = vmatpush1.bf16.msra.mxu0 %v18116_v55  ;;  %12918 = vmatpush1.bf16.msra.mxu1 %v18119_v38  ;;  %v13130_v55 = vld [vmem:[%s18787_s20 + $0x1a8] sm:$0xff] (!%p15172_p3)  ;;  %v13081_v38 = vld [vmem:[%s18787_s20 + $0x20] sm:$0xff] (!%p15172_p3) }
 0x745   : > { %11853 = vmatprep.subr.bf16.mxu0 %v18124_v58  ;;  %12919 = vmatprep.subr.bf16.mxu1 %v18127_v41  ;;  %v15290_v58 = vpack.c.bf16 (!%p15172_p3), %v13130_v55, %v13129_v40  ;;  %v13082_v41 = vld [vmem:[%s18787_s20 + $0x28] sm:$0xff] (!%p15172_p3) }
 0x748   : > { %11854 = vmatpush1.bf16.msra.mxu0 %v18122_v61  ;;  %12920 = vmatpush1.bf16.msra.mxu1 %v18125_v29  ;;  %v13113_v61 = vld [vmem:[%s18787_s20 + $0x120] sm:$0xff] (!%p15172_p3)  ;;  %v13114_v29 = vld [vmem:[%s18787_s20 + $0x128] sm:$0xff] (!%p15172_p3) }
 0x749   : > { %11855 = vmatprep.subr.bf16.mxu0 %v18130_v62  ;;  %12921 = vmatprep.subr.bf16.mxu1 %v18133_v0  ;;  %v15260_v62 = vpack.c.bf16 (!%p15172_p3), %v13082_v41, %v13081_v38  ;;  %v13099_v0 = vld [vmem:[%s18787_s20 + $0xb0] sm:$0xff] (!%p15172_p3)  ;;  %v15308_v38 = vpack.c.bf16 (!%p15172_p3), %v13122_v22, %v13121_v39  ;;  %v12965_v41 = vld [vmem:[%s367_s17] sm:$0xf] (!%p15172_p3) }
 0x74c   : > { %11856 = vmatpush1.bf16.msra.mxu0 %v18128_v46  ;;  %12922 = vmatpush1.bf16.msra.mxu1 %v18131_v1  ;;  %v13100_v46 = vld [vmem:[%s18787_s20 + $0xb8] sm:$0xff] (!%p15172_p3)  ;;  %v13131_v1 = vld [vmem:[%s18787_s20 + $0x1b0] sm:$0xff] (!%p15172_p3) }
 0x74d   : > { %11857 = vmatprep.subr.bf16.mxu0 %v18136_v53  ;;  %12923 = vmatprep.subr.bf16.mxu1 %v18139_v48  ;;  %v15292_v53 = vpack.c.bf16 (!%p15172_p3), %v13114_v29, %v13113_v61  ;;  %v15262_v48 = vpack.c.bf16 (!%p15172_p3), %v13100_v46, %v13099_v0  ;;  %v13002_v0 = vld [vmem:[%s376_s15] sm:$0xf] (!%p15172_p3)  ;;  %v13039_v46 = vld [vmem:[%s385_s8] sm:$0xf] (!%p15172_p3) }
 0x750   : > { %11858 = vmatpush1.bf16.msra.mxu0 %v18134_v3  ;;  %12924 = vmatpush1.bf16.msra.mxu1 %v18137_v52  ;;  %v13132_v3 = vld [vmem:[%s18787_s20 + $0x1b8] sm:$0xff] (!%p15172_p3)  ;;  %v13083_v52 = vld [vmem:[%s18787_s20 + $0x30] sm:$0xff] (!%p15172_p3) }
 0x751   : > { %11859 = vmatprep.subr.bf16.mxu0 %v18142_v56  ;;  %12925 = vmatprep.subr.bf16.mxu1 %v18145_v5  ;;  %v13084_v56 = vld [vmem:[%s18787_s20 + $0x38] sm:$0xff] (!%p15172_p3)  ;;  %v15294_v5 = vpack.c.bf16 (!%p15172_p3), %v13132_v3, %v13131_v1  ;;  %v12982_v1 = vrot.slane (!%p15172_p3), %v12965_v41, %v12981_v51  ;;  %v13015_v3 = vrot.slane (!%p15172_p3), %v13002_v0, %v12977_v24 }
 0x754   : > { %11860 = vmatpush1.bf16.msra.mxu0 %v18140_v54  ;;  %12926 = vmatpush1.bf16.msra.mxu1 %v18143_v59  ;;  %v13115_v54 = vld [vmem:[%s18787_s20 + $0x130] sm:$0xff] (!%p15172_p3)  ;;  %v13116_v59 = vld [vmem:[%s18787_s20 + $0x138] sm:$0xff] (!%p15172_p3) }
 0x755   : > { %15251 = vmatprep.subr.bf16.mxu0 (!%p15172_p3), %v15250_v28  ;;  %15283 = vmatprep.subr.bf16.mxu1 (!%p15172_p3), %v15282_v34  ;;  %v13120_v28 = vld [vmem:[%s18787_s20 + $0x158] sm:$0xff] (!%p15172_p3)  ;;  %v13137_v34 = vld [vmem:[%s18787_s20 + $0x1e0] sm:$0xff] (!%p15172_p3) }
 0x756   : > { %v15306_v40 = vpack.c.bf16 (!%p15172_p3), %v13138_v21, %v13137_v34 }
 0x757   : > { %11862 = vmatmul.mubr.bf16.vlgmr.msra.gmra.mrb[0].mxu0 %v818_v8  ;;  %12928 = vmatmul.mubr.bf16.vlgmr.msra.gmra.mrb[0].mxu1 %v818_v8  ;;  %v13101_v8 = vld [vmem:[%s18787_s20 + $0xc0] sm:$0xff] (!%p15172_p3) }
 0x758   : > { %15253 = vmatpush3.bf16.msra.mxu0 (!%p15172_p3), %v15252_v14  ;;  %15285 = vmatpush3.bf16.msra.mxu1 (!%p15172_p3), %v15284_v19  ;;  %v13090_v19 = vld [vmem:[%s18787_s20 + $0x68] sm:$0xff] (!%p15172_p3) }
 0x759   : > { %15255 = vmatprep.subr.bf16.mxu0 (!%p15172_p3), %v15254_v42  ;;  %15287 = vmatprep.subr.bf16.mxu1 (!%p15172_p3), %v15286_v45  ;;  %v13107_v42 = vld [vmem:[%s18787_s20 + $0xf0] sm:$0xff] (!%p15172_p3)  ;;  %v12969_v45 = vsub.s32 (!%p15172_p3), 0, %v18829_v44  ;;  %v15276_v55 = vpack.c.bf16 (!%p15172_p3), %v13090_v19, %v13089_v27  ;;  %v12978_v44 = vrot.slane (!%p15172_p3), %v12965_v41, %v12977_v24 }
 0x75b   : > { %v12970_v29 = vrot.slane (!%p15172_p3), %v12965_v41, %v12969_v45 }
 0x75c   : > { %15257 = vmatpush3.bf16.msra.mxu0 (!%p15172_p3), %v15256_v49  ;;  %15289 = vmatpush3.bf16.msra.mxu1 (!%p15172_p3), %v15288_v33  ;;  %v13139_v49 = vld [vmem:[%s18787_s20 + $0x1f0] sm:$0xff] (!%p15172_p3)  ;;  %v15304_v33 = vpack.c.bf16 (!%p15172_p3), %v13120_v28, %v13119_v10 }
 0x75d   : > { %15259 = vmatprep.subr.bf16.mxu0 (!%p15172_p3), %v15258_v36  ;;  %15291 = vmatprep.subr.bf16.mxu1 (!%p15172_p3), %v15290_v58  ;;  %v15274_v36 = vpack.c.bf16 (!%p15172_p3), %v13106_v32, %v13105_v11  ;;  %v15278_v58 = vpack.c.bf16 (!%p15172_p3), %v13108_v47, %v13107_v42  ;;  %v15310_v61 = vpack.c.bf16 (!%p15172_p3), %v13140_v30, %v13139_v49 }
 0x760   : > { %15261 = vmatpush3.bf16.msra.mxu0 (!%p15172_p3), %v15260_v62  ;;  %15293 = vmatpush3.bf16.msra.mxu1 (!%p15172_p3), %v15292_v53  ;;  %v12974_v62 = vrot.slane (!%p15172_p3), %v12965_v41, %v12973_v26  ;;  %v13007_v53 = vrot.slane (!%p15172_p3), %v13002_v0, %v12969_v45 }
 0x761   : > { %15263 = vmatprep.subr.bf16.mxu0 (!%p15172_p3), %v15262_v48  ;;  %15295 = vmatprep.subr.bf16.mxu1 (!%p15172_p3), %v15294_v5  ;;  %v13011_v48 = vrot.slane (!%p15172_p3), %v13002_v0, %v12973_v26  ;;  %v13044_v5 = vrot.slane (!%p15172_p3), %v13039_v46, %v12969_v45 }
 0x82a   : > { %v11863_v57 = vpop.f32.mrb[0].mxu0  ;;  %v12929_v12 = vpop.f32.mrb[0].mxu1 }
 0x82b   : > { %v11865_v43 = vpop.f32.mrb[1].mxu0  ;;  %v12931_v13 = vpop.f32.mrb[1].mxu1 }
 0x82c   : > { %v12940_v15 = vcombine.low %v11863_v57, %v11865_v43  ;;  %v12941_v60 = vcombine.low %v12929_v12, %v12931_v13  ;;  %v11867_v16 = vpop.f32.mrb[2].mxu0  ;;  %v12933_v17 = vpop.f32.mrb[2].mxu1  ;;  %v13102_v57 = vld [vmem:[%s18787_s20 + $0xc8] sm:$0xff] (!%p15172_p3)  ;;  %v13133_v12 = vld [vmem:[%s18787_s20 + $0x1c0] sm:$0xff] (!%p15172_p3)  ;;  %v15264_v13 = vpack.c.bf16 (!%p15172_p3), %v13084_v56, %v13083_v52  ;;  %v12983_v52 = vcombine.low (!%p15172_p3), %v12970_v29, %v12974_v62 }
 0x82d   : > { %v11868_v63 = vpop.f32.mrb[3].mxu0  ;;  %v12934_v18 = vpop.f32.mrb[3].mxu1  ;;  %v13134_v43 = vld [vmem:[%s18787_s20 + $0x1c8] sm:$0xff] (!%p15172_p3)  ;;  %v15296_v16 = vpack.c.bf16 (!%p15172_p3), %v13116_v59, %v13115_v54  ;;  %v15266_v17 = vpack.c.bf16 (!%p15172_p3), %v13102_v57, %v13101_v8  ;;  %v13019_v56 = vrot.slane (!%p15172_p3), %v13002_v0, %v12981_v51  ;;  %v13048_v54 = vrot.slane (!%p15172_p3), %v13039_v46, %v12973_v26  ;;  %v13091_v59 = vld [vmem:[%s18787_s20 + $0x70] sm:$0xff] (!%p15172_p3)  ;;  %v13092_v8 = vld [vmem:[%s18787_s20 + $0x78] sm:$0xff] (!%p15172_p3) }
 0x82e   : > { %v12948_v6 = vrot.slane %v12940_v15, %v18837_v50  ;;  %v12955_v20 = vrot.slane %v12941_v60, %v18837_v50  ;;  %12963 = sbr.rel (%p15172_p3) target bundleno = 2341 (0x925), region = 72  ;;  %v13085_v15 = vld [vmem:[%s18787_s20 + $0x40] sm:$0xff] (!%p15172_p3)  ;;  %v13086_v60 = vld [vmem:[%s18787_s20 + $0x48] sm:$0xff] (!%p15172_p3)  ;;  %15265 = vmatpush3.bf16.msra.mxu0 (!%p15172_p3), %v15264_v13  ;;  %v12984_v57 = vcombine.low (!%p15172_p3), %v12978_v44, %v12982_v1  ;;  %v13123_v13 = vld [vmem:[%s18787_s20 + $0x170] sm:$0xff] (!%p15172_p3) }
 0x82f   : > { %v13117_v63 = vld [vmem:[%s18787_s20 + $0x140] sm:$0xff] (!%p15172_p3)  ;;  %v13118_v18 = vld [vmem:[%s18787_s20 + $0x148] sm:$0xff] (!%p15172_p3)  ;;  %v15268_v31 = vpack.c.bf16 (!%p15172_p3), %v13086_v60, %v13085_v15  ;;  %15297 = vmatpush3.bf16.msra.mxu1 (!%p15172_p3), %v15296_v16  ;;  %15267 = vmatprep.subr.bf16.mxu0 (!%p15172_p3), %v15266_v17  ;;  %v13124_v15 = vld [vmem:[%s18787_s20 + $0x178] sm:$0xff] (!%p15172_p3)  ;;  %v12991_v60 = vrot.slane (!%p15172_p3), %v12983_v52, %v18837_v50  ;;  %v13021_v16 = vcombine.low (!%p15172_p3), %v13015_v3, %v13019_v56 }
 0x830   : > { %v12956_v2 = vcombine.low %v12948_v6, %v12955_v20  ;;  %v13103_v6 = vld [vmem:[%s18787_s20 + $0xd0] sm:$0xff] (!%p15172_p3)  ;;  %v15298_v20 = vpack.c.bf16 (!%p15172_p3), %v13134_v43, %v13133_v12  ;;  %v15300_v14 = vpack.c.bf16 (!%p15172_p3), %v13118_v18, %v13117_v63  ;;  %v13020_v12 = vcombine.low (!%p15172_p3), %v13007_v53, %v13011_v48 }
 0x831   : > { %v13052_v43 = vrot.slane (!%p15172_p3), %v13039_v46, %v12977_v24  ;;  %v13056_v17 = vrot.slane (!%p15172_p3), %v13039_v46, %v12981_v51  ;;  %v13057_v63 = vcombine.low (!%p15172_p3), %v13044_v5, %v13048_v54  ;;  %v12998_v18 = vrot.slane (!%p15172_p3), %v12984_v57, %v18837_v50 }
 0x832   : > { %v12958_v9 = vadd.f32 %v12956_v2, %v468_v4  ;;  %v13104_v4 = vld [vmem:[%s18787_s20 + $0xd8] sm:$0xff] (!%p15172_p3)  ;;  %v13135_v2 = vld [vmem:[%s18787_s20 + $0x1d0] sm:$0xff] (!%p15172_p3)  ;;  %15299 = vmatprep.subr.bf16.mxu1 (!%p15172_p3), %v15298_v20  ;;  %15269 = vmatpush3.bf16.msra.mxu0 (!%p15172_p3), %v15268_v31  ;;  %v15280_v20 = vpack.c.bf16 (!%p15172_p3), %v13092_v8, %v13091_v59  ;;  %v15312_v7 = vpack.c.bf16 (!%p15172_p3), %v13124_v15, %v13123_v13 }
 0x833   : > { %v15270_v35 = vpack.c.bf16 (!%p15172_p3), %v13104_v4, %v13103_v6  ;;  %15301 = vmatpush3.bf16.msra.mxu1 (!%p15172_p3), %v15300_v14  ;;  %v13028_v6 = vrot.slane (!%p15172_p3), %v13020_v12, %v18837_v50  ;;  %v13065_v23 = vrot.slane (!%p15172_p3), %v13057_v63, %v18837_v50  ;;  %v12999_v10 = vcombine.low (!%p15172_p3), %v12991_v60, %v12998_v18 }
 0x834   : > { %12959 = vst [vmem:[#allocation2] sm:$0xff] %v12958_v9  ;;  %v13136_v9 = vld [vmem:[%s18787_s20 + $0x1d8] sm:$0xff] (!%p15172_p3) }
 0x835   : > { %v15302_v25 = vpack.c.bf16 %v13136_v9, %v13135_v2  ;;  %15271 = vmatprep.subr.bf16.mxu0 %v15270_v35  ;;  %v13035_v2 = vrot.slane %v13021_v16, %v18837_v50  ;;  %v13058_v9 = vcombine.low %v13052_v43, %v13056_v17 }
 0x836   : > { %15273 = vmatpush3.bf16.msra.mxu0 %v15272_v37 }
 0x837   : > { %15303 = vmatprep.subr.bf16.mxu1 %v15302_v25  ;;  %15275 = vmatprep.subr.bf16.mxu0 %v15274_v36  ;;  %v13036_v28 = vcombine.low %v13028_v6, %v13035_v2  ;;  %v13072_v31 = vrot.slane %v13058_v9, %v18837_v50 }
 0x838   : > { %15305 = vmatpush3.bf16.msra.mxu1 %v15304_v33 }
 0x839   : > { %15307 = vmatprep.subr.bf16.mxu1 %v15306_v40  ;;  %v13073_v32 = vcombine.low %v13065_v23, %v13072_v31 }
 0x83a   : > { %15277 = vmatpush3.bf16.msra.mxu0 %v15276_v55 }
 0x83b   : > { %v12964_v4 = vld [vmem:[#allocation2] sm:$0xff]  ;;  %15279 = vmatprep.subr.bf16.mxu0 %v15278_v58 }
 0x83c   : > { %15309 = vmatpush3.bf16.msra.mxu1 %v15308_v38  ;;  %v13001_v11 = vadd.f32 %v12999_v10, %v12964_v4 }
 0x83d   : > { %15311 = vmatprep.subr.bf16.mxu1 %v15310_v61 }
 0x83e   : > { %15281 = vmatpush3.bf16.msra.mxu0 %v15280_v20  ;;  %v13038_v34 = vmul.f32 %v13036_v28, %v13001_v11 }
 0x840   : > { %15313 = vmatpush3.bf16.msra.mxu1 %v15312_v7  ;;  %v13075_v14 = vadd.f32 %v13073_v32, %v13038_v34 }
 0x842   : > { %v13076_v35 = vmax.f32 %v13075_v14, 0.0 }
 0x844   : > { %v13149_v21 = vrot.slane %v13076_v35, %v18837_v50  ;;  %v13142_v27 = vcombine.high %v13076_v35, %v13076_v35 }
 0x846   : > { %v13157_v19 = vcombine.high %v13149_v21, %v13149_v21  ;;  %v13156_v25 = vrot.slane %v13142_v27, %v18837_v50 }
 0x848   : > { %13227 = vmatprep.mubr.f32.mxu0 %v13157_v19  ;;  %v13158_v39 = vcombine.high %v13156_v25, %v13156_v25 }
 0x849   : > { %13228 = vmatmul.mubr.f32.vlgmr.msra.gmra.mrb[0].mxu0 %v13149_v21 }
 0x84a   : > { %13297 = vmatprep.mubr.f32.mxu1 %v13158_v39 }
 0x84b   : > { %13298 = vmatmul.mubr.f32.vlgmr.msra.gmra.mrb[0].mxu1 %v13156_v25 }
 0x91c   : > { %v15212_v22 = vpop.f32.mrb[0].mxu0 }
 0x91d   : > { %v15213_v42 = vpop.f32.mrb[1].mxu0 }
 0x91e   : > { %v15247_v45 = vpop.f32.mrb[0].mxu1  ;;  %v15214_v26 = vadd.f32 %v15213_v42, %v15212_v22 }
 0x91f   : > { %v15248_v24 = vpop.f32.mrb[1].mxu1 }
 0x920   : > { %v15249_v47 = vadd.f32 %v15248_v24, %v15247_v45 }
 0x922   : > { %v13300_v49 = vadd.f32 %v15249_v47, %v15214_v26 }
 0x924   : > { %13303 = vst [vmem:[%s18780_s28] sm:$0x3] %v13300_v49 }
 0x925 PF: > { %s25_s7 = sadd.s32 1, %s18395_s7   ;;  %s20889_s21 = sld [smem:[#allocation14_spill]] }
 0x926   : > { %p22_p13 = scmp.ge.s32.totalorder %s25_s7, 6   ;;  %s20890_s22 = sld [smem:[#allocation15_spill]] }
 0x927   : > { %s20891_s23 = sld [smem:[#allocation20_spill]]  ;;  %s20892_s0 = sld [smem:[#allocation21_spill]] }
 0x928   : > { %s20893_s18 = sld [smem:[#allocation18_spill]]  ;;  %s20894_s17 = sld [smem:[#allocation19_spill]] }
 0x929   : > { %s20895_s24 = smov %s18371_s25  ;;  %s20896_s25 = smov %s18375_s26 }
 0x92a   : > { %s20898_s27 = smov %s18387_s29  ;;  %s20899_s28 = smov %s18391_s30 }
 0x92b   :  { %24 = sbr.rel (!%p22_p13) target bundleno = 16 (0x10), region = 143 }
 0x92d   : > { %s20897_s26 = smov %s20892_s0 }
 0x92e   : > { %s20900_s29 = smov %s20893_s18  ;;  %s20901_s30 = smov %s20894_s17 }
 0x932   :  { %13323 = vsyncpa [#allocation4], 1 }
 0x933   :  { %13325 = vsyncpa [#allocation4 + $0x1], 1 }
 0x934   :  { %13326 = vsyncpa [#allocation6], 1 }
 0x935   :  { %13328 = vsyncpa [#allocation6 + $0x1], 1 }
 0x936   :  { %13329 = vsyncpa [#allocation9], 1 }
 0x937   :  { %13331 = vsyncpa [#allocation9 + $0x1], 1 }

</bundles_post_ra>
